<compile_context>
chip_gen: v5e
topology: v5e:2x2
jax: 0.10.0
libtpu: 0.0.40
codegen_flags: <defaults>
</compile_context>

<pallas_src>
import functools

import jax
import jax.numpy as jnp
from jax.experimental import pallas as pl
from jax.experimental.pallas import tpu as pltpu

LANE = 128                      # lane width / output-channel padding target
TM_MAX = 256                    # max rows per tile (fits easily in VMEM w/ K,N <= 512)
VMEM_LIMIT = 32 * 1024 * 1024   # explicit scoped-VMEM budget (safe on v5e/v6e/v7x)
BN_EPS = 1e-5


def _round_up(x, m):
    return (x + m - 1) // m * m


# ---------------------------------------------------------------------------
# Pallas kernels
# ---------------------------------------------------------------------------
def _conv_bn_kernel(a_ref, b_ref, bias_ref, gamma_ref, beta_ref, y_ref,
                    sum_ref, sq_ref, *, relu, groups, gw, true_rows, count,
                    tm, reuse):
    """Fused (matmul + bias) -> BatchNorm(batch stats) -> optional ReLU.

    grid = (2, num_row_tiles): phase 0 runs the MXU matmul and accumulates
    per-column sum / sum-of-squares into VMEM scratch (masking padded rows);
    phase 1 applies the normalization.  `groups` > 1 means the Np columns hold
    `groups` parity copies of the same `gw` channels (sub-pixel ConvTranspose)
    and the statistics are combined across groups.
    """
    ph = pl.program_id(0)
    m = pl.program_id(1)

    def matmul_bias():
        return jnp.dot(a_ref[...], b_ref[...],
                       preferred_element_type=jnp.float32) + bias_ref[...]

    @pl.when((ph == 0) & (m == 0))
    def _init():
        sum_ref[...] = jnp.zeros_like(sum_ref)
        sq_ref[...] = jnp.zeros_like(sq_ref)

    @pl.when(ph == 0)
    def _accumulate():
        xb = matmul_bias()
        rows = jax.lax.broadcasted_iota(jnp.int32, xb.shape, 0) + m * tm
        xm = jnp.where(rows < true_rows, xb, 0.0)      # ignore padded rows
        sum_ref[...] += jnp.sum(xm, axis=0, keepdims=True)
        sq_ref[...] += jnp.sum(xm * xm, axis=0, keepdims=True)
        y_ref[...] = xb    # provisional; stays resident when nm==1 (reuse)

    @pl.when(ph == 1)
    def _normalize():
        xb = y_ref[...] if reuse else matmul_bias()
        # combine parity-group statistics -> per-channel statistics
        s = sum_ref[:, 0:gw]
        q = sq_ref[:, 0:gw]
        for g in range(1, groups):
            s = s + sum_ref[:, g * gw:(g + 1) * gw]
            q = q + sq_ref[:, g * gw:(g + 1) * gw]
        inv_n = 1.0 / float(count)
        mean = s * inv_n
        var = q * inv_n - mean * mean                  # biased var (torch BN)
        inv = jax.lax.rsqrt(var + BN_EPS)
        for g in range(groups):                        # lane-aligned 128 slices
            lo, hi = g * gw, (g + 1) * gw
            yg = (xb[:, lo:hi] - mean) * (inv * gamma_ref[:, lo:hi]) \
                + beta_ref[:, lo:hi]
            if relu:
                yg = jnp.maximum(yg, 0.0)
            y_ref[:, lo:hi] = yg


def _matmul_bias_kernel(a_ref, b_ref, bias_ref, y_ref):
    """Plain tiled matmul + bias (final layer: no BatchNorm)."""
    y_ref[...] = jnp.dot(a_ref[...], b_ref[...],
                         preferred_element_type=jnp.float32) + bias_ref[...]


def _vq_kernel(z_ref, embt_ref, emb_ref, lat_ref, zq_ref):
    """MXU-form VQ: dists = ||z||^2 - 2*z@E^T + ||E||^2, argmin, 1-hot lookup."""
    z = z_ref[...]                                        # (TM, C) f32
    et = embt_ref[...]                                    # (C, K)  f32
    z_sq = jnp.sum(z * z, axis=1, keepdims=True)          # (TM, 1)
    e_sq = jnp.sum(et * et, axis=0, keepdims=True)        # (1, K)
    cross = jnp.dot(z, et, preferred_element_type=jnp.float32)   # (TM, K) MXU
    dists = z_sq - 2.0 * cross + e_sq
    lat = jnp.argmin(dists, axis=-1).astype(jnp.int32)    # (TM,)
    lat_ref[...] = lat[:, None]
    onehot = (jax.lax.broadcasted_iota(jnp.int32, dists.shape, 1)
              == lat[:, None]).astype(jnp.float32)
    zq_ref[...] = jnp.dot(onehot, emb_ref[...],
                          preferred_element_type=jnp.float32)


# ---------------------------------------------------------------------------
# Fused-conv wrapper (padding, bf16 cast, pallas_call plumbing)
# ---------------------------------------------------------------------------
def _fused_conv(patches, w2, bias, gamma, beta, *, relu, bn, groups):
    """patches: (M, K) f32; w2: (K, groups*Cout) f32, group-major columns;
    bias/gamma/beta: per-channel (Cout,).  Returns ((M, groups*Cp) f32, Cp)."""
    M, K = patches.shape
    Cout = w2.shape[1] // groups
    Cp = _round_up(Cout, LANE)            # lane-dense output columns
    Np = groups * Cp
    Kp = _round_up(K, 8)

    if M <= TM_MAX:
        Mp, TM = M, M                     # full-dim block (always legal)
    else:
        Mp = _round_up(M, TM_MAX)
        TM = TM_MAX
    nm = Mp // TM

    a_p = jnp.pad(patches, ((0, Mp - M), (0, Kp - K))).astype(jnp.bfloat16)
    w3 = jnp.pad(w2.reshape(K, groups, Cout),
                 ((0, Kp - K), (0, 0), (0, Cp - Cout)))
    w_p = w3.reshape(Kp, Np).astype(jnp.bfloat16)

    def _chan_vec(v, fill):
        v = jnp.pad(v.astype(jnp.float32), (0, Cp - Cout),
                    constant_values=fill)
        return jnp.tile(v, groups).reshape(1, Np)

    bias_p = _chan_vec(bias, 0.0)

    if not bn:
        out = pl.pallas_call(
            _matmul_bias_kernel,
            out_shape=jax.ShapeDtypeStruct((Mp, Np), jnp.float32),
            grid=(nm,),
            in_specs=[
                pl.BlockSpec((TM, Kp), lambda i: (i, 0)),
                pl.BlockSpec((Kp, Np), lambda i: (0, 0)),
                pl.BlockSpec((1, Np), lambda i: (0, 0)),
            ],
            out_specs=pl.BlockSpec((TM, Np), lambda i: (i, 0)),
            compiler_params=pltpu.CompilerParams(
                dimension_semantics=("parallel",),
                vmem_limit_bytes=VMEM_LIMIT),
        )(a_p, w_p, bias_p)
        return out[:M], Cp

    gamma_p = _chan_vec(gamma, 1.0)
    beta_p = _chan_vec(beta, 0.0)
    kernel = functools.partial(
        _conv_bn_kernel, relu=relu, groups=groups, gw=Cp,
        true_rows=M, count=M * groups, tm=TM, reuse=(nm == 1))
    out = pl.pallas_call(
        kernel,
        out_shape=jax.ShapeDtypeStruct((Mp, Np), jnp.float32),
        grid=(2, nm),
        in_specs=[
            pl.BlockSpec((TM, Kp), lambda p, i: (i, 0)),
            pl.BlockSpec((Kp, Np), lambda p, i: (0, 0)),
            pl.BlockSpec((1, Np), lambda p, i: (0, 0)),
            pl.BlockSpec((1, Np), lambda p, i: (0, 0)),
            pl.BlockSpec((1, Np), lambda p, i: (0, 0)),
        ],
        out_specs=pl.BlockSpec((TM, Np), lambda p, i: (i, 0)),
        scratch_shapes=[pltpu.VMEM((1, Np), jnp.float32),
                        pltpu.VMEM((1, Np), jnp.float32)],
        compiler_params=pltpu.CompilerParams(
            # batch-norm statistics couple all row tiles -> both axes arbitrary
            dimension_semantics=("arbitrary", "arbitrary"),
            vmem_limit_bytes=VMEM_LIMIT),
    )(a_p, w_p, bias_p, gamma_p, beta_p)
    return out[:M], Cp


# ---------------------------------------------------------------------------
# Convolution glue (im2col / sub-pixel weights in plain JAX; matmul in Pallas)
# ---------------------------------------------------------------------------
def _im2col(x, kh, kw, stride, pad):
    N, H, W, C = x.shape
    xp = jnp.pad(x, ((0, 0), (pad, pad), (pad, pad), (0, 0)))
    OH = (H + 2 * pad - kh) // stride + 1
    OW = (W + 2 * pad - kw) // stride + 1
    cols = []
    for i in range(kh):
        for j in range(kw):
            cols.append(xp[:, i:i + stride * OH:stride,
                           j:j + stride * OW:stride, :])
    patches = jnp.stack(cols, axis=3)                 # (N, OH, OW, kh*kw, C)
    return patches.reshape(N * OH * OW, kh * kw * C), OH, OW


def conv2d_bn(x_nhwc, w, b, gamma=None, beta=None, *, stride, pad,
              relu=False, bn=True):
    """w: (Cout, Cin, KH, KW) -- PyTorch Conv2d layout."""
    N = x_nhwc.shape[0]
    Cout, Cin, KH, KW = w.shape
    patches, OH, OW = _im2col(x_nhwc, KH, KW, stride, pad)
    w2 = jnp.transpose(w, (2, 3, 1, 0)).reshape(KH * KW * Cin, Cout)
    out2, _ = _fused_conv(patches, w2, b, gamma, beta,
                          relu=relu, bn=bn, groups=1)
    return out2[:, :Cout].reshape(N, OH, OW, Cout)


# Sub-pixel ConvTranspose2d (kernel 4, stride 2, padding 1):
#   out[2a+rh, 2b+rw] = sum_{taps} x[a-1+pi, b-1+pj] * w[:, :, kh, kw]
# parity 0: patch row 0 -> kh=3, patch row 1 -> kh=1
# parity 1: patch row 1 -> kh=2, patch row 2 -> kh=0   (same for columns)
_SUBPIX_TAPS = {0: ((0, 3), (1, 1)),
                1: ((1, 2), (2, 0))}


def _convT_subpixel_weight(w):
    """(Cin, Cout, 4, 4) ConvTranspose2d weight -> (9*Cin, 4*Cout), group-major."""
    Cin, Cout = w.shape[0], w.shape[1]
    cols = []
    for rh in (0, 1):
        for rw in (0, 1):
            wb = jnp.zeros((3, 3, Cin, Cout), w.dtype)
            for (pi, kh) in _SUBPIX_TAPS[rh]:
                for (pj, kw) in _SUBPIX_TAPS[rw]:
                    wb = wb.at[pi, pj].set(w[:, :, kh, kw])
            cols.append(wb.reshape(9 * Cin, Cout))
    return jnp.concatenate(cols, axis=1)


def conv_transpose2d_bn(x_nhwc, w, b, gamma=None, beta=None, *,
                        relu=False, bn=True):
    """w: (Cin, Cout, 4, 4), stride=2, padding=1 (sub-pixel decomposition)."""
    N, H, W, _ = x_nhwc.shape
    Cout = w.shape[1]
    patches, _, _ = _im2col(x_nhwc, 3, 3, 1, 1)        # (N*H*W, 9*Cin)
    w_comb = _convT_subpixel_weight(w)                 # (9*Cin, 4*Cout)
    out2, Cp = _fused_conv(patches, w_comb, b, gamma, beta,
                           relu=relu, bn=bn, groups=4)
    y = out2.reshape(N, H, W, 2, 2, Cp)
    y = jnp.transpose(y, (0, 1, 3, 2, 4, 5)).reshape(N, 2 * H, 2 * W, Cp)
    return y[..., :Cout]


# ---------------------------------------------------------------------------
# Vector quantization
# ---------------------------------------------------------------------------
def vector_quantize(z_nhwc, emb):
    N, H, W, C = z_nhwc.shape
    M = N * H * W
    K = emb.shape[0]
    z2 = z_nhwc.reshape(M, C)
    if M <= TM_MAX:
        Mp, TM = M, M
    else:
        Mp = _round_up(M, TM_MAX)
        TM = TM_MAX
    z2p = jnp.pad(z2, ((0, Mp - M), (0, 0)))
    emb_t = jnp.transpose(emb)                         # (C, K)
    lat, zq = pl.pallas_call(
        _vq_kernel,
        out_shape=(jax.ShapeDtypeStruct((Mp, 1), jnp.int32),
                   jax.ShapeDtypeStruct((Mp, C), jnp.float32)),
        grid=(Mp // TM,),
        in_specs=[
            pl.BlockSpec((TM, C), lambda i: (i, 0)),
            pl.BlockSpec((C, K), lambda i: (0, 0)),
            pl.BlockSpec((K, C), lambda i: (0, 0)),
        ],
        out_specs=(pl.BlockSpec((TM, 1), lambda i: (i, 0)),
                   pl.BlockSpec((TM, C), lambda i: (i, 0))),
        compiler_params=pltpu.CompilerParams(
            dimension_semantics=("parallel",),
            vmem_limit_bytes=VMEM_LIMIT),
    )(z2p, emb_t, emb)
    return lat[:M].reshape(N, H, W), zq[:M].reshape(N, H, W, C)


# ---------------------------------------------------------------------------
# Parameters (deterministic synthetic init; shapes match the PyTorch module)
# ---------------------------------------------------------------------------
NUM_CLUSTERS = 512
ENC_OUT = 32
NR_LOGISTIC_MIX = 10
DATA_CH = 1
NUM_MIXTURE = 2 * NR_LOGISTIC_MIX * DATA_CH + NR_LOGISTIC_MIX  # 30


def init_params(key):
    keys = jax.random.split(key, 16)
    ki = iter(keys)

    def conv(cout, cin, kh, kw):
        k1, k2 = jax.random.split(next(ki))
        fan_in = cin * kh * kw
        w = jax.random.normal(k1, (cout, cin, kh, kw), jnp.float32) / jnp.sqrt(fan_in)
        b = 0.01 * jax.random.normal(k2, (cout,), jnp.float32)
        return w, b

    def convT(cin, cout, kh, kw):
        k1, k2 = jax.random.split(next(ki))
        fan_in = cin * kh * kw
        w = jax.random.normal(k1, (cin, cout, kh, kw), jnp.float32) / jnp.sqrt(fan_in)
        b = 0.01 * jax.random.normal(k2, (cout,), jnp.float32)
        return w, b

    def bn(c):
        return jnp.ones((c,), jnp.float32), jnp.zeros((c,), jnp.float32)

    p = {}
    # encoder
    p["e_w1"], p["e_b1"] = conv(16, DATA_CH, 4, 4); p["e_g1"], p["e_be1"] = bn(16)
    p["e_w2"], p["e_b2"] = conv(32, 16, 4, 4);      p["e_g2"], p["e_be2"] = bn(32)
    p["e_w3"], p["e_b3"] = conv(42, 32, 4, 4);      p["e_g3"], p["e_be3"] = bn(42)
    p["e_w4"], p["e_b4"] = conv(ENC_OUT, 42, 1, 1); p["e_g4"], p["e_be4"] = bn(ENC_OUT)
    # embedding: 1/num_clusters * randn(num_clusters, encoder_output_size)
    p["emb"] = (1.0 / NUM_CLUSTERS) * jax.random.normal(
        next(ki), (NUM_CLUSTERS, ENC_OUT), jnp.float32
    )
    # decoder
    p["d_w1"], p["d_b1"] = conv(42, ENC_OUT, 1, 1); p["d_g1"], p["d_be1"] = bn(42)
    p["d_w2"], p["d_b2"] = convT(42, 32, 4, 4);     p["d_g2"], p["d_be2"] = bn(32)
    p["d_w3"], p["d_b3"] = convT(32, 16, 4, 4);     p["d_g3"], p["d_be3"] = bn(16)
    p["d_w4"], p["d_b4"] = convT(16, NUM_MIXTURE, 4, 4)
    return p


# ---------------------------------------------------------------------------
# Forward (mirrors AutoEncoder.forward)
# ---------------------------------------------------------------------------
def autoencoder_forward(params, x_nchw):
    x = jnp.transpose(x_nchw, (0, 2, 3, 1))  # NCHW -> NHWC

    # ----- encoder -----
    h = conv2d_bn(x, params["e_w1"], params["e_b1"], params["e_g1"],
                  params["e_be1"], stride=2, pad=1, relu=True)
    h = conv2d_bn(h, params["e_w2"], params["e_b2"], params["e_g2"],
                  params["e_be2"], stride=2, pad=1, relu=False)
    h = conv2d_bn(h, params["e_w3"], params["e_b3"], params["e_g3"],
                  params["e_be3"], stride=2, pad=1, relu=True)
    z_e = conv2d_bn(h, params["e_w4"], params["e_b4"], params["e_g4"],
                    params["e_be4"], stride=1, pad=0, relu=False)  # (N,2,2,32)

    # ----- vector quantization -----
    latents, z_q = vector_quantize(z_e, params["emb"])

    # ----- decoder -----
    d = conv2d_bn(z_q, params["d_w1"], params["d_b1"], params["d_g1"],
                  params["d_be1"], stride=1, pad=0, relu=True)
    d = conv_transpose2d_bn(d, params["d_w2"], params["d_b2"], params["d_g2"],
                            params["d_be2"], relu=False)
    d = conv_transpose2d_bn(d, params["d_w3"], params["d_b3"], params["d_g3"],
                            params["d_be3"], relu=True)
    x_tilde = conv_transpose2d_bn(d, params["d_w4"], params["d_b4"], bn=False)

    to_nchw = lambda t: jnp.transpose(t, (0, 3, 1, 2))
    return to_nchw(x_tilde), to_nchw(z_e), to_nchw(z_q), latents


# ---------------------------------------------------------------------------
if __name__ == "__main__":
    key = jax.random.PRNGKey(0)
    k_param, k_x = jax.random.split(key)
    params = init_params(k_param)

    # small input consistent with the module: N=2, C=1 (data channel), 16x16
    x = jax.random.normal(k_x, (2, 1, 16, 16), jnp.float32)

    fwd = jax.jit(autoencoder_forward)
    x_tilde, z_e_x, z_q_x, latents = fwd(params, x)
    jax.block_until_ready((x_tilde, z_e_x, z_q_x, latents))

    assert x_tilde.shape == (2, NUM_MIXTURE, 16, 16), x_tilde.shape
    assert z_e_x.shape == (2, ENC_OUT, 2, 2), z_e_x.shape
    assert z_q_x.shape == (2, ENC_OUT, 2, 2), z_q_x.shape
    assert latents.shape == (2, 2, 2), latents.shape

    print("KERNEL_OK")
</pallas_src>

<mosaic_0001>
module attributes {stable_mosaic.version = 11 : i64} {
  func.func @_conv_bn_kernel(%arg0: i32, %arg1: i32, %arg2: memref<128x16xbf16, #tpu.memory_space<vmem>>, %arg3: memref<16x128xbf16, #tpu.memory_space<vmem>>, %arg4: memref<1x128xf32, #tpu.memory_space<vmem>>, %arg5: memref<1x128xf32, #tpu.memory_space<vmem>>, %arg6: memref<1x128xf32, #tpu.memory_space<vmem>>, %arg7: memref<128x128xf32, #tpu.memory_space<vmem>>, %arg8: memref<1x128xf32, #tpu.memory_space<vmem>>, %arg9: memref<1x128xf32, #tpu.memory_space<vmem>>) attributes {dimension_semantics = [#tpu.dimension_semantics<arbitrary>, #tpu.dimension_semantics<arbitrary>], iteration_bounds = array<i64: 2, 1>, scalar_prefetch = 0 : i64, scratch_operands = 2 : i64, tpu.core_type = #tpu.core_type<tc>, window_params = [{transform_indices = @transform_0, window_bounds = array<i64: 128, 16>}, {pipeline_mode = #tpu.pipeline_mode<synchronous>, transform_indices = @transform_1, window_bounds = array<i64: 16, 128>}, {pipeline_mode = #tpu.pipeline_mode<synchronous>, transform_indices = @transform_2, window_bounds = array<i64: 1, 128>}, {pipeline_mode = #tpu.pipeline_mode<synchronous>, transform_indices = @transform_3, window_bounds = array<i64: 1, 128>}, {pipeline_mode = #tpu.pipeline_mode<synchronous>, transform_indices = @transform_4, window_bounds = array<i64: 1, 128>}, {transform_indices = @transform_5, window_bounds = array<i64: 128, 128>}]} {
    %c0_i32 = arith.constant 0 : i32
    %0 = arith.cmpi eq, %arg0, %c0_i32 : i32
    %c0_i32_0 = arith.constant 0 : i32
    %1 = arith.cmpi eq, %arg1, %c0_i32_0 : i32
    %2 = arith.andi %0, %1 : i1
    %3 = arith.extui %2 : i1 to i32
    %c0_i32_1 = arith.constant 0 : i32
    %4 = arith.cmpi ne, %3, %c0_i32_1 : i32
    scf.if %4 {
      %cst = arith.constant 0.000000e+00 : f32
      %11 = vector.broadcast %cst : f32 to vector<1x128xf32>
      %c0 = arith.constant 0 : index
      %c0_5 = arith.constant 0 : index
      %12 = vector.load %arg8[%c0, %c0_5] : memref<1x128xf32, #tpu.memory_space<vmem>>, vector<1x128xf32>
      tpu.vector_store %arg8[%c0, %c0_5], %11 {strides = array<i32>} : memref<1x128xf32, #tpu.memory_space<vmem>>, vector<1x128xf32>,
      %cst_6 = arith.constant 0.000000e+00 : f32
      %13 = vector.broadcast %cst_6 : f32 to vector<1x128xf32>
      %c0_7 = arith.constant 0 : index
      %c0_8 = arith.constant 0 : index
      %14 = vector.load %arg9[%c0_7, %c0_8] : memref<1x128xf32, #tpu.memory_space<vmem>>, vector<1x128xf32>
      tpu.vector_store %arg9[%c0_7, %c0_8], %13 {strides = array<i32>} : memref<1x128xf32, #tpu.memory_space<vmem>>, vector<1x128xf32>,
    } else {
    }
    %c0_i32_2 = arith.constant 0 : i32
    %5 = arith.cmpi eq, %arg0, %c0_i32_2 : i32
    %6 = arith.extui %5 : i1 to i32
    %c0_i32_3 = arith.constant 0 : i32
    %7 = arith.cmpi ne, %6, %c0_i32_3 : i32
    scf.if %7 {
      %c0 = arith.constant 0 : index
      %c0_5 = arith.constant 0 : index
      %11 = vector.load %arg2[%c0, %c0_5] : memref<128x16xbf16, #tpu.memory_space<vmem>>, vector<128x16xbf16>
      %c0_6 = arith.constant 0 : index
      %c0_7 = arith.constant 0 : index
      %12 = vector.load %arg3[%c0_6, %c0_7] : memref<16x128xbf16, #tpu.memory_space<vmem>>, vector<16x128xbf16>
      %cst = arith.constant dense<0.000000e+00> : vector<128x128xf32>
      %13 = tpu.matmul %11, %12, %cst {dimension_numbers = #tpu.dot_dimension_numbers<[1], [0], [0], [1], [0, 0, 1, 1], [], []>} : vector<128x16xbf16>, vector<16x128xbf16>, vector<128x128xf32> -> vector<128x128xf32>
      %c0_8 = arith.constant 0 : index
      %c0_9 = arith.constant 0 : index
      %14 = vector.load %arg4[%c0_8, %c0_9] : memref<1x128xf32, #tpu.memory_space<vmem>>, vector<1x128xf32>
      %15 = vector.broadcast %14 : vector<1x128xf32> to vector<128x128xf32>
      %16 = arith.addf %13, %15 : vector<128x128xf32>
      %17 = tpu.iota {dimensions = array<i32: 0>} : vector<128x128xi32>
      %c128_i32 = arith.constant 128 : i32
      %18 = arith.muli %arg1, %c128_i32 : i32
      %19 = vector.broadcast %18 : i32 to vector<128x128xi32>
      %20 = arith.addi %17, %19 : vector<128x128xi32>
      %c128_i32_10 = arith.constant 128 : i32
      %21 = vector.broadcast %c128_i32_10 : i32 to vector<128x128xi32>
      %22 = arith.cmpi slt, %20, %21 : vector<128x128xi32>
      %cst_11 = arith.constant 0.000000e+00 : f32
      %23 = vector.broadcast %cst_11 : f32 to vector<128x128xf32>
      %24 = arith.select %22, %16, %23 : vector<128x128xi1>, vector<128x128xf32>
      %c0_12 = arith.constant 0 : index
      %c0_13 = arith.constant 0 : index
      %25 = vector.load %arg8[%c0_12, %c0_13] : memref<1x128xf32, #tpu.memory_space<vmem>>, vector<1x128xf32>
      %cst_14 = arith.constant dense<0.000000e+00> : vector<128xf32>
      %26 = vector.multi_reduction <add>, %24, %cst_14 [0] : vector<128x128xf32> to vector<128xf32>
      %27 = vector.shape_cast %26 : vector<128xf32> to vector<1x128xf32>
      %28 = arith.addf %25, %27 : vector<1x128xf32>
      %c0_15 = arith.constant 0 : index
      %c0_16 = arith.constant 0 : index
      %29 = vector.load %arg8[%c0_15, %c0_16] : memref<1x128xf32, #tpu.memory_space<vmem>>, vector<1x128xf32>
      tpu.vector_store %arg8[%c0_15, %c0_16], %28 {strides = array<i32>} : memref<1x128xf32, #tpu.memory_space<vmem>>, vector<1x128xf32>,
      %c0_17 = arith.constant 0 : index
      %c0_18 = arith.constant 0 : index
      %30 = vector.load %arg9[%c0_17, %c0_18] : memref<1x128xf32, #tpu.memory_space<vmem>>, vector<1x128xf32>
      %31 = arith.mulf %24, %24 : vector<128x128xf32>
      %cst_19 = arith.constant dense<0.000000e+00> : vector<128xf32>
      %32 = vector.multi_reduction <add>, %31, %cst_19 [0] : vector<128x128xf32> to vector<128xf32>
      %33 = vector.shape_cast %32 : vector<128xf32> to vector<1x128xf32>
      %34 = arith.addf %30, %33 : vector<1x128xf32>
      %c0_20 = arith.constant 0 : index
      %c0_21 = arith.constant 0 : index
      %35 = vector.load %arg9[%c0_20, %c0_21] : memref<1x128xf32, #tpu.memory_space<vmem>>, vector<1x128xf32>
      tpu.vector_store %arg9[%c0_20, %c0_21], %34 {strides = array<i32>} : memref<1x128xf32, #tpu.memory_space<vmem>>, vector<1x128xf32>,
      %c0_22 = arith.constant 0 : index
      %c0_23 = arith.constant 0 : index
      %36 = vector.load %arg7[%c0_22, %c0_23] : memref<128x128xf32, #tpu.memory_space<vmem>>, vector<128x128xf32>
      tpu.vector_store %arg7[%c0_22, %c0_23], %16 {strides = array<i32>} : memref<128x128xf32, #tpu.memory_space<vmem>>, vector<128x128xf32>,
    } else {
    }
    %c1_i32 = arith.constant 1 : i32
    %8 = arith.cmpi eq, %arg0, %c1_i32 : i32
    %9 = arith.extui %8 : i1 to i32
    %c0_i32_4 = arith.constant 0 : i32
    %10 = arith.cmpi ne, %9, %c0_i32_4 : i32
    scf.if %10 {
      %c0 = arith.constant 0 : index
      %c0_5 = arith.constant 0 : index
      %11 = vector.load %arg7[%c0, %c0_5] : memref<128x128xf32, #tpu.memory_space<vmem>>, vector<128x128xf32>
      %c0_6 = arith.constant 0 : index
      %c0_7 = arith.constant 0 : index
      %12 = vector.load %arg8[%c0_6, %c0_7] : memref<1x128xf32, #tpu.memory_space<vmem>>, vector<1x128xf32>
      %c0_8 = arith.constant 0 : index
      %c0_9 = arith.constant 0 : index
      %13 = vector.load %arg9[%c0_8, %c0_9] : memref<1x128xf32, #tpu.memory_space<vmem>>, vector<1x128xf32>
      %cst = arith.constant 7.812500e-03 : f32
      %14 = vector.broadcast %cst : f32 to vector<1x128xf32>
      %15 = arith.mulf %12, %14 : vector<1x128xf32>
      %cst_10 = arith.constant 7.812500e-03 : f32
      %16 = vector.broadcast %cst_10 : f32 to vector<1x128xf32>
      %17 = arith.mulf %13, %16 : vector<1x128xf32>
      %18 = arith.mulf %15, %15 : vector<1x128xf32>
      %19 = arith.subf %17, %18 : vector<1x128xf32>
      %cst_11 = arith.constant 9.99999974E-6 : f32
      %20 = vector.broadcast %cst_11 : f32 to vector<1x128xf32>
      %21 = arith.addf %19, %20 : vector<1x128xf32>
      %22 = math.rsqrt %21 : vector<1x128xf32>
      %23 = vector.broadcast %15 : vector<1x128xf32> to vector<128x128xf32>
      %24 = arith.subf %11, %23 : vector<128x128xf32>
      %c0_12 = arith.constant 0 : index
      %c0_13 = arith.constant 0 : index
      %25 = vector.load %arg5[%c0_12, %c0_13] : memref<1x128xf32, #tpu.memory_space<vmem>>, vector<1x128xf32>
      %26 = arith.mulf %22, %25 : vector<1x128xf32>
      %27 = vector.broadcast %26 : vector<1x128xf32> to vector<128x128xf32>
      %28 = arith.mulf %24, %27 : vector<128x128xf32>
      %c0_14 = arith.constant 0 : index
      %c0_15 = arith.constant 0 : index
      %29 = vector.load %arg6[%c0_14, %c0_15] : memref<1x128xf32, #tpu.memory_space<vmem>>, vector<1x128xf32>
      %30 = vector.broadcast %29 : vector<1x128xf32> to vector<128x128xf32>
      %31 = arith.addf %28, %30 : vector<128x128xf32>
      %cst_16 = arith.constant 0.000000e+00 : f32
      %32 = vector.broadcast %cst_16 : f32 to vector<128x128xf32>
      %33 = arith.maximumf %31, %32 : vector<128x128xf32>
      %c0_17 = arith.constant 0 : index
      %c0_18 = arith.constant 0 : index
      %34 = vector.load %arg7[%c0_17, %c0_18] : memref<128x128xf32, #tpu.memory_space<vmem>>, vector<128x128xf32>
      tpu.vector_store %arg7[%c0_17, %c0_18], %33 {strides = array<i32>} : memref<128x128xf32, #tpu.memory_space<vmem>>, vector<128x128xf32>,
    } else {
    }
    return
  }
  func.func @transform_0(%arg0: i32, %arg1: i32) -> (i32, i32) {
    %c0_i32 = arith.constant 0 : i32
    %c0_i32_0 = arith.constant 0 : i32
    return %arg1, %c0_i32 : i32, i32
  }
  func.func @transform_1(%arg0: i32, %arg1: i32) -> (i32, i32) {
    %c0_i32 = arith.constant 0 : i32
    %c0_i32_0 = arith.constant 0 : i32
    %c0_i32_1 = arith.constant 0 : i32
    return %c0_i32, %c0_i32_0 : i32, i32
  }
  func.func @transform_2(%arg0: i32, %arg1: i32) -> (i32, i32) {
    %c0_i32 = arith.constant 0 : i32
    %c0_i32_0 = arith.constant 0 : i32
    %c0_i32_1 = arith.constant 0 : i32
    return %c0_i32, %c0_i32_0 : i32, i32
  }
  func.func @transform_3(%arg0: i32, %arg1: i32) -> (i32, i32) {
    %c0_i32 = arith.constant 0 : i32
    %c0_i32_0 = arith.constant 0 : i32
    %c0_i32_1 = arith.constant 0 : i32
    return %c0_i32, %c0_i32_0 : i32, i32
  }
  func.func @transform_4(%arg0: i32, %arg1: i32) -> (i32, i32) {
    %c0_i32 = arith.constant 0 : i32
    %c0_i32_0 = arith.constant 0 : i32
    %c0_i32_1 = arith.constant 0 : i32
    return %c0_i32, %c0_i32_0 : i32, i32
  }
  func.func @transform_5(%arg0: i32, %arg1: i32) -> (i32, i32) {
    %c0_i32 = arith.constant 0 : i32
    %c0_i32_0 = arith.constant 0 : i32
    return %arg1, %c0_i32 : i32, i32
  }
}

module attributes {stable_mosaic.version = 11 : i64} {
  func.func @_conv_bn_kernel(%arg0: i32, %arg1: i32, %arg2: memref<32x256xbf16, #tpu.memory_space<vmem>>, %arg3: memref<256x128xbf16, #tpu.memory_space<vmem>>, %arg4: memref<1x128xf32, #tpu.memory_space<vmem>>, %arg5: memref<1x128xf32, #tpu.memory_space<vmem>>, %arg6: memref<1x128xf32, #tpu.memory_space<vmem>>, %arg7: memref<32x128xf32, #tpu.memory_space<vmem>>, %arg8: memref<1x128xf32, #tpu.memory_space<vmem>>, %arg9: memref<1x128xf32, #tpu.memory_space<vmem>>) attributes {dimension_semantics = [#tpu.dimension_semantics<arbitrary>, #tpu.dimension_semantics<arbitrary>], iteration_bounds = array<i64: 2, 1>, scalar_prefetch = 0 : i64, scratch_operands = 2 : i64, tpu.core_type = #tpu.core_type<tc>, window_params = [{transform_indices = @transform_0, window_bounds = array<i64: 32, 256>}, {pipeline_mode = #tpu.pipeline_mode<synchronous>, transform_indices = @transform_1, window_bounds = array<i64: 256, 128>}, {pipeline_mode = #tpu.pipeline_mode<synchronous>, transform_indices = @transform_2, window_bounds = array<i64: 1, 128>}, {pipeline_mode = #tpu.pipeline_mode<synchronous>, transform_indices = @transform_3, window_bounds = array<i64: 1, 128>}, {pipeline_mode = #tpu.pipeline_mode<synchronous>, transform_indices = @transform_4, window_bounds = array<i64: 1, 128>}, {transform_indices = @transform_5, window_bounds = array<i64: 32, 128>}]} {
    %c0_i32 = arith.constant 0 : i32
    %0 = arith.cmpi eq, %arg0, %c0_i32 : i32
    %c0_i32_0 = arith.constant 0 : i32
    %1 = arith.cmpi eq, %arg1, %c0_i32_0 : i32
    %2 = arith.andi %0, %1 : i1
    %3 = arith.extui %2 : i1 to i32
    %c0_i32_1 = arith.constant 0 : i32
    %4 = arith.cmpi ne, %3, %c0_i32_1 : i32
    scf.if %4 {
      %cst = arith.constant 0.000000e+00 : f32
      %11 = vector.broadcast %cst : f32 to vector<1x128xf32>
      %c0 = arith.constant 0 : index
      %c0_5 = arith.constant 0 : index
      %12 = vector.load %arg8[%c0, %c0_5] : memref<1x128xf32, #tpu.memory_space<vmem>>, vector<1x128xf32>
      tpu.vector_store %arg8[%c0, %c0_5], %11 {strides = array<i32>} : memref<1x128xf32, #tpu.memory_space<vmem>>, vector<1x128xf32>,
      %cst_6 = arith.constant 0.000000e+00 : f32
      %13 = vector.broadcast %cst_6 : f32 to vector<1x128xf32>
      %c0_7 = arith.constant 0 : index
      %c0_8 = arith.constant 0 : index
      %14 = vector.load %arg9[%c0_7, %c0_8] : memref<1x128xf32, #tpu.memory_space<vmem>>, vector<1x128xf32>
      tpu.vector_store %arg9[%c0_7, %c0_8], %13 {strides = array<i32>} : memref<1x128xf32, #tpu.memory_space<vmem>>, vector<1x128xf32>,
    } else {
    }
    %c0_i32_2 = arith.constant 0 : i32
    %5 = arith.cmpi eq, %arg0, %c0_i32_2 : i32
    %6 = arith.extui %5 : i1 to i32
    %c0_i32_3 = arith.constant 0 : i32
    %7 = arith.cmpi ne, %6, %c0_i32_3 : i32
    scf.if %7 {
      %c0 = arith.constant 0 : index
      %c0_5 = arith.constant 0 : index
      %11 = vector.load %arg2[%c0, %c0_5] : memref<32x256xbf16, #tpu.memory_space<vmem>>, vector<32x256xbf16>
      %c0_6 = arith.constant 0 : index
      %c0_7 = arith.constant 0 : index
      %12 = vector.load %arg3[%c0_6, %c0_7] : memref<256x128xbf16, #tpu.memory_space<vmem>>, vector<256x128xbf16>
      %cst = arith.constant dense<0.000000e+00> : vector<32x128xf32>
      %13 = tpu.matmul %11, %12, %cst {dimension_numbers = #tpu.dot_dimension_numbers<[1], [0], [0], [1], [0, 0, 1, 1], [], []>} : vector<32x256xbf16>, vector<256x128xbf16>, vector<32x128xf32> -> vector<32x128xf32>
      %c0_8 = arith.constant 0 : index
      %c0_9 = arith.constant 0 : index
      %14 = vector.load %arg4[%c0_8, %c0_9] : memref<1x128xf32, #tpu.memory_space<vmem>>, vector<1x128xf32>
      %15 = vector.broadcast %14 : vector<1x128xf32> to vector<32x128xf32>
      %16 = arith.addf %13, %15 : vector<32x128xf32>
      %17 = tpu.iota {dimensions = array<i32: 0>} : vector<32x128xi32>
      %c32_i32 = arith.constant 32 : i32
      %18 = arith.muli %arg1, %c32_i32 : i32
      %19 = vector.broadcast %18 : i32 to vector<32x128xi32>
      %20 = arith.addi %17, %19 : vector<32x128xi32>
      %c32_i32_10 = arith.constant 32 : i32
      %21 = vector.broadcast %c32_i32_10 : i32 to vector<32x128xi32>
      %22 = arith.cmpi slt, %20, %21 : vector<32x128xi32>
      %cst_11 = arith.constant 0.000000e+00 : f32
      %23 = vector.broadcast %cst_11 : f32 to vector<32x128xf32>
      %24 = arith.select %22, %16, %23 : vector<32x128xi1>, vector<32x128xf32>
      %c0_12 = arith.constant 0 : index
      %c0_13 = arith.constant 0 : index
      %25 = vector.load %arg8[%c0_12, %c0_13] : memref<1x128xf32, #tpu.memory_space<vmem>>, vector<1x128xf32>
      %cst_14 = arith.constant dense<0.000000e+00> : vector<128xf32>
      %26 = vector.multi_reduction <add>, %24, %cst_14 [0] : vector<32x128xf32> to vector<128xf32>
      %27 = vector.shape_cast %26 : vector<128xf32> to vector<1x128xf32>
      %28 = arith.addf %25, %27 : vector<1x128xf32>
      %c0_15 = arith.constant 0 : index
      %c0_16 = arith.constant 0 : index
      %29 = vector.load %arg8[%c0_15, %c0_16] : memref<1x128xf32, #tpu.memory_space<vmem>>, vector<1x128xf32>
      tpu.vector_store %arg8[%c0_15, %c0_16], %28 {strides = array<i32>} : memref<1x128xf32, #tpu.memory_space<vmem>>, vector<1x128xf32>,
      %c0_17 = arith.constant 0 : index
      %c0_18 = arith.constant 0 : index
      %30 = vector.load %arg9[%c0_17, %c0_18] : memref<1x128xf32, #tpu.memory_space<vmem>>, vector<1x128xf32>
      %31 = arith.mulf %24, %24 : vector<32x128xf32>
      %cst_19 = arith.constant dense<0.000000e+00> : vector<128xf32>
      %32 = vector.multi_reduction <add>, %31, %cst_19 [0] : vector<32x128xf32> to vector<128xf32>
      %33 = vector.shape_cast %32 : vector<128xf32> to vector<1x128xf32>
      %34 = arith.addf %30, %33 : vector<1x128xf32>
      %c0_20 = arith.constant 0 : index
      %c0_21 = arith.constant 0 : index
      %35 = vector.load %arg9[%c0_20, %c0_21] : memref<1x128xf32, #tpu.memory_space<vmem>>, vector<1x128xf32>
      tpu.vector_store %arg9[%c0_20, %c0_21], %34 {strides = array<i32>} : memref<1x128xf32, #tpu.memory_space<vmem>>, vector<1x128xf32>,
      %c0_22 = arith.constant 0 : index
      %c0_23 = arith.constant 0 : index
      %36 = vector.load %arg7[%c0_22, %c0_23] : memref<32x128xf32, #tpu.memory_space<vmem>>, vector<32x128xf32>
      tpu.vector_store %arg7[%c0_22, %c0_23], %16 {strides = array<i32>} : memref<32x128xf32, #tpu.memory_space<vmem>>, vector<32x128xf32>,
    } else {
    }
    %c1_i32 = arith.constant 1 : i32
    %8 = arith.cmpi eq, %arg0, %c1_i32 : i32
    %9 = arith.extui %8 : i1 to i32
    %c0_i32_4 = arith.constant 0 : i32
    %10 = arith.cmpi ne, %9, %c0_i32_4 : i32
    scf.if %10 {
      %c0 = arith.constant 0 : index
      %c0_5 = arith.constant 0 : index
      %11 = vector.load %arg7[%c0, %c0_5] : memref<32x128xf32, #tpu.memory_space<vmem>>, vector<32x128xf32>
      %c0_6 = arith.constant 0 : index
      %c0_7 = arith.constant 0 : index
      %12 = vector.load %arg8[%c0_6, %c0_7] : memref<1x128xf32, #tpu.memory_space<vmem>>, vector<1x128xf32>
      %c0_8 = arith.constant 0 : index
      %c0_9 = arith.constant 0 : index
      %13 = vector.load %arg9[%c0_8, %c0_9] : memref<1x128xf32, #tpu.memory_space<vmem>>, vector<1x128xf32>
      %cst = arith.constant 3.125000e-02 : f32
      %14 = vector.broadcast %cst : f32 to vector<1x128xf32>
      %15 = arith.mulf %12, %14 : vector<1x128xf32>
      %cst_10 = arith.constant 3.125000e-02 : f32
      %16 = vector.broadcast %cst_10 : f32 to vector<1x128xf32>
      %17 = arith.mulf %13, %16 : vector<1x128xf32>
      %18 = arith.mulf %15, %15 : vector<1x128xf32>
      %19 = arith.subf %17, %18 : vector<1x128xf32>
      %cst_11 = arith.constant 9.99999974E-6 : f32
      %20 = vector.broadcast %cst_11 : f32 to vector<1x128xf32>
      %21 = arith.addf %19, %20 : vector<1x128xf32>
      %22 = math.rsqrt %21 : vector<1x128xf32>
      %23 = vector.broadcast %15 : vector<1x128xf32> to vector<32x128xf32>
      %24 = arith.subf %11, %23 : vector<32x128xf32>
      %c0_12 = arith.constant 0 : index
      %c0_13 = arith.constant 0 : index
      %25 = vector.load %arg5[%c0_12, %c0_13] : memref<1x128xf32, #tpu.memory_space<vmem>>, vector<1x128xf32>
      %26 = arith.mulf %22, %25 : vector<1x128xf32>
      %27 = vector.broadcast %26 : vector<1x128xf32> to vector<32x128xf32>
      %28 = arith.mulf %24, %27 : vector<32x128xf32>
      %c0_14 = arith.constant 0 : index
      %c0_15 = arith.constant 0 : index
      %29 = vector.load %arg6[%c0_14, %c0_15] : memref<1x128xf32, #tpu.memory_space<vmem>>, vector<1x128xf32>
      %30 = vector.broadcast %29 : vector<1x128xf32> to vector<32x128xf32>
      %31 = arith.addf %28, %30 : vector<32x128xf32>
      %c0_16 = arith.constant 0 : index
      %c0_17 = arith.constant 0 : index
      %32 = vector.load %arg7[%c0_16, %c0_17] : memref<32x128xf32, #tpu.memory_space<vmem>>, vector<32x128xf32>
      tpu.vector_store %arg7[%c0_16, %c0_17], %31 {strides = array<i32>} : memref<32x128xf32, #tpu.memory_space<vmem>>, vector<32x128xf32>,
    } else {
    }
    return
  }
  func.func @transform_0(%arg0: i32, %arg1: i32) -> (i32, i32) {
    %c0_i32 = arith.constant 0 : i32
    %c0_i32_0 = arith.constant 0 : i32
    return %arg1, %c0_i32 : i32, i32
  }
  func.func @transform_1(%arg0: i32, %arg1: i32) -> (i32, i32) {
    %c0_i32 = arith.constant 0 : i32
    %c0_i32_0 = arith.constant 0 : i32
    %c0_i32_1 = arith.constant 0 : i32
    return %c0_i32, %c0_i32_0 : i32, i32
  }
  func.func @transform_2(%arg0: i32, %arg1: i32) -> (i32, i32) {
    %c0_i32 = arith.constant 0 : i32
    %c0_i32_0 = arith.constant 0 : i32
    %c0_i32_1 = arith.constant 0 : i32
    return %c0_i32, %c0_i32_0 : i32, i32
  }
  func.func @transform_3(%arg0: i32, %arg1: i32) -> (i32, i32) {
    %c0_i32 = arith.constant 0 : i32
    %c0_i32_0 = arith.constant 0 : i32
    %c0_i32_1 = arith.constant 0 : i32
    return %c0_i32, %c0_i32_0 : i32, i32
  }
  func.func @transform_4(%arg0: i32, %arg1: i32) -> (i32, i32) {
    %c0_i32 = arith.constant 0 : i32
    %c0_i32_0 = arith.constant 0 : i32
    %c0_i32_1 = arith.constant 0 : i32
    return %c0_i32, %c0_i32_0 : i32, i32
  }
  func.func @transform_5(%arg0: i32, %arg1: i32) -> (i32, i32) {
    %c0_i32 = arith.constant 0 : i32
    %c0_i32_0 = arith.constant 0 : i32
    return %arg1, %c0_i32 : i32, i32
  }
}

module attributes {stable_mosaic.version = 11 : i64} {
  func.func @_conv_bn_kernel(%arg0: i32, %arg1: i32, %arg2: memref<8x512xbf16, #tpu.memory_space<vmem>>, %arg3: memref<512x128xbf16, #tpu.memory_space<vmem>>, %arg4: memref<1x128xf32, #tpu.memory_space<vmem>>, %arg5: memref<1x128xf32, #tpu.memory_space<vmem>>, %arg6: memref<1x128xf32, #tpu.memory_space<vmem>>, %arg7: memref<8x128xf32, #tpu.memory_space<vmem>>, %arg8: memref<1x128xf32, #tpu.memory_space<vmem>>, %arg9: memref<1x128xf32, #tpu.memory_space<vmem>>) attributes {dimension_semantics = [#tpu.dimension_semantics<arbitrary>, #tpu.dimension_semantics<arbitrary>], iteration_bounds = array<i64: 2, 1>, scalar_prefetch = 0 : i64, scratch_operands = 2 : i64, tpu.core_type = #tpu.core_type<tc>, window_params = [{transform_indices = @transform_0, window_bounds = array<i64: 8, 512>}, {pipeline_mode = #tpu.pipeline_mode<synchronous>, transform_indices = @transform_1, window_bounds = array<i64: 512, 128>}, {pipeline_mode = #tpu.pipeline_mode<synchronous>, transform_indices = @transform_2, window_bounds = array<i64: 1, 128>}, {pipeline_mode = #tpu.pipeline_mode<synchronous>, transform_indices = @transform_3, window_bounds = array<i64: 1, 128>}, {pipeline_mode = #tpu.pipeline_mode<synchronous>, transform_indices = @transform_4, window_bounds = array<i64: 1, 128>}, {transform_indices = @transform_5, window_bounds = array<i64: 8, 128>}]} {
    %c0_i32 = arith.constant 0 : i32
    %0 = arith.cmpi eq, %arg0, %c0_i32 : i32
    %c0_i32_0 = arith.constant 0 : i32
    %1 = arith.cmpi eq, %arg1, %c0_i32_0 : i32
    %2 = arith.andi %0, %1 : i1
    %3 = arith.extui %2 : i1 to i32
    %c0_i32_1 = arith.constant 0 : i32
    %4 = arith.cmpi ne, %3, %c0_i32_1 : i32
    scf.if %4 {
      %cst = arith.constant 0.000000e+00 : f32
      %11 = vector.broadcast %cst : f32 to vector<1x128xf32>
      %c0 = arith.constant 0 : index
      %c0_5 = arith.constant 0 : index
      %12 = vector.load %arg8[%c0, %c0_5] : memref<1x128xf32, #tpu.memory_space<vmem>>, vector<1x128xf32>
      tpu.vector_store %arg8[%c0, %c0_5], %11 {strides = array<i32>} : memref<1x128xf32, #tpu.memory_space<vmem>>, vector<1x128xf32>,
      %cst_6 = arith.constant 0.000000e+00 : f32
      %13 = vector.broadcast %cst_6 : f32 to vector<1x128xf32>
      %c0_7 = arith.constant 0 : index
      %c0_8 = arith.constant 0 : index
      %14 = vector.load %arg9[%c0_7, %c0_8] : memref<1x128xf32, #tpu.memory_space<vmem>>, vector<1x128xf32>
      tpu.vector_store %arg9[%c0_7, %c0_8], %13 {strides = array<i32>} : memref<1x128xf32, #tpu.memory_space<vmem>>, vector<1x128xf32>,
    } else {
    }
    %c0_i32_2 = arith.constant 0 : i32
    %5 = arith.cmpi eq, %arg0, %c0_i32_2 : i32
    %6 = arith.extui %5 : i1 to i32
    %c0_i32_3 = arith.constant 0 : i32
    %7 = arith.cmpi ne, %6, %c0_i32_3 : i32
    scf.if %7 {
      %c0 = arith.constant 0 : index
      %c0_5 = arith.constant 0 : index
      %11 = vector.load %arg2[%c0, %c0_5] : memref<8x512xbf16, #tpu.memory_space<vmem>>, vector<8x512xbf16>
      %c0_6 = arith.constant 0 : index
      %c0_7 = arith.constant 0 : index
      %12 = vector.load %arg3[%c0_6, %c0_7] : memref<512x128xbf16, #tpu.memory_space<vmem>>, vector<512x128xbf16>
      %cst = arith.constant dense<0.000000e+00> : vector<8x128xf32>
      %13 = tpu.matmul %11, %12, %cst {dimension_numbers = #tpu.dot_dimension_numbers<[1], [0], [0], [1], [0, 0, 1, 1], [], []>} : vector<8x512xbf16>, vector<512x128xbf16>, vector<8x128xf32> -> vector<8x128xf32>
      %c0_8 = arith.constant 0 : index
      %c0_9 = arith.constant 0 : index
      %14 = vector.load %arg4[%c0_8, %c0_9] : memref<1x128xf32, #tpu.memory_space<vmem>>, vector<1x128xf32>
      %15 = vector.broadcast %14 : vector<1x128xf32> to vector<8x128xf32>
      %16 = arith.addf %13, %15 : vector<8x128xf32>
      %17 = tpu.iota {dimensions = array<i32: 0>} : vector<8x128xi32>
      %c8_i32 = arith.constant 8 : i32
      %18 = arith.muli %arg1, %c8_i32 : i32
      %19 = vector.broadcast %18 : i32 to vector<8x128xi32>
      %20 = arith.addi %17, %19 : vector<8x128xi32>
      %c8_i32_10 = arith.constant 8 : i32
      %21 = vector.broadcast %c8_i32_10 : i32 to vector<8x128xi32>
      %22 = arith.cmpi slt, %20, %21 : vector<8x128xi32>
      %cst_11 = arith.constant 0.000000e+00 : f32
      %23 = vector.broadcast %cst_11 : f32 to vector<8x128xf32>
      %24 = arith.select %22, %16, %23 : vector<8x128xi1>, vector<8x128xf32>
      %c0_12 = arith.constant 0 : index
      %c0_13 = arith.constant 0 : index
      %25 = vector.load %arg8[%c0_12, %c0_13] : memref<1x128xf32, #tpu.memory_space<vmem>>, vector<1x128xf32>
      %cst_14 = arith.constant dense<0.000000e+00> : vector<128xf32>
      %26 = vector.multi_reduction <add>, %24, %cst_14 [0] : vector<8x128xf32> to vector<128xf32>
      %27 = vector.shape_cast %26 : vector<128xf32> to vector<1x128xf32>
      %28 = arith.addf %25, %27 : vector<1x128xf32>
      %c0_15 = arith.constant 0 : index
      %c0_16 = arith.constant 0 : index
      %29 = vector.load %arg8[%c0_15, %c0_16] : memref<1x128xf32, #tpu.memory_space<vmem>>, vector<1x128xf32>
      tpu.vector_store %arg8[%c0_15, %c0_16], %28 {strides = array<i32>} : memref<1x128xf32, #tpu.memory_space<vmem>>, vector<1x128xf32>,
      %c0_17 = arith.constant 0 : index
      %c0_18 = arith.constant 0 : index
      %30 = vector.load %arg9[%c0_17, %c0_18] : memref<1x128xf32, #tpu.memory_space<vmem>>, vector<1x128xf32>
      %31 = arith.mulf %24, %24 : vector<8x128xf32>
      %cst_19 = arith.constant dense<0.000000e+00> : vector<128xf32>
      %32 = vector.multi_reduction <add>, %31, %cst_19 [0] : vector<8x128xf32> to vector<128xf32>
      %33 = vector.shape_cast %32 : vector<128xf32> to vector<1x128xf32>
      %34 = arith.addf %30, %33 : vector<1x128xf32>
      %c0_20 = arith.constant 0 : index
      %c0_21 = arith.constant 0 : index
      %35 = vector.load %arg9[%c0_20, %c0_21] : memref<1x128xf32, #tpu.memory_space<vmem>>, vector<1x128xf32>
      tpu.vector_store %arg9[%c0_20, %c0_21], %34 {strides = array<i32>} : memref<1x128xf32, #tpu.memory_space<vmem>>, vector<1x128xf32>,
      %c0_22 = arith.constant 0 : index
      %c0_23 = arith.constant 0 : index
      %36 = vector.load %arg7[%c0_22, %c0_23] : memref<8x128xf32, #tpu.memory_space<vmem>>, vector<8x128xf32>
      tpu.vector_store %arg7[%c0_22, %c0_23], %16 {strides = array<i32>} : memref<8x128xf32, #tpu.memory_space<vmem>>, vector<8x128xf32>,
    } else {
    }
    %c1_i32 = arith.constant 1 : i32
    %8 = arith.cmpi eq, %arg0, %c1_i32 : i32
    %9 = arith.extui %8 : i1 to i32
    %c0_i32_4 = arith.constant 0 : i32
    %10 = arith.cmpi ne, %9, %c0_i32_4 : i32
    scf.if %10 {
      %c0 = arith.constant 0 : index
      %c0_5 = arith.constant 0 : index
      %11 = vector.load %arg7[%c0, %c0_5] : memref<8x128xf32, #tpu.memory_space<vmem>>, vector<8x128xf32>
      %c0_6 = arith.constant 0 : index
      %c0_7 = arith.constant 0 : index
      %12 = vector.load %arg8[%c0_6, %c0_7] : memref<1x128xf32, #tpu.memory_space<vmem>>, vector<1x128xf32>
      %c0_8 = arith.constant 0 : index
      %c0_9 = arith.constant 0 : index
      %13 = vector.load %arg9[%c0_8, %c0_9] : memref<1x128xf32, #tpu.memory_space<vmem>>, vector<1x128xf32>
      %cst = arith.constant 1.250000e-01 : f32
      %14 = vector.broadcast %cst : f32 to vector<1x128xf32>
      %15 = arith.mulf %12, %14 : vector<1x128xf32>
      %cst_10 = arith.constant 1.250000e-01 : f32
      %16 = vector.broadcast %cst_10 : f32 to vector<1x128xf32>
      %17 = arith.mulf %13, %16 : vector<1x128xf32>
      %18 = arith.mulf %15, %15 : vector<1x128xf32>
      %19 = arith.subf %17, %18 : vector<1x128xf32>
      %cst_11 = arith.constant 9.99999974E-6 : f32
      %20 = vector.broadcast %cst_11 : f32 to vector<1x128xf32>
      %21 = arith.addf %19, %20 : vector<1x128xf32>
      %22 = math.rsqrt %21 : vector<1x128xf32>
      %23 = vector.broadcast %15 : vector<1x128xf32> to vector<8x128xf32>
      %24 = arith.subf %11, %23 : vector<8x128xf32>
      %c0_12 = arith.constant 0 : index
      %c0_13 = arith.constant 0 : index
      %25 = vector.load %arg5[%c0_12, %c0_13] : memref<1x128xf32, #tpu.memory_space<vmem>>, vector<1x128xf32>
      %26 = arith.mulf %22, %25 : vector<1x128xf32>
      %27 = vector.broadcast %26 : vector<1x128xf32> to vector<8x128xf32>
      %28 = arith.mulf %24, %27 : vector<8x128xf32>
      %c0_14 = arith.constant 0 : index
      %c0_15 = arith.constant 0 : index
      %29 = vector.load %arg6[%c0_14, %c0_15] : memref<1x128xf32, #tpu.memory_space<vmem>>, vector<1x128xf32>
      %30 = vector.broadcast %29 : vector<1x128xf32> to vector<8x128xf32>
      %31 = arith.addf %28, %30 : vector<8x128xf32>
      %cst_16 = arith.constant 0.000000e+00 : f32
      %32 = vector.broadcast %cst_16 : f32 to vector<8x128xf32>
      %33 = arith.maximumf %31, %32 : vector<8x128xf32>
      %c0_17 = arith.constant 0 : index
      %c0_18 = arith.constant 0 : index
      %34 = vector.load %arg7[%c0_17, %c0_18] : memref<8x128xf32, #tpu.memory_space<vmem>>, vector<8x128xf32>
      tpu.vector_store %arg7[%c0_17, %c0_18], %33 {strides = array<i32>} : memref<8x128xf32, #tpu.memory_space<vmem>>, vector<8x128xf32>,
    } else {
    }
    return
  }
  func.func @transform_0(%arg0: i32, %arg1: i32) -> (i32, i32) {
    %c0_i32 = arith.constant 0 : i32
    %c0_i32_0 = arith.constant 0 : i32
    return %arg1, %c0_i32 : i32, i32
  }
  func.func @transform_1(%arg0: i32, %arg1: i32) -> (i32, i32) {
    %c0_i32 = arith.constant 0 : i32
    %c0_i32_0 = arith.constant 0 : i32
    %c0_i32_1 = arith.constant 0 : i32
    return %c0_i32, %c0_i32_0 : i32, i32
  }
  func.func @transform_2(%arg0: i32, %arg1: i32) -> (i32, i32) {
    %c0_i32 = arith.constant 0 : i32
    %c0_i32_0 = arith.constant 0 : i32
    %c0_i32_1 = arith.constant 0 : i32
    return %c0_i32, %c0_i32_0 : i32, i32
  }
  func.func @transform_3(%arg0: i32, %arg1: i32) -> (i32, i32) {
    %c0_i32 = arith.constant 0 : i32
    %c0_i32_0 = arith.constant 0 : i32
    %c0_i32_1 = arith.constant 0 : i32
    return %c0_i32, %c0_i32_0 : i32, i32
  }
  func.func @transform_4(%arg0: i32, %arg1: i32) -> (i32, i32) {
    %c0_i32 = arith.constant 0 : i32
    %c0_i32_0 = arith.constant 0 : i32
    %c0_i32_1 = arith.constant 0 : i32
    return %c0_i32, %c0_i32_0 : i32, i32
  }
  func.func @transform_5(%arg0: i32, %arg1: i32) -> (i32, i32) {
    %c0_i32 = arith.constant 0 : i32
    %c0_i32_0 = arith.constant 0 : i32
    return %arg1, %c0_i32 : i32, i32
  }
}

module attributes {stable_mosaic.version = 11 : i64} {
  func.func @_vq_kernel(%arg0: i32, %arg1: memref<8x32xf32, #tpu.memory_space<vmem>>, %arg2: memref<32x512xf32, #tpu.memory_space<vmem>>, %arg3: memref<512x32xf32, #tpu.memory_space<vmem>>, %arg4: memref<8x1xi32, #tpu.memory_space<vmem>>, %arg5: memref<8x32xf32, #tpu.memory_space<vmem>>) attributes {dimension_semantics = [#tpu.dimension_semantics<parallel>], iteration_bounds = array<i64: 1>, scalar_prefetch = 0 : i64, scratch_operands = 0 : i64, tpu.core_type = #tpu.core_type<tc>, window_params = [{transform_indices = @transform_0, window_bounds = array<i64: 8, 32>}, {pipeline_mode = #tpu.pipeline_mode<synchronous>, transform_indices = @transform_1, window_bounds = array<i64: 32, 512>}, {pipeline_mode = #tpu.pipeline_mode<synchronous>, transform_indices = @transform_2, window_bounds = array<i64: 512, 32>}, {transform_indices = @transform_3, window_bounds = array<i64: 8, 1>}, {transform_indices = @transform_4, window_bounds = array<i64: 8, 32>}]} {
    %c0 = arith.constant 0 : index
    %c0_0 = arith.constant 0 : index
    %0 = vector.load %arg1[%c0, %c0_0] : memref<8x32xf32, #tpu.memory_space<vmem>>, vector<8x32xf32>
    %c0_1 = arith.constant 0 : index
    %c0_2 = arith.constant 0 : index
    %1 = vector.load %arg2[%c0_1, %c0_2] : memref<32x512xf32, #tpu.memory_space<vmem>>, vector<32x512xf32>
    %2 = arith.mulf %0, %0 : vector<8x32xf32>
    %cst = arith.constant dense<0.000000e+00> : vector<8xf32>
    %3 = vector.multi_reduction <add>, %2, %cst [1] : vector<8x32xf32> to vector<8xf32>
    %4 = vector.shape_cast %3 : vector<8xf32> to vector<8x1xf32>
    %5 = arith.mulf %1, %1 : vector<32x512xf32>
    %cst_3 = arith.constant dense<0.000000e+00> : vector<512xf32>
    %6 = vector.multi_reduction <add>, %5, %cst_3 [0] : vector<32x512xf32> to vector<512xf32>
    %7 = vector.shape_cast %6 : vector<512xf32> to vector<1x512xf32>
    %cst_4 = arith.constant dense<0.000000e+00> : vector<8x512xf32>
    %8 = tpu.matmul %0, %1, %cst_4 {dimension_numbers = #tpu.dot_dimension_numbers<[1], [0], [0], [1], [0, 0, 1, 1], [], []>} : vector<8x32xf32>, vector<32x512xf32>, vector<8x512xf32> -> vector<8x512xf32>
    %cst_5 = arith.constant 2.000000e+00 : f32
    %9 = vector.broadcast %cst_5 : f32 to vector<8x512xf32>
    %10 = arith.mulf %9, %8 : vector<8x512xf32>
    %11 = vector.broadcast %4 : vector<8x1xf32> to vector<8x512xf32>
    %12 = arith.subf %11, %10 : vector<8x512xf32>
    %13 = vector.broadcast %7 : vector<1x512xf32> to vector<8x512xf32>
    %14 = arith.addf %12, %13 : vector<8x512xf32>
    %15 = tpu.reduce_index %14 {axis = 1 : i32, kind = #tpu.reduction_kind<arg_min>} : vector<8x512xf32> -> vector<8xi32>
    %16 = vector.shape_cast %15 : vector<8xi32> to vector<8x1xi32>
    %c0_6 = arith.constant 0 : index
    %c0_7 = arith.constant 0 : index
    %17 = vector.load %arg4[%c0_6, %c0_7] : memref<8x1xi32, #tpu.memory_space<vmem>>, vector<8x1xi32>
    tpu.vector_store %arg4[%c0_6, %c0_7], %16 {strides = array<i32>} : memref<8x1xi32, #tpu.memory_space<vmem>>, vector<8x1xi32>,
    %18 = tpu.iota {dimensions = array<i32: 1>} : vector<8x512xi32>
    %19 = vector.shape_cast %15 : vector<8xi32> to vector<8x1xi32>
    %20 = vector.broadcast %19 : vector<8x1xi32> to vector<8x512xi32>
    %21 = arith.cmpi eq, %18, %20 : vector<8x512xi32>
    %22 = arith.extui %21 : vector<8x512xi1> to vector<8x512xi32>
    %23 = arith.sitofp %22 : vector<8x512xi32> to vector<8x512xf32>
    %c0_8 = arith.constant 0 : index
    %c0_9 = arith.constant 0 : index
    %24 = vector.load %arg3[%c0_8, %c0_9] : memref<512x32xf32, #tpu.memory_space<vmem>>, vector<512x32xf32>
    %cst_10 = arith.constant dense<0.000000e+00> : vector<8x32xf32>
    %25 = tpu.matmul %23, %24, %cst_10 {dimension_numbers = #tpu.dot_dimension_numbers<[1], [0], [0], [1], [0, 0, 1, 1], [], []>} : vector<8x512xf32>, vector<512x32xf32>, vector<8x32xf32> -> vector<8x32xf32>
    %c0_11 = arith.constant 0 : index
    %c0_12 = arith.constant 0 : index
    %26 = vector.load %arg5[%c0_11, %c0_12] : memref<8x32xf32, #tpu.memory_space<vmem>>, vector<8x32xf32>
    tpu.vector_store %arg5[%c0_11, %c0_12], %25 {strides = array<i32>} : memref<8x32xf32, #tpu.memory_space<vmem>>, vector<8x32xf32>,
    return
  }
  func.func @transform_0(%arg0: i32) -> (i32, i32) {
    %c0_i32 = arith.constant 0 : i32
    %c0_i32_0 = arith.constant 0 : i32
    return %arg0, %c0_i32 : i32, i32
  }
  func.func @transform_1(%arg0: i32) -> (i32, i32) {
    %c0_i32 = arith.constant 0 : i32
    %c0_i32_0 = arith.constant 0 : i32
    %c0_i32_1 = arith.constant 0 : i32
    return %c0_i32, %c0_i32_0 : i32, i32
  }
  func.func @transform_2(%arg0: i32) -> (i32, i32) {
    %c0_i32 = arith.constant 0 : i32
    %c0_i32_0 = arith.constant 0 : i32
    %c0_i32_1 = arith.constant 0 : i32
    return %c0_i32, %c0_i32_0 : i32, i32
  }
  func.func @transform_3(%arg0: i32) -> (i32, i32) {
    %c0_i32 = arith.constant 0 : i32
    %c0_i32_0 = arith.constant 0 : i32
    return %arg0, %c0_i32 : i32, i32
  }
  func.func @transform_4(%arg0: i32) -> (i32, i32) {
    %c0_i32 = arith.constant 0 : i32
    %c0_i32_0 = arith.constant 0 : i32
    return %arg0, %c0_i32 : i32, i32
  }
}

module attributes {stable_mosaic.version = 11 : i64} {
  func.func @_conv_bn_kernel(%arg0: i32, %arg1: i32, %arg2: memref<8x48xbf16, #tpu.memory_space<vmem>>, %arg3: memref<48x128xbf16, #tpu.memory_space<vmem>>, %arg4: memref<1x128xf32, #tpu.memory_space<vmem>>, %arg5: memref<1x128xf32, #tpu.memory_space<vmem>>, %arg6: memref<1x128xf32, #tpu.memory_space<vmem>>, %arg7: memref<8x128xf32, #tpu.memory_space<vmem>>, %arg8: memref<1x128xf32, #tpu.memory_space<vmem>>, %arg9: memref<1x128xf32, #tpu.memory_space<vmem>>) attributes {dimension_semantics = [#tpu.dimension_semantics<arbitrary>, #tpu.dimension_semantics<arbitrary>], iteration_bounds = array<i64: 2, 1>, scalar_prefetch = 0 : i64, scratch_operands = 2 : i64, tpu.core_type = #tpu.core_type<tc>, window_params = [{transform_indices = @transform_0, window_bounds = array<i64: 8, 48>}, {pipeline_mode = #tpu.pipeline_mode<synchronous>, transform_indices = @transform_1, window_bounds = array<i64: 48, 128>}, {pipeline_mode = #tpu.pipeline_mode<synchronous>, transform_indices = @transform_2, window_bounds = array<i64: 1, 128>}, {pipeline_mode = #tpu.pipeline_mode<synchronous>, transform_indices = @transform_3, window_bounds = array<i64: 1, 128>}, {pipeline_mode = #tpu.pipeline_mode<synchronous>, transform_indices = @transform_4, window_bounds = array<i64: 1, 128>}, {transform_indices = @transform_5, window_bounds = array<i64: 8, 128>}]} {
    %c0_i32 = arith.constant 0 : i32
    %0 = arith.cmpi eq, %arg0, %c0_i32 : i32
    %c0_i32_0 = arith.constant 0 : i32
    %1 = arith.cmpi eq, %arg1, %c0_i32_0 : i32
    %2 = arith.andi %0, %1 : i1
    %3 = arith.extui %2 : i1 to i32
    %c0_i32_1 = arith.constant 0 : i32
    %4 = arith.cmpi ne, %3, %c0_i32_1 : i32
    scf.if %4 {
      %cst = arith.constant 0.000000e+00 : f32
      %11 = vector.broadcast %cst : f32 to vector<1x128xf32>
      %c0 = arith.constant 0 : index
      %c0_5 = arith.constant 0 : index
      %12 = vector.load %arg8[%c0, %c0_5] : memref<1x128xf32, #tpu.memory_space<vmem>>, vector<1x128xf32>
      tpu.vector_store %arg8[%c0, %c0_5], %11 {strides = array<i32>} : memref<1x128xf32, #tpu.memory_space<vmem>>, vector<1x128xf32>,
      %cst_6 = arith.constant 0.000000e+00 : f32
      %13 = vector.broadcast %cst_6 : f32 to vector<1x128xf32>
      %c0_7 = arith.constant 0 : index
      %c0_8 = arith.constant 0 : index
      %14 = vector.load %arg9[%c0_7, %c0_8] : memref<1x128xf32, #tpu.memory_space<vmem>>, vector<1x128xf32>
      tpu.vector_store %arg9[%c0_7, %c0_8], %13 {strides = array<i32>} : memref<1x128xf32, #tpu.memory_space<vmem>>, vector<1x128xf32>,
    } else {
    }
    %c0_i32_2 = arith.constant 0 : i32
    %5 = arith.cmpi eq, %arg0, %c0_i32_2 : i32
    %6 = arith.extui %5 : i1 to i32
    %c0_i32_3 = arith.constant 0 : i32
    %7 = arith.cmpi ne, %6, %c0_i32_3 : i32
    scf.if %7 {
      %c0 = arith.constant 0 : index
      %c0_5 = arith.constant 0 : index
      %11 = vector.load %arg2[%c0, %c0_5] : memref<8x48xbf16, #tpu.memory_space<vmem>>, vector<8x48xbf16>
      %c0_6 = arith.constant 0 : index
      %c0_7 = arith.constant 0 : index
      %12 = vector.load %arg3[%c0_6, %c0_7] : memref<48x128xbf16, #tpu.memory_space<vmem>>, vector<48x128xbf16>
      %cst = arith.constant dense<0.000000e+00> : vector<8x128xf32>
      %13 = tpu.matmul %11, %12, %cst {dimension_numbers = #tpu.dot_dimension_numbers<[1], [0], [0], [1], [0, 0, 1, 1], [], []>} : vector<8x48xbf16>, vector<48x128xbf16>, vector<8x128xf32> -> vector<8x128xf32>
      %c0_8 = arith.constant 0 : index
      %c0_9 = arith.constant 0 : index
      %14 = vector.load %arg4[%c0_8, %c0_9] : memref<1x128xf32, #tpu.memory_space<vmem>>, vector<1x128xf32>
      %15 = vector.broadcast %14 : vector<1x128xf32> to vector<8x128xf32>
      %16 = arith.addf %13, %15 : vector<8x128xf32>
      %17 = tpu.iota {dimensions = array<i32: 0>} : vector<8x128xi32>
      %c8_i32 = arith.constant 8 : i32
      %18 = arith.muli %arg1, %c8_i32 : i32
      %19 = vector.broadcast %18 : i32 to vector<8x128xi32>
      %20 = arith.addi %17, %19 : vector<8x128xi32>
      %c8_i32_10 = arith.constant 8 : i32
      %21 = vector.broadcast %c8_i32_10 : i32 to vector<8x128xi32>
      %22 = arith.cmpi slt, %20, %21 : vector<8x128xi32>
      %cst_11 = arith.constant 0.000000e+00 : f32
      %23 = vector.broadcast %cst_11 : f32 to vector<8x128xf32>
      %24 = arith.select %22, %16, %23 : vector<8x128xi1>, vector<8x128xf32>
      %c0_12 = arith.constant 0 : index
      %c0_13 = arith.constant 0 : index
      %25 = vector.load %arg8[%c0_12, %c0_13] : memref<1x128xf32, #tpu.memory_space<vmem>>, vector<1x128xf32>
      %cst_14 = arith.constant dense<0.000000e+00> : vector<128xf32>
      %26 = vector.multi_reduction <add>, %24, %cst_14 [0] : vector<8x128xf32> to vector<128xf32>
      %27 = vector.shape_cast %26 : vector<128xf32> to vector<1x128xf32>
      %28 = arith.addf %25, %27 : vector<1x128xf32>
      %c0_15 = arith.constant 0 : index
      %c0_16 = arith.constant 0 : index
      %29 = vector.load %arg8[%c0_15, %c0_16] : memref<1x128xf32, #tpu.memory_space<vmem>>, vector<1x128xf32>
      tpu.vector_store %arg8[%c0_15, %c0_16], %28 {strides = array<i32>} : memref<1x128xf32, #tpu.memory_space<vmem>>, vector<1x128xf32>,
      %c0_17 = arith.constant 0 : index
      %c0_18 = arith.constant 0 : index
      %30 = vector.load %arg9[%c0_17, %c0_18] : memref<1x128xf32, #tpu.memory_space<vmem>>, vector<1x128xf32>
      %31 = arith.mulf %24, %24 : vector<8x128xf32>
      %cst_19 = arith.constant dense<0.000000e+00> : vector<128xf32>
      %32 = vector.multi_reduction <add>, %31, %cst_19 [0] : vector<8x128xf32> to vector<128xf32>
      %33 = vector.shape_cast %32 : vector<128xf32> to vector<1x128xf32>
      %34 = arith.addf %30, %33 : vector<1x128xf32>
      %c0_20 = arith.constant 0 : index
      %c0_21 = arith.constant 0 : index
      %35 = vector.load %arg9[%c0_20, %c0_21] : memref<1x128xf32, #tpu.memory_space<vmem>>, vector<1x128xf32>
      tpu.vector_store %arg9[%c0_20, %c0_21], %34 {strides = array<i32>} : memref<1x128xf32, #tpu.memory_space<vmem>>, vector<1x128xf32>,
      %c0_22 = arith.constant 0 : index
      %c0_23 = arith.constant 0 : index
      %36 = vector.load %arg7[%c0_22, %c0_23] : memref<8x128xf32, #tpu.memory_space<vmem>>, vector<8x128xf32>
      tpu.vector_store %arg7[%c0_22, %c0_23], %16 {strides = array<i32>} : memref<8x128xf32, #tpu.memory_space<vmem>>, vector<8x128xf32>,
    } else {
    }
    %c1_i32 = arith.constant 1 : i32
    %8 = arith.cmpi eq, %arg0, %c1_i32 : i32
    %9 = arith.extui %8 : i1 to i32
    %c0_i32_4 = arith.constant 0 : i32
    %10 = arith.cmpi ne, %9, %c0_i32_4 : i32
    scf.if %10 {
      %c0 = arith.constant 0 : index
      %c0_5 = arith.constant 0 : index
      %11 = vector.load %arg7[%c0, %c0_5] : memref<8x128xf32, #tpu.memory_space<vmem>>, vector<8x128xf32>
      %c0_6 = arith.constant 0 : index
      %c0_7 = arith.constant 0 : index
      %12 = vector.load %arg8[%c0_6, %c0_7] : memref<1x128xf32, #tpu.memory_space<vmem>>, vector<1x128xf32>
      %c0_8 = arith.constant 0 : index
      %c0_9 = arith.constant 0 : index
      %13 = vector.load %arg9[%c0_8, %c0_9] : memref<1x128xf32, #tpu.memory_space<vmem>>, vector<1x128xf32>
      %cst = arith.constant 1.250000e-01 : f32
      %14 = vector.broadcast %cst : f32 to vector<1x128xf32>
      %15 = arith.mulf %12, %14 : vector<1x128xf32>
      %cst_10 = arith.constant 1.250000e-01 : f32
      %16 = vector.broadcast %cst_10 : f32 to vector<1x128xf32>
      %17 = arith.mulf %13, %16 : vector<1x128xf32>
      %18 = arith.mulf %15, %15 : vector<1x128xf32>
      %19 = arith.subf %17, %18 : vector<1x128xf32>
      %cst_11 = arith.constant 9.99999974E-6 : f32
      %20 = vector.broadcast %cst_11 : f32 to vector<1x128xf32>
      %21 = arith.addf %19, %20 : vector<1x128xf32>
      %22 = math.rsqrt %21 : vector<1x128xf32>
      %23 = vector.broadcast %15 : vector<1x128xf32> to vector<8x128xf32>
      %24 = arith.subf %11, %23 : vector<8x128xf32>
      %c0_12 = arith.constant 0 : index
      %c0_13 = arith.constant 0 : index
      %25 = vector.load %arg5[%c0_12, %c0_13] : memref<1x128xf32, #tpu.memory_space<vmem>>, vector<1x128xf32>
      %26 = arith.mulf %22, %25 : vector<1x128xf32>
      %27 = vector.broadcast %26 : vector<1x128xf32> to vector<8x128xf32>
      %28 = arith.mulf %24, %27 : vector<8x128xf32>
      %c0_14 = arith.constant 0 : index
      %c0_15 = arith.constant 0 : index
      %29 = vector.load %arg6[%c0_14, %c0_15] : memref<1x128xf32, #tpu.memory_space<vmem>>, vector<1x128xf32>
      %30 = vector.broadcast %29 : vector<1x128xf32> to vector<8x128xf32>
      %31 = arith.addf %28, %30 : vector<8x128xf32>
      %c0_16 = arith.constant 0 : index
      %c0_17 = arith.constant 0 : index
      %32 = vector.load %arg7[%c0_16, %c0_17] : memref<8x128xf32, #tpu.memory_space<vmem>>, vector<8x128xf32>
      tpu.vector_store %arg7[%c0_16, %c0_17], %31 {strides = array<i32>} : memref<8x128xf32, #tpu.memory_space<vmem>>, vector<8x128xf32>,
    } else {
    }
    return
  }
  func.func @transform_0(%arg0: i32, %arg1: i32) -> (i32, i32) {
    %c0_i32 = arith.constant 0 : i32
    %c0_i32_0 = arith.constant 0 : i32
    return %arg1, %c0_i32 : i32, i32
  }
  func.func @transform_1(%arg0: i32, %arg1: i32) -> (i32, i32) {
    %c0_i32 = arith.constant 0 : i32
    %c0_i32_0 = arith.constant 0 : i32
    %c0_i32_1 = arith.constant 0 : i32
    return %c0_i32, %c0_i32_0 : i32, i32
  }
  func.func @transform_2(%arg0: i32, %arg1: i32) -> (i32, i32) {
    %c0_i32 = arith.constant 0 : i32
    %c0_i32_0 = arith.constant 0 : i32
    %c0_i32_1 = arith.constant 0 : i32
    return %c0_i32, %c0_i32_0 : i32, i32
  }
  func.func @transform_3(%arg0: i32, %arg1: i32) -> (i32, i32) {
    %c0_i32 = arith.constant 0 : i32
    %c0_i32_0 = arith.constant 0 : i32
    %c0_i32_1 = arith.constant 0 : i32
    return %c0_i32, %c0_i32_0 : i32, i32
  }
  func.func @transform_4(%arg0: i32, %arg1: i32) -> (i32, i32) {
    %c0_i32 = arith.constant 0 : i32
    %c0_i32_0 = arith.constant 0 : i32
    %c0_i32_1 = arith.constant 0 : i32
    return %c0_i32, %c0_i32_0 : i32, i32
  }
  func.func @transform_5(%arg0: i32, %arg1: i32) -> (i32, i32) {
    %c0_i32 = arith.constant 0 : i32
    %c0_i32_0 = arith.constant 0 : i32
    return %arg1, %c0_i32 : i32, i32
  }
}

module attributes {stable_mosaic.version = 11 : i64} {
  func.func @_conv_bn_kernel(%arg0: i32, %arg1: i32, %arg2: memref<8x32xbf16, #tpu.memory_space<vmem>>, %arg3: memref<32x128xbf16, #tpu.memory_space<vmem>>, %arg4: memref<1x128xf32, #tpu.memory_space<vmem>>, %arg5: memref<1x128xf32, #tpu.memory_space<vmem>>, %arg6: memref<1x128xf32, #tpu.memory_space<vmem>>, %arg7: memref<8x128xf32, #tpu.memory_space<vmem>>, %arg8: memref<1x128xf32, #tpu.memory_space<vmem>>, %arg9: memref<1x128xf32, #tpu.memory_space<vmem>>) attributes {dimension_semantics = [#tpu.dimension_semantics<arbitrary>, #tpu.dimension_semantics<arbitrary>], iteration_bounds = array<i64: 2, 1>, scalar_prefetch = 0 : i64, scratch_operands = 2 : i64, tpu.core_type = #tpu.core_type<tc>, window_params = [{transform_indices = @transform_0, window_bounds = array<i64: 8, 32>}, {pipeline_mode = #tpu.pipeline_mode<synchronous>, transform_indices = @transform_1, window_bounds = array<i64: 32, 128>}, {pipeline_mode = #tpu.pipeline_mode<synchronous>, transform_indices = @transform_2, window_bounds = array<i64: 1, 128>}, {pipeline_mode = #tpu.pipeline_mode<synchronous>, transform_indices = @transform_3, window_bounds = array<i64: 1, 128>}, {pipeline_mode = #tpu.pipeline_mode<synchronous>, transform_indices = @transform_4, window_bounds = array<i64: 1, 128>}, {transform_indices = @transform_5, window_bounds = array<i64: 8, 128>}]} {
    %c0_i32 = arith.constant 0 : i32
    %0 = arith.cmpi eq, %arg0, %c0_i32 : i32
    %c0_i32_0 = arith.constant 0 : i32
    %1 = arith.cmpi eq, %arg1, %c0_i32_0 : i32
    %2 = arith.andi %0, %1 : i1
    %3 = arith.extui %2 : i1 to i32
    %c0_i32_1 = arith.constant 0 : i32
    %4 = arith.cmpi ne, %3, %c0_i32_1 : i32
    scf.if %4 {
      %cst = arith.constant 0.000000e+00 : f32
      %11 = vector.broadcast %cst : f32 to vector<1x128xf32>
      %c0 = arith.constant 0 : index
      %c0_5 = arith.constant 0 : index
      %12 = vector.load %arg8[%c0, %c0_5] : memref<1x128xf32, #tpu.memory_space<vmem>>, vector<1x128xf32>
      tpu.vector_store %arg8[%c0, %c0_5], %11 {strides = array<i32>} : memref<1x128xf32, #tpu.memory_space<vmem>>, vector<1x128xf32>,
      %cst_6 = arith.constant 0.000000e+00 : f32
      %13 = vector.broadcast %cst_6 : f32 to vector<1x128xf32>
      %c0_7 = arith.constant 0 : index
      %c0_8 = arith.constant 0 : index
      %14 = vector.load %arg9[%c0_7, %c0_8] : memref<1x128xf32, #tpu.memory_space<vmem>>, vector<1x128xf32>
      tpu.vector_store %arg9[%c0_7, %c0_8], %13 {strides = array<i32>} : memref<1x128xf32, #tpu.memory_space<vmem>>, vector<1x128xf32>,
    } else {
    }
    %c0_i32_2 = arith.constant 0 : i32
    %5 = arith.cmpi eq, %arg0, %c0_i32_2 : i32
    %6 = arith.extui %5 : i1 to i32
    %c0_i32_3 = arith.constant 0 : i32
    %7 = arith.cmpi ne, %6, %c0_i32_3 : i32
    scf.if %7 {
      %c0 = arith.constant 0 : index
      %c0_5 = arith.constant 0 : index
      %11 = vector.load %arg2[%c0, %c0_5] : memref<8x32xbf16, #tpu.memory_space<vmem>>, vector<8x32xbf16>
      %c0_6 = arith.constant 0 : index
      %c0_7 = arith.constant 0 : index
      %12 = vector.load %arg3[%c0_6, %c0_7] : memref<32x128xbf16, #tpu.memory_space<vmem>>, vector<32x128xbf16>
      %cst = arith.constant dense<0.000000e+00> : vector<8x128xf32>
      %13 = tpu.matmul %11, %12, %cst {dimension_numbers = #tpu.dot_dimension_numbers<[1], [0], [0], [1], [0, 0, 1, 1], [], []>} : vector<8x32xbf16>, vector<32x128xbf16>, vector<8x128xf32> -> vector<8x128xf32>
      %c0_8 = arith.constant 0 : index
      %c0_9 = arith.constant 0 : index
      %14 = vector.load %arg4[%c0_8, %c0_9] : memref<1x128xf32, #tpu.memory_space<vmem>>, vector<1x128xf32>
      %15 = vector.broadcast %14 : vector<1x128xf32> to vector<8x128xf32>
      %16 = arith.addf %13, %15 : vector<8x128xf32>
      %17 = tpu.iota {dimensions = array<i32: 0>} : vector<8x128xi32>
      %c8_i32 = arith.constant 8 : i32
      %18 = arith.muli %arg1, %c8_i32 : i32
      %19 = vector.broadcast %18 : i32 to vector<8x128xi32>
      %20 = arith.addi %17, %19 : vector<8x128xi32>
      %c8_i32_10 = arith.constant 8 : i32
      %21 = vector.broadcast %c8_i32_10 : i32 to vector<8x128xi32>
      %22 = arith.cmpi slt, %20, %21 : vector<8x128xi32>
      %cst_11 = arith.constant 0.000000e+00 : f32
      %23 = vector.broadcast %cst_11 : f32 to vector<8x128xf32>
      %24 = arith.select %22, %16, %23 : vector<8x128xi1>, vector<8x128xf32>
      %c0_12 = arith.constant 0 : index
      %c0_13 = arith.constant 0 : index
      %25 = vector.load %arg8[%c0_12, %c0_13] : memref<1x128xf32, #tpu.memory_space<vmem>>, vector<1x128xf32>
      %cst_14 = arith.constant dense<0.000000e+00> : vector<128xf32>
      %26 = vector.multi_reduction <add>, %24, %cst_14 [0] : vector<8x128xf32> to vector<128xf32>
      %27 = vector.shape_cast %26 : vector<128xf32> to vector<1x128xf32>
      %28 = arith.addf %25, %27 : vector<1x128xf32>
      %c0_15 = arith.constant 0 : index
      %c0_16 = arith.constant 0 : index
      %29 = vector.load %arg8[%c0_15, %c0_16] : memref<1x128xf32, #tpu.memory_space<vmem>>, vector<1x128xf32>
      tpu.vector_store %arg8[%c0_15, %c0_16], %28 {strides = array<i32>} : memref<1x128xf32, #tpu.memory_space<vmem>>, vector<1x128xf32>,
      %c0_17 = arith.constant 0 : index
      %c0_18 = arith.constant 0 : index
      %30 = vector.load %arg9[%c0_17, %c0_18] : memref<1x128xf32, #tpu.memory_space<vmem>>, vector<1x128xf32>
      %31 = arith.mulf %24, %24 : vector<8x128xf32>
      %cst_19 = arith.constant dense<0.000000e+00> : vector<128xf32>
      %32 = vector.multi_reduction <add>, %31, %cst_19 [0] : vector<8x128xf32> to vector<128xf32>
      %33 = vector.shape_cast %32 : vector<128xf32> to vector<1x128xf32>
      %34 = arith.addf %30, %33 : vector<1x128xf32>
      %c0_20 = arith.constant 0 : index
      %c0_21 = arith.constant 0 : index
      %35 = vector.load %arg9[%c0_20, %c0_21] : memref<1x128xf32, #tpu.memory_space<vmem>>, vector<1x128xf32>
      tpu.vector_store %arg9[%c0_20, %c0_21], %34 {strides = array<i32>} : memref<1x128xf32, #tpu.memory_space<vmem>>, vector<1x128xf32>,
      %c0_22 = arith.constant 0 : index
      %c0_23 = arith.constant 0 : index
      %36 = vector.load %arg7[%c0_22, %c0_23] : memref<8x128xf32, #tpu.memory_space<vmem>>, vector<8x128xf32>
      tpu.vector_store %arg7[%c0_22, %c0_23], %16 {strides = array<i32>} : memref<8x128xf32, #tpu.memory_space<vmem>>, vector<8x128xf32>,
    } else {
    }
    %c1_i32 = arith.constant 1 : i32
    %8 = arith.cmpi eq, %arg0, %c1_i32 : i32
    %9 = arith.extui %8 : i1 to i32
    %c0_i32_4 = arith.constant 0 : i32
    %10 = arith.cmpi ne, %9, %c0_i32_4 : i32
    scf.if %10 {
      %c0 = arith.constant 0 : index
      %c0_5 = arith.constant 0 : index
      %11 = vector.load %arg7[%c0, %c0_5] : memref<8x128xf32, #tpu.memory_space<vmem>>, vector<8x128xf32>
      %c0_6 = arith.constant 0 : index
      %c0_7 = arith.constant 0 : index
      %12 = vector.load %arg8[%c0_6, %c0_7] : memref<1x128xf32, #tpu.memory_space<vmem>>, vector<1x128xf32>
      %c0_8 = arith.constant 0 : index
      %c0_9 = arith.constant 0 : index
      %13 = vector.load %arg9[%c0_8, %c0_9] : memref<1x128xf32, #tpu.memory_space<vmem>>, vector<1x128xf32>
      %cst = arith.constant 1.250000e-01 : f32
      %14 = vector.broadcast %cst : f32 to vector<1x128xf32>
      %15 = arith.mulf %12, %14 : vector<1x128xf32>
      %cst_10 = arith.constant 1.250000e-01 : f32
      %16 = vector.broadcast %cst_10 : f32 to vector<1x128xf32>
      %17 = arith.mulf %13, %16 : vector<1x128xf32>
      %18 = arith.mulf %15, %15 : vector<1x128xf32>
      %19 = arith.subf %17, %18 : vector<1x128xf32>
      %cst_11 = arith.constant 9.99999974E-6 : f32
      %20 = vector.broadcast %cst_11 : f32 to vector<1x128xf32>
      %21 = arith.addf %19, %20 : vector<1x128xf32>
      %22 = math.rsqrt %21 : vector<1x128xf32>
      %23 = vector.broadcast %15 : vector<1x128xf32> to vector<8x128xf32>
      %24 = arith.subf %11, %23 : vector<8x128xf32>
      %c0_12 = arith.constant 0 : index
      %c0_13 = arith.constant 0 : index
      %25 = vector.load %arg5[%c0_12, %c0_13] : memref<1x128xf32, #tpu.memory_space<vmem>>, vector<1x128xf32>
      %26 = arith.mulf %22, %25 : vector<1x128xf32>
      %27 = vector.broadcast %26 : vector<1x128xf32> to vector<8x128xf32>
      %28 = arith.mulf %24, %27 : vector<8x128xf32>
      %c0_14 = arith.constant 0 : index
      %c0_15 = arith.constant 0 : index
      %29 = vector.load %arg6[%c0_14, %c0_15] : memref<1x128xf32, #tpu.memory_space<vmem>>, vector<1x128xf32>
      %30 = vector.broadcast %29 : vector<1x128xf32> to vector<8x128xf32>
      %31 = arith.addf %28, %30 : vector<8x128xf32>
      %cst_16 = arith.constant 0.000000e+00 : f32
      %32 = vector.broadcast %cst_16 : f32 to vector<8x128xf32>
      %33 = arith.maximumf %31, %32 : vector<8x128xf32>
      %c0_17 = arith.constant 0 : index
      %c0_18 = arith.constant 0 : index
      %34 = vector.load %arg7[%c0_17, %c0_18] : memref<8x128xf32, #tpu.memory_space<vmem>>, vector<8x128xf32>
      tpu.vector_store %arg7[%c0_17, %c0_18], %33 {strides = array<i32>} : memref<8x128xf32, #tpu.memory_space<vmem>>, vector<8x128xf32>,
    } else {
    }
    return
  }
  func.func @transform_0(%arg0: i32, %arg1: i32) -> (i32, i32) {
    %c0_i32 = arith.constant 0 : i32
    %c0_i32_0 = arith.constant 0 : i32
    return %arg1, %c0_i32 : i32, i32
  }
  func.func @transform_1(%arg0: i32, %arg1: i32) -> (i32, i32) {
    %c0_i32 = arith.constant 0 : i32
    %c0_i32_0 = arith.constant 0 : i32
    %c0_i32_1 = arith.constant 0 : i32
    return %c0_i32, %c0_i32_0 : i32, i32
  }
  func.func @transform_2(%arg0: i32, %arg1: i32) -> (i32, i32) {
    %c0_i32 = arith.constant 0 : i32
    %c0_i32_0 = arith.constant 0 : i32
    %c0_i32_1 = arith.constant 0 : i32
    return %c0_i32, %c0_i32_0 : i32, i32
  }
  func.func @transform_3(%arg0: i32, %arg1: i32) -> (i32, i32) {
    %c0_i32 = arith.constant 0 : i32
    %c0_i32_0 = arith.constant 0 : i32
    %c0_i32_1 = arith.constant 0 : i32
    return %c0_i32, %c0_i32_0 : i32, i32
  }
  func.func @transform_4(%arg0: i32, %arg1: i32) -> (i32, i32) {
    %c0_i32 = arith.constant 0 : i32
    %c0_i32_0 = arith.constant 0 : i32
    %c0_i32_1 = arith.constant 0 : i32
    return %c0_i32, %c0_i32_0 : i32, i32
  }
  func.func @transform_5(%arg0: i32, %arg1: i32) -> (i32, i32) {
    %c0_i32 = arith.constant 0 : i32
    %c0_i32_0 = arith.constant 0 : i32
    return %arg1, %c0_i32 : i32, i32
  }
}

module attributes {stable_mosaic.version = 11 : i64} {
  func.func @_conv_bn_kernel(%arg0: i32, %arg1: i32, %arg2: memref<8x384xbf16, #tpu.memory_space<vmem>>, %arg3: memref<384x512xbf16, #tpu.memory_space<vmem>>, %arg4: memref<1x512xf32, #tpu.memory_space<vmem>>, %arg5: memref<1x512xf32, #tpu.memory_space<vmem>>, %arg6: memref<1x512xf32, #tpu.memory_space<vmem>>, %arg7: memref<8x512xf32, #tpu.memory_space<vmem>>, %arg8: memref<1x512xf32, #tpu.memory_space<vmem>>, %arg9: memref<1x512xf32, #tpu.memory_space<vmem>>) attributes {dimension_semantics = [#tpu.dimension_semantics<arbitrary>, #tpu.dimension_semantics<arbitrary>], iteration_bounds = array<i64: 2, 1>, scalar_prefetch = 0 : i64, scratch_operands = 2 : i64, tpu.core_type = #tpu.core_type<tc>, window_params = [{transform_indices = @transform_0, window_bounds = array<i64: 8, 384>}, {pipeline_mode = #tpu.pipeline_mode<synchronous>, transform_indices = @transform_1, window_bounds = array<i64: 384, 512>}, {pipeline_mode = #tpu.pipeline_mode<synchronous>, transform_indices = @transform_2, window_bounds = array<i64: 1, 512>}, {pipeline_mode = #tpu.pipeline_mode<synchronous>, transform_indices = @transform_3, window_bounds = array<i64: 1, 512>}, {pipeline_mode = #tpu.pipeline_mode<synchronous>, transform_indices = @transform_4, window_bounds = array<i64: 1, 512>}, {transform_indices = @transform_5, window_bounds = array<i64: 8, 512>}]} {
    %c0_i32 = arith.constant 0 : i32
    %0 = arith.cmpi eq, %arg0, %c0_i32 : i32
    %c0_i32_0 = arith.constant 0 : i32
    %1 = arith.cmpi eq, %arg1, %c0_i32_0 : i32
    %2 = arith.andi %0, %1 : i1
    %3 = arith.extui %2 : i1 to i32
    %c0_i32_1 = arith.constant 0 : i32
    %4 = arith.cmpi ne, %3, %c0_i32_1 : i32
    scf.if %4 {
      %cst = arith.constant 0.000000e+00 : f32
      %11 = vector.broadcast %cst : f32 to vector<1x512xf32>
      %c0 = arith.constant 0 : index
      %c0_5 = arith.constant 0 : index
      %12 = vector.load %arg8[%c0, %c0_5] : memref<1x512xf32, #tpu.memory_space<vmem>>, vector<1x512xf32>
      tpu.vector_store %arg8[%c0, %c0_5], %11 {strides = array<i32>} : memref<1x512xf32, #tpu.memory_space<vmem>>, vector<1x512xf32>,
      %cst_6 = arith.constant 0.000000e+00 : f32
      %13 = vector.broadcast %cst_6 : f32 to vector<1x512xf32>
      %c0_7 = arith.constant 0 : index
      %c0_8 = arith.constant 0 : index
      %14 = vector.load %arg9[%c0_7, %c0_8] : memref<1x512xf32, #tpu.memory_space<vmem>>, vector<1x512xf32>
      tpu.vector_store %arg9[%c0_7, %c0_8], %13 {strides = array<i32>} : memref<1x512xf32, #tpu.memory_space<vmem>>, vector<1x512xf32>,
    } else {
    }
    %c0_i32_2 = arith.constant 0 : i32
    %5 = arith.cmpi eq, %arg0, %c0_i32_2 : i32
    %6 = arith.extui %5 : i1 to i32
    %c0_i32_3 = arith.constant 0 : i32
    %7 = arith.cmpi ne, %6, %c0_i32_3 : i32
    scf.if %7 {
      %c0 = arith.constant 0 : index
      %c0_5 = arith.constant 0 : index
      %11 = vector.load %arg2[%c0, %c0_5] : memref<8x384xbf16, #tpu.memory_space<vmem>>, vector<8x384xbf16>
      %c0_6 = arith.constant 0 : index
      %c0_7 = arith.constant 0 : index
      %12 = vector.load %arg3[%c0_6, %c0_7] : memref<384x512xbf16, #tpu.memory_space<vmem>>, vector<384x512xbf16>
      %cst = arith.constant dense<0.000000e+00> : vector<8x512xf32>
      %13 = tpu.matmul %11, %12, %cst {dimension_numbers = #tpu.dot_dimension_numbers<[1], [0], [0], [1], [0, 0, 1, 1], [], []>} : vector<8x384xbf16>, vector<384x512xbf16>, vector<8x512xf32> -> vector<8x512xf32>
      %c0_8 = arith.constant 0 : index
      %c0_9 = arith.constant 0 : index
      %14 = vector.load %arg4[%c0_8, %c0_9] : memref<1x512xf32, #tpu.memory_space<vmem>>, vector<1x512xf32>
      %15 = vector.broadcast %14 : vector<1x512xf32> to vector<8x512xf32>
      %16 = arith.addf %13, %15 : vector<8x512xf32>
      %17 = tpu.iota {dimensions = array<i32: 0>} : vector<8x512xi32>
      %c8_i32 = arith.constant 8 : i32
      %18 = arith.muli %arg1, %c8_i32 : i32
      %19 = vector.broadcast %18 : i32 to vector<8x512xi32>
      %20 = arith.addi %17, %19 : vector<8x512xi32>
      %c8_i32_10 = arith.constant 8 : i32
      %21 = vector.broadcast %c8_i32_10 : i32 to vector<8x512xi32>
      %22 = arith.cmpi slt, %20, %21 : vector<8x512xi32>
      %cst_11 = arith.constant 0.000000e+00 : f32
      %23 = vector.broadcast %cst_11 : f32 to vector<8x512xf32>
      %24 = arith.select %22, %16, %23 : vector<8x512xi1>, vector<8x512xf32>
      %c0_12 = arith.constant 0 : index
      %c0_13 = arith.constant 0 : index
      %25 = vector.load %arg8[%c0_12, %c0_13] : memref<1x512xf32, #tpu.memory_space<vmem>>, vector<1x512xf32>
      %cst_14 = arith.constant dense<0.000000e+00> : vector<512xf32>
      %26 = vector.multi_reduction <add>, %24, %cst_14 [0] : vector<8x512xf32> to vector<512xf32>
      %27 = vector.shape_cast %26 : vector<512xf32> to vector<1x512xf32>
      %28 = arith.addf %25, %27 : vector<1x512xf32>
      %c0_15 = arith.constant 0 : index
      %c0_16 = arith.constant 0 : index
      %29 = vector.load %arg8[%c0_15, %c0_16] : memref<1x512xf32, #tpu.memory_space<vmem>>, vector<1x512xf32>
      tpu.vector_store %arg8[%c0_15, %c0_16], %28 {strides = array<i32>} : memref<1x512xf32, #tpu.memory_space<vmem>>, vector<1x512xf32>,
      %c0_17 = arith.constant 0 : index
      %c0_18 = arith.constant 0 : index
      %30 = vector.load %arg9[%c0_17, %c0_18] : memref<1x512xf32, #tpu.memory_space<vmem>>, vector<1x512xf32>
      %31 = arith.mulf %24, %24 : vector<8x512xf32>
      %cst_19 = arith.constant dense<0.000000e+00> : vector<512xf32>
      %32 = vector.multi_reduction <add>, %31, %cst_19 [0] : vector<8x512xf32> to vector<512xf32>
      %33 = vector.shape_cast %32 : vector<512xf32> to vector<1x512xf32>
      %34 = arith.addf %30, %33 : vector<1x512xf32>
      %c0_20 = arith.constant 0 : index
      %c0_21 = arith.constant 0 : index
      %35 = vector.load %arg9[%c0_20, %c0_21] : memref<1x512xf32, #tpu.memory_space<vmem>>, vector<1x512xf32>
      tpu.vector_store %arg9[%c0_20, %c0_21], %34 {strides = array<i32>} : memref<1x512xf32, #tpu.memory_space<vmem>>, vector<1x512xf32>,
      %c0_22 = arith.constant 0 : index
      %c0_23 = arith.constant 0 : index
      %36 = vector.load %arg7[%c0_22, %c0_23] : memref<8x512xf32, #tpu.memory_space<vmem>>, vector<8x512xf32>
      tpu.vector_store %arg7[%c0_22, %c0_23], %16 {strides = array<i32>} : memref<8x512xf32, #tpu.memory_space<vmem>>, vector<8x512xf32>,
    } else {
    }
    %c1_i32 = arith.constant 1 : i32
    %8 = arith.cmpi eq, %arg0, %c1_i32 : i32
    %9 = arith.extui %8 : i1 to i32
    %c0_i32_4 = arith.constant 0 : i32
    %10 = arith.cmpi ne, %9, %c0_i32_4 : i32
    scf.if %10 {
      %c0 = arith.constant 0 : index
      %c0_5 = arith.constant 0 : index
      %11 = vector.load %arg7[%c0, %c0_5] : memref<8x512xf32, #tpu.memory_space<vmem>>, vector<8x512xf32>
      %c0_6 = arith.constant 0 : index
      %c0_7 = arith.constant 0 : index
      %12 = vector.load %arg8[%c0_6, %c0_7] : memref<1x512xf32, #tpu.memory_space<vmem>>, vector<1x128xf32>
      %c0_8 = arith.constant 0 : index
      %c0_9 = arith.constant 0 : index
      %13 = vector.load %arg9[%c0_8, %c0_9] : memref<1x512xf32, #tpu.memory_space<vmem>>, vector<1x128xf32>
      %c0_10 = arith.constant 0 : index
      %c128 = arith.constant 128 : index
      %14 = vector.load %arg8[%c0_10, %c128] : memref<1x512xf32, #tpu.memory_space<vmem>>, vector<1x128xf32>
      %15 = arith.addf %12, %14 : vector<1x128xf32>
      %c0_11 = arith.constant 0 : index
      %c128_12 = arith.constant 128 : index
      %16 = vector.load %arg9[%c0_11, %c128_12] : memref<1x512xf32, #tpu.memory_space<vmem>>, vector<1x128xf32>
      %17 = arith.addf %13, %16 : vector<1x128xf32>
      %c0_13 = arith.constant 0 : index
      %c256 = arith.constant 256 : index
      %18 = vector.load %arg8[%c0_13, %c256] : memref<1x512xf32, #tpu.memory_space<vmem>>, vector<1x128xf32>
      %19 = arith.addf %15, %18 : vector<1x128xf32>
      %c0_14 = arith.constant 0 : index
      %c256_15 = arith.constant 256 : index
      %20 = vector.load %arg9[%c0_14, %c256_15] : memref<1x512xf32, #tpu.memory_space<vmem>>, vector<1x128xf32>
      %21 = arith.addf %17, %20 : vector<1x128xf32>
      %c0_16 = arith.constant 0 : index
      %c384 = arith.constant 384 : index
      %22 = vector.load %arg8[%c0_16, %c384] : memref<1x512xf32, #tpu.memory_space<vmem>>, vector<1x128xf32>
      %23 = arith.addf %19, %22 : vector<1x128xf32>
      %c0_17 = arith.constant 0 : index
      %c384_18 = arith.constant 384 : index
      %24 = vector.load %arg9[%c0_17, %c384_18] : memref<1x512xf32, #tpu.memory_space<vmem>>, vector<1x128xf32>
      %25 = arith.addf %21, %24 : vector<1x128xf32>
      %cst = arith.constant 3.125000e-02 : f32
      %26 = vector.broadcast %cst : f32 to vector<1x128xf32>
      %27 = arith.mulf %23, %26 : vector<1x128xf32>
      %cst_19 = arith.constant 3.125000e-02 : f32
      %28 = vector.broadcast %cst_19 : f32 to vector<1x128xf32>
      %29 = arith.mulf %25, %28 : vector<1x128xf32>
      %30 = arith.mulf %27, %27 : vector<1x128xf32>
      %31 = arith.subf %29, %30 : vector<1x128xf32>
      %cst_20 = arith.constant 9.99999974E-6 : f32
      %32 = vector.broadcast %cst_20 : f32 to vector<1x128xf32>
      %33 = arith.addf %31, %32 : vector<1x128xf32>
      %34 = math.rsqrt %33 : vector<1x128xf32>
      %35 = vector.extract_strided_slice %11 {offsets = [0, 0], sizes = [8, 128], strides = [1, 1]} : vector<8x512xf32> to vector<8x128xf32>
      %36 = vector.broadcast %27 : vector<1x128xf32> to vector<8x128xf32>
      %37 = arith.subf %35, %36 : vector<8x128xf32>
      %c0_21 = arith.constant 0 : index
      %c0_22 = arith.constant 0 : index
      %38 = vector.load %arg5[%c0_21, %c0_22] : memref<1x512xf32, #tpu.memory_space<vmem>>, vector<1x128xf32>
      %39 = arith.mulf %34, %38 : vector<1x128xf32>
      %40 = vector.broadcast %39 : vector<1x128xf32> to vector<8x128xf32>
      %41 = arith.mulf %37, %40 : vector<8x128xf32>
      %c0_23 = arith.constant 0 : index
      %c0_24 = arith.constant 0 : index
      %42 = vector.load %arg6[%c0_23, %c0_24] : memref<1x512xf32, #tpu.memory_space<vmem>>, vector<1x128xf32>
      %43 = vector.broadcast %42 : vector<1x128xf32> to vector<8x128xf32>
      %44 = arith.addf %41, %43 : vector<8x128xf32>
      %c0_25 = arith.constant 0 : index
      %c0_26 = arith.constant 0 : index
      %45 = vector.load %arg7[%c0_25, %c0_26] : memref<8x512xf32, #tpu.memory_space<vmem>>, vector<8x128xf32>
      tpu.vector_store %arg7[%c0_25, %c0_26], %44 {strides = array<i32>} : memref<8x512xf32, #tpu.memory_space<vmem>>, vector<8x128xf32>,
      %46 = vector.extract_strided_slice %11 {offsets = [0, 128], sizes = [8, 128], strides = [1, 1]} : vector<8x512xf32> to vector<8x128xf32>
      %47 = vector.broadcast %27 : vector<1x128xf32> to vector<8x128xf32>
      %48 = arith.subf %46, %47 : vector<8x128xf32>
      %c0_27 = arith.constant 0 : index
      %c128_28 = arith.constant 128 : index
      %49 = vector.load %arg5[%c0_27, %c128_28] : memref<1x512xf32, #tpu.memory_space<vmem>>, vector<1x128xf32>
      %50 = arith.mulf %34, %49 : vector<1x128xf32>
      %51 = vector.broadcast %50 : vector<1x128xf32> to vector<8x128xf32>
      %52 = arith.mulf %48, %51 : vector<8x128xf32>
      %c0_29 = arith.constant 0 : index
      %c128_30 = arith.constant 128 : index
      %53 = vector.load %arg6[%c0_29, %c128_30] : memref<1x512xf32, #tpu.memory_space<vmem>>, vector<1x128xf32>
      %54 = vector.broadcast %53 : vector<1x128xf32> to vector<8x128xf32>
      %55 = arith.addf %52, %54 : vector<8x128xf32>
      %c0_31 = arith.constant 0 : index
      %c128_32 = arith.constant 128 : index
      %56 = vector.load %arg7[%c0_31, %c128_32] : memref<8x512xf32, #tpu.memory_space<vmem>>, vector<8x128xf32>
      tpu.vector_store %arg7[%c0_31, %c128_32], %55 {strides = array<i32>} : memref<8x512xf32, #tpu.memory_space<vmem>>, vector<8x128xf32>,
      %57 = vector.extract_strided_slice %11 {offsets = [0, 256], sizes = [8, 128], strides = [1, 1]} : vector<8x512xf32> to vector<8x128xf32>
      %58 = vector.broadcast %27 : vector<1x128xf32> to vector<8x128xf32>
      %59 = arith.subf %57, %58 : vector<8x128xf32>
      %c0_33 = arith.constant 0 : index
      %c256_34 = arith.constant 256 : index
      %60 = vector.load %arg5[%c0_33, %c256_34] : memref<1x512xf32, #tpu.memory_space<vmem>>, vector<1x128xf32>
      %61 = arith.mulf %34, %60 : vector<1x128xf32>
      %62 = vector.broadcast %61 : vector<1x128xf32> to vector<8x128xf32>
      %63 = arith.mulf %59, %62 : vector<8x128xf32>
      %c0_35 = arith.constant 0 : index
      %c256_36 = arith.constant 256 : index
      %64 = vector.load %arg6[%c0_35, %c256_36] : memref<1x512xf32, #tpu.memory_space<vmem>>, vector<1x128xf32>
      %65 = vector.broadcast %64 : vector<1x128xf32> to vector<8x128xf32>
      %66 = arith.addf %63, %65 : vector<8x128xf32>
      %c0_37 = arith.constant 0 : index
      %c256_38 = arith.constant 256 : index
      %67 = vector.load %arg7[%c0_37, %c256_38] : memref<8x512xf32, #tpu.memory_space<vmem>>, vector<8x128xf32>
      tpu.vector_store %arg7[%c0_37, %c256_38], %66 {strides = array<i32>} : memref<8x512xf32, #tpu.memory_space<vmem>>, vector<8x128xf32>,
      %68 = vector.extract_strided_slice %11 {offsets = [0, 384], sizes = [8, 128], strides = [1, 1]} : vector<8x512xf32> to vector<8x128xf32>
      %69 = vector.broadcast %27 : vector<1x128xf32> to vector<8x128xf32>
      %70 = arith.subf %68, %69 : vector<8x128xf32>
      %c0_39 = arith.constant 0 : index
      %c384_40 = arith.constant 384 : index
      %71 = vector.load %arg5[%c0_39, %c384_40] : memref<1x512xf32, #tpu.memory_space<vmem>>, vector<1x128xf32>
      %72 = arith.mulf %34, %71 : vector<1x128xf32>
      %73 = vector.broadcast %72 : vector<1x128xf32> to vector<8x128xf32>
      %74 = arith.mulf %70, %73 : vector<8x128xf32>
      %c0_41 = arith.constant 0 : index
      %c384_42 = arith.constant 384 : index
      %75 = vector.load %arg6[%c0_41, %c384_42] : memref<1x512xf32, #tpu.memory_space<vmem>>, vector<1x128xf32>
      %76 = vector.broadcast %75 : vector<1x128xf32> to vector<8x128xf32>
      %77 = arith.addf %74, %76 : vector<8x128xf32>
      %c0_43 = arith.constant 0 : index
      %c384_44 = arith.constant 384 : index
      %78 = vector.load %arg7[%c0_43, %c384_44] : memref<8x512xf32, #tpu.memory_space<vmem>>, vector<8x128xf32>
      tpu.vector_store %arg7[%c0_43, %c384_44], %77 {strides = array<i32>} : memref<8x512xf32, #tpu.memory_space<vmem>>, vector<8x128xf32>,
    } else {
    }
    return
  }
  func.func @transform_0(%arg0: i32, %arg1: i32) -> (i32, i32) {
    %c0_i32 = arith.constant 0 : i32
    %c0_i32_0 = arith.constant 0 : i32
    return %arg1, %c0_i32 : i32, i32
  }
  func.func @transform_1(%arg0: i32, %arg1: i32) -> (i32, i32) {
    %c0_i32 = arith.constant 0 : i32
    %c0_i32_0 = arith.constant 0 : i32
    %c0_i32_1 = arith.constant 0 : i32
    return %c0_i32, %c0_i32_0 : i32, i32
  }
  func.func @transform_2(%arg0: i32, %arg1: i32) -> (i32, i32) {
    %c0_i32 = arith.constant 0 : i32
    %c0_i32_0 = arith.constant 0 : i32
    %c0_i32_1 = arith.constant 0 : i32
    return %c0_i32, %c0_i32_0 : i32, i32
  }
  func.func @transform_3(%arg0: i32, %arg1: i32) -> (i32, i32) {
    %c0_i32 = arith.constant 0 : i32
    %c0_i32_0 = arith.constant 0 : i32
    %c0_i32_1 = arith.constant 0 : i32
    return %c0_i32, %c0_i32_0 : i32, i32
  }
  func.func @transform_4(%arg0: i32, %arg1: i32) -> (i32, i32) {
    %c0_i32 = arith.constant 0 : i32
    %c0_i32_0 = arith.constant 0 : i32
    %c0_i32_1 = arith.constant 0 : i32
    return %c0_i32, %c0_i32_0 : i32, i32
  }
  func.func @transform_5(%arg0: i32, %arg1: i32) -> (i32, i32) {
    %c0_i32 = arith.constant 0 : i32
    %c0_i32_0 = arith.constant 0 : i32
    return %arg1, %c0_i32 : i32, i32
  }
}

module attributes {stable_mosaic.version = 11 : i64} {
  func.func @_conv_bn_kernel(%arg0: i32, %arg1: i32, %arg2: memref<32x288xbf16, #tpu.memory_space<vmem>>, %arg3: memref<288x512xbf16, #tpu.memory_space<vmem>>, %arg4: memref<1x512xf32, #tpu.memory_space<vmem>>, %arg5: memref<1x512xf32, #tpu.memory_space<vmem>>, %arg6: memref<1x512xf32, #tpu.memory_space<vmem>>, %arg7: memref<32x512xf32, #tpu.memory_space<vmem>>, %arg8: memref<1x512xf32, #tpu.memory_space<vmem>>, %arg9: memref<1x512xf32, #tpu.memory_space<vmem>>) attributes {dimension_semantics = [#tpu.dimension_semantics<arbitrary>, #tpu.dimension_semantics<arbitrary>], iteration_bounds = array<i64: 2, 1>, scalar_prefetch = 0 : i64, scratch_operands = 2 : i64, tpu.core_type = #tpu.core_type<tc>, window_params = [{transform_indices = @transform_0, window_bounds = array<i64: 32, 288>}, {pipeline_mode = #tpu.pipeline_mode<synchronous>, transform_indices = @transform_1, window_bounds = array<i64: 288, 512>}, {pipeline_mode = #tpu.pipeline_mode<synchronous>, transform_indices = @transform_2, window_bounds = array<i64: 1, 512>}, {pipeline_mode = #tpu.pipeline_mode<synchronous>, transform_indices = @transform_3, window_bounds = array<i64: 1, 512>}, {pipeline_mode = #tpu.pipeline_mode<synchronous>, transform_indices = @transform_4, window_bounds = array<i64: 1, 512>}, {transform_indices = @transform_5, window_bounds = array<i64: 32, 512>}]} {
    %c0_i32 = arith.constant 0 : i32
    %0 = arith.cmpi eq, %arg0, %c0_i32 : i32
    %c0_i32_0 = arith.constant 0 : i32
    %1 = arith.cmpi eq, %arg1, %c0_i32_0 : i32
    %2 = arith.andi %0, %1 : i1
    %3 = arith.extui %2 : i1 to i32
    %c0_i32_1 = arith.constant 0 : i32
    %4 = arith.cmpi ne, %3, %c0_i32_1 : i32
    scf.if %4 {
      %cst = arith.constant 0.000000e+00 : f32
      %11 = vector.broadcast %cst : f32 to vector<1x512xf32>
      %c0 = arith.constant 0 : index
      %c0_5 = arith.constant 0 : index
      %12 = vector.load %arg8[%c0, %c0_5] : memref<1x512xf32, #tpu.memory_space<vmem>>, vector<1x512xf32>
      tpu.vector_store %arg8[%c0, %c0_5], %11 {strides = array<i32>} : memref<1x512xf32, #tpu.memory_space<vmem>>, vector<1x512xf32>,
      %cst_6 = arith.constant 0.000000e+00 : f32
      %13 = vector.broadcast %cst_6 : f32 to vector<1x512xf32>
      %c0_7 = arith.constant 0 : index
      %c0_8 = arith.constant 0 : index
      %14 = vector.load %arg9[%c0_7, %c0_8] : memref<1x512xf32, #tpu.memory_space<vmem>>, vector<1x512xf32>
      tpu.vector_store %arg9[%c0_7, %c0_8], %13 {strides = array<i32>} : memref<1x512xf32, #tpu.memory_space<vmem>>, vector<1x512xf32>,
    } else {
    }
    %c0_i32_2 = arith.constant 0 : i32
    %5 = arith.cmpi eq, %arg0, %c0_i32_2 : i32
    %6 = arith.extui %5 : i1 to i32
    %c0_i32_3 = arith.constant 0 : i32
    %7 = arith.cmpi ne, %6, %c0_i32_3 : i32
    scf.if %7 {
      %c0 = arith.constant 0 : index
      %c0_5 = arith.constant 0 : index
      %11 = vector.load %arg2[%c0, %c0_5] : memref<32x288xbf16, #tpu.memory_space<vmem>>, vector<32x288xbf16>
      %c0_6 = arith.constant 0 : index
      %c0_7 = arith.constant 0 : index
      %12 = vector.load %arg3[%c0_6, %c0_7] : memref<288x512xbf16, #tpu.memory_space<vmem>>, vector<288x512xbf16>
      %cst = arith.constant dense<0.000000e+00> : vector<32x512xf32>
      %13 = tpu.matmul %11, %12, %cst {dimension_numbers = #tpu.dot_dimension_numbers<[1], [0], [0], [1], [0, 0, 1, 1], [], []>} : vector<32x288xbf16>, vector<288x512xbf16>, vector<32x512xf32> -> vector<32x512xf32>
      %c0_8 = arith.constant 0 : index
      %c0_9 = arith.constant 0 : index
      %14 = vector.load %arg4[%c0_8, %c0_9] : memref<1x512xf32, #tpu.memory_space<vmem>>, vector<1x512xf32>
      %15 = vector.broadcast %14 : vector<1x512xf32> to vector<32x512xf32>
      %16 = arith.addf %13, %15 : vector<32x512xf32>
      %17 = tpu.iota {dimensions = array<i32: 0>} : vector<32x512xi32>
      %c32_i32 = arith.constant 32 : i32
      %18 = arith.muli %arg1, %c32_i32 : i32
      %19 = vector.broadcast %18 : i32 to vector<32x512xi32>
      %20 = arith.addi %17, %19 : vector<32x512xi32>
      %c32_i32_10 = arith.constant 32 : i32
      %21 = vector.broadcast %c32_i32_10 : i32 to vector<32x512xi32>
      %22 = arith.cmpi slt, %20, %21 : vector<32x512xi32>
      %cst_11 = arith.constant 0.000000e+00 : f32
      %23 = vector.broadcast %cst_11 : f32 to vector<32x512xf32>
      %24 = arith.select %22, %16, %23 : vector<32x512xi1>, vector<32x512xf32>
      %c0_12 = arith.constant 0 : index
      %c0_13 = arith.constant 0 : index
      %25 = vector.load %arg8[%c0_12, %c0_13] : memref<1x512xf32, #tpu.memory_space<vmem>>, vector<1x512xf32>
      %cst_14 = arith.constant dense<0.000000e+00> : vector<512xf32>
      %26 = vector.multi_reduction <add>, %24, %cst_14 [0] : vector<32x512xf32> to vector<512xf32>
      %27 = vector.shape_cast %26 : vector<512xf32> to vector<1x512xf32>
      %28 = arith.addf %25, %27 : vector<1x512xf32>
      %c0_15 = arith.constant 0 : index
      %c0_16 = arith.constant 0 : index
      %29 = vector.load %arg8[%c0_15, %c0_16] : memref<1x512xf32, #tpu.memory_space<vmem>>, vector<1x512xf32>
      tpu.vector_store %arg8[%c0_15, %c0_16], %28 {strides = array<i32>} : memref<1x512xf32, #tpu.memory_space<vmem>>, vector<1x512xf32>,
      %c0_17 = arith.constant 0 : index
      %c0_18 = arith.constant 0 : index
      %30 = vector.load %arg9[%c0_17, %c0_18] : memref<1x512xf32, #tpu.memory_space<vmem>>, vector<1x512xf32>
      %31 = arith.mulf %24, %24 : vector<32x512xf32>
      %cst_19 = arith.constant dense<0.000000e+00> : vector<512xf32>
      %32 = vector.multi_reduction <add>, %31, %cst_19 [0] : vector<32x512xf32> to vector<512xf32>
      %33 = vector.shape_cast %32 : vector<512xf32> to vector<1x512xf32>
      %34 = arith.addf %30, %33 : vector<1x512xf32>
      %c0_20 = arith.constant 0 : index
      %c0_21 = arith.constant 0 : index
      %35 = vector.load %arg9[%c0_20, %c0_21] : memref<1x512xf32, #tpu.memory_space<vmem>>, vector<1x512xf32>
      tpu.vector_store %arg9[%c0_20, %c0_21], %34 {strides = array<i32>} : memref<1x512xf32, #tpu.memory_space<vmem>>, vector<1x512xf32>,
      %c0_22 = arith.constant 0 : index
      %c0_23 = arith.constant 0 : index
      %36 = vector.load %arg7[%c0_22, %c0_23] : memref<32x512xf32, #tpu.memory_space<vmem>>, vector<32x512xf32>
      tpu.vector_store %arg7[%c0_22, %c0_23], %16 {strides = array<i32>} : memref<32x512xf32, #tpu.memory_space<vmem>>, vector<32x512xf32>,
    } else {
    }
    %c1_i32 = arith.constant 1 : i32
    %8 = arith.cmpi eq, %arg0, %c1_i32 : i32
    %9 = arith.extui %8 : i1 to i32
    %c0_i32_4 = arith.constant 0 : i32
    %10 = arith.cmpi ne, %9, %c0_i32_4 : i32
    scf.if %10 {
      %c0 = arith.constant 0 : index
      %c0_5 = arith.constant 0 : index
      %11 = vector.load %arg7[%c0, %c0_5] : memref<32x512xf32, #tpu.memory_space<vmem>>, vector<32x512xf32>
      %c0_6 = arith.constant 0 : index
      %c0_7 = arith.constant 0 : index
      %12 = vector.load %arg8[%c0_6, %c0_7] : memref<1x512xf32, #tpu.memory_space<vmem>>, vector<1x128xf32>
      %c0_8 = arith.constant 0 : index
      %c0_9 = arith.constant 0 : index
      %13 = vector.load %arg9[%c0_8, %c0_9] : memref<1x512xf32, #tpu.memory_space<vmem>>, vector<1x128xf32>
      %c0_10 = arith.constant 0 : index
      %c128 = arith.constant 128 : index
      %14 = vector.load %arg8[%c0_10, %c128] : memref<1x512xf32, #tpu.memory_space<vmem>>, vector<1x128xf32>
      %15 = arith.addf %12, %14 : vector<1x128xf32>
      %c0_11 = arith.constant 0 : index
      %c128_12 = arith.constant 128 : index
      %16 = vector.load %arg9[%c0_11, %c128_12] : memref<1x512xf32, #tpu.memory_space<vmem>>, vector<1x128xf32>
      %17 = arith.addf %13, %16 : vector<1x128xf32>
      %c0_13 = arith.constant 0 : index
      %c256 = arith.constant 256 : index
      %18 = vector.load %arg8[%c0_13, %c256] : memref<1x512xf32, #tpu.memory_space<vmem>>, vector<1x128xf32>
      %19 = arith.addf %15, %18 : vector<1x128xf32>
      %c0_14 = arith.constant 0 : index
      %c256_15 = arith.constant 256 : index
      %20 = vector.load %arg9[%c0_14, %c256_15] : memref<1x512xf32, #tpu.memory_space<vmem>>, vector<1x128xf32>
      %21 = arith.addf %17, %20 : vector<1x128xf32>
      %c0_16 = arith.constant 0 : index
      %c384 = arith.constant 384 : index
      %22 = vector.load %arg8[%c0_16, %c384] : memref<1x512xf32, #tpu.memory_space<vmem>>, vector<1x128xf32>
      %23 = arith.addf %19, %22 : vector<1x128xf32>
      %c0_17 = arith.constant 0 : index
      %c384_18 = arith.constant 384 : index
      %24 = vector.load %arg9[%c0_17, %c384_18] : memref<1x512xf32, #tpu.memory_space<vmem>>, vector<1x128xf32>
      %25 = arith.addf %21, %24 : vector<1x128xf32>
      %cst = arith.constant 7.812500e-03 : f32
      %26 = vector.broadcast %cst : f32 to vector<1x128xf32>
      %27 = arith.mulf %23, %26 : vector<1x128xf32>
      %cst_19 = arith.constant 7.812500e-03 : f32
      %28 = vector.broadcast %cst_19 : f32 to vector<1x128xf32>
      %29 = arith.mulf %25, %28 : vector<1x128xf32>
      %30 = arith.mulf %27, %27 : vector<1x128xf32>
      %31 = arith.subf %29, %30 : vector<1x128xf32>
      %cst_20 = arith.constant 9.99999974E-6 : f32
      %32 = vector.broadcast %cst_20 : f32 to vector<1x128xf32>
      %33 = arith.addf %31, %32 : vector<1x128xf32>
      %34 = math.rsqrt %33 : vector<1x128xf32>
      %35 = vector.extract_strided_slice %11 {offsets = [0, 0], sizes = [32, 128], strides = [1, 1]} : vector<32x512xf32> to vector<32x128xf32>
      %36 = vector.broadcast %27 : vector<1x128xf32> to vector<32x128xf32>
      %37 = arith.subf %35, %36 : vector<32x128xf32>
      %c0_21 = arith.constant 0 : index
      %c0_22 = arith.constant 0 : index
      %38 = vector.load %arg5[%c0_21, %c0_22] : memref<1x512xf32, #tpu.memory_space<vmem>>, vector<1x128xf32>
      %39 = arith.mulf %34, %38 : vector<1x128xf32>
      %40 = vector.broadcast %39 : vector<1x128xf32> to vector<32x128xf32>
      %41 = arith.mulf %37, %40 : vector<32x128xf32>
      %c0_23 = arith.constant 0 : index
      %c0_24 = arith.constant 0 : index
      %42 = vector.load %arg6[%c0_23, %c0_24] : memref<1x512xf32, #tpu.memory_space<vmem>>, vector<1x128xf32>
      %43 = vector.broadcast %42 : vector<1x128xf32> to vector<32x128xf32>
      %44 = arith.addf %41, %43 : vector<32x128xf32>
      %cst_25 = arith.constant 0.000000e+00 : f32
      %45 = vector.broadcast %cst_25 : f32 to vector<32x128xf32>
      %46 = arith.maximumf %44, %45 : vector<32x128xf32>
      %c0_26 = arith.constant 0 : index
      %c0_27 = arith.constant 0 : index
      %47 = vector.load %arg7[%c0_26, %c0_27] : memref<32x512xf32, #tpu.memory_space<vmem>>, vector<32x128xf32>
      tpu.vector_store %arg7[%c0_26, %c0_27], %46 {strides = array<i32>} : memref<32x512xf32, #tpu.memory_space<vmem>>, vector<32x128xf32>,
      %48 = vector.extract_strided_slice %11 {offsets = [0, 128], sizes = [32, 128], strides = [1, 1]} : vector<32x512xf32> to vector<32x128xf32>
      %49 = vector.broadcast %27 : vector<1x128xf32> to vector<32x128xf32>
      %50 = arith.subf %48, %49 : vector<32x128xf32>
      %c0_28 = arith.constant 0 : index
      %c128_29 = arith.constant 128 : index
      %51 = vector.load %arg5[%c0_28, %c128_29] : memref<1x512xf32, #tpu.memory_space<vmem>>, vector<1x128xf32>
      %52 = arith.mulf %34, %51 : vector<1x128xf32>
      %53 = vector.broadcast %52 : vector<1x128xf32> to vector<32x128xf32>
      %54 = arith.mulf %50, %53 : vector<32x128xf32>
      %c0_30 = arith.constant 0 : index
      %c128_31 = arith.constant 128 : index
      %55 = vector.load %arg6[%c0_30, %c128_31] : memref<1x512xf32, #tpu.memory_space<vmem>>, vector<1x128xf32>
      %56 = vector.broadcast %55 : vector<1x128xf32> to vector<32x128xf32>
      %57 = arith.addf %54, %56 : vector<32x128xf32>
      %cst_32 = arith.constant 0.000000e+00 : f32
      %58 = vector.broadcast %cst_32 : f32 to vector<32x128xf32>
      %59 = arith.maximumf %57, %58 : vector<32x128xf32>
      %c0_33 = arith.constant 0 : index
      %c128_34 = arith.constant 128 : index
      %60 = vector.load %arg7[%c0_33, %c128_34] : memref<32x512xf32, #tpu.memory_space<vmem>>, vector<32x128xf32>
      tpu.vector_store %arg7[%c0_33, %c128_34], %59 {strides = array<i32>} : memref<32x512xf32, #tpu.memory_space<vmem>>, vector<32x128xf32>,
      %61 = vector.extract_strided_slice %11 {offsets = [0, 256], sizes = [32, 128], strides = [1, 1]} : vector<32x512xf32> to vector<32x128xf32>
      %62 = vector.broadcast %27 : vector<1x128xf32> to vector<32x128xf32>
      %63 = arith.subf %61, %62 : vector<32x128xf32>
      %c0_35 = arith.constant 0 : index
      %c256_36 = arith.constant 256 : index
      %64 = vector.load %arg5[%c0_35, %c256_36] : memref<1x512xf32, #tpu.memory_space<vmem>>, vector<1x128xf32>
      %65 = arith.mulf %34, %64 : vector<1x128xf32>
      %66 = vector.broadcast %65 : vector<1x128xf32> to vector<32x128xf32>
      %67 = arith.mulf %63, %66 : vector<32x128xf32>
      %c0_37 = arith.constant 0 : index
      %c256_38 = arith.constant 256 : index
      %68 = vector.load %arg6[%c0_37, %c256_38] : memref<1x512xf32, #tpu.memory_space<vmem>>, vector<1x128xf32>
      %69 = vector.broadcast %68 : vector<1x128xf32> to vector<32x128xf32>
      %70 = arith.addf %67, %69 : vector<32x128xf32>
      %cst_39 = arith.constant 0.000000e+00 : f32
      %71 = vector.broadcast %cst_39 : f32 to vector<32x128xf32>
      %72 = arith.maximumf %70, %71 : vector<32x128xf32>
      %c0_40 = arith.constant 0 : index
      %c256_41 = arith.constant 256 : index
      %73 = vector.load %arg7[%c0_40, %c256_41] : memref<32x512xf32, #tpu.memory_space<vmem>>, vector<32x128xf32>
      tpu.vector_store %arg7[%c0_40, %c256_41], %72 {strides = array<i32>} : memref<32x512xf32, #tpu.memory_space<vmem>>, vector<32x128xf32>,
      %74 = vector.extract_strided_slice %11 {offsets = [0, 384], sizes = [32, 128], strides = [1, 1]} : vector<32x512xf32> to vector<32x128xf32>
      %75 = vector.broadcast %27 : vector<1x128xf32> to vector<32x128xf32>
      %76 = arith.subf %74, %75 : vector<32x128xf32>
      %c0_42 = arith.constant 0 : index
      %c384_43 = arith.constant 384 : index
      %77 = vector.load %arg5[%c0_42, %c384_43] : memref<1x512xf32, #tpu.memory_space<vmem>>, vector<1x128xf32>
      %78 = arith.mulf %34, %77 : vector<1x128xf32>
      %79 = vector.broadcast %78 : vector<1x128xf32> to vector<32x128xf32>
      %80 = arith.mulf %76, %79 : vector<32x128xf32>
      %c0_44 = arith.constant 0 : index
      %c384_45 = arith.constant 384 : index
      %81 = vector.load %arg6[%c0_44, %c384_45] : memref<1x512xf32, #tpu.memory_space<vmem>>, vector<1x128xf32>
      %82 = vector.broadcast %81 : vector<1x128xf32> to vector<32x128xf32>
      %83 = arith.addf %80, %82 : vector<32x128xf32>
      %cst_46 = arith.constant 0.000000e+00 : f32
      %84 = vector.broadcast %cst_46 : f32 to vector<32x128xf32>
      %85 = arith.maximumf %83, %84 : vector<32x128xf32>
      %c0_47 = arith.constant 0 : index
      %c384_48 = arith.constant 384 : index
      %86 = vector.load %arg7[%c0_47, %c384_48] : memref<32x512xf32, #tpu.memory_space<vmem>>, vector<32x128xf32>
      tpu.vector_store %arg7[%c0_47, %c384_48], %85 {strides = array<i32>} : memref<32x512xf32, #tpu.memory_space<vmem>>, vector<32x128xf32>,
    } else {
    }
    return
  }
  func.func @transform_0(%arg0: i32, %arg1: i32) -> (i32, i32) {
    %c0_i32 = arith.constant 0 : i32
    %c0_i32_0 = arith.constant 0 : i32
    return %arg1, %c0_i32 : i32, i32
  }
  func.func @transform_1(%arg0: i32, %arg1: i32) -> (i32, i32) {
    %c0_i32 = arith.constant 0 : i32
    %c0_i32_0 = arith.constant 0 : i32
    %c0_i32_1 = arith.constant 0 : i32
    return %c0_i32, %c0_i32_0 : i32, i32
  }
  func.func @transform_2(%arg0: i32, %arg1: i32) -> (i32, i32) {
    %c0_i32 = arith.constant 0 : i32
    %c0_i32_0 = arith.constant 0 : i32
    %c0_i32_1 = arith.constant 0 : i32
    return %c0_i32, %c0_i32_0 : i32, i32
  }
  func.func @transform_3(%arg0: i32, %arg1: i32) -> (i32, i32) {
    %c0_i32 = arith.constant 0 : i32
    %c0_i32_0 = arith.constant 0 : i32
    %c0_i32_1 = arith.constant 0 : i32
    return %c0_i32, %c0_i32_0 : i32, i32
  }
  func.func @transform_4(%arg0: i32, %arg1: i32) -> (i32, i32) {
    %c0_i32 = arith.constant 0 : i32
    %c0_i32_0 = arith.constant 0 : i32
    %c0_i32_1 = arith.constant 0 : i32
    return %c0_i32, %c0_i32_0 : i32, i32
  }
  func.func @transform_5(%arg0: i32, %arg1: i32) -> (i32, i32) {
    %c0_i32 = arith.constant 0 : i32
    %c0_i32_0 = arith.constant 0 : i32
    return %arg1, %c0_i32 : i32, i32
  }
}

module attributes {stable_mosaic.version = 11 : i64} {
  func.func @_matmul_bias_kernel(%arg0: i32, %arg1: memref<128x144xbf16, #tpu.memory_space<vmem>>, %arg2: memref<144x512xbf16, #tpu.memory_space<vmem>>, %arg3: memref<1x512xf32, #tpu.memory_space<vmem>>, %arg4: memref<128x512xf32, #tpu.memory_space<vmem>>) attributes {dimension_semantics = [#tpu.dimension_semantics<parallel>], iteration_bounds = array<i64: 1>, scalar_prefetch = 0 : i64, scratch_operands = 0 : i64, tpu.core_type = #tpu.core_type<tc>, window_params = [{transform_indices = @transform_0, window_bounds = array<i64: 128, 144>}, {pipeline_mode = #tpu.pipeline_mode<synchronous>, transform_indices = @transform_1, window_bounds = array<i64: 144, 512>}, {pipeline_mode = #tpu.pipeline_mode<synchronous>, transform_indices = @transform_2, window_bounds = array<i64: 1, 512>}, {transform_indices = @transform_3, window_bounds = array<i64: 128, 512>}]} {
    %c0 = arith.constant 0 : index
    %c0_0 = arith.constant 0 : index
    %0 = vector.load %arg1[%c0, %c0_0] : memref<128x144xbf16, #tpu.memory_space<vmem>>, vector<128x144xbf16>
    %c0_1 = arith.constant 0 : index
    %c0_2 = arith.constant 0 : index
    %1 = vector.load %arg2[%c0_1, %c0_2] : memref<144x512xbf16, #tpu.memory_space<vmem>>, vector<144x512xbf16>
    %cst = arith.constant dense<0.000000e+00> : vector<128x512xf32>
    %2 = tpu.matmul %0, %1, %cst {dimension_numbers = #tpu.dot_dimension_numbers<[1], [0], [0], [1], [0, 0, 1, 1], [], []>} : vector<128x144xbf16>, vector<144x512xbf16>, vector<128x512xf32> -> vector<128x512xf32>
    %c0_3 = arith.constant 0 : index
    %c0_4 = arith.constant 0 : index
    %3 = vector.load %arg3[%c0_3, %c0_4] : memref<1x512xf32, #tpu.memory_space<vmem>>, vector<1x512xf32>
    %4 = vector.broadcast %3 : vector<1x512xf32> to vector<128x512xf32>
    %5 = arith.addf %2, %4 : vector<128x512xf32>
    %c0_5 = arith.constant 0 : index
    %c0_6 = arith.constant 0 : index
    %6 = vector.load %arg4[%c0_5, %c0_6] : memref<128x512xf32, #tpu.memory_space<vmem>>, vector<128x512xf32>
    tpu.vector_store %arg4[%c0_5, %c0_6], %5 {strides = array<i32>} : memref<128x512xf32, #tpu.memory_space<vmem>>, vector<128x512xf32>,
    return
  }
  func.func @transform_0(%arg0: i32) -> (i32, i32) {
    %c0_i32 = arith.constant 0 : i32
    %c0_i32_0 = arith.constant 0 : i32
    return %arg0, %c0_i32 : i32, i32
  }
  func.func @transform_1(%arg0: i32) -> (i32, i32) {
    %c0_i32 = arith.constant 0 : i32
    %c0_i32_0 = arith.constant 0 : i32
    %c0_i32_1 = arith.constant 0 : i32
    return %c0_i32, %c0_i32_0 : i32, i32
  }
  func.func @transform_2(%arg0: i32) -> (i32, i32) {
    %c0_i32 = arith.constant 0 : i32
    %c0_i32_0 = arith.constant 0 : i32
    %c0_i32_1 = arith.constant 0 : i32
    return %c0_i32, %c0_i32_0 : i32, i32
  }
  func.func @transform_3(%arg0: i32) -> (i32, i32) {
    %c0_i32 = arith.constant 0 : i32
    %c0_i32_0 = arith.constant 0 : i32
    return %arg0, %c0_i32 : i32, i32
  }
}

</mosaic_0001>

<bundles_post_ra>
// kernel: autoencoder_forward.9
= control target key start
LH: loop header
LB: loop body
LE: loop exit
PB: predicated region body
PF: predicated region fallthrough
CT: control target
= control target key end

     0   :  { %s887_s18 = smov 0   ;;  %s889_s19 = smov 0   ;;  %s1149_s0 = inlined_call_operand.vmem [shape: bf16[128,16], index: 0, kind: input, shape index: {}]   ;;  %s1150_s1 = inlined_call_operand.vmem [shape: bf16[16,128], index: 1, kind: input, shape index: {}]   ;;  %s1151_s2 = inlined_call_operand.vmem [shape: f32[1,128], index: 2, kind: input, shape index: {}]   ;;  %s1152_s3 = inlined_call_operand.vmem [shape: f32[1,128], index: 3, kind: input, shape index: {}]   ;;  %s1153_s4 = inlined_call_operand.vmem [shape: f32[1,128], index: 4, kind: input, shape index: {}]   ;;  %s1154_s5 = inlined_call_operand.vmem [shape: f32[128,128], index: 5, kind: output, shape index: {}]  }
   0x1   :  { %s891_s20 = smov 0  }
   0x2 LB: > { %s27_s21 = sadd.s32 1, %s850_s19  ;;  %p738_p0 = scmp.ge.s32.totalorder %s854_s20, 1  ;;  %s854_s20 = sphi %s891_s20, %s15_s20   ;;  %s850_s19 = sphi %s889_s19, %s1156_s19   ;;  %s846_s18 = sphi %s887_s18, %s1155_s18  }
   0x3   : > { %p29_p1 = scmp.ge.s32.totalorder %s27_s21, 2  ;;  %p200_p2 = scmp.lt.s32.totalorder %s854_s20, 3 }
   0x5   : > { %s1158_s21 = smov (%p29_p1, %s27_s21), 0  ;;  %p201_p3 = pnand %p738_p0, %p200_p2 }
   0x6   : > { %p241_p4 = scmp.eq.s32.totalorder (!%p201_p3), %s846_s18, 0 }
   0x7   : > { %204 = sbr.rel (%p201_p3) target bundleno = 283 (0x11b), region = 40 }
   0xc   : > { %246 = sbr.rel (!%p241_p4) target bundleno = 17 (0x11), region = 44  ;;  %v856_v0 = vmov (%p241_p4), 0.0  }
   0xd   : > { %247 = vst [vmem:[#allocation2] sm:$0x1] (%p241_p4), %v856_v0 }
   0xe   : > { %248 = vst [vmem:[#allocation3] sm:$0x1] (%p241_p4), %v856_v0 }
  0x11 PF: > { %p740_p5 = scmp.ne.s32.totalorder %s846_s18, 0 }
  0x13   : > { %251 = sbr.rel (%p740_p5) target bundleno = 223 (0xdf), region = 48 }
  0x18   : > { %v799_v1 = vld [vmem:[%s1150_s1] sm:$0xff]  ;;  %v793_v3 = vld [vmem:[%s1149_s0 + $0x10] sm:$0xff]  ;;  %vm320_vm0 = vcmask 130048   ;;  %v792_v6 = vld [vmem:[%s1149_s0 + $0x8] sm:$0xff] }
  0x19   : > { %v791_v2 = vld [vmem:[%s1149_s0] sm:$0xff]  ;;  %352 = vmatpush.bf16.msra.mxu0 %v799_v1  ;;  %800 = vmatpush.bf16.msra.mxu1 %v799_v1  ;;  %v797_v5 = vld [vmem:[%s1149_s0 + $0x30] sm:$0xff]  ;;  %v794_v7 = vld [vmem:[%s1149_s0 + $0x18] sm:$0xff] }
  0x1a   : > { %v795_v4 = vld [vmem:[%s1149_s0 + $0x20] sm:$0xff]  ;;  %801 = vmatpush.bf16.msra.mxu2 %v799_v1  ;;  %802 = vmatpush.bf16.msra.mxu3 %v799_v1  ;;  %v796_v8 = vld [vmem:[%s1149_s0 + $0x28] sm:$0xff]  ;;  %v798_v9 = vld [vmem:[%s1149_s0 + $0x38] sm:$0xff] }
  0x1b   : > { %v828_v10 = vld [vmem:[%s1151_s2] ss:$0 sm:$0xff] }
  0x1c   : > { %777 = vmatmul.msk.bf16.vlgmr.msra.gmra.mxu0 %vm320_vm0, %v791_v2  ;;  %779 = vmatmul.msk.bf16.vlgmr.msra.gmra.mxu1 %vm320_vm0, %v793_v3 }
  0x1d   : > { %781 = vmatmul.msk.bf16.vlgmr.msra.gmra.mxu2 %vm320_vm0, %v795_v4  ;;  %783 = vmatmul.msk.bf16.vlgmr.msra.gmra.mxu3 %vm320_vm0, %v797_v5 }
  0x2c   : > { %778 = vmatmul.msk.bf16.gmra.mxu0 %vm320_vm0, %v792_v6  ;;  %780 = vmatmul.msk.bf16.gmra.mxu1 %vm320_vm0, %v794_v7 }
  0x2d   : > { %782 = vmatmul.msk.bf16.gmra.mxu2 %vm320_vm0, %v796_v8  ;;  %784 = vmatmul.msk.bf16.gmra.mxu3 %vm320_vm0, %v798_v9 }
  0x99   : > { %v354_v11 = vpop.f32.mrf.mxu0  ;;  %v364_v12 = vpop.f32.mrf.mxu1 }
  0x9a   : > { %v355_v13 = vadd.f32 %v828_v10, %v354_v11  ;;  %v365_v14 = vadd.f32 %v828_v10, %v364_v12 }
  0x9c   : > { %525 = vst [vmem:[%s1154_s5] sm:$0xff] %v355_v13  ;;  %v486_v32 = vmul.f32 %v355_v13, %v355_v13  ;;  %v490_v48 = vmul.f32 %v365_v14, %v365_v14 }
  0x9d   : > { %529 = vst [vmem:[%s1154_s5 + $0x20] sm:$0xff] %v365_v14 }
  0xa0   : > { %v374_v15 = vpop.f32.mrf.mxu2  ;;  %v384_v16 = vpop.f32.mrf.mxu3 }
  0xa1   : > { %v356_v17 = vpop.f32.mrf.mxu0  ;;  %v366_v18 = vpop.f32.mrf.mxu1  ;;  %v375_v19 = vadd.f32 %v828_v10, %v374_v15  ;;  %v953_v22 = vadd.f32 %v828_v10, %v384_v16 }
  0xa2   : > { %v357_v20 = vadd.f32 %v828_v10, %v356_v17  ;;  %v367_v21 = vadd.f32 %v828_v10, %v366_v18 }
  0xa3   : > { %533 = vst [vmem:[%s1154_s5 + $0x40] sm:$0xff] %v375_v19  ;;  %v494_v0 = vmul.f32 %v375_v19, %v375_v19  ;;  %v498_v12 = vmul.f32 %v953_v22, %v953_v22 }
  0xa4   : > { %526 = vst [vmem:[%s1154_s5 + $0x8] sm:$0xff] %v357_v20  ;;  %v487_v31 = vmul.f32 %v357_v20, %v357_v20  ;;  %v462_v33 = vadd.f32 %v357_v20, %v355_v13  ;;  %v491_v51 = vmul.f32 %v367_v21, %v367_v21 }
  0xa5   : > { %530 = vst [vmem:[%s1154_s5 + $0x28] sm:$0xff] %v367_v21 }
  0xa6   : > { %537 = vst [vmem:[%s1154_s5 + $0x60] sm:$0xff] %v953_v22  ;;  %v502_v37 = vadd.f32 %v487_v31, %v486_v32 }
  0xa8   : > { %v376_v23 = vpop.f32.mrf.mxu2  ;;  %v386_v24 = vpop.f32.mrf.mxu3 }
  0xa9   : > { %v359_v25 = vpop.f32.mrf.mxu0  ;;  %v369_v26 = vpop.f32.mrf.mxu1  ;;  %v377_v27 = vadd.f32 %v828_v10, %v376_v23  ;;  %v387_v30 = vadd.f32 %v828_v10, %v386_v24 }
  0xaa   : > { %v360_v28 = vadd.f32 %v828_v10, %v359_v25  ;;  %v370_v29 = vadd.f32 %v828_v10, %v369_v26 }
  0xab   : > { %534 = vst [vmem:[%s1154_s5 + $0x48] sm:$0xff] %v377_v27  ;;  %v495_v3 = vmul.f32 %v377_v27, %v377_v27  ;;  %v499_v15 = vmul.f32 %v387_v30, %v387_v30 }
  0xac   : > { %527 = vst [vmem:[%s1154_s5 + $0x10] sm:$0xff] %v360_v28  ;;  %v488_v34 = vmul.f32 %v360_v28, %v360_v28  ;;  %v463_v41 = vadd.f32 %v462_v33, %v360_v28  ;;  %v492_v58 = vmul.f32 %v370_v29, %v370_v29 }
  0xad   : > { %531 = vst [vmem:[%s1154_s5 + $0x30] sm:$0xff] %v370_v29 }
  0xae   : > { %538 = vst [vmem:[%s1154_s5 + $0x68] sm:$0xff] %v387_v30  ;;  %v503_v45 = vadd.f32 %v502_v37, %v488_v34 }
  0xb0   : > { %v379_v35 = vpop.f32.mrf.mxu2  ;;  %v389_v36 = vpop.f32.mrf.mxu3 }
  0xb1   : > { %v361_v38 = vpop.f32.mrf.mxu0  ;;  %v371_v39 = vpop.f32.mrf.mxu1  ;;  %v380_v40 = vadd.f32 %v828_v10, %v379_v35  ;;  %v390_v44 = vadd.f32 %v828_v10, %v389_v36  ;;  %v461_v35 = vld [vmem:[#allocation2] sm:$0x1] }
  0xb2   : > { %v362_v42 = vadd.f32 %v828_v10, %v361_v38  ;;  %v372_v43 = vadd.f32 %v828_v10, %v371_v39 }
  0xb3   : > { %535 = vst [vmem:[%s1154_s5 + $0x50] sm:$0xff] %v380_v40  ;;  %v496_v7 = vmul.f32 %v380_v40, %v380_v40 }
  0xb4   : > { %v464_v46 = vadd.f32 %v463_v41, %v362_v42  ;;  %v489_v47 = vmul.f32 %v362_v42, %v362_v42  ;;  %528 = vst [vmem:[%s1154_s5 + $0x18] sm:$0xff] %v362_v42  ;;  %v493_v62 = vmul.f32 %v372_v43, %v372_v43 }
  0xb5   : > { %532 = vst [vmem:[%s1154_s5 + $0x38] sm:$0xff] %v372_v43 }
  0xb6   : > { %v465_v49 = vadd.f32 %v464_v46, %v365_v14  ;;  %v504_v50 = vadd.f32 %v503_v45, %v489_v47  ;;  %539 = vst [vmem:[%s1154_s5 + $0x70] sm:$0xff] %v390_v44 }
  0xb8   : > { %v505_v52 = vadd.f32 %v504_v50, %v490_v48  ;;  %v466_v53 = vadd.f32 %v465_v49, %v367_v21  ;;  %v381_v54 = vpop.f32.mrf.mxu2  ;;  %v391_v55 = vpop.f32.mrf.mxu3 }
  0xb9   : > { %v382_v56 = vadd.f32 %v828_v10, %v381_v54  ;;  %v392_v57 = vadd.f32 %v828_v10, %v391_v55 }
  0xba   : > { %v467_v59 = vadd.f32 %v466_v53, %v370_v29  ;;  %v506_v60 = vadd.f32 %v505_v52, %v491_v51 }
  0xbb   : > { %536 = vst [vmem:[%s1154_s5 + $0x58] sm:$0xff] %v382_v56  ;;  %v497_v11 = vmul.f32 %v382_v56, %v382_v56  ;;  %v501_v24 = vmul.f32 %v392_v57, %v392_v57 }
  0xbc   : > { %v468_v61 = vadd.f32 %v467_v59, %v372_v43  ;;  %v507_v63 = vadd.f32 %v506_v60, %v492_v58  ;;  %540 = vst [vmem:[%s1154_s5 + $0x78] sm:$0xff] %v392_v57 }
  0xbe   : > { %v469_v1 = vadd.f32 %v468_v61, %v375_v19  ;;  %v508_v2 = vadd.f32 %v507_v63, %v493_v62  ;;  %v500_v19 = vmul.f32 %v390_v44, %v390_v44 }
  0xc0   : > { %v509_v4 = vadd.f32 %v508_v2, %v494_v0  ;;  %v470_v5 = vadd.f32 %v469_v1, %v377_v27 }
  0xc2   : > { %v471_v6 = vadd.f32 %v470_v5, %v380_v40  ;;  %v510_v8 = vadd.f32 %v509_v4, %v495_v3 }
  0xc4   : > { %v511_v9 = vadd.f32 %v510_v8, %v496_v7  ;;  %v472_v10 = vadd.f32 %v471_v6, %v382_v56 }
  0xc6   : > { %v473_v13 = vadd.f32 %v472_v10, %v953_v22  ;;  %v512_v14 = vadd.f32 %v511_v9, %v497_v11 }
  0xc8   : > { %v513_v16 = vadd.f32 %v512_v14, %v498_v12  ;;  %v474_v17 = vadd.f32 %v473_v13, %v387_v30  ;;  %v485_v30 = vld [vmem:[#allocation3] sm:$0x1] }
  0xca   : > { %v475_v18 = vadd.f32 %v474_v17, %v390_v44  ;;  %v514_v20 = vadd.f32 %v513_v16, %v499_v15 }
  0xcc   : > { %v515_v21 = vadd.f32 %v514_v20, %v500_v19  ;;  %v476_v23 = vadd.f32 %v475_v18, %v392_v57 }
  0xce   : > { %v477_v25 = vrot.slane %v476_v23, 4  ;;  %v516_v26 = vadd.f32 %v515_v21, %v501_v24 }
  0xd0   : > { %v478_v27 = vadd.f32 %v477_v25, %v476_v23  ;;  %v517_v28 = vrot.slane %v516_v26, 4 }
  0xd2   : > { %v479_v29 = vrot.slane %v478_v27, 2  ;;  %v518_v31 = vadd.f32 %v517_v28, %v516_v26 }
  0xd4   : > { %v480_v32 = vadd.f32 %v479_v29, %v478_v27  ;;  %v519_v33 = vrot.slane %v518_v31, 2 }
  0xd6   : > { %v481_v34 = vrot.slane %v480_v32, 1  ;;  %v520_v22 = vadd.f32 %v519_v33, %v518_v31 }
  0xd8   : > { %v482_v36 = vadd.f32 %v481_v34, %v480_v32  ;;  %v521_v37 = vrot.slane %v520_v22, 1 }
  0xda   : > { %v483_v38 = vadd.f32 %v482_v36, %v461_v35  ;;  %v522_v39 = vadd.f32 %v521_v37, %v520_v22 }
  0xdc   : > { %484 = vst [vmem:[#allocation2] sm:$0x1] %v483_v38  ;;  %v523_v40 = vadd.f32 %v522_v39, %v485_v30 }
  0xde   : > { %524 = vst [vmem:[#allocation3] sm:$0x1] %v523_v40 }
  0xdf PF: > { %p785_p6 = scmp.ne.s32.totalorder %s846_s18, 1 }
  0xe1   : > { %544 = sbr.rel (%p785_p6) target bundleno = 283 (0x11b), region = 52 }
  0xe6   : > { %v561_v41 = vld [vmem:[#allocation2] sm:$0x1]  ;;  %v562_v42 = vld [vmem:[#allocation3] sm:$0x1]  ;;  %v546_v56 = vld [vmem:[%s1154_s5 + $0x8] sm:$0xff] }
  0xe7   : > { %v563_v43 = vmul.f32 0.0078125, %v561_v41  ;;  %v564_v44 = vmul.f32 0.0078125, %v562_v42  ;;  %v545_v52 = vld [vmem:[%s1154_s5] sm:$0xff]  ;;  %v547_v58 = vld [vmem:[%s1154_s5 + $0x10] sm:$0xff]  ;;  %v548_v59 = vld [vmem:[%s1154_s5 + $0x18] sm:$0xff] }
  0xe8   : > { %v597_v55 = vld [vmem:[%s1152_s3] sm:$0x1]  ;;  %v550_v61 = vld [vmem:[%s1154_s5 + $0x28] sm:$0xff]  ;;  %v551_v62 = vld [vmem:[%s1154_s5 + $0x30] sm:$0xff] }
  0xe9   : > { %v565_v45 = vmul.f32 %v563_v43, %v563_v43  ;;  %v1005_v54 = vperm.slane %v563_v43, 0  ;;  %v549_v60 = vld [vmem:[%s1154_s5 + $0x20] sm:$0xff]  ;;  %v552_v63 = vld [vmem:[%s1154_s5 + $0x38] sm:$0xff]  ;;  %v554_v3 = vld [vmem:[%s1154_s5 + $0x48] sm:$0xff] }
  0xea   : > { %v553_v2 = vld [vmem:[%s1154_s5 + $0x40] sm:$0xff]  ;;  %v555_v8 = vld [vmem:[%s1154_s5 + $0x50] sm:$0xff]  ;;  %v556_v9 = vld [vmem:[%s1154_s5 + $0x58] sm:$0xff] }
  0xeb   : > { %v566_v46 = vsub.f32 %v564_v44, %v565_v45  ;;  %v581_v1 = vsub.f32 %v545_v52, %v1005_v54  ;;  %v582_v5 = vsub.f32 %v546_v56, %v1005_v54  ;;  %v583_v6 = vsub.f32 %v547_v58, %v1005_v54  ;;  %v557_v10 = vld [vmem:[%s1154_s5 + $0x60] sm:$0xff]  ;;  %v558_v27 = vld [vmem:[%s1154_s5 + $0x68] sm:$0xff]  ;;  %v559_v33 = vld [vmem:[%s1154_s5 + $0x70] sm:$0xff] }
  0xec   : > { %v584_v7 = vsub.f32 %v548_v59, %v1005_v54  ;;  %v585_v11 = vsub.f32 %v549_v60, %v1005_v54  ;;  %v586_v12 = vsub.f32 %v550_v61, %v1005_v54  ;;  %v587_v13 = vsub.f32 %v551_v62, %v1005_v54  ;;  %v1057_v16 = vld [vmem:[%s1153_s4] ss:$0 sm:$0xff]  ;;  %v560_v37 = vld [vmem:[%s1154_s5 + $0x78] sm:$0xff] }
  0xed   : > { %v567_v47 = vadd.f32 1e-05, %v566_v46  ;;  %v588_v14 = vsub.f32 %v552_v63, %v1005_v54  ;;  %v589_v17 = vsub.f32 %v553_v2, %v1005_v54  ;;  %v590_v18 = vsub.f32 %v554_v3, %v1005_v54 }
  0xee   : > { %v591_v19 = vsub.f32 %v555_v8, %v1005_v54  ;;  %v592_v20 = vsub.f32 %v556_v9, %v1005_v54  ;;  %v593_v21 = vsub.f32 %v557_v10, %v1005_v54  ;;  %v594_v40 = vsub.f32 %v558_v27, %v1005_v54 }
  0xef   : > { %830 = vrsqrt.f32 %v567_v47  ;;  %vm574_vm1 = vweird.f32 %v567_v47  ;;  %v595_v44 = vsub.f32 %v559_v33, %v1005_v54 }
  0xf5   : > { %v831_v48 = vpop.eup %830 }
  0xf6   : > { %v569_v49 = vmul.f32 %v831_v48, %v567_v47  ;;  %vm575_vm2 = vweird.f32 %v831_v48 }
  0xf7   : > { %vm576_vm3 = vmor %vm574_vm1, %vm575_vm2 }
  0xf8   : > { %v570_v50 = vmul.f32 %v831_v48, %v569_v49 }
  0xfa   : > { %v571_v51 = vmul.f32 0.5, %v570_v50 }
  0xfc   : > { %v572_v53 = vsub.f32 1.5, %v571_v51 }
  0xfe   : > { %v573_v57 = vmul.f32 %v831_v48, %v572_v53 }
 0x100   : > { %v577_v0 = vsel %vm576_vm3, %v831_v48, %v573_v57  ;;  %v596_v48 = vsub.f32 %v560_v37, %v1005_v54 }
 0x101   : > { %v598_v4 = vmul.f32 %v597_v55, %v577_v0 }
 0x103   : > { %v600_v15 = vperm.slane %v598_v4, 0 }
 0x105   : > { %v602_v23 = vmul.f32 %v600_v15, %v581_v1  ;;  %v603_v24 = vmul.f32 %v600_v15, %v582_v5  ;;  %v604_v25 = vmul.f32 %v600_v15, %v583_v6  ;;  %v605_v26 = vmul.f32 %v600_v15, %v584_v7 }
 0x106   : > { %v606_v28 = vmul.f32 %v600_v15, %v585_v11  ;;  %v607_v29 = vmul.f32 %v600_v15, %v586_v12  ;;  %v608_v31 = vmul.f32 %v600_v15, %v587_v13  ;;  %v609_v32 = vmul.f32 %v600_v15, %v588_v14 }
 0x107   : > { %v622_v34 = vadd.f32 %v1057_v16, %v602_v23  ;;  %v623_v22 = vadd.f32 %v1057_v16, %v603_v24  ;;  %v624_v35 = vadd.f32 %v1057_v16, %v604_v25  ;;  %v625_v36 = vadd.f32 %v1057_v16, %v605_v26 }
 0x108   : > { %v626_v30 = vadd.f32 %v1057_v16, %v606_v28  ;;  %v627_v38 = vadd.f32 %v1057_v16, %v607_v29  ;;  %v628_v39 = vadd.f32 %v1057_v16, %v608_v31  ;;  %v629_v47 = vadd.f32 %v1057_v16, %v609_v32 }
 0x109   : > { %v638_v41 = vmax.f32 %v622_v34, 0.0  ;;  %v639_v42 = vmax.f32 %v623_v22, 0.0  ;;  %v640_v43 = vmax.f32 %v624_v35, 0.0  ;;  %v641_v45 = vmax.f32 %v625_v36, 0.0 }
 0x10a   : > { %v642_v46 = vmax.f32 %v626_v30, 0.0  ;;  %v610_v49 = vmul.f32 %v600_v15, %v589_v17  ;;  %v611_v50 = vmul.f32 %v600_v15, %v590_v18  ;;  %v612_v51 = vmul.f32 %v600_v15, %v591_v19 }
 0x10b   : > { %654 = vst [vmem:[%s1154_s5] sm:$0xff] %v638_v41  ;;  %v613_v52 = vmul.f32 %v600_v15, %v592_v20  ;;  %v643_v53 = vmax.f32 %v627_v38, 0.0  ;;  %v644_v55 = vmax.f32 %v628_v39, 0.0  ;;  %v614_v56 = vmul.f32 %v600_v15, %v593_v21 }
 0x10c   : > { %655 = vst [vmem:[%s1154_s5 + $0x8] sm:$0xff] %v639_v42  ;;  %v615_v57 = vmul.f32 %v600_v15, %v594_v40  ;;  %v630_v54 = vadd.f32 %v1057_v16, %v610_v49  ;;  %v631_v58 = vadd.f32 %v1057_v16, %v611_v50  ;;  %v632_v59 = vadd.f32 %v1057_v16, %v612_v51 }
 0x10d   : > { %656 = vst [vmem:[%s1154_s5 + $0x10] sm:$0xff] %v640_v43  ;;  %v616_v60 = vmul.f32 %v600_v15, %v595_v44  ;;  %v645_v61 = vmax.f32 %v629_v47, 0.0  ;;  %v633_v62 = vadd.f32 %v1057_v16, %v613_v52  ;;  %v617_v63 = vmul.f32 %v600_v15, %v596_v48 }
 0x10e   : > { %657 = vst [vmem:[%s1154_s5 + $0x18] sm:$0xff] %v641_v45  ;;  %v646_v0 = vmax.f32 %v630_v54, 0.0  ;;  %v634_v1 = vadd.f32 %v1057_v16, %v614_v56  ;;  %v647_v2 = vmax.f32 %v631_v58, 0.0  ;;  %v635_v3 = vadd.f32 %v1057_v16, %v615_v57 }
 0x10f   : > { %658 = vst [vmem:[%s1154_s5 + $0x20] sm:$0xff] %v642_v46  ;;  %v648_v4 = vmax.f32 %v632_v59, 0.0  ;;  %v636_v5 = vadd.f32 %v1057_v16, %v616_v60  ;;  %v649_v6 = vmax.f32 %v633_v62, 0.0  ;;  %v637_v7 = vadd.f32 %v1057_v16, %v617_v63 }
 0x110   : > { %659 = vst [vmem:[%s1154_s5 + $0x28] sm:$0xff] %v643_v53  ;;  %v650_v8 = vmax.f32 %v634_v1, 0.0  ;;  %v651_v9 = vmax.f32 %v635_v3, 0.0 }
 0x111   : > { %660 = vst [vmem:[%s1154_s5 + $0x30] sm:$0xff] %v644_v55  ;;  %v652_v10 = vmax.f32 %v636_v5, 0.0  ;;  %v653_v11 = vmax.f32 %v637_v7, 0.0 }
 0x112   : > { %661 = vst [vmem:[%s1154_s5 + $0x38] sm:$0xff] %v645_v61 }
 0x113   : > { %662 = vst [vmem:[%s1154_s5 + $0x40] sm:$0xff] %v646_v0 }
 0x114   : > { %663 = vst [vmem:[%s1154_s5 + $0x48] sm:$0xff] %v647_v2 }
 0x115   : > { %664 = vst [vmem:[%s1154_s5 + $0x50] sm:$0xff] %v648_v4 }
 0x116   : > { %665 = vst [vmem:[%s1154_s5 + $0x58] sm:$0xff] %v649_v6 }
 0x117   : > { %666 = vst [vmem:[%s1154_s5 + $0x60] sm:$0xff] %v650_v8 }
 0x118   : > { %667 = vst [vmem:[%s1154_s5 + $0x68] sm:$0xff] %v651_v9 }
 0x119   : > { %668 = vst [vmem:[%s1154_s5 + $0x70] sm:$0xff] %v652_v10 }
 0x11a   : > { %669 = vst [vmem:[%s1154_s5 + $0x78] sm:$0xff] %v653_v11 }
 0x11b PF: > { %s15_s20 = sadd.s32 1, %s854_s20   ;;  %s1155_s18 = smov %s850_s19 }
 0x11c   : > { %p12_p7 = scmp.ge.s32.totalorder %s15_s20, 4   ;;  %s1156_s19 = smov %s1158_s21 }
 0x11e   :  { %14 = sbr.rel (!%p12_p7) target bundleno = 2 (0x2), region = 82 }

// kernel: autoencoder_forward.10
= control target key start
LH: loop header
LB: loop body
LE: loop exit
PB: predicated region body
PF: predicated region fallthrough
CT: control target
= control target key end

     0   :  { %s829_s18 = smov 0   ;;  %s831_s19 = smov 0   ;;  %s978_s0 = inlined_call_operand.vmem [shape: bf16[32,256], index: 0, kind: input, shape index: {}]   ;;  %s979_s1 = inlined_call_operand.vmem [shape: bf16[256,128], index: 1, kind: input, shape index: {}]   ;;  %s980_s2 = inlined_call_operand.vmem [shape: f32[1,128], index: 2, kind: input, shape index: {}]   ;;  %s981_s3 = inlined_call_operand.vmem [shape: f32[1,128], index: 3, kind: input, shape index: {}]   ;;  %s982_s4 = inlined_call_operand.vmem [shape: f32[1,128], index: 4, kind: input, shape index: {}]   ;;  %s983_s5 = inlined_call_operand.vmem [shape: f32[32,128], index: 5, kind: output, shape index: {}]  }
   0x1   :  { %s833_s20 = smov 0  }
   0x2 LB: > { %s27_s21 = sadd.s32 1, %s792_s19  ;;  %p620_p0 = scmp.ge.s32.totalorder %s796_s20, 1  ;;  %s796_s20 = sphi %s833_s20, %s15_s20   ;;  %s792_s19 = sphi %s831_s19, %s985_s19   ;;  %s788_s18 = sphi %s829_s18, %s984_s18  }
   0x3   : > { %p29_p1 = scmp.ge.s32.totalorder %s27_s21, 2  ;;  %p201_p2 = scmp.lt.s32.totalorder %s796_s20, 3 }
   0x5   : > { %s987_s21 = smov (%p29_p1, %s27_s21), 0  ;;  %p202_p3 = pnand %p620_p0, %p201_p2 }
   0x6   : > { %p243_p4 = scmp.eq.s32.totalorder (!%p202_p3), %s788_s18, 0 }
   0x7   : > { %205 = sbr.rel (%p202_p3) target bundleno = 265 (0x109), region = 40 }
   0xc   : > { %248 = sbr.rel (!%p243_p4) target bundleno = 17 (0x11), region = 44  ;;  %v798_v0 = vmov (%p243_p4), 0.0  }
   0xd   : > { %249 = vst [vmem:[#allocation2] sm:$0x1] (%p243_p4), %v798_v0 }
   0xe   : > { %250 = vst [vmem:[#allocation3] sm:$0x1] (%p243_p4), %v798_v0 }
  0x11 PF: > { %p622_p5 = scmp.ne.s32.totalorder %s788_s18, 0 }
  0x13   : > { %253 = sbr.rel (%p622_p5) target bundleno = 219 (0xdb), region = 48 }
  0x18   : > { %v720_v1 = vld [vmem:[%s979_s1 + $0x38] sm:$0xff]  ;;  %v719_v3 = vld [vmem:[%s979_s1 + $0x30] sm:$0xff]  ;;  %v718_v5 = vld [vmem:[%s979_s1 + $0x28] sm:$0xff] }
  0x19   : > { %v728_v2 = vld [vmem:[%s979_s1 + $0x78] sm:$0xff]  ;;  %410 = vmatpush.bf16.msra.mxu0 %v720_v1  ;;  %729 = vmatpush.bf16.msra.mxu2 %v720_v1  ;;  %v727_v4 = vld [vmem:[%s979_s1 + $0x70] sm:$0xff]  ;;  %v726_v6 = vld [vmem:[%s979_s1 + $0x68] sm:$0xff] }
  0x1a   : > { %429 = vmatpush.bf16.msra.mxu1 %v728_v2  ;;  %737 = vmatpush.bf16.msra.mxu3 %v728_v2  ;;  %v717_v7 = vld [vmem:[%s979_s1 + $0x20] sm:$0xff]  ;;  %v716_v9 = vld [vmem:[%s979_s1 + $0x18] sm:$0xff]  ;;  %v715_v11 = vld [vmem:[%s979_s1 + $0x10] sm:$0xff] }
  0x1b   : > { %v725_v8 = vld [vmem:[%s979_s1 + $0x60] sm:$0xff]  ;;  %v724_v10 = vld [vmem:[%s979_s1 + $0x58] sm:$0xff]  ;;  %v723_v12 = vld [vmem:[%s979_s1 + $0x50] sm:$0xff] }
  0x1c   : > { %v714_v13 = vld [vmem:[%s979_s1 + $0x8] sm:$0xff]  ;;  %v713_v15 = vld [vmem:[%s979_s1] sm:$0xff]  ;;  %v633_v19 = vld [vmem:[%s978_s0 + $0x10] sm:$0xf] }
  0x1d   : > { %411 = vmatpush.bf16.msra.mxu0 %v719_v3  ;;  %730 = vmatpush.bf16.msra.mxu2 %v719_v3  ;;  %v722_v14 = vld [vmem:[%s979_s1 + $0x48] sm:$0xff]  ;;  %v721_v16 = vld [vmem:[%s979_s1 + $0x40] sm:$0xff]  ;;  %v712_v20 = vld [vmem:[%s978_s0 + $0x14] sm:$0xf0] }
  0x1e   : > { %430 = vmatpush.bf16.msra.mxu1 %v727_v4  ;;  %738 = vmatpush.bf16.msra.mxu3 %v727_v4  ;;  %v625_v17 = vld [vmem:[%s978_s0] sm:$0xf]  ;;  %v710_v18 = vld [vmem:[%s978_s0 + $0x4] sm:$0xf0]  ;;  %v709_v21 = vld [vmem:[%s978_s0 + $0x4] sm:$0xf]  ;;  %v634_v26 = vor.u32 %v712_v20, %v633_v19 }
  0x1f   : > { %v627_v22 = vld [vmem:[%s978_s0 + $0x8] sm:$0xf0]  ;;  %v711_v23 = vld [vmem:[%s978_s0 + $0x14] sm:$0xf]  ;;  %v635_v24 = vld [vmem:[%s978_s0 + $0x18] sm:$0xf0]  ;;  %v626_v25 = vor.u32 %v710_v18, %v625_v17 }
  0x20   : > { %v630_v27 = vor.u32 %v709_v21, %v627_v22  ;;  %v638_v28 = vor.u32 %v711_v23, %v635_v24  ;;  %v770_v29 = vld [vmem:[%s980_s2] ss:$0 sm:$0xff]  ;;  %v479_v4 = vld [vmem:[#allocation3] sm:$0x1] }
  0x21   : > { %412 = vmatpush.bf16.msra.mxu0 %v718_v5  ;;  %731 = vmatpush.bf16.msra.mxu2 %v718_v5  ;;  %v467_v1 = vld [vmem:[#allocation2] sm:$0x1] }
  0x22   : > { %431 = vmatpush.bf16.msra.mxu1 %v726_v6  ;;  %739 = vmatpush.bf16.msra.mxu3 %v726_v6 }
  0x25   : > { %413 = vmatpush.bf16.msra.mxu0 %v717_v7  ;;  %732 = vmatpush.bf16.msra.mxu2 %v717_v7 }
  0x26   : > { %432 = vmatpush.bf16.msra.mxu1 %v725_v8  ;;  %740 = vmatpush.bf16.msra.mxu3 %v725_v8 }
  0x29   : > { %414 = vmatpush.bf16.msra.mxu0 %v716_v9  ;;  %733 = vmatpush.bf16.msra.mxu2 %v716_v9 }
  0x2a   : > { %433 = vmatpush.bf16.msra.mxu1 %v724_v10  ;;  %741 = vmatpush.bf16.msra.mxu3 %v724_v10 }
  0x2d   : > { %415 = vmatpush.bf16.msra.mxu0 %v715_v11  ;;  %734 = vmatpush.bf16.msra.mxu2 %v715_v11 }
  0x2e   : > { %434 = vmatpush.bf16.msra.mxu1 %v723_v12  ;;  %742 = vmatpush.bf16.msra.mxu3 %v723_v12 }
  0x31   : > { %416 = vmatpush.bf16.msra.mxu0 %v714_v13  ;;  %735 = vmatpush.bf16.msra.mxu2 %v714_v13 }
  0x32   : > { %435 = vmatpush.bf16.msra.mxu1 %v722_v14  ;;  %743 = vmatpush.bf16.msra.mxu3 %v722_v14 }
  0x35   : > { %417 = vmatpush.bf16.msra.mxu0 %v713_v15  ;;  %736 = vmatpush.bf16.msra.mxu2 %v713_v15 }
  0x36   : > { %436 = vmatpush.bf16.msra.mxu1 %v721_v16  ;;  %744 = vmatpush.bf16.msra.mxu3 %v721_v16 }
  0x38   : > { %418 = vmatmul.bf16.vlgmr.msra.gmra.mxu0 %v626_v25  ;;  %423 = vmatmul.bf16.vlgmr.msra.gmra.mxu2 %v634_v26 }
  0x39   : > { %437 = vmatmul.bf16.vlgmr.msra.gmra.mxu1 %v630_v27  ;;  %442 = vmatmul.bf16.vlgmr.msra.gmra.mxu3 %v638_v28 }
  0xb5   : > { %v419_v30 = vpop.f32.mrf.mxu0 }
  0xb6   : > { %v420_v31 = vadd.f32 %v770_v29, %v419_v30  ;;  %v438_v32 = vpop.f32.mrf.mxu1 }
  0xb8   : > { %v439_v33 = vadd.f32 %v438_v32, %v420_v31 }
  0xba   : > { %495 = vst [vmem:[%s983_s5] sm:$0xff] %v439_v33  ;;  %v480_v42 = vmul.f32 %v439_v33, %v439_v33 }
  0xbb   : > { %v424_v34 = vpop.f32.mrf.mxu2 }
  0xbc   : > { %v425_v35 = vadd.f32 %v770_v29, %v424_v34  ;;  %v443_v36 = vpop.f32.mrf.mxu3 }
  0xbd   : > { %v421_v37 = vpop.f32.mrf.mxu0 }
  0xbe   : > { %v444_v38 = vadd.f32 %v443_v36, %v425_v35  ;;  %v422_v39 = vadd.f32 %v770_v29, %v421_v37  ;;  %v440_v40 = vpop.f32.mrf.mxu1 }
  0xc0   : > { %497 = vst [vmem:[%s983_s5 + $0x10] sm:$0xff] %v444_v38  ;;  %v441_v41 = vadd.f32 %v440_v40, %v422_v39  ;;  %v482_v49 = vmul.f32 %v444_v38, %v444_v38 }
  0xc2   : > { %v468_v43 = vadd.f32 %v441_v41, %v439_v33  ;;  %v481_v44 = vmul.f32 %v441_v41, %v441_v41  ;;  %496 = vst [vmem:[%s983_s5 + $0x8] sm:$0xff] %v441_v41 }
  0xc3   : > { %v426_v45 = vpop.f32.mrf.mxu2 }
  0xc4   : > { %v484_v46 = vadd.f32 %v481_v44, %v480_v42  ;;  %v427_v47 = vadd.f32 %v770_v29, %v426_v45  ;;  %v445_v48 = vpop.f32.mrf.mxu3  ;;  %v469_v51 = vadd.f32 %v468_v43, %v444_v38 }
  0xc6   : > { %v446_v50 = vadd.f32 %v445_v48, %v427_v47  ;;  %v485_v54 = vadd.f32 %v484_v46, %v482_v49 }
  0xc8   : > { %v470_v52 = vadd.f32 %v469_v51, %v446_v50  ;;  %v483_v53 = vmul.f32 %v446_v50, %v446_v50  ;;  %498 = vst [vmem:[%s983_s5 + $0x18] sm:$0xff] %v446_v50 }
  0xca   : > { %v471_v55 = vrot.slane %v470_v52, 4  ;;  %v486_v56 = vadd.f32 %v485_v54, %v483_v53 }
  0xcc   : > { %v472_v57 = vadd.f32 %v471_v55, %v470_v52  ;;  %v487_v58 = vrot.slane %v486_v56, 4 }
  0xce   : > { %v473_v59 = vrot.slane %v472_v57, 2  ;;  %v488_v60 = vadd.f32 %v487_v58, %v486_v56 }
  0xd0   : > { %v474_v61 = vadd.f32 %v473_v59, %v472_v57  ;;  %v489_v62 = vrot.slane %v488_v60, 2 }
  0xd2   : > { %v475_v63 = vrot.slane %v474_v61, 1  ;;  %v490_v0 = vadd.f32 %v489_v62, %v488_v60 }
  0xd4   : > { %v476_v2 = vadd.f32 %v475_v63, %v474_v61  ;;  %v491_v3 = vrot.slane %v490_v0, 1 }
  0xd6   : > { %v477_v5 = vadd.f32 %v476_v2, %v467_v1  ;;  %v492_v6 = vadd.f32 %v491_v3, %v490_v0 }
  0xd8   : > { %478 = vst [vmem:[#allocation2] sm:$0x1] %v477_v5  ;;  %v493_v7 = vadd.f32 %v492_v6, %v479_v4 }
  0xda   : > { %494 = vst [vmem:[#allocation3] sm:$0x1] %v493_v7 }
  0xdb PF: > { %p703_p6 = scmp.ne.s32.totalorder %s788_s18, 1 }
  0xdd   : > { %502 = sbr.rel (%p703_p6) target bundleno = 265 (0x109), region = 52 }
  0xe2   : > { %v507_v8 = vld [vmem:[#allocation2] sm:$0x1]  ;;  %v508_v9 = vld [vmem:[#allocation3] sm:$0x1]  ;;  %v504_v24 = vld [vmem:[%s983_s5 + $0x8] sm:$0xff] }
  0xe3   : > { %v509_v10 = vmul.f32 0.03125, %v507_v8  ;;  %v510_v11 = vmul.f32 0.03125, %v508_v9  ;;  %v503_v21 = vld [vmem:[%s983_s5] sm:$0xff]  ;;  %v505_v25 = vld [vmem:[%s983_s5 + $0x10] sm:$0xff]  ;;  %v506_v26 = vld [vmem:[%s983_s5 + $0x18] sm:$0xff] }
  0xe4   : > { %v531_v22 = vld [vmem:[%s981_s3] sm:$0x1] }
  0xe5   : > { %v511_v12 = vmul.f32 %v509_v10, %v509_v10  ;;  %v525_v20 = vperm.slane %v509_v10, 0  ;;  %v771_v34 = vld [vmem:[%s982_s4] ss:$0 sm:$0xff] }
  0xe7   : > { %v512_v13 = vsub.f32 %v510_v11, %v511_v12  ;;  %v527_v28 = vsub.f32 %v503_v21, %v525_v20  ;;  %v528_v30 = vsub.f32 %v504_v24, %v525_v20  ;;  %v529_v31 = vsub.f32 %v505_v25, %v525_v20 }
  0xe8   : > { %v530_v32 = vsub.f32 %v506_v26, %v525_v20 }
  0xe9   : > { %v513_v14 = vadd.f32 1e-05, %v512_v13 }
  0xeb   : > { %772 = vrsqrt.f32 %v513_v14  ;;  %vm520_vm0 = vweird.f32 %v513_v14 }
  0xf1   : > { %v773_v15 = vpop.eup %772 }
  0xf2   : > { %v515_v16 = vmul.f32 %v773_v15, %v513_v14  ;;  %vm521_vm1 = vweird.f32 %v773_v15 }
  0xf3   : > { %vm522_vm2 = vmor %vm520_vm0, %vm521_vm1 }
  0xf4   : > { %v516_v17 = vmul.f32 %v773_v15, %v515_v16 }
  0xf6   : > { %v517_v18 = vmul.f32 0.5, %v516_v17 }
  0xf8   : > { %v518_v19 = vsub.f32 1.5, %v517_v18 }
  0xfa   : > { %v519_v23 = vmul.f32 %v773_v15, %v518_v19 }
  0xfc   : > { %v523_v27 = vsel %vm522_vm2, %v773_v15, %v519_v23 }
  0xfd   : > { %v532_v29 = vmul.f32 %v531_v22, %v523_v27 }
  0xff   : > { %v534_v33 = vperm.slane %v532_v29, 0 }
 0x101   : > { %v536_v35 = vmul.f32 %v534_v33, %v527_v28  ;;  %v537_v36 = vmul.f32 %v534_v33, %v528_v30  ;;  %v538_v37 = vmul.f32 %v534_v33, %v529_v31  ;;  %v539_v38 = vmul.f32 %v534_v33, %v530_v32 }
 0x103   : > { %v544_v39 = vadd.f32 %v771_v34, %v536_v35  ;;  %v545_v40 = vadd.f32 %v771_v34, %v537_v36  ;;  %v546_v41 = vadd.f32 %v771_v34, %v538_v37  ;;  %v547_v42 = vadd.f32 %v771_v34, %v539_v38 }
 0x105   : > { %548 = vst [vmem:[%s983_s5] sm:$0xff] %v544_v39 }
 0x106   : > { %549 = vst [vmem:[%s983_s5 + $0x8] sm:$0xff] %v545_v40 }
 0x107   : > { %550 = vst [vmem:[%s983_s5 + $0x10] sm:$0xff] %v546_v41 }
 0x108   : > { %551 = vst [vmem:[%s983_s5 + $0x18] sm:$0xff] %v547_v42 }
 0x109 PF: > { %s15_s20 = sadd.s32 1, %s796_s20   ;;  %s984_s18 = smov %s792_s19 }
 0x10a   : > { %p12_p7 = scmp.ge.s32.totalorder %s15_s20, 4   ;;  %s985_s19 = smov %s987_s21 }
 0x10c   :  { %14 = sbr.rel (!%p12_p7) target bundleno = 2 (0x2), region = 82 }

// kernel: autoencoder_forward.11
= control target key start
LH: loop header
LB: loop body
LE: loop exit
PB: predicated region body
PF: predicated region fallthrough
CT: control target
= control target key end

     0   :  { %s957_s18 = smov 0   ;;  %s959_s19 = smov 0   ;;  %s1109_s0 = inlined_call_operand.vmem [shape: bf16[8,512], index: 0, kind: input, shape index: {}]   ;;  %s1110_s1 = inlined_call_operand.vmem [shape: bf16[512,128], index: 1, kind: input, shape index: {}]   ;;  %s1111_s2 = inlined_call_operand.vmem [shape: f32[1,128], index: 2, kind: input, shape index: {}]   ;;  %s1112_s3 = inlined_call_operand.vmem [shape: f32[1,128], index: 3, kind: input, shape index: {}]   ;;  %s1113_s4 = inlined_call_operand.vmem [shape: f32[1,128], index: 4, kind: input, shape index: {}]   ;;  %s1114_s5 = inlined_call_operand.vmem [shape: f32[8,128], index: 5, kind: output, shape index: {}]  }
   0x1   :  { %s961_s20 = smov 0  }
   0x2 LB: > { %s27_s21 = sadd.s32 1, %s920_s19  ;;  %p705_p0 = scmp.ge.s32.totalorder %s924_s20, 1  ;;  %s924_s20 = sphi %s961_s20, %s15_s20   ;;  %s920_s19 = sphi %s959_s19, %s1116_s19   ;;  %s916_s18 = sphi %s957_s18, %s1115_s18  }
   0x3   : > { %p29_p1 = scmp.ge.s32.totalorder %s27_s21, 2  ;;  %p199_p2 = scmp.lt.s32.totalorder %s924_s20, 3 }
   0x5   : > { %s1118_s21 = smov (%p29_p1, %s27_s21), 0  ;;  %p200_p3 = pnand %p705_p0, %p199_p2 }
   0x6   : > { %p235_p4 = scmp.eq.s32.totalorder (!%p200_p3), %s916_s18, 0 }
   0x7   : > { %203 = sbr.rel (%p200_p3) target bundleno = 256 (0x100), region = 40 }
   0xc   : > { %240 = sbr.rel (!%p235_p4) target bundleno = 17 (0x11), region = 44  ;;  %v926_v0 = vmov (%p235_p4), 0.0  }
   0xd   : > { %241 = vst [vmem:[#allocation2] sm:$0x1] (%p235_p4), %v926_v0 }
   0xe   : > { %242 = vst [vmem:[#allocation3] sm:$0x1] (%p235_p4), %v926_v0 }
  0x11 PF: > { %p707_p5 = scmp.ne.s32.totalorder %s916_s18, 0 }
  0x13   : > { %245 = sbr.rel (%p707_p5) target bundleno = 211 (0xd3), region = 48 }
  0x18   : > { %v848_v1 = vld [vmem:[%s1110_s1 + $0x38] sm:$0xff]  ;;  %v847_v5 = vld [vmem:[%s1110_s1 + $0x30] sm:$0xff]  ;;  %v846_v9 = vld [vmem:[%s1110_s1 + $0x28] sm:$0xff] }
  0x19   : > { %v856_v2 = vld [vmem:[%s1110_s1 + $0x78] sm:$0xff]  ;;  %522 = vmatpush.bf16.msra.mxu0 %v848_v1  ;;  %v855_v6 = vld [vmem:[%s1110_s1 + $0x70] sm:$0xff]  ;;  %v854_v10 = vld [vmem:[%s1110_s1 + $0x68] sm:$0xff] }
  0x1a   : > { %v864_v3 = vld [vmem:[%s1110_s1 + $0xb8] sm:$0xff]  ;;  %535 = vmatpush.bf16.msra.mxu1 %v856_v2  ;;  %v863_v7 = vld [vmem:[%s1110_s1 + $0xb0] sm:$0xff]  ;;  %v862_v11 = vld [vmem:[%s1110_s1 + $0xa8] sm:$0xff] }
  0x1b   : > { %v872_v4 = vld [vmem:[%s1110_s1 + $0xf8] sm:$0xff]  ;;  %548 = vmatpush.bf16.msra.mxu2 %v864_v3  ;;  %v871_v8 = vld [vmem:[%s1110_s1 + $0xf0] sm:$0xff]  ;;  %v870_v12 = vld [vmem:[%s1110_s1 + $0xe8] sm:$0xff] }
  0x1c   : > { %561 = vmatpush.bf16.msra.mxu3 %v872_v4  ;;  %v845_v13 = vld [vmem:[%s1110_s1 + $0x20] sm:$0xff]  ;;  %v844_v17 = vld [vmem:[%s1110_s1 + $0x18] sm:$0xff]  ;;  %v843_v21 = vld [vmem:[%s1110_s1 + $0x10] sm:$0xff] }
  0x1d   : > { %523 = vmatpush.bf16.msra.mxu0 %v847_v5  ;;  %v853_v14 = vld [vmem:[%s1110_s1 + $0x60] sm:$0xff]  ;;  %v852_v18 = vld [vmem:[%s1110_s1 + $0x58] sm:$0xff]  ;;  %v851_v22 = vld [vmem:[%s1110_s1 + $0x50] sm:$0xff] }
  0x1e   : > { %536 = vmatpush.bf16.msra.mxu1 %v855_v6  ;;  %v861_v15 = vld [vmem:[%s1110_s1 + $0xa0] sm:$0xff]  ;;  %v860_v19 = vld [vmem:[%s1110_s1 + $0x98] sm:$0xff]  ;;  %v859_v23 = vld [vmem:[%s1110_s1 + $0x90] sm:$0xff] }
  0x1f   : > { %549 = vmatpush.bf16.msra.mxu2 %v863_v7  ;;  %v869_v16 = vld [vmem:[%s1110_s1 + $0xe0] sm:$0xff]  ;;  %v868_v20 = vld [vmem:[%s1110_s1 + $0xd8] sm:$0xff]  ;;  %v867_v24 = vld [vmem:[%s1110_s1 + $0xd0] sm:$0xff] }
  0x20   : > { %562 = vmatpush.bf16.msra.mxu3 %v871_v8  ;;  %v842_v25 = vld [vmem:[%s1110_s1 + $0x8] sm:$0xff]  ;;  %v246_v27 = vld [vmem:[%s1109_s0] sm:$0xff] }
  0x21   : > { %524 = vmatpush.bf16.msra.mxu0 %v846_v9  ;;  %v850_v26 = vld [vmem:[%s1110_s1 + $0x48] sm:$0xff]  ;;  %v318_v31 = vunpack.c.l.b16 %v246_v27  ;;  %v319_v32 = vunpack.c.h.b16 %v246_v27  ;;  %v841_v33 = vld [vmem:[%s1110_s1] sm:$0xff] }
  0x22   : > { %537 = vmatpush.bf16.msra.mxu1 %v854_v10  ;;  %v858_v28 = vld [vmem:[%s1110_s1 + $0x88] sm:$0xff]  ;;  %v849_v34 = vld [vmem:[%s1110_s1 + $0x40] sm:$0xff] }
  0x23   : > { %550 = vmatpush.bf16.msra.mxu2 %v862_v11  ;;  %v866_v29 = vld [vmem:[%s1110_s1 + $0xc8] sm:$0xff]  ;;  %v857_v37 = vld [vmem:[%s1110_s1 + $0x80] sm:$0xff]  ;;  %v322_v39 = vpack.c.b16 %v318_v31, %v318_v31  ;;  %v323_v40 = vpack.c.b16 %v319_v32, %v319_v32 }
  0x24   : > { %563 = vmatpush.bf16.msra.mxu3 %v870_v12  ;;  %v247_v30 = vld [vmem:[%s1109_s0 + $0x8] sm:$0xff]  ;;  %v865_v38 = vld [vmem:[%s1110_s1 + $0xc0] sm:$0xff] }
  0x25   : > { %525 = vmatpush.bf16.msra.mxu0 %v845_v13  ;;  %v320_v35 = vunpack.c.l.b16 %v247_v30  ;;  %v321_v36 = vunpack.c.h.b16 %v247_v30  ;;  %v898_v43 = vld [vmem:[%s1111_s2] ss:$0 sm:$0xff]  ;;  %v590_v5 = vld [vmem:[#allocation3] sm:$0x1] }
  0x26   : > { %538 = vmatpush.bf16.msra.mxu1 %v853_v14  ;;  %v581_v2 = vld [vmem:[#allocation2] sm:$0x1] }
  0x27   : > { %551 = vmatpush.bf16.msra.mxu2 %v861_v15  ;;  %v324_v41 = vpack.c.b16 %v320_v35, %v320_v35  ;;  %v325_v42 = vpack.c.b16 %v321_v36, %v321_v36 }
  0x28   : > { %564 = vmatpush.bf16.msra.mxu3 %v869_v16 }
  0x29   : > { %526 = vmatpush.bf16.msra.mxu0 %v844_v17 }
  0x2a   : > { %539 = vmatpush.bf16.msra.mxu1 %v852_v18 }
  0x2b   : > { %552 = vmatpush.bf16.msra.mxu2 %v860_v19 }
  0x2c   : > { %565 = vmatpush.bf16.msra.mxu3 %v868_v20 }
  0x2d   : > { %527 = vmatpush.bf16.msra.mxu0 %v843_v21 }
  0x2e   : > { %540 = vmatpush.bf16.msra.mxu1 %v851_v22 }
  0x2f   : > { %553 = vmatpush.bf16.msra.mxu2 %v859_v23 }
  0x30   : > { %566 = vmatpush.bf16.msra.mxu3 %v867_v24 }
  0x31   : > { %528 = vmatpush.bf16.msra.mxu0 %v842_v25 }
  0x32   : > { %541 = vmatpush.bf16.msra.mxu1 %v850_v26 }
  0x33   : > { %554 = vmatpush.bf16.msra.mxu2 %v858_v28 }
  0x34   : > { %567 = vmatpush.bf16.msra.mxu3 %v866_v29 }
  0x35   : > { %529 = vmatpush.bf16.msra.mxu0 %v841_v33 }
  0x36   : > { %542 = vmatpush.bf16.msra.mxu1 %v849_v34 }
  0x37   : > { %555 = vmatpush.bf16.msra.mxu2 %v857_v37 }
  0x38   : > { %568 = vmatpush.bf16.msra.mxu3 %v865_v38  ;;  %530 = vmatmul.bf16.vlgmr.msra.gmra.mxu0 %v322_v39 }
  0x39   : > { %543 = vmatmul.bf16.vlgmr.msra.gmra.mxu1 %v323_v40 }
  0x3a   : > { %556 = vmatmul.bf16.vlgmr.msra.gmra.mxu2 %v324_v41 }
  0x3b   : > { %569 = vmatmul.bf16.vlgmr.msra.gmra.mxu3 %v325_v42 }
  0xb5   : > { %v531_v44 = vpop.f32.mrf.mxu0 }
  0xb6   : > { %v544_v45 = vpop.f32.mrf.mxu1  ;;  %v532_v46 = vadd.f32 %v898_v43, %v531_v44 }
  0xb8   : > { %v545_v47 = vadd.f32 %v544_v45, %v532_v46 }
  0xbd   : > { %v557_v48 = vpop.f32.mrf.mxu2  ;;  %v533_v51 = vpop.f32.mrf.mxu0 }
  0xbe   : > { %v570_v49 = vpop.f32.mrf.mxu3  ;;  %v558_v50 = vadd.f32 %v557_v48, %v545_v47  ;;  %v546_v52 = vpop.f32.mrf.mxu1 }
  0xc0   : > { %v571_v53 = vadd.f32 %v570_v49, %v558_v50 }
  0xc2   : > { %v582_v54 = vrot.slane %v571_v53, 4  ;;  %v591_v55 = vmul.f32 %v571_v53, %v571_v53  ;;  %600 = vst [vmem:[%s1114_s5] sm:$0xff] %v571_v53 }
  0xc4   : > { %v583_v56 = vadd.f32 %v582_v54, %v571_v53  ;;  %v592_v57 = vrot.slane %v591_v55, 4 }
  0xc5   : > { %v559_v58 = vpop.f32.mrf.mxu2 }
  0xc6   : > { %v572_v59 = vpop.f32.mrf.mxu3  ;;  %v584_v60 = vrot.slane %v583_v56, 2  ;;  %v593_v61 = vadd.f32 %v592_v57, %v591_v55 }
  0xc8   : > { %v585_v62 = vadd.f32 %v584_v60, %v583_v56  ;;  %v594_v63 = vrot.slane %v593_v61, 2 }
  0xca   : > { %v586_v0 = vrot.slane %v585_v62, 1  ;;  %v595_v1 = vadd.f32 %v594_v63, %v593_v61 }
  0xcc   : > { %v587_v3 = vadd.f32 %v586_v0, %v585_v62  ;;  %v596_v4 = vrot.slane %v595_v1, 1 }
  0xce   : > { %v588_v6 = vadd.f32 %v587_v3, %v581_v2  ;;  %v597_v7 = vadd.f32 %v596_v4, %v595_v1 }
  0xd0   : > { %589 = vst [vmem:[#allocation2] sm:$0x1] %v588_v6  ;;  %v598_v8 = vadd.f32 %v597_v7, %v590_v5 }
  0xd2   : > { %599 = vst [vmem:[#allocation3] sm:$0x1] %v598_v8 }
  0xd3 PF: > { %p836_p6 = scmp.ne.s32.totalorder %s916_s18, 1 }
  0xd5   : > { %604 = sbr.rel (%p836_p6) target bundleno = 256 (0x100), region = 52 }
  0xda   : > { %v606_v9 = vld [vmem:[#allocation2] sm:$0x1]  ;;  %v607_v10 = vld [vmem:[#allocation3] sm:$0x1] }
  0xdb   : > { %v608_v11 = vmul.f32 0.125, %v606_v9  ;;  %v609_v12 = vmul.f32 0.125, %v607_v10  ;;  %v605_v22 = vld [vmem:[%s1114_s5] sm:$0xff] }
  0xdc   : > { %v627_v24 = vld [vmem:[%s1112_s3] sm:$0x1] }
  0xdd   : > { %v610_v13 = vmul.f32 %v608_v11, %v608_v11  ;;  %v624_v21 = vperm.slane %v608_v11, 0  ;;  %v899_v29 = vld [vmem:[%s1113_s4] ss:$0 sm:$0xff] }
  0xdf   : > { %v611_v14 = vsub.f32 %v609_v12, %v610_v13  ;;  %v626_v26 = vsub.f32 %v605_v22, %v624_v21 }
  0xe1   : > { %v612_v15 = vadd.f32 1e-05, %v611_v14 }
  0xe3   : > { %900 = vrsqrt.f32 %v612_v15  ;;  %vm619_vm0 = vweird.f32 %v612_v15 }
  0xe9   : > { %v901_v16 = vpop.eup %900 }
  0xea   : > { %v614_v17 = vmul.f32 %v901_v16, %v612_v15  ;;  %vm620_vm1 = vweird.f32 %v901_v16 }
  0xeb   : > { %vm621_vm2 = vmor %vm619_vm0, %vm620_vm1 }
  0xec   : > { %v615_v18 = vmul.f32 %v901_v16, %v614_v17 }
  0xee   : > { %v616_v19 = vmul.f32 0.5, %v615_v18 }
  0xf0   : > { %v617_v20 = vsub.f32 1.5, %v616_v19 }
  0xf2   : > { %v618_v23 = vmul.f32 %v901_v16, %v617_v20 }
  0xf4   : > { %v622_v25 = vsel %vm621_vm2, %v901_v16, %v618_v23 }
  0xf5   : > { %v628_v27 = vmul.f32 %v627_v24, %v622_v25 }
  0xf7   : > { %v630_v28 = vperm.slane %v628_v27, 0 }
  0xf9   : > { %v632_v30 = vmul.f32 %v630_v28, %v626_v26 }
  0xfb   : > { %v637_v31 = vadd.f32 %v899_v29, %v632_v30 }
  0xfd   : > { %v638_v32 = vmax.f32 %v637_v31, 0.0 }
  0xff   : > { %639 = vst [vmem:[%s1114_s5] sm:$0xff] %v638_v32 }
 0x100 PF: > { %s15_s20 = sadd.s32 1, %s924_s20   ;;  %s1115_s18 = smov %s920_s19 }
 0x101   : > { %p12_p7 = scmp.ge.s32.totalorder %s15_s20, 4   ;;  %s1116_s19 = smov %s1118_s21 }
 0x103   :  { %14 = sbr.rel (!%p12_p7) target bundleno = 2 (0x2), region = 82 }

// kernel: autoencoder_forward.12
= control target key start
LH: loop header
LB: loop body
LE: loop exit
PB: predicated region body
PF: predicated region fallthrough
CT: control target
= control target key end

     0   :  { %s528_s18 = smov 0   ;;  %s530_s19 = smov 0   ;;  %s590_s0 = inlined_call_operand.vmem [shape: bf16[8,48], index: 0, kind: input, shape index: {}]   ;;  %s591_s1 = inlined_call_operand.vmem [shape: bf16[48,128], index: 1, kind: input, shape index: {}]   ;;  %s592_s2 = inlined_call_operand.vmem [shape: f32[1,128], index: 2, kind: input, shape index: {}]   ;;  %s593_s3 = inlined_call_operand.vmem [shape: f32[1,128], index: 3, kind: input, shape index: {}]   ;;  %s594_s4 = inlined_call_operand.vmem [shape: f32[1,128], index: 4, kind: input, shape index: {}]   ;;  %s595_s5 = inlined_call_operand.vmem [shape: f32[8,128], index: 5, kind: output, shape index: {}]  }
   0x1   :  { %s532_s20 = smov 0  }
   0x2 LB: > { %s27_s21 = sadd.s32 1, %s491_s19  ;;  %p420_p0 = scmp.ge.s32.totalorder %s495_s20, 1  ;;  %s495_s20 = sphi %s532_s20, %s15_s20   ;;  %s491_s19 = sphi %s530_s19, %s597_s19   ;;  %s487_s18 = sphi %s528_s18, %s596_s18  }
   0x3   : > { %p29_p1 = scmp.ge.s32.totalorder %s27_s21, 2  ;;  %p198_p2 = scmp.lt.s32.totalorder %s495_s20, 3 }
   0x5   : > { %s599_s21 = smov (%p29_p1, %s27_s21), 0  ;;  %p199_p3 = pnand %p420_p0, %p198_p2 }
   0x6   : > { %p233_p4 = scmp.eq.s32.totalorder (!%p199_p3), %s487_s18, 0 }
   0x7   : > { %202 = sbr.rel (%p199_p3) target bundleno = 224 (0xe0), region = 40 }
   0xc   : > { %238 = sbr.rel (!%p233_p4) target bundleno = 17 (0x11), region = 44  ;;  %v497_v0 = vmov (%p233_p4), 0.0  }
   0xd   : > { %239 = vst [vmem:[#allocation2] sm:$0x1] (%p233_p4), %v497_v0 }
   0xe   : > { %240 = vst [vmem:[#allocation3] sm:$0x1] (%p233_p4), %v497_v0 }
  0x11 PF: > { %p422_p5 = scmp.ne.s32.totalorder %s487_s18, 0 }
  0x13   : > { %243 = sbr.rel (%p422_p5) target bundleno = 181 (0xb5), region = 48 }
  0x18   : > { %v443_v1 = vld [vmem:[%s591_s1 + $0x10] sm:$0xff]  ;;  %v442_v2 = vld [vmem:[%s591_s1 + $0x8] sm:$0xff]  ;;  %v441_v3 = vld [vmem:[%s591_s1] sm:$0xff]  ;;  %vm273_vm0 = vcmask 392192  }
  0x19   : > { %282 = vmatpush.bf16.msra.mxu0 %v443_v1  ;;  %v244_v4 = vld [vmem:[%s590_s0] sm:$0xf] }
  0x1a   : > { %v469_v5 = vld [vmem:[%s592_s2] ss:$0 sm:$0xff]  ;;  %v306_v22 = vld [vmem:[#allocation3] sm:$0x1] }
  0x1b   : > { %v297_v19 = vld [vmem:[#allocation2] sm:$0x1] }
  0x1d   : > { %283 = vmatpush.bf16.msra.mxu0 %v442_v2 }
  0x21   : > { %284 = vmatpush.bf16.msra.mxu0 %v441_v3 }
  0x24   : > { %435 = vmatmul.msk.bf16.vlgmr.msra.gmra.mxu0 %vm273_vm0, %v244_v4 }
  0xa1   : > { %v286_v6 = vpop.f32.mrf.mxu0 }
  0xa2   : > { %v287_v7 = vadd.f32 %v469_v5, %v286_v6 }
  0xa4   : > { %v298_v8 = vrot.slane %v287_v7, 4  ;;  %v307_v9 = vmul.f32 %v287_v7, %v287_v7  ;;  %316 = vst [vmem:[%s595_s5] sm:$0xff] %v287_v7 }
  0xa6   : > { %v299_v10 = vadd.f32 %v298_v8, %v287_v7  ;;  %v308_v11 = vrot.slane %v307_v9, 4 }
  0xa8   : > { %v300_v12 = vrot.slane %v299_v10, 2  ;;  %v309_v13 = vadd.f32 %v308_v11, %v307_v9 }
  0xa9   : > { %v288_v14 = vpop.f32.mrf.mxu0 }
  0xaa   : > { %v301_v15 = vadd.f32 %v300_v12, %v299_v10  ;;  %v310_v16 = vrot.slane %v309_v13, 2 }
  0xac   : > { %v302_v17 = vrot.slane %v301_v15, 1  ;;  %v311_v18 = vadd.f32 %v310_v16, %v309_v13 }
  0xae   : > { %v303_v20 = vadd.f32 %v302_v17, %v301_v15  ;;  %v312_v21 = vrot.slane %v311_v18, 1 }
  0xb0   : > { %v304_v23 = vadd.f32 %v303_v20, %v297_v19  ;;  %v313_v24 = vadd.f32 %v312_v21, %v311_v18 }
  0xb2   : > { %305 = vst [vmem:[#allocation2] sm:$0x1] %v304_v23  ;;  %v314_v25 = vadd.f32 %v313_v24, %v306_v22 }
  0xb4   : > { %315 = vst [vmem:[#allocation3] sm:$0x1] %v314_v25 }
  0xb5 PF: > { %p436_p6 = scmp.ne.s32.totalorder %s487_s18, 1 }
  0xb7   : > { %320 = sbr.rel (%p436_p6) target bundleno = 224 (0xe0), region = 52 }
  0xbc   : > { %v322_v26 = vld [vmem:[#allocation2] sm:$0x1]  ;;  %v323_v27 = vld [vmem:[#allocation3] sm:$0x1] }
  0xbd   : > { %v324_v28 = vmul.f32 0.125, %v322_v26  ;;  %v325_v29 = vmul.f32 0.125, %v323_v27  ;;  %v321_v39 = vld [vmem:[%s595_s5] sm:$0xff] }
  0xbe   : > { %v343_v41 = vld [vmem:[%s593_s3] sm:$0x1] }
  0xbf   : > { %v326_v30 = vmul.f32 %v324_v28, %v324_v28  ;;  %v340_v38 = vperm.slane %v324_v28, 0  ;;  %v470_v46 = vld [vmem:[%s594_s4] ss:$0 sm:$0xff] }
  0xc1   : > { %v327_v31 = vsub.f32 %v325_v29, %v326_v30  ;;  %v342_v43 = vsub.f32 %v321_v39, %v340_v38 }
  0xc3   : > { %v328_v32 = vadd.f32 1e-05, %v327_v31 }
  0xc5   : > { %471 = vrsqrt.f32 %v328_v32  ;;  %vm335_vm1 = vweird.f32 %v328_v32 }
  0xcb   : > { %v472_v33 = vpop.eup %471 }
  0xcc   : > { %v330_v34 = vmul.f32 %v472_v33, %v328_v32  ;;  %vm336_vm2 = vweird.f32 %v472_v33 }
  0xcd   : > { %vm337_vm3 = vmor %vm335_vm1, %vm336_vm2 }
  0xce   : > { %v331_v35 = vmul.f32 %v472_v33, %v330_v34 }
  0xd0   : > { %v332_v36 = vmul.f32 0.5, %v331_v35 }
  0xd2   : > { %v333_v37 = vsub.f32 1.5, %v332_v36 }
  0xd4   : > { %v334_v40 = vmul.f32 %v472_v33, %v333_v37 }
  0xd6   : > { %v338_v42 = vsel %vm337_vm3, %v472_v33, %v334_v40 }
  0xd7   : > { %v344_v44 = vmul.f32 %v343_v41, %v338_v42 }
  0xd9   : > { %v346_v45 = vperm.slane %v344_v44, 0 }
  0xdb   : > { %v348_v47 = vmul.f32 %v346_v45, %v342_v43 }
  0xdd   : > { %v353_v48 = vadd.f32 %v470_v46, %v348_v47 }
  0xdf   : > { %354 = vst [vmem:[%s595_s5] sm:$0xff] %v353_v48 }
  0xe0 PF: > { %s15_s20 = sadd.s32 1, %s495_s20   ;;  %s596_s18 = smov %s491_s19 }
  0xe1   : > { %p12_p7 = scmp.ge.s32.totalorder %s15_s20, 4   ;;  %s597_s19 = smov %s599_s21 }
  0xe3   :  { %14 = sbr.rel (!%p12_p7) target bundleno = 2 (0x2), region = 82 }

// kernel: autoencoder_forward.13
= control target key start
LH: loop header
LB: loop body
LE: loop exit
PB: predicated region body
PF: predicated region fallthrough
CT: control target
= control target key end

     0   :  { %vm34_vm0 = vcmask 261120   ;;  %v185_v62 = vlaneseq  ;;  %vm204_vm4 = vcmask 7168   ;;  %s689_s1 = inlined_call_operand.vmem [shape: f32[32,512], index: 1, kind: input, shape index: {}]   ;;  %s690_s0 = inlined_call_operand.vmem [shape: f32[8,32], index: 0, kind: input, shape index: {}]   ;;  %s691_s2 = inlined_call_operand.vmem [shape: f32[512,32], index: 2, kind: input, shape index: {}]   ;;  %s692_s3 = inlined_call_operand.vmem [shape: s32[8,1], index: 3, kind: output, shape index: {0}]   ;;  %s693_s4 = inlined_call_operand.vmem [shape: f32[8,32], index: 4, kind: output, shape index: {1}]  }
   0x1   :  { %v31_v0 = vld [vmem:[%s689_s1 + $0x70] sm:$0xff]  ;;  %v32_v1 = vld [vmem:[%s689_s1 + $0x78] sm:$0xff]  ;;  %v29_v4 = vld [vmem:[%s689_s1 + $0x60] sm:$0xff] }
   0x2   :  { %v27_v2 = vld [vmem:[%s689_s1 + $0x50] sm:$0xff]  ;;  %145 = vmatpush.msra.mxu2 %v31_v0  ;;  %165 = vmatpush.msra.mxu3 %v32_v1  ;;  %v28_v3 = vld [vmem:[%s689_s1 + $0x58] sm:$0xff]  ;;  %v30_v5 = vld [vmem:[%s689_s1 + $0x68] sm:$0xff]  ;;  %v52_v6 = vmul.f32 %v31_v0, %v31_v0  ;;  %v53_v7 = vmul.f32 %v32_v1, %v32_v1  ;;  %v50_v32 = vmul.f32 %v29_v4, %v29_v4 }
   0x3   :  { %v48_v8 = vmul.f32 %v27_v2, %v27_v2  ;;  %105 = vmatpush.msra.mxu0 %v29_v4  ;;  %125 = vmatpush.msra.mxu1 %v30_v5  ;;  %v23_v9 = vld [vmem:[%s689_s1 + $0x30] sm:$0xff]  ;;  %v24_v10 = vld [vmem:[%s689_s1 + $0x38] sm:$0xff]  ;;  %v25_v11 = vld [vmem:[%s689_s1 + $0x40] sm:$0xff]  ;;  %v49_v12 = vmul.f32 %v28_v3, %v28_v3  ;;  %v51_v39 = vmul.f32 %v30_v5, %v30_v5 }
   0x4   :  { %146 = vmatpush.msra.mxu2 %v27_v2  ;;  %166 = vmatpush.msra.mxu3 %v28_v3  ;;  %v44_v13 = vmul.f32 %v23_v9, %v23_v9  ;;  %v45_v14 = vmul.f32 %v24_v10, %v24_v10  ;;  %v26_v15 = vld [vmem:[%s689_s1 + $0x48] sm:$0xff]  ;;  %v19_v16 = vld [vmem:[%s689_s1 + $0x10] sm:$0xff]  ;;  %v20_v17 = vld [vmem:[%s689_s1 + $0x18] sm:$0xff]  ;;  %v46_v18 = vmul.f32 %v25_v11, %v25_v11 }
   0x5   :  { %106 = vmatpush.msra.mxu0 %v25_v11  ;;  %126 = vmatpush.msra.mxu1 %v26_v15  ;;  %v40_v19 = vmul.f32 %v19_v16, %v19_v16  ;;  %v41_v20 = vmul.f32 %v20_v17, %v20_v17  ;;  %v21_v21 = vld [vmem:[%s689_s1 + $0x20] sm:$0xff]  ;;  %v22_v22 = vld [vmem:[%s689_s1 + $0x28] sm:$0xff]  ;;  %v47_v33 = vmul.f32 %v26_v15, %v26_v15 }
   0x6   :  { %v16_v23 = vld [vmem:[%s690_s0] sm:$0xff]  ;;  %147 = vmatpush.msra.mxu2 %v23_v9  ;;  %167 = vmatpush.msra.mxu3 %v24_v10  ;;  %v42_v24 = vmul.f32 %v21_v21, %v21_v21  ;;  %v43_v25 = vmul.f32 %v22_v22, %v22_v22  ;;  %v18_v31 = vld [vmem:[%s689_s1 + $0x8] sm:$0xff] }
   0x7   :  { %v17_v26 = vld [vmem:[%s689_s1] sm:$0xff]  ;;  %v33_v27 = vmul.f32 %v16_v23, %v16_v23  ;;  %v72_v28 = vadd.f32 %v44_v13, %v40_v19  ;;  %v81_v29 = vadd.f32 %v45_v14, %v41_v20  ;;  %107 = vmatpush.msra.mxu0 %v21_v21  ;;  %127 = vmatpush.msra.mxu1 %v22_v22 }
   0x8   :  { %v38_v30 = vmul.f32 %v17_v26, %v17_v26  ;;  %148 = vmatpush.msra.mxu2 %v19_v16  ;;  %168 = vmatpush.msra.mxu3 %v20_v17  ;;  %v39_v34 = vmul.f32 %v18_v31, %v18_v31 }
   0x9   :  { %v73_v35 = vadd.f32 %v72_v28, %v48_v8  ;;  %v82_v36 = vadd.f32 %v81_v29, %v49_v12  ;;  %373 = vmatmul.msk.f32.vlgmr.msra.gmra.mxu2 %vm34_vm0, %v16_v23  ;;  %374 = vmatmul.msk.f32.vlgmr.msra.gmra.mxu3 %vm34_vm0, %v16_v23  ;;  %v35_v38 = vsel %vm34_vm0, %v33_v27, 0.0 }
   0xa   :  { %v54_v37 = vadd.f32 %v42_v24, %v38_v30  ;;  %108 = vmatpush.msra.mxu0 %v17_v26  ;;  %v63_v40 = vadd.f32 %v43_v25, %v39_v34  ;;  %128 = vmatpush.msra.mxu1 %v18_v31 }
   0xb   :  { %v74_v41 = vadd.f32 %v73_v35, %v52_v6  ;;  %v83_v42 = vadd.f32 %v82_v36, %v53_v7  ;;  %371 = vmatmul.msk.f32.vlgmr.msra.gmra.mxu0 %vm34_vm0, %v16_v23  ;;  %372 = vmatmul.msk.f32.vlgmr.msra.gmra.mxu1 %vm34_vm0, %v16_v23  ;;  %v468_v6 = vand.u32 127, %v185_v62  ;;  %v233_v35 = vld [vmem:[%s691_s2 + $0x78] sm:$0xff]  ;;  %v275_v62 = vld [vmem:[%s691_s2 + $0x1c8] sm:$0xff] }
   0xc   :  { %v55_v43 = vadd.f32 %v54_v37, %v46_v18  ;;  %v64_v44 = vadd.f32 %v63_v40, %v47_v33  ;;  %36 = vadd.xlane.f32.xlu0 %v35_v38  ;;  %v249_v36 = vld [vmem:[%s691_s2 + $0xf8] sm:$0xff]  ;;  %282 = vmatpush.msrb.mxu0 %v233_v35  ;;  %v248_v40 = vld [vmem:[%s691_s2 + $0xf0] sm:$0xff]  ;;  %v251_v35 = vld [vmem:[%s691_s2 + $0x108] sm:$0xff] }
   0xd   :  { %v75_v49 = vrot.slane %v74_v41, 4  ;;  %v84_v52 = vrot.slane %v83_v42, 4  ;;  %v471_v17 = vadd.s32 128, %v468_v6  ;;  %v474_v26 = vadd.s32 256, %v468_v6  ;;  %v265_v37 = vld [vmem:[%s691_s2 + $0x178] sm:$0xff]  ;;  %302 = vmatpush.msrb.mxu1 %v249_v36  ;;  %v267_v36 = vld [vmem:[%s691_s2 + $0x188] sm:$0xff] }
   0xe   :  { %v56_v45 = vadd.f32 %v55_v43, %v50_v32  ;;  %v65_v46 = vadd.f32 %v64_v44, %v51_v39  ;;  %v479_v29 = vadd.s32 384, %v468_v6  ;;  %v281_v38 = vld [vmem:[%s691_s2 + $0x1f8] sm:$0xff]  ;;  %v232_v39 = vld [vmem:[%s691_s2 + $0x70] sm:$0xff]  ;;  %322 = vmatpush.msrb.mxu2 %v265_v37  ;;  %v231_v43 = vld [vmem:[%s691_s2 + $0x68] sm:$0xff] }
   0xf   :  { %v76_v53 = vadd.f32 %v75_v49, %v74_v41  ;;  %v85_v56 = vadd.f32 %v84_v52, %v83_v42  ;;  %342 = vmatpush.msrb.mxu3 %v281_v38  ;;  %v264_v41 = vld [vmem:[%s691_s2 + $0x170] sm:$0xff]  ;;  %283 = vmatpush.msrb.mxu0 %v232_v39  ;;  %v247_v44 = vld [vmem:[%s691_s2 + $0xe8] sm:$0xff]  ;;  %v262_v49 = vld [vmem:[%s691_s2 + $0x160] sm:$0xff] }
  0x10   :  { %v57_v47 = vrot.slane %v56_v45, 4  ;;  %v66_v48 = vrot.slane %v65_v46, 4  ;;  %v280_v42 = vld [vmem:[%s691_s2 + $0x1f0] sm:$0xff]  ;;  %303 = vmatpush.msrb.mxu1 %v248_v40  ;;  %323 = vmatpush.msrb.mxu2 %v264_v41  ;;  %v245_v52 = vld [vmem:[%s691_s2 + $0xd8] sm:$0xff]  ;;  %v218_v37 = vld [vmem:[%s691_s2] sm:$0xff]  ;;  %v386_v41 = vmov 1.0  }
  0x11   :  { %v77_v57 = vrot.slane %v76_v53, 2  ;;  %v86_v60 = vrot.slane %v85_v56, 2  ;;  %343 = vmatpush.msrb.mxu3 %v280_v42  ;;  %284 = vmatpush.msrb.mxu0 %v231_v43  ;;  %v234_v38 = vld [vmem:[%s691_s2 + $0x80] sm:$0xff] }
  0x12   :  { %v58_v50 = vadd.f32 %v57_v47, %v56_v45  ;;  %v67_v51 = vadd.f32 %v66_v48, %v65_v46  ;;  %v263_v45 = vld [vmem:[%s691_s2 + $0x168] sm:$0xff]  ;;  %v230_v47 = vld [vmem:[%s691_s2 + $0x60] sm:$0xff]  ;;  %304 = vmatpush.msrb.mxu1 %v247_v44 }
  0x13   :  { %v78_v61 = vadd.f32 %v77_v57, %v76_v53  ;;  %v87_v2 = vadd.f32 %v86_v60, %v85_v56  ;;  %v279_v46 = vld [vmem:[%s691_s2 + $0x1e8] sm:$0xff]  ;;  %v246_v48 = vld [vmem:[%s691_s2 + $0xe0] sm:$0xff]  ;;  %324 = vmatpush.msrb.mxu2 %v263_v45  ;;  %285 = vmatpush.msrb.mxu0 %v230_v47  ;;  %v261_v53 = vld [vmem:[%s691_s2 + $0x158] sm:$0xff] }
  0x14   :  { %v59_v54 = vrot.slane %v58_v50, 2  ;;  %v68_v55 = vrot.slane %v67_v51, 2  ;;  %344 = vmatpush.msrb.mxu3 %v279_v46  ;;  %305 = vmatpush.msrb.mxu1 %v246_v48  ;;  %v244_v56 = vld [vmem:[%s691_s2 + $0xd0] sm:$0xff]  ;;  %v243_v60 = vld [vmem:[%s691_s2 + $0xc8] sm:$0xff]  ;;  %v250_v39 = vld [vmem:[%s691_s2 + $0x100] sm:$0xff] }
  0x15   :  { %v79_v5 = vrot.slane %v78_v61, 1  ;;  %v88_v13 = vrot.slane %v87_v2, 1  ;;  %325 = vmatpush.msrb.mxu2 %v262_v49  ;;  %v260_v57 = vld [vmem:[%s691_s2 + $0x150] sm:$0xff]  ;;  %v266_v40 = vld [vmem:[%s691_s2 + $0x180] sm:$0xff] }
  0x16   :  { %v60_v58 = vadd.f32 %v59_v54, %v58_v50  ;;  %v69_v59 = vadd.f32 %v68_v55, %v67_v51  ;;  %v278_v50 = vld [vmem:[%s691_s2 + $0x1e0] sm:$0xff]  ;;  %v229_v51 = vld [vmem:[%s691_s2 + $0x58] sm:$0xff]  ;;  %v228_v55 = vld [vmem:[%s691_s2 + $0x50] sm:$0xff]  ;;  %306 = vmatpush.msrb.mxu1 %v245_v52 }
  0x17   :  { %v80_v14 = vadd.f32 %v79_v5, %v78_v61  ;;  %v89_v23 = vadd.f32 %v88_v13, %v87_v2  ;;  %v277_v54 = vld [vmem:[%s691_s2 + $0x1d8] sm:$0xff]  ;;  %345 = vmatpush.msrb.mxu3 %v278_v50  ;;  %286 = vmatpush.msrb.mxu0 %v229_v51  ;;  %v259_v61 = vld [vmem:[%s691_s2 + $0x148] sm:$0xff]  ;;  %v274_v2 = vld [vmem:[%s691_s2 + $0x1c0] sm:$0xff] }
  0x18   :  { %v61_v63 = vrot.slane %v60_v58, 1  ;;  %v70_v0 = vrot.slane %v69_v59, 1  ;;  %326 = vmatpush.msrb.mxu2 %v261_v53  ;;  %307 = vmatpush.msrb.mxu1 %v244_v56  ;;  %v257_v5 = vld [vmem:[%s691_s2 + $0x138] sm:$0xff]  ;;  %v239_v13 = vld [vmem:[%s691_s2 + $0xa8] sm:$0xff] }
  0x19   :  { %346 = vmatpush.msrb.mxu3 %v277_v54  ;;  %287 = vmatpush.msrb.mxu0 %v228_v55 }
  0x1a   :  { %v62_v9 = vadd.f32 %v61_v63, %v60_v58  ;;  %v71_v10 = vadd.f32 %v70_v0, %v69_v59  ;;  %v276_v58 = vld [vmem:[%s691_s2 + $0x1d0] sm:$0xff]  ;;  %v227_v59 = vld [vmem:[%s691_s2 + $0x48] sm:$0xff]  ;;  %327 = vmatpush.msrb.mxu2 %v260_v57  ;;  %v226_v63 = vld [vmem:[%s691_s2 + $0x40] sm:$0xff]  ;;  %308 = vmatpush.msrb.mxu1 %v243_v60 }
  0x1b   :  { %347 = vmatpush.msrb.mxu3 %v276_v58  ;;  %v242_v0 = vld [vmem:[%s691_s2 + $0xc0] sm:$0xff]  ;;  %288 = vmatpush.msrb.mxu0 %v227_v59 }
  0x1c   :  { %328 = vmatpush.msrb.mxu2 %v259_v61  ;;  %309 = vmatpush.msrb.mxu1 %v242_v0 }
  0x1d   :  { %348 = vmatpush.msrb.mxu3 %v275_v62  ;;  %289 = vmatpush.msrb.mxu0 %v226_v63 }
  0x1f   :  { %349 = vmatpush.msrb.mxu3 %v274_v2 }
  0x7f   :  { %v37_v1 = vpop.xlane.xlu0 %36 }
  0x88   :  { %v110_v3 = vpop.f32.mrf.mxu0  ;;  %v130_v4 = vpop.f32.mrf.mxu1 }
  0x89   :  { %v173_v7 = vmul.f32 2.0, %v110_v3  ;;  %v174_v8 = vmul.f32 2.0, %v130_v4  ;;  %v225_v3 = vld [vmem:[%s691_s2 + $0x38] sm:$0xff] }
  0x8a   :  { %v241_v4 = vld [vmem:[%s691_s2 + $0xb8] sm:$0xff]  ;;  %290 = vmatpush.msrb.mxu0 %v225_v3 }
  0x8b   :  { %v177_v11 = vsub.f32 %v37_v1, %v173_v7  ;;  %v178_v12 = vsub.f32 %v37_v1, %v174_v8  ;;  %v273_v7 = vld [vmem:[%s691_s2 + $0x1b8] sm:$0xff]  ;;  %v224_v8 = vld [vmem:[%s691_s2 + $0x30] sm:$0xff]  ;;  %310 = vmatpush.msrb.mxu1 %v241_v4 }
  0x8c   :  { %v150_v15 = vpop.f32.mrf.mxu2  ;;  %v170_v16 = vpop.f32.mrf.mxu3  ;;  %350 = vmatpush.msrb.mxu3 %v273_v7  ;;  %291 = vmatpush.msrb.mxu0 %v224_v8 }
  0x8d   :  { %v181_v18 = vadd.f32 %v177_v11, %v62_v9  ;;  %v182_v19 = vadd.f32 %v178_v12, %v71_v10  ;;  %v175_v20 = vmul.f32 2.0, %v150_v15  ;;  %v176_v21 = vmul.f32 2.0, %v170_v16  ;;  %v240_v9 = vld [vmem:[%s691_s2 + $0xb0] sm:$0xff]  ;;  %v223_v12 = vld [vmem:[%s691_s2 + $0x28] sm:$0xff]  ;;  %v222_v16 = vld [vmem:[%s691_s2 + $0x20] sm:$0xff] }
  0x8e   :  { %v256_v10 = vld [vmem:[%s691_s2 + $0x130] sm:$0xff]  ;;  %311 = vmatpush.msrb.mxu1 %v240_v9  ;;  %v271_v15 = vld [vmem:[%s691_s2 + $0x1a8] sm:$0xff]  ;;  %292 = vmatpush.msrb.mxu0 %v223_v12 }
  0x8f   :  { %v179_v22 = vsub.f32 %v37_v1, %v175_v20  ;;  %v180_v24 = vsub.f32 %v37_v1, %v176_v21  ;;  %vm188_vm1 = vcmp.le.f32.partialorder %v181_v18, %v182_v19  ;;  %v258_v1 = vld [vmem:[%s691_s2 + $0x140] sm:$0xff]  ;;  %v272_v11 = vld [vmem:[%s691_s2 + $0x1b0] sm:$0xff] }
  0x90   :  { %v189_v25 = vsel %vm188_vm1, %v181_v18, %v182_v19  ;;  %v190_v28 = vsel %vm188_vm1, %v468_v6, %v471_v17  ;;  %329 = vmatpush.msrb.mxu2 %v258_v1  ;;  %351 = vmatpush.msrb.mxu3 %v272_v11  ;;  %v238_v18 = vld [vmem:[%s691_s2 + $0xa0] sm:$0xff] }
  0x91   :  { %v183_v27 = vadd.f32 %v179_v22, %v80_v14  ;;  %v184_v30 = vadd.f32 %v180_v24, %v89_v23  ;;  %v255_v14 = vld [vmem:[%s691_s2 + $0x128] sm:$0xff]  ;;  %312 = vmatpush.msrb.mxu1 %v239_v13  ;;  %v254_v19 = vld [vmem:[%s691_s2 + $0x120] sm:$0xff]  ;;  %293 = vmatpush.msrb.mxu0 %v222_v16  ;;  %v221_v22 = vld [vmem:[%s691_s2 + $0x18] sm:$0xff] }
  0x92   :  { %330 = vmatpush.msrb.mxu2 %v257_v5  ;;  %352 = vmatpush.msrb.mxu3 %v271_v15  ;;  %v270_v20 = vld [vmem:[%s691_s2 + $0x1a0] sm:$0xff]  ;;  %v237_v23 = vld [vmem:[%s691_s2 + $0x98] sm:$0xff] }
  0x93   :  { %vm192_vm2 = vcmp.le.f32.partialorder %v189_v25, %v183_v27  ;;  %313 = vmatpush.msrb.mxu1 %v238_v18  ;;  %v253_v24 = vld [vmem:[%s691_s2 + $0x118] sm:$0xff]  ;;  %294 = vmatpush.msrb.mxu0 %v221_v22 }
  0x94   :  { %v193_v31 = vsel %vm192_vm2, %v189_v25, %v183_v27  ;;  %v194_v32 = vsel %vm192_vm2, %v190_v28, %v474_v26  ;;  %331 = vmatpush.msrb.mxu2 %v256_v10  ;;  %v269_v25 = vld [vmem:[%s691_s2 + $0x198] sm:$0xff]  ;;  %353 = vmatpush.msrb.mxu3 %v270_v20  ;;  %v220_v27 = vld [vmem:[%s691_s2 + $0x10] sm:$0xff] }
  0x95   :  { %vm196_vm3 = vcmp.le.f32.partialorder %v193_v31, %v184_v30  ;;  %v236_v28 = vld [vmem:[%s691_s2 + $0x90] sm:$0xff]  ;;  %314 = vmatpush.msrb.mxu1 %v237_v23  ;;  %295 = vmatpush.msrb.mxu0 %v220_v27 }
  0x96   :  { %v197_v33 = vsel %vm196_vm3, %v193_v31, %v184_v30  ;;  %v483_v34 = vsel %vm196_vm3, %v194_v32, %v479_v29  ;;  %332 = vmatpush.msrb.mxu2 %v255_v14  ;;  %v252_v30 = vld [vmem:[%s691_s2 + $0x110] sm:$0xff]  ;;  %354 = vmatpush.msrb.mxu3 %v269_v25  ;;  %v219_v32 = vld [vmem:[%s691_s2 + $0x8] sm:$0xff] }
  0x97   :  { %199 = vmin.index.xlane.f32.xlu0 %v197_v33  ;;  %v268_v31 = vld [vmem:[%s691_s2 + $0x190] sm:$0xff]  ;;  %v235_v33 = vld [vmem:[%s691_s2 + $0x88] sm:$0xff]  ;;  %315 = vmatpush.msrb.mxu1 %v236_v28 }
  0x98   :  { %333 = vmatpush.msrb.mxu2 %v254_v19  ;;  %355 = vmatpush.msrb.mxu3 %v268_v31 }
  0x99   :  { %296 = vmatpush.msrb.mxu0 %v219_v32  ;;  %316 = vmatpush.msrb.mxu1 %v235_v33 }
  0x9a   :  { %334 = vmatpush.msrb.mxu2 %v253_v24  ;;  %356 = vmatpush.msrb.mxu3 %v267_v36 }
  0x9b   :  { %297 = vmatpush.msrb.mxu0 %v218_v37  ;;  %317 = vmatpush.msrb.mxu1 %v234_v38 }
  0x9c   :  { %335 = vmatpush.msrb.mxu2 %v252_v30  ;;  %357 = vmatpush.msrb.mxu3 %v266_v40 }
  0x9e   :  { %336 = vmatpush.msrb.mxu2 %v251_v35 }
  0xa0   :  { %337 = vmatpush.msrb.mxu2 %v250_v39 }
 0x10a   :  { %v200_v21 = vpop.xlane.xlu0 %199 }
 0x10b   :  { %385 = vset.pattern.permute.xlu0 %v200_v21  ;;  %384 = vset.pattern.permute.xlu1 %v200_v21 }
 0x113   :  { %202 = vperm.xlu1 %384, %v483_v34  }
 0x185   :  { %v203_v34 = vpop.permute.xlu1 %202 }
 0x186   :  { %205 = vst.msk [vmem:[%s692_s3] sm:$0xff] %vm204_vm4, %v203_v34  ;;  %vm206_vm5 = vcmp.eq.s32.totalorder %v468_v6, %v203_v34  ;;  %vm207_vm6 = vcmp.eq.s32.totalorder %v471_v17, %v203_v34  ;;  %vm208_vm7 = vcmp.eq.s32.totalorder %v474_v26, %v203_v34  ;;  %vm209_vm8 = vcmp.eq.s32.totalorder %v479_v29, %v203_v34 }
 0x187   :  { %379 = vmatmul.msk.f32.vlgmr.msrb.gmra.mxu0 %vm206_vm5, %v386_v41  ;;  %380 = vmatmul.msk.f32.vlgmr.msrb.gmra.mxu1 %vm207_vm6, %v386_v41 }
 0x188   :  { %381 = vmatmul.msk.f32.vlgmr.msrb.gmra.mxu2 %vm208_vm7, %v386_v41  ;;  %382 = vmatmul.msk.f32.vlgmr.msrb.gmra.mxu3 %vm209_vm8, %v386_v41 }
 0x204   :  { %v299_v42 = vpop.f32.mrf.mxu0  ;;  %v319_v43 = vpop.f32.mrf.mxu1 }
 0x205   :  { %v320_v44 = vadd.f32 %v319_v43, %v299_v42 }
 0x20b   :  { %v339_v45 = vpop.f32.mrf.mxu2  ;;  %v359_v47 = vpop.f32.mrf.mxu3 }
 0x20c   :  { %v340_v46 = vadd.f32 %v339_v45, %v320_v44 }
 0x20e   :  { %v360_v48 = vadd.f32 %v359_v47, %v340_v46 }
 0x210   :  { %362 = vst.msk [vmem:[%s693_s4] sm:$0xff] %vm34_vm0, %v360_v48 }

// kernel: autoencoder_forward.14
= control target key start
LH: loop header
LB: loop body
LE: loop exit
PB: predicated region body
PF: predicated region fallthrough
CT: control target
= control target key end

     0   :  { %s516_s18 = smov 0   ;;  %s518_s19 = smov 0   ;;  %s575_s0 = inlined_call_operand.vmem [shape: bf16[8,32], index: 0, kind: input, shape index: {}]   ;;  %s576_s1 = inlined_call_operand.vmem [shape: bf16[32,128], index: 1, kind: input, shape index: {}]   ;;  %s577_s2 = inlined_call_operand.vmem [shape: f32[1,128], index: 2, kind: input, shape index: {}]   ;;  %s578_s3 = inlined_call_operand.vmem [shape: f32[1,128], index: 3, kind: input, shape index: {}]   ;;  %s579_s4 = inlined_call_operand.vmem [shape: f32[1,128], index: 4, kind: input, shape index: {}]   ;;  %s580_s5 = inlined_call_operand.vmem [shape: f32[8,128], index: 5, kind: output, shape index: {}]  }
   0x1   :  { %s520_s20 = smov 0  }
   0x2 LB: > { %s27_s21 = sadd.s32 1, %s479_s19  ;;  %p413_p0 = scmp.ge.s32.totalorder %s483_s20, 1  ;;  %s483_s20 = sphi %s520_s20, %s15_s20   ;;  %s479_s19 = sphi %s518_s19, %s582_s19   ;;  %s475_s18 = sphi %s516_s18, %s581_s18  }
   0x3   : > { %p29_p1 = scmp.ge.s32.totalorder %s27_s21, 2  ;;  %p198_p2 = scmp.lt.s32.totalorder %s483_s20, 3 }
   0x5   : > { %s584_s21 = smov (%p29_p1, %s27_s21), 0  ;;  %p199_p3 = pnand %p413_p0, %p198_p2 }
   0x6   : > { %p233_p4 = scmp.eq.s32.totalorder (!%p199_p3), %s475_s18, 0 }
   0x7   : > { %202 = sbr.rel (%p199_p3) target bundleno = 222 (0xde), region = 40 }
   0xc   : > { %238 = sbr.rel (!%p233_p4) target bundleno = 17 (0x11), region = 44  ;;  %v485_v0 = vmov (%p233_p4), 0.0  }
   0xd   : > { %239 = vst [vmem:[#allocation2] sm:$0x1] (%p233_p4), %v485_v0 }
   0xe   : > { %240 = vst [vmem:[#allocation3] sm:$0x1] (%p233_p4), %v485_v0 }
  0x11 PF: > { %p415_p5 = scmp.ne.s32.totalorder %s475_s18, 0 }
  0x13   : > { %243 = sbr.rel (%p415_p5) target bundleno = 177 (0xb1), region = 48 }
  0x18   : > { %v431_v1 = vld [vmem:[%s576_s1 + $0x8] sm:$0xff]  ;;  %v430_v2 = vld [vmem:[%s576_s1] sm:$0xff]  ;;  %vm265_vm0 = vcmask 261120  }
  0x19   : > { %275 = vmatpush.bf16.msra.mxu0 %v431_v1  ;;  %v244_v3 = vld [vmem:[%s575_s0] sm:$0xf] }
  0x1a   : > { %v457_v4 = vld [vmem:[%s577_s2] ss:$0 sm:$0xff]  ;;  %v298_v21 = vld [vmem:[#allocation3] sm:$0x1] }
  0x1b   : > { %v289_v18 = vld [vmem:[#allocation2] sm:$0x1] }
  0x1d   : > { %276 = vmatpush.bf16.msra.mxu0 %v430_v2 }
  0x20   : > { %424 = vmatmul.msk.bf16.vlgmr.msra.gmra.mxu0 %vm265_vm0, %v244_v3 }
  0x9d   : > { %v278_v5 = vpop.f32.mrf.mxu0 }
  0x9e   : > { %v279_v6 = vadd.f32 %v457_v4, %v278_v5 }
  0xa0   : > { %v290_v7 = vrot.slane %v279_v6, 4  ;;  %v299_v8 = vmul.f32 %v279_v6, %v279_v6  ;;  %308 = vst [vmem:[%s580_s5] sm:$0xff] %v279_v6 }
  0xa2   : > { %v291_v9 = vadd.f32 %v290_v7, %v279_v6  ;;  %v300_v10 = vrot.slane %v299_v8, 4 }
  0xa4   : > { %v292_v11 = vrot.slane %v291_v9, 2  ;;  %v301_v12 = vadd.f32 %v300_v10, %v299_v8 }
  0xa5   : > { %v280_v13 = vpop.f32.mrf.mxu0 }
  0xa6   : > { %v293_v14 = vadd.f32 %v292_v11, %v291_v9  ;;  %v302_v15 = vrot.slane %v301_v12, 2 }
  0xa8   : > { %v294_v16 = vrot.slane %v293_v14, 1  ;;  %v303_v17 = vadd.f32 %v302_v15, %v301_v12 }
  0xaa   : > { %v295_v19 = vadd.f32 %v294_v16, %v293_v14  ;;  %v304_v20 = vrot.slane %v303_v17, 1 }
  0xac   : > { %v296_v22 = vadd.f32 %v295_v19, %v289_v18  ;;  %v305_v23 = vadd.f32 %v304_v20, %v303_v17 }
  0xae   : > { %297 = vst [vmem:[#allocation2] sm:$0x1] %v296_v22  ;;  %v306_v24 = vadd.f32 %v305_v23, %v298_v21 }
  0xb0   : > { %307 = vst [vmem:[#allocation3] sm:$0x1] %v306_v24 }
  0xb1 PF: > { %p425_p6 = scmp.ne.s32.totalorder %s475_s18, 1 }
  0xb3   : > { %312 = sbr.rel (%p425_p6) target bundleno = 222 (0xde), region = 52 }
  0xb8   : > { %v314_v25 = vld [vmem:[#allocation2] sm:$0x1]  ;;  %v315_v26 = vld [vmem:[#allocation3] sm:$0x1] }
  0xb9   : > { %v316_v27 = vmul.f32 0.125, %v314_v25  ;;  %v317_v28 = vmul.f32 0.125, %v315_v26  ;;  %v313_v38 = vld [vmem:[%s580_s5] sm:$0xff] }
  0xba   : > { %v335_v40 = vld [vmem:[%s578_s3] sm:$0x1] }
  0xbb   : > { %v318_v29 = vmul.f32 %v316_v27, %v316_v27  ;;  %v332_v37 = vperm.slane %v316_v27, 0  ;;  %v458_v45 = vld [vmem:[%s579_s4] ss:$0 sm:$0xff] }
  0xbd   : > { %v319_v30 = vsub.f32 %v317_v28, %v318_v29  ;;  %v334_v42 = vsub.f32 %v313_v38, %v332_v37 }
  0xbf   : > { %v320_v31 = vadd.f32 1e-05, %v319_v30 }
  0xc1   : > { %459 = vrsqrt.f32 %v320_v31  ;;  %vm327_vm1 = vweird.f32 %v320_v31 }
  0xc7   : > { %v460_v32 = vpop.eup %459 }
  0xc8   : > { %v322_v33 = vmul.f32 %v460_v32, %v320_v31  ;;  %vm328_vm2 = vweird.f32 %v460_v32 }
  0xc9   : > { %vm329_vm3 = vmor %vm327_vm1, %vm328_vm2 }
  0xca   : > { %v323_v34 = vmul.f32 %v460_v32, %v322_v33 }
  0xcc   : > { %v324_v35 = vmul.f32 0.5, %v323_v34 }
  0xce   : > { %v325_v36 = vsub.f32 1.5, %v324_v35 }
  0xd0   : > { %v326_v39 = vmul.f32 %v460_v32, %v325_v36 }
  0xd2   : > { %v330_v41 = vsel %vm329_vm3, %v460_v32, %v326_v39 }
  0xd3   : > { %v336_v43 = vmul.f32 %v335_v40, %v330_v41 }
  0xd5   : > { %v338_v44 = vperm.slane %v336_v43, 0 }
  0xd7   : > { %v340_v46 = vmul.f32 %v338_v44, %v334_v42 }
  0xd9   : > { %v345_v47 = vadd.f32 %v458_v45, %v340_v46 }
  0xdb   : > { %v346_v48 = vmax.f32 %v345_v47, 0.0 }
  0xdd   : > { %347 = vst [vmem:[%s580_s5] sm:$0xff] %v346_v48 }
  0xde PF: > { %s15_s20 = sadd.s32 1, %s483_s20   ;;  %s581_s18 = smov %s479_s19 }
  0xdf   : > { %p12_p7 = scmp.ge.s32.totalorder %s15_s20, 4   ;;  %s582_s19 = smov %s584_s21 }
  0xe1   :  { %14 = sbr.rel (!%p12_p7) target bundleno = 2 (0x2), region = 82 }

// kernel: tile.73
= control target key start
LH: loop header
LB: loop body
LE: loop exit
PB: predicated region body
PF: predicated region fallthrough
CT: control target
= control target key end

     0   :  { %s22_s0 = inlined_call_operand.vmem [shape: f32[128], index: 0, kind: input, shape index: {}]   ;;  %s23_s1 = inlined_call_operand.vmem [shape: f32[4,128], index: 1, kind: output, shape index: {}]  }
   0x1   :  { %v4_v0 = vld [vmem:[%s22_s0] ss:$0 sm:$0xff] }
   0x2   :  { %5 = vst [vmem:[%s23_s1] sm:$0xf] %v4_v0 }

// kernel: autoencoder_forward.15
= control target key start
LH: loop header
LB: loop body
LE: loop exit
PB: predicated region body
PF: predicated region fallthrough
CT: control target
= control target key end

     0   :  { %s1841_s18 = smov 0   ;;  %s1843_s19 = smov 0   ;;  %s2540_s0 = inlined_call_operand.vmem [shape: bf16[8,384], index: 0, kind: input, shape index: {}]   ;;  %s2541_s1 = inlined_call_operand.vmem [shape: bf16[384,512], index: 1, kind: input, shape index: {}]   ;;  %s2542_s2 = inlined_call_operand.vmem [shape: f32[1,512], index: 2, kind: input, shape index: {}]   ;;  %s2543_s3 = inlined_call_operand.vmem [shape: f32[1,512], index: 3, kind: input, shape index: {}]   ;;  %s2544_s4 = inlined_call_operand.vmem [shape: f32[1,512], index: 4, kind: input, shape index: {}]   ;;  %s2545_s5 = inlined_call_operand.vmem [shape: f32[8,512], index: 5, kind: output, shape index: {}]  }
   0x1   :  { %s1845_s20 = smov 0  }
   0x2 LB: > { %s27_s21 = sadd.s32 1, %s1804_s19  ;;  %p1267_p0 = scmp.ge.s32.totalorder %s1808_s20, 1  ;;  %s1808_s20 = sphi %s1845_s20, %s15_s20   ;;  %s1804_s19 = sphi %s1843_s19, %s2547_s19   ;;  %s1800_s18 = sphi %s1841_s18, %s2546_s18  }
   0x3   : > { %p29_p1 = scmp.ge.s32.totalorder %s27_s21, 2  ;;  %p199_p2 = scmp.lt.s32.totalorder %s1808_s20, 3 }
   0x5   : > { %s2549_s21 = smov (%p29_p1, %s27_s21), 0  ;;  %p200_p3 = pnand %p1267_p0, %p199_p2 }
   0x6   : > { %p237_p4 = scmp.eq.s32.totalorder (!%p200_p3), %s1800_s18, 0 }
   0x7   : > { %203 = sbr.rel (%p200_p3) target bundleno = 333 (0x14d), region = 40 }
   0xc   : > { %242 = sbr.rel (!%p237_p4) target bundleno = 17 (0x11), region = 44  ;;  %v243_v0 = vlaneseq (%p237_p4)  ;;  %v1810_v1 = vmov (%p237_p4), 0.0  }
   0xe   : > { %vm245_vm0 = vcmp.lt.s32.totalorder (%p237_p4), %v243_v0, 512 }
   0xf   : > { %247 = vst.msk [vmem:[#allocation2] sm:$0xf] (%p237_p4), %vm245_vm0, %v1810_v1 }
  0x10   : > { %248 = vst.msk [vmem:[#allocation3] sm:$0xf] (%p237_p4), %vm245_vm0, %v1810_v1 }
  0x11 PF: > { %p1269_p5 = scmp.ne.s32.totalorder %s1800_s18, 0 }
  0x13   : > { %251 = sbr.rel (%p1269_p5) target bundleno = 281 (0x119), region = 48 }
  0x18   : > { %v1384_v2 = vld [vmem:[%s2541_s1 + $0xe0] sm:$0xf]  ;;  %v1689_v3 = vld [vmem:[%s2541_s1 + $0xec] sm:$0xf0]  ;;  %v1687_v11 = vld [vmem:[%s2541_s1 + $0xe4] sm:$0xf] }
  0x19   : > { %v1512_v4 = vld [vmem:[%s2541_s1 + $0x1e0] sm:$0xf]  ;;  %v1385_v5 = vor.u32 %v1689_v3, %v1384_v2  ;;  %v1721_v6 = vld [vmem:[%s2541_s1 + $0x1ec] sm:$0xf0]  ;;  %v1386_v12 = vld [vmem:[%s2541_s1 + $0xf0] sm:$0xf0] }
  0x1a   : > { %v1640_v7 = vld [vmem:[%s2541_s1 + $0x2e0] sm:$0xf]  ;;  %v1753_v8 = vld [vmem:[%s2541_s1 + $0x2ec] sm:$0xf0]  ;;  %v1513_v9 = vor.u32 %v1721_v6, %v1512_v4  ;;  %v1389_v14 = vor.u32 %v1687_v11, %v1386_v12  ;;  %v1683_v22 = vld [vmem:[%s2541_s1 + $0xc4] sm:$0xf] }
  0x1b   : > { %v1641_v10 = vor.u32 %v1753_v8, %v1640_v7  ;;  %v1368_v13 = vld [vmem:[%s2541_s1 + $0xc0] sm:$0xf]  ;;  %851 = vmatpush.bf16.msra.mxu0 %v1385_v5  ;;  %v1685_v15 = vld [vmem:[%s2541_s1 + $0xcc] sm:$0xf0]  ;;  %v1370_v24 = vld [vmem:[%s2541_s1 + $0xd0] sm:$0xf0] }
  0x1c   : > { %v1496_v16 = vld [vmem:[%s2541_s1 + $0x1c0] sm:$0xf]  ;;  %v1717_v17 = vld [vmem:[%s2541_s1 + $0x1cc] sm:$0xf0]  ;;  %864 = vmatpush.bf16.msra.mxu1 %v1513_v9  ;;  %v1369_v18 = vor.u32 %v1685_v15, %v1368_v13  ;;  %890 = vmatpush.bf16.msra.mxu3 %v1389_v14  ;;  %v1373_v27 = vor.u32 %v1683_v22, %v1370_v24  ;;  %v1679_v33 = vld [vmem:[%s2541_s1 + $0xa4] sm:$0xf] }
  0x1d   : > { %877 = vmatpush.bf16.msra.mxu2 %v1641_v10  ;;  %v1497_v19 = vor.u32 %v1717_v17, %v1496_v16  ;;  %v1624_v20 = vld [vmem:[%s2541_s1 + $0x2c0] sm:$0xf]  ;;  %v1749_v21 = vld [vmem:[%s2541_s1 + $0x2cc] sm:$0xf0]  ;;  %v1354_v34 = vld [vmem:[%s2541_s1 + $0xb0] sm:$0xf0] }
  0x1e   : > { %v1625_v23 = vor.u32 %v1749_v21, %v1624_v20  ;;  %v1352_v25 = vld [vmem:[%s2541_s1 + $0xa0] sm:$0xf]  ;;  %v1681_v26 = vld [vmem:[%s2541_s1 + $0xac] sm:$0xf0]  ;;  %v1357_v40 = vor.u32 %v1679_v33, %v1354_v34  ;;  %v1675_v44 = vld [vmem:[%s2541_s1 + $0x84] sm:$0xf] }
  0x1f   : > { %v1480_v28 = vld [vmem:[%s2541_s1 + $0x1a0] sm:$0xf]  ;;  %v1713_v29 = vld [vmem:[%s2541_s1 + $0x1ac] sm:$0xf0]  ;;  %852 = vmatpush.bf16.msra.mxu0 %v1369_v18  ;;  %v1353_v31 = vor.u32 %v1681_v26, %v1352_v25  ;;  %v1338_v45 = vld [vmem:[%s2541_s1 + $0x90] sm:$0xf0] }
  0x20   : > { %v1608_v30 = vld [vmem:[%s2541_s1 + $0x2a0] sm:$0xf]  ;;  %v1745_v32 = vld [vmem:[%s2541_s1 + $0x2ac] sm:$0xf0]  ;;  %865 = vmatpush.bf16.msra.mxu1 %v1497_v19  ;;  %v1481_v35 = vor.u32 %v1713_v29, %v1480_v28  ;;  %891 = vmatpush.bf16.msra.mxu3 %v1373_v27  ;;  %v1341_v52 = vor.u32 %v1675_v44, %v1338_v45  ;;  %v1671_v56 = vld [vmem:[%s2541_s1 + $0x64] sm:$0xf] }
  0x21   : > { %878 = vmatpush.bf16.msra.mxu2 %v1625_v23  ;;  %v1609_v36 = vor.u32 %v1745_v32, %v1608_v30  ;;  %v1336_v37 = vld [vmem:[%s2541_s1 + $0x80] sm:$0xf]  ;;  %v1677_v38 = vld [vmem:[%s2541_s1 + $0x8c] sm:$0xf0]  ;;  %v1322_v57 = vld [vmem:[%s2541_s1 + $0x70] sm:$0xf0] }
  0x22   : > { %v1464_v39 = vld [vmem:[%s2541_s1 + $0x180] sm:$0xf]  ;;  %v1709_v41 = vld [vmem:[%s2541_s1 + $0x18c] sm:$0xf0]  ;;  %v1337_v46 = vor.u32 %v1677_v38, %v1336_v37  ;;  %v1325_v0 = vor.u32 %v1671_v56, %v1322_v57  ;;  %v1667_v4 = vld [vmem:[%s2541_s1 + $0x44] sm:$0xf] }
  0x23   : > { %v1592_v42 = vld [vmem:[%s2541_s1 + $0x280] sm:$0xf]  ;;  %v1741_v43 = vld [vmem:[%s2541_s1 + $0x28c] sm:$0xf0]  ;;  %853 = vmatpush.bf16.msra.mxu0 %v1353_v31  ;;  %v1465_v47 = vor.u32 %v1709_v41, %v1464_v39  ;;  %v1306_v5 = vld [vmem:[%s2541_s1 + $0x50] sm:$0xf0] }
  0x24   : > { %866 = vmatpush.bf16.msra.mxu1 %v1481_v35  ;;  %v1593_v48 = vor.u32 %v1741_v43, %v1592_v42  ;;  %v1320_v49 = vld [vmem:[%s2541_s1 + $0x60] sm:$0xf]  ;;  %v1673_v50 = vld [vmem:[%s2541_s1 + $0x6c] sm:$0xf0]  ;;  %892 = vmatpush.bf16.msra.mxu3 %v1357_v40  ;;  %v1309_v12 = vor.u32 %v1667_v4, %v1306_v5  ;;  %v1663_v16 = vld [vmem:[%s2541_s1 + $0x24] sm:$0xf] }
  0x25   : > { %879 = vmatpush.bf16.msra.mxu2 %v1609_v36  ;;  %v1448_v51 = vld [vmem:[%s2541_s1 + $0x160] sm:$0xf]  ;;  %v1705_v53 = vld [vmem:[%s2541_s1 + $0x16c] sm:$0xf0]  ;;  %v1321_v58 = vor.u32 %v1673_v50, %v1320_v49  ;;  %v1290_v17 = vld [vmem:[%s2541_s1 + $0x30] sm:$0xf0] }
  0x26   : > { %v1576_v54 = vld [vmem:[%s2541_s1 + $0x260] sm:$0xf]  ;;  %v1737_v55 = vld [vmem:[%s2541_s1 + $0x26c] sm:$0xf0]  ;;  %v1449_v59 = vor.u32 %v1705_v53, %v1448_v51  ;;  %v1293_v26 = vor.u32 %v1663_v16, %v1290_v17  ;;  %v1659_v28 = vld [vmem:[%s2541_s1 + $0x4] sm:$0xf] }
  0x27   : > { %854 = vmatpush.bf16.msra.mxu0 %v1337_v46  ;;  %v1577_v60 = vor.u32 %v1737_v55, %v1576_v54  ;;  %v1304_v61 = vld [vmem:[%s2541_s1 + $0x40] sm:$0xf]  ;;  %v1669_v62 = vld [vmem:[%s2541_s1 + $0x4c] sm:$0xf0]  ;;  %v1274_v29 = vld [vmem:[%s2541_s1 + $0x10] sm:$0xf0] }
  0x28   : > { %867 = vmatpush.bf16.msra.mxu1 %v1465_v47  ;;  %v1432_v63 = vld [vmem:[%s2541_s1 + $0x140] sm:$0xf]  ;;  %893 = vmatpush.bf16.msra.mxu3 %v1341_v52  ;;  %v1701_v1 = vld [vmem:[%s2541_s1 + $0x14c] sm:$0xf0]  ;;  %v1305_v6 = vor.u32 %v1669_v62, %v1304_v61  ;;  %v1719_v30 = vld [vmem:[%s2541_s1 + $0x1e4] sm:$0xf]  ;;  %v1277_v41 = vor.u32 %v1659_v28, %v1274_v29 }
  0x29   : > { %880 = vmatpush.bf16.msra.mxu2 %v1593_v48  ;;  %v1560_v2 = vld [vmem:[%s2541_s1 + $0x240] sm:$0xf]  ;;  %v1733_v3 = vld [vmem:[%s2541_s1 + $0x24c] sm:$0xf0]  ;;  %v1433_v7 = vor.u32 %v1701_v1, %v1432_v63  ;;  %v1514_v31 = vld [vmem:[%s2541_s1 + $0x1f0] sm:$0xf0] }
  0x2a   : > { %v1561_v8 = vor.u32 %v1733_v3, %v1560_v2  ;;  %v1288_v9 = vld [vmem:[%s2541_s1 + $0x20] sm:$0xf]  ;;  %v1665_v10 = vld [vmem:[%s2541_s1 + $0x2c] sm:$0xf0]  ;;  %v1751_v32 = vld [vmem:[%s2541_s1 + $0x2e4] sm:$0xf]  ;;  %v1517_v42 = vor.u32 %v1719_v30, %v1514_v31 }
  0x2b   : > { %855 = vmatpush.bf16.msra.mxu0 %v1321_v58  ;;  %v1416_v11 = vld [vmem:[%s2541_s1 + $0x120] sm:$0xf]  ;;  %v1697_v13 = vld [vmem:[%s2541_s1 + $0x12c] sm:$0xf0]  ;;  %v1289_v18 = vor.u32 %v1665_v10, %v1288_v9  ;;  %v1642_v34 = vld [vmem:[%s2541_s1 + $0x2f0] sm:$0xf0] }
  0x2c   : > { %868 = vmatpush.bf16.msra.mxu1 %v1449_v59  ;;  %894 = vmatpush.bf16.msra.mxu3 %v1325_v0  ;;  %v1544_v14 = vld [vmem:[%s2541_s1 + $0x220] sm:$0xf]  ;;  %v1729_v15 = vld [vmem:[%s2541_s1 + $0x22c] sm:$0xf0]  ;;  %v1417_v21 = vor.u32 %v1697_v13, %v1416_v11  ;;  %v1392_v35 = vld [vmem:[%s2541_s1 + $0xe8] sm:$0xf]  ;;  %v1645_v43 = vor.u32 %v1751_v32, %v1642_v34 }
  0x2d   : > { %881 = vmatpush.bf16.msra.mxu2 %v1577_v60  ;;  %v1272_v19 = vld [vmem:[%s2541_s1] sm:$0xf]  ;;  %v1661_v20 = vld [vmem:[%s2541_s1 + $0xc] sm:$0xf0]  ;;  %v1545_v22 = vor.u32 %v1729_v15, %v1544_v14  ;;  %v1690_v36 = vld [vmem:[%s2541_s1 + $0xf4] sm:$0xf0] }
  0x2e   : > { %v1400_v23 = vld [vmem:[%s2541_s1 + $0x100] sm:$0xf]  ;;  %v1693_v24 = vld [vmem:[%s2541_s1 + $0x10c] sm:$0xf0]  ;;  %v1273_v33 = vor.u32 %v1661_v20, %v1272_v19  ;;  %v1520_v39 = vld [vmem:[%s2541_s1 + $0x1e8] sm:$0xf]  ;;  %v1393_v44 = vor.u32 %v1690_v36, %v1392_v35 }
  0x2f   : > { %856 = vmatpush.bf16.msra.mxu0 %v1305_v6  ;;  %v1528_v25 = vld [vmem:[%s2541_s1 + $0x200] sm:$0xf]  ;;  %v1725_v27 = vld [vmem:[%s2541_s1 + $0x20c] sm:$0xf0]  ;;  %v1401_v37 = vor.u32 %v1693_v24, %v1400_v23  ;;  %v1722_v40 = vld [vmem:[%s2541_s1 + $0x1f4] sm:$0xf0] }
  0x30   : > { %869 = vmatpush.bf16.msra.mxu1 %v1433_v7  ;;  %895 = vmatpush.bf16.msra.mxu3 %v1309_v12  ;;  %v1529_v38 = vor.u32 %v1725_v27, %v1528_v25  ;;  %v1715_v45 = vld [vmem:[%s2541_s1 + $0x1c4] sm:$0xf]  ;;  %v1498_v46 = vld [vmem:[%s2541_s1 + $0x1d0] sm:$0xf0]  ;;  %v1521_v48 = vor.u32 %v1722_v40, %v1520_v39  ;;  %v1376_v50 = vld [vmem:[%s2541_s1 + $0xc8] sm:$0xf] }
  0x31   : > { %882 = vmatpush.bf16.msra.mxu2 %v1561_v8  ;;  %v1747_v47 = vld [vmem:[%s2541_s1 + $0x2c4] sm:$0xf]  ;;  %v1626_v49 = vld [vmem:[%s2541_s1 + $0x2d0] sm:$0xf0]  ;;  %v1686_v51 = vld [vmem:[%s2541_s1 + $0xd4] sm:$0xf0]  ;;  %v1501_v55 = vor.u32 %v1715_v45, %v1498_v46 }
  0x32   : > { %v1504_v52 = vld [vmem:[%s2541_s1 + $0x1c8] sm:$0xf]  ;;  %v1718_v53 = vld [vmem:[%s2541_s1 + $0x1d4] sm:$0xf0]  ;;  %v252_v54 = vld [vmem:[%s2540_s0] sm:$0xff]  ;;  %v1629_v59 = vor.u32 %v1747_v47, %v1626_v49  ;;  %v1377_v60 = vor.u32 %v1686_v51, %v1376_v50  ;;  %vm1049_vm1 = vcmask 1040384  }
  0x33   : > { %857 = vmatpush.bf16.msra.mxu0 %v1289_v18  ;;  %v1711_v56 = vld [vmem:[%s2541_s1 + $0x1a4] sm:$0xf]  ;;  %v362_v57 = vunpack.c.l.b16 %v252_v54  ;;  %v363_v58 = vunpack.c.h.b16 %v252_v54  ;;  %v1482_v61 = vld [vmem:[%s2541_s1 + $0x1b0] sm:$0xf0]  ;;  %v1505_v0 = vor.u32 %v1718_v53, %v1504_v52  ;;  %v1360_v1 = vld [vmem:[%s2541_s1 + $0xa8] sm:$0xf] }
  0x34   : > { %870 = vmatpush.bf16.msra.mxu1 %v1417_v21  ;;  %896 = vmatpush.bf16.msra.mxu3 %v1293_v26  ;;  %v1743_v62 = vld [vmem:[%s2541_s1 + $0x2a4] sm:$0xf]  ;;  %v1610_v63 = vld [vmem:[%s2541_s1 + $0x2b0] sm:$0xf0]  ;;  %v1682_v2 = vld [vmem:[%s2541_s1 + $0xb4] sm:$0xf0]  ;;  %v1485_v9 = vor.u32 %v1711_v56, %v1482_v61 }
  0x35   : > { %883 = vmatpush.bf16.msra.mxu2 %v1545_v22  ;;  %v2124_v3 = vpack.c.b16 %v362_v57, %v362_v57  ;;  %v2126_v4 = vpack.c.b16 %v363_v58, %v363_v58  ;;  %v253_v5 = vld [vmem:[%s2540_s0 + $0x8] sm:$0xf]  ;;  %v1714_v7 = vld [vmem:[%s2541_s1 + $0x1b4] sm:$0xf0]  ;;  %v1613_v10 = vor.u32 %v1743_v62, %v1610_v63  ;;  %v1361_v11 = vor.u32 %v1682_v2, %v1360_v1  ;;  %v1707_v12 = vld [vmem:[%s2541_s1 + $0x184] sm:$0xf] }
  0x36   : > { %v1488_v6 = vld [vmem:[%s2541_s1 + $0x1a8] sm:$0xf]  ;;  %v364_v8 = vunpack.c.l.b16 %v253_v5  ;;  %v1466_v13 = vld [vmem:[%s2541_s1 + $0x190] sm:$0xf0]  ;;  %v1739_v14 = vld [vmem:[%s2541_s1 + $0x284] sm:$0xf] }
  0x37   : > { %858 = vmatpush.bf16.msra.mxu0 %v1273_v33  ;;  %v1489_v16 = vor.u32 %v1714_v7, %v1488_v6  ;;  %v1594_v17 = vld [vmem:[%s2541_s1 + $0x290] sm:$0xf0]  ;;  %v1344_v18 = vld [vmem:[%s2541_s1 + $0x88] sm:$0xf]  ;;  %v1678_v19 = vld [vmem:[%s2541_s1 + $0x94] sm:$0xf0]  ;;  %v1469_v22 = vor.u32 %v1707_v12, %v1466_v13 }
  0x38   : > { %871 = vmatpush.bf16.msra.mxu1 %v1401_v37  ;;  %897 = vmatpush.bf16.msra.mxu3 %v1277_v41  ;;  %v2147_v15 = vpack.c.b16 %v364_v8, %v364_v8  ;;  %v1472_v20 = vld [vmem:[%s2541_s1 + $0x188] sm:$0xf]  ;;  %v1710_v21 = vld [vmem:[%s2541_s1 + $0x194] sm:$0xf0]  ;;  %v1597_v23 = vor.u32 %v1739_v14, %v1594_v17  ;;  %v1345_v24 = vor.u32 %v1678_v19, %v1344_v18  ;;  %v1703_v25 = vld [vmem:[%s2541_s1 + $0x164] sm:$0xf] }
  0x39   : > { %884 = vmatpush.bf16.msra.mxu2 %v1529_v38  ;;  %v1450_v26 = vld [vmem:[%s2541_s1 + $0x170] sm:$0xf0]  ;;  %v1735_v27 = vld [vmem:[%s2541_s1 + $0x264] sm:$0xf]  ;;  %v1473_v28 = vor.u32 %v1710_v21, %v1472_v20  ;;  %v1328_v30 = vld [vmem:[%s2541_s1 + $0x68] sm:$0xf] }
  0x3a   : > { %859 = vmatmul.bf16.vlgmr.msra.gmra.mxu0 %v2124_v3  ;;  %v1578_v29 = vld [vmem:[%s2541_s1 + $0x270] sm:$0xf0]  ;;  %v1674_v31 = vld [vmem:[%s2541_s1 + $0x74] sm:$0xf0]  ;;  %v1456_v32 = vld [vmem:[%s2541_s1 + $0x168] sm:$0xf]  ;;  %v1453_v34 = vor.u32 %v1703_v25, %v1450_v26 }
  0x3b   : > { %903 = vmatpush.bf16.msrb.mxu0 %v1517_v42  ;;  %872 = vmatmul.bf16.vlgmr.msra.gmra.mxu1 %v2126_v4  ;;  %v1706_v33 = vld [vmem:[%s2541_s1 + $0x174] sm:$0xf0]  ;;  %v1581_v35 = vor.u32 %v1735_v27, %v1578_v29  ;;  %v1329_v36 = vor.u32 %v1674_v31, %v1328_v30  ;;  %v1699_v37 = vld [vmem:[%s2541_s1 + $0x144] sm:$0xf]  ;;  %v1434_v38 = vld [vmem:[%s2541_s1 + $0x150] sm:$0xf0] }
  0x3c   : > { %916 = vmatpush.bf16.msrb.mxu1 %v1645_v43  ;;  %942 = vmatpush.bf16.msrb.mxu3 %v1521_v48  ;;  %v1731_v39 = vld [vmem:[%s2541_s1 + $0x244] sm:$0xf]  ;;  %v1457_v40 = vor.u32 %v1706_v33, %v1456_v32  ;;  %v1562_v41 = vld [vmem:[%s2541_s1 + $0x250] sm:$0xf0]  ;;  %v1312_v42 = vld [vmem:[%s2541_s1 + $0x48] sm:$0xf]  ;;  %v1437_v46 = vor.u32 %v1699_v37, %v1434_v38 }
  0x3d   : > { %929 = vmatpush.bf16.msrb.mxu2 %v1393_v44  ;;  %898 = vmatmul.bf16.vlgmr.msra.gmra.mxu3 %v2124_v3  ;;  %v1670_v43 = vld [vmem:[%s2541_s1 + $0x54] sm:$0xf0]  ;;  %v1440_v44 = vld [vmem:[%s2541_s1 + $0x148] sm:$0xf]  ;;  %v1565_v47 = vor.u32 %v1731_v39, %v1562_v41  ;;  %v1695_v49 = vld [vmem:[%s2541_s1 + $0x124] sm:$0xf] }
  0x3e   : > { %885 = vmatmul.bf16.vlgmr.msra.gmra.mxu2 %v2147_v15  ;;  %v1702_v45 = vld [vmem:[%s2541_s1 + $0x154] sm:$0xf0]  ;;  %v1313_v48 = vor.u32 %v1670_v43, %v1312_v42  ;;  %v1418_v50 = vld [vmem:[%s2541_s1 + $0x130] sm:$0xf0]  ;;  %v1727_v51 = vld [vmem:[%s2541_s1 + $0x224] sm:$0xf] }
  0x3f   : > { %904 = vmatpush.bf16.msrb.mxu0 %v1501_v55  ;;  %v1441_v52 = vor.u32 %v1702_v45, %v1440_v44  ;;  %v1546_v53 = vld [vmem:[%s2541_s1 + $0x230] sm:$0xf0]  ;;  %v1296_v54 = vld [vmem:[%s2541_s1 + $0x28] sm:$0xf]  ;;  %v1666_v55 = vld [vmem:[%s2541_s1 + $0x34] sm:$0xf0]  ;;  %v1421_v58 = vor.u32 %v1695_v49, %v1418_v50 }
  0x40   : > { %917 = vmatpush.bf16.msrb.mxu1 %v1629_v59  ;;  %943 = vmatpush.bf16.msrb.mxu3 %v1505_v0  ;;  %v1424_v56 = vld [vmem:[%s2541_s1 + $0x128] sm:$0xf]  ;;  %v1698_v57 = vld [vmem:[%s2541_s1 + $0x134] sm:$0xf0]  ;;  %v1691_v59 = vld [vmem:[%s2541_s1 + $0x104] sm:$0xf]  ;;  %v1549_v61 = vor.u32 %v1727_v51, %v1546_v53  ;;  %v1297_v62 = vor.u32 %v1666_v55, %v1296_v54 }
  0x41   : > { %930 = vmatpush.bf16.msrb.mxu2 %v1377_v60  ;;  %v1402_v60 = vld [vmem:[%s2541_s1 + $0x110] sm:$0xf0]  ;;  %v1723_v63 = vld [vmem:[%s2541_s1 + $0x204] sm:$0xf]  ;;  %v1280_v1 = vld [vmem:[%s2541_s1 + $0x8] sm:$0xf]  ;;  %v1425_v2 = vor.u32 %v1698_v57, %v1424_v56 }
  0x42   : > { %v1530_v0 = vld [vmem:[%s2541_s1 + $0x210] sm:$0xf0]  ;;  %v1662_v5 = vld [vmem:[%s2541_s1 + $0x14] sm:$0xf0]  ;;  %v1408_v6 = vld [vmem:[%s2541_s1 + $0x108] sm:$0xf] }
  0x43   : > { %905 = vmatpush.bf16.msrb.mxu0 %v1485_v9  ;;  %v1694_v7 = vld [vmem:[%s2541_s1 + $0x114] sm:$0xf0]  ;;  %v1648_v8 = vld [vmem:[%s2541_s1 + $0x2e8] sm:$0xf]  ;;  %v1394_v12 = vld [vmem:[%s2541_s1 + $0xf8] sm:$0xf0]  ;;  %v1281_v17 = vor.u32 %v1662_v5, %v1280_v1 }
  0x44   : > { %918 = vmatpush.bf16.msrb.mxu1 %v1613_v10  ;;  %944 = vmatpush.bf16.msrb.mxu3 %v1489_v16  ;;  %v1754_v9 = vld [vmem:[%s2541_s1 + $0x2f4] sm:$0xf0]  ;;  %v1688_v10 = vld [vmem:[%s2541_s1 + $0xec] sm:$0xf]  ;;  %v1522_v14 = vld [vmem:[%s2541_s1 + $0x1f8] sm:$0xf0]  ;;  %v1533_v16 = vor.u32 %v1723_v63, %v1530_v0  ;;  %v1409_v20 = vor.u32 %v1694_v7, %v1408_v6 }
  0x45   : > { %931 = vmatpush.bf16.msrb.mxu2 %v1361_v11  ;;  %v1405_v11 = vor.u32 %v1691_v59, %v1402_v60  ;;  %v1720_v13 = vld [vmem:[%s2541_s1 + $0x1ec] sm:$0xf]  ;;  %v1650_v19 = vld [vmem:[%s2541_s1 + $0x2f8] sm:$0xf0]  ;;  %v1649_v21 = vor.u32 %v1754_v9, %v1648_v8  ;;  %v1750_v25 = vld [vmem:[%s2541_s1 + $0x2d4] sm:$0xf0] }
  0x46   : > { %v1752_v18 = vld [vmem:[%s2541_s1 + $0x2ec] sm:$0xf]  ;;  %v1506_v30 = vld [vmem:[%s2541_s1 + $0x1d8] sm:$0xf0]  ;;  %v1746_v37 = vld [vmem:[%s2541_s1 + $0x2b4] sm:$0xf0] }
  0x47   : > { %906 = vmatpush.bf16.msrb.mxu0 %v1469_v22  ;;  %v1397_v22 = vor.u32 %v1688_v10, %v1394_v12  ;;  %v1684_v26 = vld [vmem:[%s2541_s1 + $0xcc] sm:$0xf]  ;;  %v1653_v27 = vor.u32 %v1752_v18, %v1650_v19  ;;  %v1634_v32 = vld [vmem:[%s2541_s1 + $0x2d8] sm:$0xf0]  ;;  %v1742_v49 = vld [vmem:[%s2541_s1 + $0x294] sm:$0xf0] }
  0x48   : > { %919 = vmatpush.bf16.msrb.mxu1 %v1597_v23  ;;  %945 = vmatpush.bf16.msrb.mxu3 %v1473_v28  ;;  %v1525_v23 = vor.u32 %v1720_v13, %v1522_v14  ;;  %v1378_v28 = vld [vmem:[%s2541_s1 + $0xd8] sm:$0xf0]  ;;  %v1716_v29 = vld [vmem:[%s2541_s1 + $0x1cc] sm:$0xf]  ;;  %v1584_v60 = vld [vmem:[%s2541_s1 + $0x268] sm:$0xf] }
  0x49   : > { %932 = vmatpush.bf16.msrb.mxu2 %v1345_v24  ;;  %v1632_v24 = vld [vmem:[%s2541_s1 + $0x2c8] sm:$0xf]  ;;  %v1748_v31 = vld [vmem:[%s2541_s1 + $0x2cc] sm:$0xf]  ;;  %v1490_v42 = vld [vmem:[%s2541_s1 + $0x1b8] sm:$0xf0] }
  0x4a   : > { %v1633_v33 = vor.u32 %v1750_v25, %v1632_v24  ;;  %v1680_v38 = vld [vmem:[%s2541_s1 + $0xac] sm:$0xf]  ;;  %v1637_v39 = vor.u32 %v1748_v31, %v1634_v32  ;;  %v1618_v44 = vld [vmem:[%s2541_s1 + $0x2b8] sm:$0xf0]  ;;  %v1568_v10 = vld [vmem:[%s2541_s1 + $0x248] sm:$0xf] }
  0x4b   : > { %907 = vmatpush.bf16.msrb.mxu0 %v1453_v34  ;;  %v1381_v34 = vor.u32 %v1684_v26, %v1378_v28  ;;  %v1712_v41 = vld [vmem:[%s2541_s1 + $0x1ac] sm:$0xf]  ;;  %v1474_v54 = vld [vmem:[%s2541_s1 + $0x198] sm:$0xf0]  ;;  %v1730_v24 = vld [vmem:[%s2541_s1 + $0x234] sm:$0xf0] }
  0x4c   : > { %920 = vmatpush.bf16.msrb.mxu1 %v1581_v35  ;;  %946 = vmatpush.bf16.msrb.mxu3 %v1457_v40  ;;  %v1509_v35 = vor.u32 %v1716_v29, %v1506_v30  ;;  %v1362_v40 = vld [vmem:[%s2541_s1 + $0xb8] sm:$0xf0]  ;;  %v1744_v43 = vld [vmem:[%s2541_s1 + $0x2ac] sm:$0xf]  ;;  %vm1051_vm2 = vcmask 1042434   ;;  %vm1053_vm3 = vcmask 1041408  }
  0x4d   : > { %933 = vmatpush.bf16.msrb.mxu2 %v1329_v36  ;;  %v1616_v36 = vld [vmem:[%s2541_s1 + $0x2a8] sm:$0xf]  ;;  %v1676_v50 = vld [vmem:[%s2541_s1 + $0x8c] sm:$0xf]  ;;  %v1621_v51 = vor.u32 %v1744_v43, %v1618_v44  ;;  %v1602_v56 = vld [vmem:[%s2541_s1 + $0x298] sm:$0xf0] }
  0x4e   : > { %v1617_v45 = vor.u32 %v1746_v37, %v1616_v36  ;;  %v1708_v53 = vld [vmem:[%s2541_s1 + $0x18c] sm:$0xf]  ;;  %v1330_v0 = vld [vmem:[%s2541_s1 + $0x78] sm:$0xf0]  ;;  %v1726_v36 = vld [vmem:[%s2541_s1 + $0x214] sm:$0xf0] }
  0x4f   : > { %908 = vmatpush.bf16.msrb.mxu0 %v1437_v46  ;;  %v1365_v46 = vor.u32 %v1680_v38, %v1362_v40  ;;  %v1740_v55 = vld [vmem:[%s2541_s1 + $0x28c] sm:$0xf]  ;;  %v1477_v59 = vor.u32 %v1708_v53, %v1474_v54  ;;  %v1586_v6 = vld [vmem:[%s2541_s1 + $0x278] sm:$0xf0] }
  0x50   : > { %921 = vmatpush.bf16.msrb.mxu1 %v1565_v47  ;;  %947 = vmatpush.bf16.msrb.mxu3 %v1441_v52  ;;  %v1493_v47 = vor.u32 %v1712_v41, %v1490_v42  ;;  %v1346_v52 = vld [vmem:[%s2541_s1 + $0x98] sm:$0xf0]  ;;  %v1605_v63 = vor.u32 %v1740_v55, %v1602_v56  ;;  %v1704_v1 = vld [vmem:[%s2541_s1 + $0x16c] sm:$0xf] }
  0x51   : > { %934 = vmatpush.bf16.msrb.mxu2 %v1313_v48  ;;  %v1600_v48 = vld [vmem:[%s2541_s1 + $0x288] sm:$0xf]  ;;  %v1736_v5 = vld [vmem:[%s2541_s1 + $0x26c] sm:$0xf]  ;;  %v1314_v14 = vld [vmem:[%s2541_s1 + $0x58] sm:$0xf0] }
  0x52   : > { %v1601_v57 = vor.u32 %v1742_v49, %v1600_v48  ;;  %v1668_v12 = vld [vmem:[%s2541_s1 + $0x4c] sm:$0xf]  ;;  %v1589_v13 = vor.u32 %v1736_v5, %v1586_v6  ;;  %v1570_v19 = vld [vmem:[%s2541_s1 + $0x258] sm:$0xf0]  ;;  %v350_v48 = vld [vmem:[%s2542_s2] sm:$0xf] }
  0x53   : > { %909 = vmatpush.bf16.msrb.mxu0 %v1421_v58  ;;  %v1349_v58 = vor.u32 %v1676_v50, %v1346_v52  ;;  %v1732_v18 = vld [vmem:[%s2541_s1 + $0x24c] sm:$0xf]  ;;  %v1426_v29 = vld [vmem:[%s2541_s1 + $0x138] sm:$0xf0]  ;;  %v352_v49 = vperm.slane %v350_v48, 0 }
  0x54   : > { %922 = vmatpush.bf16.msrb.mxu1 %v1549_v61  ;;  %948 = vmatpush.bf16.msrb.mxu3 %v1425_v2  ;;  %v1738_v61 = vld [vmem:[%s2541_s1 + $0x274] sm:$0xf0]  ;;  %v1458_v2 = vld [vmem:[%s2541_s1 + $0x178] sm:$0xf0]  ;;  %v1664_v25 = vld [vmem:[%s2541_s1 + $0x2c] sm:$0xf]  ;;  %v1573_v26 = vor.u32 %v1732_v18, %v1570_v19 }
  0x55   : > { %935 = vmatpush.bf16.msrb.mxu2 %v1297_v62  ;;  %v1672_v62 = vld [vmem:[%s2541_s1 + $0x6c] sm:$0xf]  ;;  %v1585_v7 = vor.u32 %v1738_v61, %v1584_v60  ;;  %v1461_v9 = vor.u32 %v1704_v1, %v1458_v2  ;;  %v1554_v31 = vld [vmem:[%s2541_s1 + $0x238] sm:$0xf0] }
  0x56   : > { %v1333_v8 = vor.u32 %v1672_v62, %v1330_v0  ;;  %v1696_v28 = vld [vmem:[%s2541_s1 + $0x12c] sm:$0xf]  ;;  %v1410_v41 = vld [vmem:[%s2541_s1 + $0x118] sm:$0xf0] }
  0x57   : > { %910 = vmatpush.bf16.msrb.mxu0 %v1405_v11  ;;  %v1734_v11 = vld [vmem:[%s2541_s1 + $0x254] sm:$0xf0]  ;;  %v1728_v30 = vld [vmem:[%s2541_s1 + $0x22c] sm:$0xf]  ;;  %v1538_v43 = vld [vmem:[%s2541_s1 + $0x218] sm:$0xf0] }
  0x58   : > { %923 = vmatpush.bf16.msrb.mxu1 %v1533_v16  ;;  %949 = vmatpush.bf16.msrb.mxu3 %v1409_v20  ;;  %v1700_v16 = vld [vmem:[%s2541_s1 + $0x14c] sm:$0xf]  ;;  %v1569_v20 = vor.u32 %v1734_v11, %v1568_v10  ;;  %v1557_v38 = vor.u32 %v1728_v30, %v1554_v31 }
  0x59   : > { %936 = vmatpush.bf16.msrb.mxu2 %v1281_v17  ;;  %v1442_v17 = vld [vmem:[%s2541_s1 + $0x158] sm:$0xf0]  ;;  %v1660_v37 = vld [vmem:[%s2541_s1 + $0xc] sm:$0xf] }
  0x5a   : > { %911 = vmatmul.bf16.vlgmr.msrb.gmra.mxu0 %v2126_v4  ;;  %v1692_v40 = vld [vmem:[%s2541_s1 + $0x10c] sm:$0xf] }
  0x5b   : > { %955 = vmatpush.bf16.msra.mxu0 %v1649_v21  ;;  %924 = vmatmul.bf16.vlgmr.msrb.gmra.mxu1 %v2147_v15  ;;  %v1317_v21 = vor.u32 %v1668_v12, %v1314_v14  ;;  %v1724_v42 = vld [vmem:[%s2541_s1 + $0x20c] sm:$0xf] }
  0x5c   : > { %968 = vmatpush.bf16.msra.mxu1 %v1397_v22  ;;  %994 = vmatpush.bf16.msra.mxu3 %v1653_v27  ;;  %v1445_v22 = vor.u32 %v1700_v16, %v1442_v17  ;;  %v1298_v27 = vld [vmem:[%s2541_s1 + $0x38] sm:$0xf0]  ;;  %v355_v16 = vperm.slane %v350_v48, 3 }
  0x5d   : > { %981 = vmatpush.bf16.msra.mxu2 %v1525_v23  ;;  %950 = vmatmul.bf16.vlgmr.msrb.gmra.mxu3 %v2126_v4  ;;  %v1552_v23 = vld [vmem:[%s2541_s1 + $0x228] sm:$0xf] }
  0x5e   : > { %937 = vmatmul.bf16.vlgmr.msrb.gmra.mxu2 %v2124_v3  ;;  %v1553_v32 = vor.u32 %v1730_v24, %v1552_v23 }
  0x5f   : > { %956 = vmatpush.bf16.msra.mxu0 %v1633_v33  ;;  %v1301_v33 = vor.u32 %v1664_v25, %v1298_v27 }
  0x60   : > { %969 = vmatpush.bf16.msra.mxu1 %v1381_v34  ;;  %995 = vmatpush.bf16.msra.mxu3 %v1637_v39  ;;  %v1429_v34 = vor.u32 %v1696_v28, %v1426_v29  ;;  %v1282_v39 = vld [vmem:[%s2541_s1 + $0x18] sm:$0xf0] }
  0x61   : > { %982 = vmatpush.bf16.msra.mxu2 %v1509_v35  ;;  %v1536_v35 = vld [vmem:[%s2541_s1 + $0x208] sm:$0xf] }
  0x62   : > { %v1537_v44 = vor.u32 %v1726_v36, %v1536_v35 }
  0x63   : > { %957 = vmatpush.bf16.msra.mxu0 %v1617_v45  ;;  %v1285_v45 = vor.u32 %v1660_v37, %v1282_v39 }
  0x64   : > { %970 = vmatpush.bf16.msra.mxu1 %v1365_v46  ;;  %996 = vmatpush.bf16.msra.mxu3 %v1621_v51  ;;  %v1413_v46 = vor.u32 %v1692_v40, %v1410_v41 }
  0x65   : > { %983 = vmatpush.bf16.msra.mxu2 %v1493_v47  ;;  %v1541_v47 = vor.u32 %v1724_v42, %v1538_v43 }
  0x67   : > { %958 = vmatpush.bf16.msra.mxu0 %v1601_v57 }
  0x68   : > { %971 = vmatpush.bf16.msra.mxu1 %v1349_v58  ;;  %997 = vmatpush.bf16.msra.mxu3 %v1605_v63 }
  0x69   : > { %984 = vmatpush.bf16.msra.mxu2 %v1477_v59 }
  0x6b   : > { %959 = vmatpush.bf16.msra.mxu0 %v1585_v7 }
  0x6c   : > { %972 = vmatpush.bf16.msra.mxu1 %v1333_v8  ;;  %998 = vmatpush.bf16.msra.mxu3 %v1589_v13  ;;  %v354_v8 = vperm.slane %v350_v48, 2 }
  0x6d   : > { %985 = vmatpush.bf16.msra.mxu2 %v1461_v9 }
  0x6f   : > { %960 = vmatpush.bf16.msra.mxu0 %v1569_v20 }
  0x70   : > { %973 = vmatpush.bf16.msra.mxu1 %v1317_v21  ;;  %999 = vmatpush.bf16.msra.mxu3 %v1573_v26 }
  0x71   : > { %986 = vmatpush.bf16.msra.mxu2 %v1445_v22 }
  0x73   : > { %961 = vmatpush.bf16.msra.mxu0 %v1553_v32 }
  0x74   : > { %974 = vmatpush.bf16.msra.mxu1 %v1301_v33  ;;  %1000 = vmatpush.bf16.msra.mxu3 %v1557_v38 }
  0x75   : > { %987 = vmatpush.bf16.msra.mxu2 %v1429_v34 }
  0x77   : > { %962 = vmatpush.bf16.msra.mxu0 %v1537_v44 }
  0x78   : > { %975 = vmatpush.bf16.msra.mxu1 %v1285_v45  ;;  %1001 = vmatpush.bf16.msra.mxu3 %v1541_v47 }
  0x79   : > { %988 = vmatpush.bf16.msra.mxu2 %v1413_v46 }
  0x7a   : > { %963 = vmatmul.bf16.vlgmr.msra.gmra.mxu0 %v2147_v15 }
  0x7b   : > { %976 = vmatmul.bf16.vlgmr.msra.gmra.mxu1 %v2124_v3  ;;  %1002 = vmatmul.bf16.vlgmr.msra.gmra.mxu3 %v2147_v15  ;;  %v353_v15 = vperm.slane %v350_v48, 1 }
  0x7c   : > { %989 = vmatmul.bf16.vlgmr.msra.gmra.mxu2 %v2126_v4 }
  0xb7   : > { %v860_v51 = vpop.f32.mrf.mxu0 }
  0xb8   : > { %v873_v50 = vpop.f32.mrf.mxu1  ;;  %v861_v52 = vadd.f32 %v860_v51, %v352_v49 }
  0xba   : > { %v874_v53 = vadd.f32 %v873_v50, %v861_v52 }
  0xbf   : > { %v862_v57 = vpop.f32.mrf.mxu0 }
  0xc0   : > { %v875_v54 = vpop.f32.mrf.mxu1  ;;  %v899_v56 = vpop.f32.mrf.mxu3 }
  0xc1   : > { %v886_v55 = vpop.f32.mrf.mxu2  ;;  %v900_v59 = vadd.f32 %v899_v56, %v353_v15 }
  0xc2   : > { %v887_v58 = vadd.f32 %v886_v55, %v874_v53 }
  0xc4   : > { %1104 = vst [vmem:[%s2545_s5] sm:$0xff] %v887_v58  ;;  %v1063_v17 = vmul.f32 %v887_v58, %v887_v58  ;;  %v1018_v21 = vrot.slane %v887_v58, 4 }
  0xc6   : > { %v1067_v26 = vrot.slane %v1063_v17, 4  ;;  %v1019_v30 = vadd.f32 %v1018_v21, %v887_v58 }
  0xc8   : > { %v901_v4 = vpop.f32.mrf.mxu3  ;;  %v1068_v38 = vadd.f32 %v1067_v26, %v1063_v17  ;;  %v1020_v43 = vrot.slane %v1019_v30, 2 }
  0xc9   : > { %v888_v3 = vpop.f32.mrf.mxu2 }
  0xca   : > { %v1069_v48 = vrot.slane %v1068_v38, 2  ;;  %v1021_v53 = vadd.f32 %v1020_v43, %v1019_v30 }
  0xcc   : > { %v1070_v4 = vadd.f32 %v1069_v48, %v1068_v38 }
  0xd7   : > { %v912_v60 = vpop.f32.mrf.mxu0 }
  0xd8   : > { %v913_v61 = vadd.f32 %v912_v60, %v900_v59  ;;  %v925_v62 = vpop.f32.mrf.mxu1 }
  0xda   : > { %v926_v63 = vadd.f32 %v925_v62, %v913_v61  ;;  %v1022_v62 = vrot.slane %v1021_v53, 1 }
  0xdc   : > { %1105 = vst [vmem:[%s2545_s5 + $0x8] sm:$0xff] %v926_v63  ;;  %v1064_v9 = vmul.f32 %v926_v63, %v926_v63  ;;  %v1024_v11 = vrot.slane %v926_v63, 4 }
  0xde   : > { %v1073_v12 = vrot.slane %v1064_v9, 4  ;;  %v1025_v20 = vadd.f32 %v1024_v11, %v926_v63 }
  0xdf   : > { %v914_v2 = vpop.f32.mrf.mxu0 }
  0xe0   : > { %v951_v1 = vpop.f32.mrf.mxu3  ;;  %v927_v5 = vpop.f32.mrf.mxu1  ;;  %v1074_v22 = vadd.f32 %v1073_v12, %v1064_v9  ;;  %v1026_v29 = vrot.slane %v1025_v20, 2  ;;  %v1057_v12 = vlaneseq }
  0xe1   : > { %v938_v0 = vpop.f32.mrf.mxu2  ;;  %v1071_v5 = vrot.slane %v1070_v4, 1 }
  0xe2   : > { %v939_v10 = vadd.f32 %v938_v0, %v354_v8  ;;  %v1075_v31 = vrot.slane %v1074_v22, 2  ;;  %v1027_v40 = vadd.f32 %v1026_v29, %v1025_v20  ;;  %vm1059_vm4 = vcmp.lt.s32.totalorder %v1057_v12, 512 }
  0xe3   : > { %v1072_v17 = vadd.f32 %v1071_v5, %v1070_v4 }
  0xe4   : > { %v952_v13 = vadd.f32 %v951_v1, %v939_v10  ;;  %v1076_v44 = vadd.f32 %v1075_v31, %v1074_v22  ;;  %v1028_v49 = vrot.slane %v1027_v40, 1  ;;  %v1023_v10 = vadd.f32 %v1022_v62, %v1021_v53 }
  0xe6   : > { %v1077_v54 = vrot.slane %v1076_v44, 1  ;;  %v1029_v15 = vadd.f32 %v1028_v49, %v1027_v40 }
  0xe8   : > { %v953_v7 = vpop.f32.mrf.mxu3  ;;  %v1078_v63 = vadd.f32 %v1077_v54, %v1076_v44 }
  0xe9   : > { %v940_v6 = vpop.f32.mrf.mxu2 }
  0xea   : > { %v1046_v6 = vrot.slane %v1029_v15, 7  ;;  %v1095_v11 = vrot.slane %v1078_v63, 7 }
  0xf7   : > { %v964_v14 = vpop.f32.mrf.mxu0 }
  0xf8   : > { %v965_v18 = vadd.f32 %v964_v14, %v952_v13  ;;  %v977_v19 = vpop.f32.mrf.mxu1 }
  0xf9   : > { %v978_v25 = vadd.f32 %v977_v19, %v355_v16  ;;  %v1050_v19 = vsel %vm1049_vm1, %v1023_v10, %v1046_v6 }
  0xfa   : > { %v1030_v23 = vrot.slane %v965_v18, 4  ;;  %v1065_v24 = vmul.f32 %v965_v18, %v965_v18  ;;  %1106 = vst [vmem:[%s2545_s5 + $0x10] sm:$0xff] %v965_v18 }
  0xfc   : > { %v1031_v27 = vadd.f32 %v1030_v23, %v965_v18  ;;  %v1079_v28 = vrot.slane %v1065_v24, 4  ;;  %v1017_v18 = vld [vmem:[#allocation2] sm:$0xf] }
  0xfe   : > { %v1080_v32 = vadd.f32 %v1079_v28, %v1065_v24  ;;  %v1032_v34 = vrot.slane %v1031_v27, 2  ;;  %v1003_v36 = vpop.f32.mrf.mxu3  ;;  %v1062_v24 = vld [vmem:[#allocation3] sm:$0xf] }
  0xff   : > { %v990_v33 = vpop.f32.mrf.mxu2  ;;  %v966_v37 = vpop.f32.mrf.mxu0 }
 0x100   : > { %v991_v35 = vadd.f32 %v990_v33, %v978_v25  ;;  %v979_v39 = vpop.f32.mrf.mxu1  ;;  %v1081_v41 = vrot.slane %v1080_v32, 2  ;;  %v1033_v45 = vadd.f32 %v1032_v34, %v1031_v27  ;;  %v1098_v25 = vsel %vm1049_vm1, %v1072_v17, %v1095_v11 }
 0x102   : > { %v1004_v42 = vadd.f32 %v1003_v36, %v991_v35  ;;  %v1082_v50 = vadd.f32 %v1081_v41, %v1080_v32  ;;  %v1034_v56 = vrot.slane %v1033_v45, 1 }
 0x104   : > { %v1036_v46 = vrot.slane %v1004_v42, 4  ;;  %v1066_v47 = vmul.f32 %v1004_v42, %v1004_v42  ;;  %1107 = vst [vmem:[%s2545_s5 + $0x18] sm:$0xff] %v1004_v42  ;;  %v1083_v59 = vrot.slane %v1082_v50, 1  ;;  %v1035_v0 = vadd.f32 %v1034_v56, %v1033_v45 }
 0x106   : > { %v1037_v51 = vadd.f32 %v1036_v46, %v1004_v42  ;;  %v1085_v52 = vrot.slane %v1066_v47, 4  ;;  %v1005_v3 = vpop.f32.mrf.mxu3  ;;  %v1084_v7 = vadd.f32 %v1083_v59, %v1082_v50  ;;  %v1047_v13 = vrot.slane %v1035_v0, 6 }
 0x107   : > { %v992_v55 = vpop.f32.mrf.mxu2 }
 0x108   : > { %v1038_v57 = vrot.slane %v1037_v51, 2  ;;  %v1086_v58 = vadd.f32 %v1085_v52, %v1066_v47  ;;  %v1096_v20 = vrot.slane %v1084_v7, 6 }
 0x10a   : > { %v1039_v60 = vadd.f32 %v1038_v57, %v1037_v51  ;;  %v1087_v61 = vrot.slane %v1086_v58, 2 }
 0x10c   : > { %v1040_v1 = vrot.slane %v1039_v60, 1  ;;  %v1088_v2 = vadd.f32 %v1087_v61, %v1086_v58 }
 0x10e   : > { %v1041_v8 = vadd.f32 %v1040_v1, %v1039_v60  ;;  %v1089_v9 = vrot.slane %v1088_v2, 1 }
 0x110   : > { %v1048_v14 = vrot.slane %v1041_v8, 5  ;;  %v1090_v16 = vadd.f32 %v1089_v9, %v1088_v2 }
 0x112   : > { %v1052_v21 = vsel %vm1051_vm2, %v1047_v13, %v1048_v14  ;;  %v1097_v22 = vrot.slane %v1090_v16, 5 }
 0x113   : > { %v1054_v23 = vsel %vm1053_vm3, %v1050_v19, %v1052_v21 }
 0x114   : > { %v1056_v26 = vadd.f32 %v1054_v23, %v1017_v18  ;;  %v1099_v27 = vsel %vm1051_vm2, %v1096_v20, %v1097_v22 }
 0x115   : > { %v1100_v28 = vsel %vm1053_vm3, %v1098_v25, %v1099_v27 }
 0x116   : > { %1061 = vst.msk [vmem:[#allocation2] sm:$0xf] %vm1059_vm4, %v1056_v26  ;;  %v1102_v29 = vadd.f32 %v1100_v28, %v1062_v24 }
 0x118   : > { %1103 = vst.msk [vmem:[#allocation3] sm:$0xf] %vm1059_vm4, %v1102_v29 }
 0x119 PF: > { %p1654_p6 = scmp.ne.s32.totalorder %s1800_s18, 1 }
 0x11b   : > { %1111 = sbr.rel (%p1654_p6) target bundleno = 333 (0x14d), region = 52 }
 0x120   : > { %v1116_v30 = vld [vmem:[#allocation2] sm:$0x1]  ;;  %v1117_v31 = vld [vmem:[#allocation3] sm:$0x1]  ;;  %v1118_v32 = vld [vmem:[#allocation2 + $0x1] sm:$0x1] }
 0x121   : > { %v1120_v33 = vld [vmem:[#allocation3 + $0x1] sm:$0x1]  ;;  %v1122_v34 = vld [vmem:[#allocation2 + $0x2] sm:$0x1]  ;;  %v1119_v35 = vadd.f32 %v1118_v32, %v1116_v30  ;;  %v1124_v37 = vld [vmem:[#allocation3 + $0x2] sm:$0x1] }
 0x122   : > { %v1121_v36 = vadd.f32 %v1120_v33, %v1117_v31  ;;  %v1126_v38 = vld [vmem:[#allocation2 + $0x3] sm:$0x1]  ;;  %v1128_v39 = vld [vmem:[#allocation3 + $0x3] sm:$0x1]  ;;  %v1149_v56 = vld [vmem:[%s2543_s3] sm:$0x1] }
 0x123   : > { %v1123_v40 = vadd.f32 %v1122_v34, %v1119_v35  ;;  %v1112_v54 = vld [vmem:[%s2545_s5] sm:$0xff]  ;;  %v1113_v57 = vld [vmem:[%s2545_s5 + $0x8] sm:$0xff]  ;;  %v1114_v58 = vld [vmem:[%s2545_s5 + $0x10] sm:$0xff] }
 0x124   : > { %v1125_v41 = vadd.f32 %v1124_v37, %v1121_v36  ;;  %v1115_v3 = vld [vmem:[%s2545_s5 + $0x18] sm:$0xff]  ;;  %v1162_v15 = vld [vmem:[%s2543_s3 + $0x1] sm:$0x1]  ;;  %v1175_v59 = vld [vmem:[%s2543_s3 + $0x2] sm:$0x1] }
 0x125   : > { %v1127_v42 = vadd.f32 %v1126_v38, %v1123_v40  ;;  %v1188_v60 = vld [vmem:[%s2543_s3 + $0x3] sm:$0x1]  ;;  %v1780_v8 = vld [vmem:[%s2544_s4] ss:$0 sm:$0xff]  ;;  %v1781_v9 = vld [vmem:[%s2544_s4 + $0x1] ss:$0 sm:$0xff] }
 0x126   : > { %v1129_v43 = vadd.f32 %v1128_v39, %v1125_v41  ;;  %v1782_v13 = vld [vmem:[%s2544_s4 + $0x2] ss:$0 sm:$0xff]  ;;  %v1783_v16 = vld [vmem:[%s2544_s4 + $0x3] ss:$0 sm:$0xff] }
 0x127   : > { %v1130_v44 = vmul.f32 0.03125, %v1127_v42 }
 0x128   : > { %v1131_v45 = vmul.f32 0.03125, %v1129_v43 }
 0x129   : > { %v1132_v46 = vmul.f32 %v1130_v44, %v1130_v44  ;;  %v1146_v53 = vperm.slane %v1130_v44, 0 }
 0x12b   : > { %v1133_v47 = vsub.f32 %v1131_v45, %v1132_v46  ;;  %v1148_v61 = vsub.f32 %v1112_v54, %v1146_v53  ;;  %v1161_v63 = vsub.f32 %v1113_v57, %v1146_v53  ;;  %v1174_v0 = vsub.f32 %v1114_v58, %v1146_v53 }
 0x12c   : > { %v1187_v1 = vsub.f32 %v1115_v3, %v1146_v53 }
 0x12d   : > { %v1134_v48 = vadd.f32 1e-05, %v1133_v47 }
 0x12f   : > { %1784 = vrsqrt.f32 %v1134_v48  ;;  %vm1141_vm5 = vweird.f32 %v1134_v48 }
 0x135   : > { %v1785_v49 = vpop.eup %1784 }
 0x136   : > { %v1136_v50 = vmul.f32 %v1785_v49, %v1134_v48  ;;  %vm1142_vm6 = vweird.f32 %v1785_v49 }
 0x137   : > { %vm1143_vm7 = vmor %vm1141_vm5, %vm1142_vm6 }
 0x138   : > { %v1137_v51 = vmul.f32 %v1785_v49, %v1136_v50 }
 0x13a   : > { %v1138_v52 = vmul.f32 0.5, %v1137_v51 }
 0x13c   : > { %v1139_v55 = vsub.f32 1.5, %v1138_v52 }
 0x13e   : > { %v1140_v4 = vmul.f32 %v1785_v49, %v1139_v55 }
 0x140   : > { %v1144_v62 = vsel %vm1143_vm7, %v1785_v49, %v1140_v4 }
 0x141   : > { %v1150_v2 = vmul.f32 %v1149_v56, %v1144_v62  ;;  %v1163_v5 = vmul.f32 %v1162_v15, %v1144_v62  ;;  %v1176_v6 = vmul.f32 %v1175_v59, %v1144_v62  ;;  %v1189_v7 = vmul.f32 %v1188_v60, %v1144_v62 }
 0x143   : > { %v1152_v10 = vperm.slane %v1150_v2, 0  ;;  %v1165_v11 = vperm.slane %v1163_v5, 0  ;;  %v1178_v12 = vperm.slane %v1176_v6, 0  ;;  %v1191_v14 = vperm.slane %v1189_v7, 0 }
 0x145   : > { %v1154_v17 = vmul.f32 %v1152_v10, %v1148_v61  ;;  %v1167_v18 = vmul.f32 %v1165_v11, %v1161_v63  ;;  %v1180_v19 = vmul.f32 %v1178_v12, %v1174_v0  ;;  %v1193_v20 = vmul.f32 %v1191_v14, %v1187_v1 }
 0x147   : > { %v1159_v21 = vadd.f32 %v1780_v8, %v1154_v17  ;;  %v1172_v22 = vadd.f32 %v1781_v9, %v1167_v18  ;;  %v1185_v23 = vadd.f32 %v1782_v13, %v1180_v19  ;;  %v1198_v24 = vadd.f32 %v1783_v16, %v1193_v20 }
 0x149   : > { %1160 = vst [vmem:[%s2545_s5] sm:$0xff] %v1159_v21 }
 0x14a   : > { %1173 = vst [vmem:[%s2545_s5 + $0x8] sm:$0xff] %v1172_v22 }
 0x14b   : > { %1186 = vst [vmem:[%s2545_s5 + $0x10] sm:$0xff] %v1185_v23 }
 0x14c   : > { %1199 = vst [vmem:[%s2545_s5 + $0x18] sm:$0xff] %v1198_v24 }
 0x14d PF: > { %s15_s20 = sadd.s32 1, %s1808_s20   ;;  %s2546_s18 = smov %s1804_s19 }
 0x14e   : > { %p12_p7 = scmp.ge.s32.totalorder %s15_s20, 4   ;;  %s2547_s19 = smov %s2549_s21 }
 0x150   :  { %14 = sbr.rel (!%p12_p7) target bundleno = 2 (0x2), region = 82 }

// kernel: autoencoder_forward.16
= control target key start
LH: loop header
LB: loop body
LE: loop exit
PB: predicated region body
PF: predicated region fallthrough
CT: control target
= control target key end

     0   :  { %s1885_s18 = smov 0   ;;  %s1887_s19 = smov 0   ;;  %s2636_s0 = inlined_call_operand.vmem [shape: bf16[32,288], index: 0, kind: input, shape index: {}]   ;;  %s2637_s1 = inlined_call_operand.vmem [shape: bf16[288,512], index: 1, kind: input, shape index: {}]   ;;  %s2638_s2 = inlined_call_operand.vmem [shape: f32[1,512], index: 2, kind: input, shape index: {}]   ;;  %s2639_s3 = inlined_call_operand.vmem [shape: f32[1,512], index: 3, kind: input, shape index: {}]   ;;  %s2640_s4 = inlined_call_operand.vmem [shape: f32[1,512], index: 4, kind: input, shape index: {}]   ;;  %s2641_s5 = inlined_call_operand.vmem [shape: f32[32,512], index: 5, kind: output, shape index: {}]  }
   0x1   :  { %s1889_s20 = smov 0  }
   0x2 LB: > { %s27_s21 = sadd.s32 1, %s1848_s19  ;;  %p1384_p0 = scmp.ge.s32.totalorder %s1852_s20, 1  ;;  %s1852_s20 = sphi %s1889_s20, %s15_s20   ;;  %s1848_s19 = sphi %s1887_s19, %s2643_s19   ;;  %s1844_s18 = sphi %s1885_s18, %s2642_s18  }
   0x3   : > { %p29_p1 = scmp.ge.s32.totalorder %s27_s21, 2  ;;  %p201_p2 = scmp.lt.s32.totalorder %s1852_s20, 3 }
   0x5   : > { %s2645_s21 = smov (%p29_p1, %s27_s21), 0  ;;  %p202_p3 = pnand %p1384_p0, %p201_p2 }
   0x6   : > { %p246_p4 = scmp.eq.s32.totalorder (!%p202_p3), %s1844_s18, 0 }
   0x7   : > { %205 = sbr.rel (%p202_p3) target bundleno = 371 (0x173), region = 40 }
   0xc   : > { %251 = sbr.rel (!%p246_p4) target bundleno = 17 (0x11), region = 44  ;;  %v252_v0 = vlaneseq (%p246_p4)  ;;  %v1854_v1 = vmov (%p246_p4), 0.0  }
   0xe   : > { %vm254_vm0 = vcmp.lt.s32.totalorder (%p246_p4), %v252_v0, 512 }
   0xf   : > { %256 = vst.msk [vmem:[#allocation2] sm:$0xf] (%p246_p4), %vm254_vm0, %v1854_v1 }
  0x10   : > { %257 = vst.msk [vmem:[#allocation3] sm:$0xf] (%p246_p4), %vm254_vm0, %v1854_v1 }
  0x11 PF: > { %p1386_p5 = scmp.ne.s32.totalorder %s1844_s18, 0 }
  0x13   : > { %260 = sbr.rel (%p1386_p5) target bundleno = 305 (0x131), region = 48 }
  0x18   : > { %v1525_v2 = vld [vmem:[%s2637_s1 + $0xe0] sm:$0xf]  ;;  %v1749_v3 = vld [vmem:[%s2637_s1 + $0xec] sm:$0xf0]  ;;  %v1747_v11 = vld [vmem:[%s2637_s1 + $0xe4] sm:$0xf] }
  0x19   : > { %v1653_v4 = vld [vmem:[%s2637_s1 + $0x1e0] sm:$0xf]  ;;  %v1526_v5 = vor.u32 %v1749_v3, %v1525_v2  ;;  %v1781_v6 = vld [vmem:[%s2637_s1 + $0x1ec] sm:$0xf0]  ;;  %v1527_v12 = vld [vmem:[%s2637_s1 + $0xf0] sm:$0xf0] }
  0x1a   : > { %v1685_v7 = vld [vmem:[%s2637_s1 + $0x220] sm:$0xf]  ;;  %v1789_v8 = vld [vmem:[%s2637_s1 + $0x22c] sm:$0xf0]  ;;  %v1654_v9 = vor.u32 %v1781_v6, %v1653_v4  ;;  %v1530_v14 = vor.u32 %v1747_v11, %v1527_v12  ;;  %v1743_v22 = vld [vmem:[%s2637_s1 + $0xc4] sm:$0xf] }
  0x1b   : > { %v1686_v10 = vor.u32 %v1789_v8, %v1685_v7  ;;  %v1509_v13 = vld [vmem:[%s2637_s1 + $0xc0] sm:$0xf]  ;;  %748 = vmatpush.bf16.msra.mxu0 %v1526_v5  ;;  %v1745_v15 = vld [vmem:[%s2637_s1 + $0xcc] sm:$0xf0]  ;;  %v1511_v24 = vld [vmem:[%s2637_s1 + $0xd0] sm:$0xf0] }
  0x1c   : > { %v1637_v16 = vld [vmem:[%s2637_s1 + $0x1c0] sm:$0xf]  ;;  %v1777_v17 = vld [vmem:[%s2637_s1 + $0x1cc] sm:$0xf0]  ;;  %767 = vmatpush.bf16.msra.mxu1 %v1654_v9  ;;  %v1510_v18 = vor.u32 %v1745_v15, %v1509_v13  ;;  %805 = vmatpush.bf16.msra.mxu3 %v1530_v14  ;;  %v1397_v25 = vld [vmem:[%s2636_s0 + $0x8] sm:$0xf]  ;;  %v1514_v27 = vor.u32 %v1743_v22, %v1511_v24 }
  0x1d   : > { %792 = vmatpush.bf16.msra.mxu2 %v1686_v10  ;;  %v1638_v19 = vor.u32 %v1777_v17, %v1637_v16  ;;  %v1669_v20 = vld [vmem:[%s2637_s1 + $0x200] sm:$0xf]  ;;  %v1785_v21 = vld [vmem:[%s2637_s1 + $0x20c] sm:$0xf0]  ;;  %v1715_v26 = vld [vmem:[%s2636_s0 + $0x10] sm:$0xf0] }
  0x1e   : > { %v1670_v23 = vor.u32 %v1785_v21, %v1669_v20  ;;  %vm741_vm1 = vcmask 261120   ;;  %v1493_v28 = vld [vmem:[%s2637_s1 + $0xa0] sm:$0xf]  ;;  %v1741_v29 = vld [vmem:[%s2637_s1 + $0xac] sm:$0xf0]  ;;  %v1967_v30 = vor.u32 %v1715_v26, %v1397_v25  ;;  %vm1051_vm2 = vcmask 1040384  }
  0x1f   : > { %749 = vmatpush.bf16.msra.mxu0 %v1510_v18  ;;  %v1494_v31 = vor.u32 %v1741_v29, %v1493_v28  ;;  %v1621_v32 = vld [vmem:[%s2637_s1 + $0x1a0] sm:$0xf]  ;;  %v1773_v33 = vld [vmem:[%s2637_s1 + $0x1ac] sm:$0xf0]  ;;  %v1739_v34 = vld [vmem:[%s2637_s1 + $0xa4] sm:$0xf] }
  0x20   : > { %768 = vmatpush.bf16.msra.mxu1 %v1638_v19  ;;  %v1622_v35 = vor.u32 %v1773_v33, %v1621_v32  ;;  %v1495_v36 = vld [vmem:[%s2637_s1 + $0xb0] sm:$0xf0]  ;;  %v1779_v37 = vld [vmem:[%s2637_s1 + $0x1e4] sm:$0xf]  ;;  %806 = vmatpush.bf16.msra.mxu3 %v1514_v27  ;;  %v1477_v41 = vld [vmem:[%s2637_s1 + $0x80] sm:$0xf] }
  0x21   : > { %793 = vmatpush.bf16.msra.mxu2 %v1670_v23  ;;  %v1655_v38 = vld [vmem:[%s2637_s1 + $0x1f0] sm:$0xf0]  ;;  %v1498_v39 = vor.u32 %v1739_v34, %v1495_v36  ;;  %v1737_v42 = vld [vmem:[%s2637_s1 + $0x8c] sm:$0xf0]  ;;  %v1605_v43 = vld [vmem:[%s2637_s1 + $0x180] sm:$0xf] }
  0x22   : > { %v1658_v40 = vor.u32 %v1779_v37, %v1655_v38  ;;  %v1769_v44 = vld [vmem:[%s2637_s1 + $0x18c] sm:$0xf0]  ;;  %v1735_v45 = vld [vmem:[%s2637_s1 + $0x84] sm:$0xf]  ;;  %v1479_v46 = vld [vmem:[%s2637_s1 + $0x90] sm:$0xf0]  ;;  %v1478_v47 = vor.u32 %v1737_v42, %v1477_v41 }
  0x23   : > { %750 = vmatpush.bf16.msra.mxu0 %v1494_v31  ;;  %v1775_v48 = vld [vmem:[%s2637_s1 + $0x1c4] sm:$0xf]  ;;  %v1639_v49 = vld [vmem:[%s2637_s1 + $0x1d0] sm:$0xf0]  ;;  %v1606_v50 = vor.u32 %v1769_v44, %v1605_v43  ;;  %v1461_v52 = vld [vmem:[%s2637_s1 + $0x60] sm:$0xf]  ;;  %v1482_v54 = vor.u32 %v1735_v45, %v1479_v46 }
  0x24   : > { %1699 = vmatmul.msk.bf16.vlgmr.msra.gmra.mxu2 %vm741_vm1, %v1967_v30  ;;  %769 = vmatpush.bf16.msra.mxu1 %v1622_v35  ;;  %v1642_v51 = vor.u32 %v1775_v48, %v1639_v49  ;;  %v1733_v53 = vld [vmem:[%s2637_s1 + $0x6c] sm:$0xf0]  ;;  %v1589_v55 = vld [vmem:[%s2637_s1 + $0x160] sm:$0xf]  ;;  %v1771_v57 = vld [vmem:[%s2637_s1 + $0x1a4] sm:$0xf] }
  0x25   : > { %824 = vmatpush.bf16.msrb.mxu2 %v1658_v40  ;;  %807 = vmatpush.bf16.msra.mxu3 %v1498_v39  ;;  %v1765_v56 = vld [vmem:[%s2637_s1 + $0x16c] sm:$0xf0]  ;;  %v1731_v58 = vld [vmem:[%s2637_s1 + $0x64] sm:$0xf]  ;;  %v1463_v59 = vld [vmem:[%s2637_s1 + $0x70] sm:$0xf0]  ;;  %v1462_v61 = vor.u32 %v1733_v53, %v1461_v52 }
  0x26   : > { %v1623_v60 = vld [vmem:[%s2637_s1 + $0x1b0] sm:$0xf0]  ;;  %v1590_v62 = vor.u32 %v1765_v56, %v1589_v55  ;;  %v1445_v0 = vld [vmem:[%s2637_s1 + $0x40] sm:$0xf]  ;;  %v1729_v1 = vld [vmem:[%s2637_s1 + $0x4c] sm:$0xf0]  ;;  %v1466_v3 = vor.u32 %v1731_v58, %v1463_v59 }
  0x27   : > { %751 = vmatpush.bf16.msra.mxu0 %v1478_v47  ;;  %v1626_v63 = vor.u32 %v1771_v57, %v1623_v60  ;;  %v1573_v2 = vld [vmem:[%s2637_s1 + $0x140] sm:$0xf]  ;;  %v1761_v4 = vld [vmem:[%s2637_s1 + $0x14c] sm:$0xf0]  ;;  %v1767_v5 = vld [vmem:[%s2637_s1 + $0x184] sm:$0xf]  ;;  %v1446_v9 = vor.u32 %v1729_v1, %v1445_v0 }
  0x28   : > { %770 = vmatpush.bf16.msra.mxu1 %v1606_v50  ;;  %v1607_v6 = vld [vmem:[%s2637_s1 + $0x190] sm:$0xf0]  ;;  %v1727_v7 = vld [vmem:[%s2637_s1 + $0x44] sm:$0xf]  ;;  %v1409_v10 = vld [vmem:[%s2636_s0 + $0x20] sm:$0xf]  ;;  %v1574_v12 = vor.u32 %v1761_v4, %v1573_v2 }
  0x29   : > { %825 = vmatpush.bf16.msrb.mxu2 %v1642_v51  ;;  %808 = vmatpush.bf16.msra.mxu3 %v1482_v54  ;;  %v1447_v8 = vld [vmem:[%s2637_s1 + $0x50] sm:$0xf0]  ;;  %v1718_v11 = vld [vmem:[%s2636_s0 + $0x28] sm:$0xf0]  ;;  %v1610_v13 = vor.u32 %v1767_v5, %v1607_v6  ;;  %v1429_v14 = vld [vmem:[%s2637_s1 + $0x20] sm:$0xf] }
  0x2a   : > { %v1725_v15 = vld [vmem:[%s2637_s1 + $0x2c] sm:$0xf0]  ;;  %v1557_v16 = vld [vmem:[%s2637_s1 + $0x120] sm:$0xf]  ;;  %v1450_v17 = vor.u32 %v1727_v7, %v1447_v8  ;;  %v1763_v19 = vld [vmem:[%s2637_s1 + $0x164] sm:$0xf]  ;;  %v2091_v23 = vor.u32 %v1718_v11, %v1409_v10 }
  0x2b   : > { %752 = vmatpush.bf16.msra.mxu0 %v1462_v61  ;;  %v1757_v18 = vld [vmem:[%s2637_s1 + $0x12c] sm:$0xf0]  ;;  %v1591_v20 = vld [vmem:[%s2637_s1 + $0x170] sm:$0xf0]  ;;  %v1723_v21 = vld [vmem:[%s2637_s1 + $0x24] sm:$0xf]  ;;  %v1430_v24 = vor.u32 %v1725_v15, %v1429_v14 }
  0x2c   : > { %771 = vmatpush.bf16.msra.mxu1 %v1590_v62  ;;  %v1431_v22 = vld [vmem:[%s2637_s1 + $0x30] sm:$0xf0]  ;;  %v1413_v25 = vld [vmem:[%s2637_s1] sm:$0xf]  ;;  %v1721_v26 = vld [vmem:[%s2637_s1 + $0xc] sm:$0xf0]  ;;  %v1558_v27 = vor.u32 %v1757_v18, %v1557_v16  ;;  %v1594_v28 = vor.u32 %v1763_v19, %v1591_v20 }
  0x2d   : > { %826 = vmatpush.bf16.msrb.mxu2 %v1626_v63  ;;  %809 = vmatpush.bf16.msra.mxu3 %v1466_v3  ;;  %v1541_v29 = vld [vmem:[%s2637_s1 + $0x100] sm:$0xf]  ;;  %v1753_v31 = vld [vmem:[%s2637_s1 + $0x10c] sm:$0xf0]  ;;  %v1719_v32 = vld [vmem:[%s2637_s1 + $0x4] sm:$0xf]  ;;  %v1434_v33 = vor.u32 %v1723_v21, %v1431_v22  ;;  %v1414_v40 = vor.u32 %v1721_v26, %v1413_v25 }
  0x2e   : > { %v1415_v34 = vld [vmem:[%s2637_s1 + $0x10] sm:$0xf0]  ;;  %v1759_v35 = vld [vmem:[%s2637_s1 + $0x144] sm:$0xf]  ;;  %v1389_v37 = vld [vmem:[%s2636_s0] sm:$0xf]  ;;  %v1542_v44 = vor.u32 %v1753_v31, %v1541_v29 }
  0x2f   : > { %753 = vmatpush.bf16.msra.mxu0 %v1446_v9  ;;  %v1575_v36 = vld [vmem:[%s2637_s1 + $0x150] sm:$0xf0]  ;;  %v1533_v38 = vld [vmem:[%s2637_s1 + $0xe8] sm:$0xf]  ;;  %v1750_v39 = vld [vmem:[%s2637_s1 + $0xf4] sm:$0xf0]  ;;  %v1418_v48 = vor.u32 %v1719_v32, %v1415_v34 }
  0x30   : > { %772 = vmatpush.bf16.msra.mxu1 %v1574_v12  ;;  %v1714_v41 = vld [vmem:[%s2636_s0 + $0x8] sm:$0xf0]  ;;  %v1661_v42 = vld [vmem:[%s2637_s1 + $0x1e8] sm:$0xf]  ;;  %v1782_v43 = vld [vmem:[%s2637_s1 + $0x1f4] sm:$0xf0]  ;;  %v1578_v45 = vor.u32 %v1759_v35, %v1575_v36  ;;  %v1534_v51 = vor.u32 %v1750_v39, %v1533_v38 }
  0x31   : > { %827 = vmatpush.bf16.msrb.mxu2 %v1610_v13  ;;  %810 = vmatpush.bf16.msra.mxu3 %v1450_v17  ;;  %v1713_v46 = vld [vmem:[%s2636_s0 + $0x4] sm:$0xf]  ;;  %v1391_v47 = vld [vmem:[%s2636_s0 + $0xc] sm:$0xf0]  ;;  %v1559_v50 = vld [vmem:[%s2637_s1 + $0x130] sm:$0xf0]  ;;  %v2149_v52 = vor.u32 %v1714_v41, %v1389_v37  ;;  %v1662_v53 = vor.u32 %v1782_v43, %v1661_v42 }
  0x32   : > { %v1755_v49 = vld [vmem:[%s2637_s1 + $0x124] sm:$0xf]  ;;  %v1517_v54 = vld [vmem:[%s2637_s1 + $0xc8] sm:$0xf]  ;;  %v1746_v55 = vld [vmem:[%s2637_s1 + $0xd4] sm:$0xf0]  ;;  %v2157_v56 = vor.u32 %v1713_v46, %v1391_v47 }
  0x33   : > { %754 = vmatpush.bf16.msra.mxu0 %v1430_v24  ;;  %v1645_v57 = vld [vmem:[%s2637_s1 + $0x1c8] sm:$0xf]  ;;  %v1778_v58 = vld [vmem:[%s2637_s1 + $0x1d4] sm:$0xf0]  ;;  %v1787_v59 = vld [vmem:[%s2637_s1 + $0x224] sm:$0xf]  ;;  %v1562_v60 = vor.u32 %v1755_v49, %v1559_v50  ;;  %v1518_v0 = vor.u32 %v1746_v55, %v1517_v54 }
  0x34   : > { %1700 = vmatmul.msk.bf16.gmra.mxu2 %vm741_vm1, %v2091_v23  ;;  %773 = vmatpush.bf16.msra.mxu1 %v1558_v27  ;;  %v1687_v61 = vld [vmem:[%s2637_s1 + $0x230] sm:$0xf0]  ;;  %v1751_v62 = vld [vmem:[%s2637_s1 + $0x104] sm:$0xf]  ;;  %v1501_v1 = vld [vmem:[%s2637_s1 + $0xa8] sm:$0xf]  ;;  %v1646_v3 = vor.u32 %v1778_v58, %v1645_v57 }
  0x35   : > { %828 = vmatpush.bf16.msrb.mxu2 %v1594_v28  ;;  %811 = vmatpush.bf16.msra.mxu3 %v1434_v33  ;;  %v1543_v63 = vld [vmem:[%s2637_s1 + $0x110] sm:$0xf0]  ;;  %v1690_v2 = vor.u32 %v1787_v59, %v1687_v61  ;;  %v1742_v4 = vld [vmem:[%s2637_s1 + $0xb4] sm:$0xf0]  ;;  %v1693_v5 = vld [vmem:[%s2637_s1 + $0x228] sm:$0xf] }
  0x36   : > { %v1790_v6 = vld [vmem:[%s2637_s1 + $0x234] sm:$0xf0]  ;;  %v1629_v7 = vld [vmem:[%s2637_s1 + $0x1a8] sm:$0xf]  ;;  %v1546_v9 = vor.u32 %v1751_v62, %v1543_v63  ;;  %v1502_v10 = vor.u32 %v1742_v4, %v1501_v1  ;;  %v1783_v19 = vld [vmem:[%s2637_s1 + $0x204] sm:$0xf] }
  0x37   : > { %755 = vmatpush.bf16.msra.mxu0 %v1414_v40  ;;  %v1774_v8 = vld [vmem:[%s2637_s1 + $0x1b4] sm:$0xf0]  ;;  %v1613_v11 = vld [vmem:[%s2637_s1 + $0x188] sm:$0xf]  ;;  %v1694_v12 = vor.u32 %v1790_v6, %v1693_v5  ;;  %v1671_v20 = vld [vmem:[%s2637_s1 + $0x210] sm:$0xf0] }
  0x38   : > { %774 = vmatpush.bf16.msra.mxu1 %v1542_v44  ;;  %v1485_v13 = vld [vmem:[%s2637_s1 + $0x88] sm:$0xf]  ;;  %v1630_v14 = vor.u32 %v1774_v8, %v1629_v7  ;;  %v1738_v15 = vld [vmem:[%s2637_s1 + $0x94] sm:$0xf0]  ;;  %v1674_v21 = vor.u32 %v1783_v19, %v1671_v20  ;;  %v1748_v27 = vld [vmem:[%s2637_s1 + $0xec] sm:$0xf] }
  0x39   : > { %829 = vmatpush.bf16.msrb.mxu2 %v1578_v45  ;;  %812 = vmatpush.bf16.msra.mxu3 %v1418_v48  ;;  %v1677_v16 = vld [vmem:[%s2637_s1 + $0x208] sm:$0xf]  ;;  %v1786_v17 = vld [vmem:[%s2637_s1 + $0x214] sm:$0xf0]  ;;  %v1486_v22 = vor.u32 %v1738_v15, %v1485_v13  ;;  %v1535_v28 = vld [vmem:[%s2637_s1 + $0xf8] sm:$0xf0] }
  0x3a   : > { %756 = vmatmul.bf16.vlgmr.msra.gmra.mxu0 %v2149_v52  ;;  %v1770_v18 = vld [vmem:[%s2637_s1 + $0x194] sm:$0xf0]  ;;  %v1469_v25 = vld [vmem:[%s2637_s1 + $0x68] sm:$0xf]  ;;  %v1678_v26 = vor.u32 %v1786_v17, %v1677_v16  ;;  %v1538_v32 = vor.u32 %v1748_v27, %v1535_v28  ;;  %v1744_v33 = vld [vmem:[%s2637_s1 + $0xcc] sm:$0xf] }
  0x3b   : > { %775 = vmatmul.bf16.vlgmr.msra.gmra.mxu1 %v2157_v56  ;;  %849 = vmatpush.bf16.msrb.mxu0 %v1690_v2  ;;  %v1401_v24 = vld [vmem:[%s2636_s0 + $0x18] sm:$0xf]  ;;  %v1614_v29 = vor.u32 %v1770_v18, %v1613_v11  ;;  %v1519_v34 = vld [vmem:[%s2637_s1 + $0xd8] sm:$0xf0]  ;;  %v1717_v35 = vld [vmem:[%s2636_s0 + $0x20] sm:$0xf0] }
  0x3c   : > { %862 = vmatpush.bf16.msrb.mxu1 %v1534_v51  ;;  %813 = vmatmul.bf16.vlgmr.msra.gmra.mxu3 %v2149_v52  ;;  %v1734_v31 = vld [vmem:[%s2637_s1 + $0x74] sm:$0xf0]  ;;  %v1597_v36 = vld [vmem:[%s2637_s1 + $0x168] sm:$0xf]  ;;  %v1716_v38 = vld [vmem:[%s2636_s0 + $0x1c] sm:$0xf]  ;;  %v1522_v40 = vor.u32 %v1744_v33, %v1519_v34  ;;  %v2265_v44 = vor.u32 %v1717_v35, %v1401_v24 }
  0x3d   : > { %881 = vmatpush.bf16.msrb.mxu3 %v1662_v53  ;;  %830 = vmatpush.bf16.msrb.mxu2 %v1562_v60  ;;  %v1766_v37 = vld [vmem:[%s2637_s1 + $0x174] sm:$0xf0]  ;;  %v1403_v39 = vld [vmem:[%s2636_s0 + $0x24] sm:$0xf0]  ;;  %v1470_v41 = vor.u32 %v1734_v31, %v1469_v25  ;;  %v1740_v42 = vld [vmem:[%s2637_s1 + $0xac] sm:$0xf] }
  0x3e   : > { %v1503_v43 = vld [vmem:[%s2637_s1 + $0xb8] sm:$0xf0]  ;;  %v1598_v45 = vor.u32 %v1766_v37, %v1597_v36  ;;  %v1453_v46 = vld [vmem:[%s2637_s1 + $0x48] sm:$0xf]  ;;  %v1730_v47 = vld [vmem:[%s2637_s1 + $0x54] sm:$0xf0]  ;;  %v2273_v48 = vor.u32 %v1716_v38, %v1403_v39 }
  0x3f   : > { %850 = vmatpush.bf16.msrb.mxu0 %v1674_v21  ;;  %v1581_v49 = vld [vmem:[%s2637_s1 + $0x148] sm:$0xf]  ;;  %v1762_v50 = vld [vmem:[%s2637_s1 + $0x154] sm:$0xf0]  ;;  %v1506_v51 = vor.u32 %v1740_v42, %v1503_v43  ;;  %v1454_v53 = vor.u32 %v1730_v47, %v1453_v46  ;;  %v1736_v54 = vld [vmem:[%s2637_s1 + $0x8c] sm:$0xf] }
  0x40   : > { %863 = vmatpush.bf16.msrb.mxu1 %v1518_v0  ;;  %v1487_v55 = vld [vmem:[%s2637_s1 + $0x98] sm:$0xf0]  ;;  %v1582_v57 = vor.u32 %v1762_v50, %v1581_v49  ;;  %v1437_v58 = vld [vmem:[%s2637_s1 + $0x28] sm:$0xf]  ;;  %v1726_v59 = vld [vmem:[%s2637_s1 + $0x34] sm:$0xf0] }
  0x41   : > { %882 = vmatpush.bf16.msrb.mxu3 %v1646_v3  ;;  %831 = vmatpush.bf16.msrb.mxu2 %v1546_v9  ;;  %v1565_v60 = vld [vmem:[%s2637_s1 + $0x128] sm:$0xf]  ;;  %v1758_v61 = vld [vmem:[%s2637_s1 + $0x134] sm:$0xf0]  ;;  %v1490_v62 = vor.u32 %v1736_v54, %v1487_v55  ;;  %v1438_v63 = vor.u32 %v1726_v59, %v1437_v58  ;;  %v1732_v0 = vld [vmem:[%s2637_s1 + $0x6c] sm:$0xf] }
  0x42   : > { %v1471_v1 = vld [vmem:[%s2637_s1 + $0x78] sm:$0xf0]  ;;  %v1566_v2 = vor.u32 %v1758_v61, %v1565_v60  ;;  %v1549_v3 = vld [vmem:[%s2637_s1 + $0x108] sm:$0xf]  ;;  %v1722_v5 = vld [vmem:[%s2637_s1 + $0x14] sm:$0xf0] }
  0x43   : > { %919 = vmatpush.bf16.msra.mxu0 %v1538_v32  ;;  %v1421_v4 = vld [vmem:[%s2637_s1 + $0x8] sm:$0xf]  ;;  %v1754_v6 = vld [vmem:[%s2637_s1 + $0x114] sm:$0xf0]  ;;  %v1780_v7 = vld [vmem:[%s2637_s1 + $0x1ec] sm:$0xf]  ;;  %v1474_v11 = vor.u32 %v1732_v0, %v1471_v1 }
  0x44   : > { %864 = vmatpush.bf16.msrb.mxu1 %v1502_v10  ;;  %832 = vmatmul.bf16.vlgmr.msrb.gmra.mxu2 %v2157_v56  ;;  %v1663_v8 = vld [vmem:[%s2637_s1 + $0x1f8] sm:$0xf0]  ;;  %v1788_v9 = vld [vmem:[%s2637_s1 + $0x22c] sm:$0xf]  ;;  %v1550_v15 = vor.u32 %v1754_v6, %v1549_v3  ;;  %vm1053_vm3 = vcmask 1042434   ;;  %vm1055_vm4 = vcmask 1041408  }
  0x45   : > { %906 = vmatpush.bf16.msra.mxu2 %v1694_v12  ;;  %883 = vmatpush.bf16.msrb.mxu3 %v1630_v14  ;;  %v1695_v10 = vld [vmem:[%s2637_s1 + $0x238] sm:$0xf0]  ;;  %v1422_v12 = vor.u32 %v1722_v5, %v1421_v4  ;;  %v1728_v13 = vld [vmem:[%s2637_s1 + $0x4c] sm:$0xf]  ;;  %v1666_v16 = vor.u32 %v1780_v7, %v1663_v8 }
  0x46   : > { %v1455_v14 = vld [vmem:[%s2637_s1 + $0x58] sm:$0xf0]  ;;  %v1698_v17 = vor.u32 %v1788_v9, %v1695_v10  ;;  %v1776_v18 = vld [vmem:[%s2637_s1 + $0x1cc] sm:$0xf] }
  0x47   : > { %920 = vmatpush.bf16.msra.mxu0 %v1522_v40  ;;  %v1647_v19 = vld [vmem:[%s2637_s1 + $0x1d8] sm:$0xf0]  ;;  %v1784_v20 = vld [vmem:[%s2637_s1 + $0x20c] sm:$0xf] }
  0x48   : > { %865 = vmatpush.bf16.msrb.mxu1 %v1486_v22  ;;  %v1679_v21 = vld [vmem:[%s2637_s1 + $0x218] sm:$0xf0]  ;;  %v1458_v22 = vor.u32 %v1728_v13, %v1455_v14  ;;  %v1724_v24 = vld [vmem:[%s2637_s1 + $0x2c] sm:$0xf] }
  0x49   : > { %907 = vmatpush.bf16.msra.mxu2 %v1678_v26  ;;  %884 = vmatpush.bf16.msrb.mxu3 %v1614_v29  ;;  %v1439_v25 = vld [vmem:[%s2637_s1 + $0x38] sm:$0xf0]  ;;  %v1650_v26 = vor.u32 %v1776_v18, %v1647_v19  ;;  %v1772_v27 = vld [vmem:[%s2637_s1 + $0x1ac] sm:$0xf]  ;;  %v1682_v29 = vor.u32 %v1784_v20, %v1679_v21 }
  0x4a   : > { %761 = vmatmul.bf16.gmra.mxu0 %v2265_v44  ;;  %v1631_v28 = vld [vmem:[%s2637_s1 + $0x1b8] sm:$0xf0]  ;;  %v1442_v31 = vor.u32 %v1724_v24, %v1439_v25  ;;  %v1768_v35 = vld [vmem:[%s2637_s1 + $0x18c] sm:$0xf] }
  0x4b   : > { %780 = vmatmul.bf16.gmra.mxu1 %v2273_v48  ;;  %921 = vmatpush.bf16.msra.mxu0 %v1506_v51  ;;  %v1423_v33 = vld [vmem:[%s2637_s1 + $0x18] sm:$0xf0]  ;;  %v1634_v34 = vor.u32 %v1772_v27, %v1631_v28  ;;  %v1764_v39 = vld [vmem:[%s2637_s1 + $0x16c] sm:$0xf] }
  0x4c   : > { %866 = vmatpush.bf16.msrb.mxu1 %v1470_v41  ;;  %818 = vmatmul.bf16.gmra.mxu3 %v2265_v44  ;;  %v1615_v36 = vld [vmem:[%s2637_s1 + $0x198] sm:$0xf0]  ;;  %v1760_v42 = vld [vmem:[%s2637_s1 + $0x14c] sm:$0xf] }
  0x4d   : > { %1791 = vmatpush.bf16.msrb.mxu2 %v1538_v32  ;;  %885 = vmatpush.bf16.msrb.mxu3 %v1598_v45  ;;  %v1720_v32 = vld [vmem:[%s2637_s1 + $0xc] sm:$0xf]  ;;  %v1618_v38 = vor.u32 %v1768_v35, %v1615_v36  ;;  %v1583_v43 = vld [vmem:[%s2637_s1 + $0x158] sm:$0xf0] }
  0x4e   : > { %v1426_v37 = vor.u32 %v1720_v32, %v1423_v33  ;;  %v1586_v45 = vor.u32 %v1760_v42, %v1583_v43  ;;  %v1756_v46 = vld [vmem:[%s2637_s1 + $0x12c] sm:$0xf]  ;;  %v1567_v47 = vld [vmem:[%s2637_s1 + $0x138] sm:$0xf0] }
  0x4f   : > { %922 = vmatpush.bf16.msra.mxu0 %v1490_v62  ;;  %v1570_v49 = vor.u32 %v1756_v46, %v1567_v47  ;;  %v1752_v50 = vld [vmem:[%s2637_s1 + $0x10c] sm:$0xf] }
  0x50   : > { %867 = vmatpush.bf16.msrb.mxu1 %v1454_v53 }
  0x51   : > { %1792 = vmatpush.bf16.msrb.mxu2 %v1522_v40  ;;  %886 = vmatpush.bf16.msrb.mxu3 %v1582_v57  ;;  %v1599_v40 = vld [vmem:[%s2637_s1 + $0x178] sm:$0xf0]  ;;  %v2422_v57 = vld [vmem:[%s2638_s2] sm:$0xf] }
  0x52   : > { %v1602_v41 = vor.u32 %v1764_v39, %v1599_v40  ;;  %v344_v18 = vperm.slane %v2422_v57, 1 }
  0x53   : > { %923 = vmatpush.bf16.msra.mxu0 %v1474_v11 }
  0x54   : > { %868 = vmatpush.bf16.msrb.mxu1 %v1438_v63  ;;  %837 = vmatmul.bf16.gmra.mxu2 %v2273_v48 }
  0x55   : > { %1793 = vmatpush.bf16.msrb.mxu2 %v1506_v51  ;;  %887 = vmatpush.bf16.msrb.mxu3 %v1566_v2  ;;  %v1551_v51 = vld [vmem:[%s2637_s1 + $0x118] sm:$0xf0] }
  0x56   : > { %v1554_v53 = vor.u32 %v1752_v50, %v1551_v51 }
  0x57   : > { %924 = vmatpush.bf16.msra.mxu0 %v1458_v22 }
  0x58   : > { %869 = vmatpush.bf16.msrb.mxu1 %v1422_v12 }
  0x59   : > { %1794 = vmatpush.bf16.msrb.mxu2 %v1490_v62  ;;  %888 = vmatpush.bf16.msrb.mxu3 %v1550_v15 }
  0x5a   : > { %1701 = vmatmul.msk.bf16.vlgmr.msrb.gmra.mxu0 %vm741_vm1, %v1967_v30 }
  0x5b   : > { %870 = vmatmul.bf16.vlgmr.msrb.gmra.mxu1 %v2149_v52  ;;  %925 = vmatpush.bf16.msra.mxu0 %v1442_v31 }
  0x5c   : > { %938 = vmatpush.bf16.msra.mxu1 %v1666_v16  ;;  %889 = vmatmul.bf16.vlgmr.msrb.gmra.mxu3 %v2157_v56 }
  0x5d   : > { %963 = vmatpush.bf16.msra.mxu3 %v1698_v17  ;;  %1795 = vmatpush.bf16.msrb.mxu2 %v1474_v11 }
  0x5f   : > { %926 = vmatpush.bf16.msra.mxu0 %v1426_v37 }
  0x60   : > { %939 = vmatpush.bf16.msra.mxu1 %v1650_v26 }
  0x61   : > { %964 = vmatpush.bf16.msra.mxu3 %v1682_v29  ;;  %1796 = vmatpush.bf16.msrb.mxu2 %v1458_v22 }
  0x64   : > { %940 = vmatpush.bf16.msra.mxu1 %v1634_v34  ;;  %1703 = vmatmul.msk.bf16.vlgmr.msra.gmra.mxu2 %vm741_vm1, %v1967_v30 }
  0x65   : > { %1797 = vmatpush.bf16.msrb.mxu2 %v1442_v31 }
  0x68   : > { %941 = vmatpush.bf16.msra.mxu1 %v1618_v38 }
  0x69   : > { %1798 = vmatpush.bf16.msrb.mxu2 %v1426_v37  ;;  %v345_v37 = vperm.slane %v2422_v57, 2 }
  0x6a   : > { %1702 = vmatmul.msk.bf16.gmra.mxu0 %vm741_vm1, %v2091_v23 }
  0x6b   : > { %875 = vmatmul.bf16.gmra.mxu1 %v2265_v44 }
  0x6c   : > { %942 = vmatpush.bf16.msra.mxu1 %v1602_v41  ;;  %894 = vmatmul.bf16.gmra.mxu3 %v2273_v48 }
  0x70   : > { %943 = vmatpush.bf16.msra.mxu1 %v1586_v45 }
  0x74   : > { %944 = vmatpush.bf16.msra.mxu1 %v1570_v49  ;;  %1704 = vmatmul.msk.bf16.gmra.mxu2 %vm741_vm1, %v2091_v23 }
  0x78   : > { %945 = vmatpush.bf16.msra.mxu1 %v1554_v53 }
  0x7a   : > { %927 = vmatmul.bf16.vlgmr.msra.gmra.mxu0 %v2149_v52  ;;  %v343_v52 = vperm.slane %v2422_v57, 0 }
  0x7b   : > { %946 = vmatmul.bf16.vlgmr.msra.gmra.mxu1 %v2157_v56 }
  0x7c   : > { %1705 = vmatmul.msk.bf16.vlgmr.msra.gmra.mxu3 %vm741_vm1, %v1967_v30 }
  0x84   : > { %932 = vmatmul.bf16.vlgmr.msrb.gmra.mxu2 %v2265_v44 }
  0x8b   : > { %951 = vmatmul.bf16.gmra.mxu1 %v2273_v48 }
  0x8c   : > { %1706 = vmatmul.msk.bf16.gmra.mxu3 %vm741_vm1, %v2091_v23 }
  0xa7   : > { %v795_v54 = vpop.f32.mrf.mxu2 }
  0xaf   : > { %v797_v55 = vpop.f32.mrf.mxu2 }
  0xb7   : > { %v800_v56 = vpop.f32.mrf.mxu2  ;;  %v757_v58 = vpop.f32.mrf.mxu0 }
  0xb8   : > { %v758_v59 = vadd.f32 %v757_v58, %v343_v52  ;;  %v776_v30 = vpop.f32.mrf.mxu1 }
  0xba   : > { %v777_v60 = vadd.f32 %v776_v30, %v758_v59 }
  0xbc   : > { %v796_v44 = vadd.f32 %v795_v54, %v777_v60 }
  0xbe   : > { %1130 = vst [vmem:[%s2641_s5] sm:$0xff] %v796_v44  ;;  %v1065_v2 = vmul.f32 %v796_v44, %v796_v44 }
  0xbf   : > { %v802_v23 = vpop.f32.mrf.mxu2  ;;  %v814_v48 = vpop.f32.mrf.mxu3 }
  0xc0   : > { %v759_v61 = vpop.f32.mrf.mxu0  ;;  %v778_v63 = vpop.f32.mrf.mxu1  ;;  %v815_v24 = vadd.f32 %v814_v48, %v344_v18 }
  0xc1   : > { %v760_v62 = vadd.f32 %v759_v61, %v343_v52 }
  0xc3   : > { %v779_v0 = vadd.f32 %v778_v63, %v760_v62 }
  0xc5   : > { %v798_v1 = vadd.f32 %v797_v55, %v779_v0  ;;  %v346_v0 = vperm.slane %v2422_v57, 3 }
  0xc7   : > { %v1008_v3 = vadd.f32 %v798_v1, %v796_v44  ;;  %v1069_v4 = vmul.f32 %v798_v1, %v798_v1  ;;  %1134 = vst [vmem:[%s2641_s5 + $0x20] sm:$0xff] %v798_v1  ;;  %v833_v5 = vpop.f32.mrf.mxu2  ;;  %v816_v6 = vpop.f32.mrf.mxu3 }
  0xc8   : > { %v762_v7 = vpop.f32.mrf.mxu0  ;;  %v781_v10 = vpop.f32.mrf.mxu1  ;;  %v834_v26 = vadd.f32 %v833_v5, %v815_v24  ;;  %v817_v36 = vadd.f32 %v816_v6, %v344_v18 }
  0xc9   : > { %v1081_v8 = vadd.f32 %v1069_v4, %v1065_v2  ;;  %v763_v9 = vadd.f32 %v762_v7, %v343_v52 }
  0xcb   : > { %v782_v11 = vadd.f32 %v781_v10, %v763_v9 }
  0xcd   : > { %v801_v12 = vadd.f32 %v800_v56, %v782_v11 }
  0xcf   : > { %v1009_v13 = vadd.f32 %v1008_v3, %v801_v12  ;;  %v1073_v14 = vmul.f32 %v801_v12, %v801_v12  ;;  %1138 = vst [vmem:[%s2641_s5 + $0x40] sm:$0xff] %v801_v12  ;;  %v835_v15 = vpop.f32.mrf.mxu2  ;;  %v819_v16 = vpop.f32.mrf.mxu3 }
  0xd0   : > { %v764_v17 = vpop.f32.mrf.mxu0  ;;  %v783_v21 = vpop.f32.mrf.mxu1  ;;  %v836_v38 = vadd.f32 %v835_v15, %v817_v36  ;;  %v820_v46 = vadd.f32 %v819_v16, %v344_v18 }
  0xd1   : > { %v1082_v19 = vadd.f32 %v1081_v8, %v1073_v14  ;;  %v765_v20 = vadd.f32 %v764_v17, %v343_v52 }
  0xd3   : > { %v784_v22 = vadd.f32 %v783_v21, %v765_v20 }
  0xd5   : > { %v803_v25 = vadd.f32 %v802_v23, %v784_v22 }
  0xd7   : > { %v2435_v27 = vadd.f32 %v1009_v13, %v803_v25  ;;  %v1077_v28 = vmul.f32 %v803_v25, %v803_v25  ;;  %1142 = vst [vmem:[%s2641_s5 + $0x60] sm:$0xff] %v803_v25  ;;  %v838_v29 = vpop.f32.mrf.mxu2  ;;  %v821_v31 = vpop.f32.mrf.mxu3 }
  0xd8   : > { %v852_v32 = vpop.f32.mrf.mxu0  ;;  %v871_v35 = vpop.f32.mrf.mxu1  ;;  %v839_v49 = vadd.f32 %v838_v29, %v820_v46  ;;  %v822_v58 = vadd.f32 %v821_v31, %v344_v18 }
  0xd9   : > { %v2440_v33 = vadd.f32 %v1082_v19, %v1077_v28  ;;  %v853_v34 = vadd.f32 %v852_v32, %v834_v26  ;;  %v872_v45 = vadd.f32 %v871_v35, %v345_v37 }
  0xdb   : > { %1131 = vst [vmem:[%s2641_s5 + $0x8] sm:$0xff] %v853_v34  ;;  %v1066_v18 = vmul.f32 %v853_v34, %v853_v34 }
  0xdf   : > { %v840_v39 = vpop.f32.mrf.mxu2  ;;  %v890_v40 = vpop.f32.mrf.mxu3 }
  0xe0   : > { %v854_v41 = vpop.f32.mrf.mxu0  ;;  %v873_v43 = vpop.f32.mrf.mxu1  ;;  %v891_v47 = vadd.f32 %v890_v40, %v872_v45  ;;  %v841_v30 = vadd.f32 %v840_v39, %v822_v58 }
  0xe1   : > { %v855_v42 = vadd.f32 %v854_v41, %v836_v38  ;;  %v874_v56 = vadd.f32 %v873_v43, %v345_v37 }
  0xe3   : > { %1135 = vst [vmem:[%s2641_s5 + $0x28] sm:$0xff] %v855_v42  ;;  %v1070_v17 = vmul.f32 %v855_v42, %v855_v42  ;;  %v1017_v19 = vadd.f32 %v855_v42, %v853_v34 }
  0xe5   : > { %v1090_v25 = vadd.f32 %v1070_v17, %v1066_v18 }
  0xe7   : > { %v909_v50 = vpop.f32.mrf.mxu2  ;;  %v892_v51 = vpop.f32.mrf.mxu3 }
  0xe8   : > { %v910_v53 = vadd.f32 %v909_v50, %v891_v47  ;;  %v857_v54 = vpop.f32.mrf.mxu0  ;;  %v876_v52 = vpop.f32.mrf.mxu1  ;;  %v893_v59 = vadd.f32 %v892_v51, %v874_v56 }
  0xe9   : > { %v858_v55 = vadd.f32 %v857_v54, %v839_v49  ;;  %v877_v63 = vadd.f32 %v876_v52, %v345_v37 }
  0xea   : > { %1132 = vst [vmem:[%s2641_s5 + $0x10] sm:$0xff] %v910_v53  ;;  %v1067_v26 = vmul.f32 %v910_v53, %v910_v53 }
  0xeb   : > { %1139 = vst [vmem:[%s2641_s5 + $0x48] sm:$0xff] %v858_v55  ;;  %v1074_v20 = vmul.f32 %v858_v55, %v858_v55  ;;  %v1018_v28 = vadd.f32 %v1017_v19, %v858_v55 }
  0xed   : > { %v1091_v38 = vadd.f32 %v1090_v25, %v1074_v20 }
  0xef   : > { %v911_v60 = vpop.f32.mrf.mxu2  ;;  %v895_v44 = vpop.f32.mrf.mxu3 }
  0xf0   : > { %v912_v23 = vadd.f32 %v911_v60, %v893_v59  ;;  %v859_v48 = vpop.f32.mrf.mxu0  ;;  %v878_v62 = vpop.f32.mrf.mxu1  ;;  %v896_v1 = vadd.f32 %v895_v44, %v877_v63 }
  0xf1   : > { %v860_v61 = vadd.f32 %v859_v48, %v841_v30  ;;  %v879_v8 = vadd.f32 %v878_v62, %v345_v37  ;;  %v1011_v30 = vrot.slane %v2435_v27, 4 }
  0xf2   : > { %1136 = vst [vmem:[%s2641_s5 + $0x30] sm:$0xff] %v912_v23  ;;  %v1071_v21 = vmul.f32 %v912_v23, %v912_v23  ;;  %v1026_v32 = vadd.f32 %v912_v23, %v910_v53 }
  0xf3   : > { %1143 = vst [vmem:[%s2641_s5 + $0x68] sm:$0xff] %v860_v61  ;;  %v1078_v29 = vmul.f32 %v860_v61, %v860_v61  ;;  %v1019_v39 = vadd.f32 %v1018_v28, %v860_v61  ;;  %v1084_v61 = vrot.slane %v2440_v33, 4 }
  0xf4   : > { %v1099_v41 = vadd.f32 %v1071_v21, %v1067_v26 }
  0xf5   : > { %v1092_v34 = vadd.f32 %v1091_v38, %v1078_v29  ;;  %v1020_v49 = vrot.slane %v1019_v39, 4 }
  0xf7   : > { %v914_v2 = vpop.f32.mrf.mxu2  ;;  %v897_v3 = vpop.f32.mrf.mxu3  ;;  %v1093_v51 = vrot.slane %v1092_v34, 4  ;;  %v1021_v56 = vadd.f32 %v1020_v49, %v1019_v39 }
  0xf8   : > { %v915_v4 = vadd.f32 %v914_v2, %v896_v1  ;;  %v928_v5 = vpop.f32.mrf.mxu0  ;;  %v947_v7 = vpop.f32.mrf.mxu1  ;;  %v898_v10 = vadd.f32 %v897_v3, %v879_v8 }
  0xf9   : > { %v929_v6 = vadd.f32 %v928_v5, %v346_v0  ;;  %v1094_v60 = vadd.f32 %v1093_v51, %v1092_v34  ;;  %v1022_v62 = vrot.slane %v1021_v56, 2 }
  0xfa   : > { %1140 = vst [vmem:[%s2641_s5 + $0x50] sm:$0xff] %v915_v4  ;;  %v1075_v35 = vmul.f32 %v915_v4, %v915_v4  ;;  %v1027_v43 = vadd.f32 %v1026_v32, %v915_v4 }
  0xfb   : > { %v948_v9 = vadd.f32 %v947_v7, %v929_v6  ;;  %v1095_v5 = vrot.slane %v1094_v60, 2 }
  0xfc   : > { %v1100_v42 = vadd.f32 %v1099_v41, %v1075_v35 }
  0xfd   : > { %v1096_v17 = vadd.f32 %v1095_v5, %v1094_v60 }
  0xff   : > { %v916_v11 = vpop.f32.mrf.mxu2  ;;  %v966_v13 = vpop.f32.mrf.mxu3  ;;  %v1097_v26 = vrot.slane %v1096_v17, 1 }
 0x100   : > { %v917_v12 = vadd.f32 %v916_v11, %v898_v10  ;;  %v930_v14 = vpop.f32.mrf.mxu0  ;;  %v967_v15 = vadd.f32 %v966_v13, %v948_v9  ;;  %v949_v57 = vpop.f32.mrf.mxu1  ;;  %v1085_v11 = vadd.f32 %v1084_v61, %v2440_v33 }
 0x101   : > { %v931_v16 = vadd.f32 %v930_v14, %v346_v0 }
 0x102   : > { %1144 = vst [vmem:[%s2641_s5 + $0x70] sm:$0xff] %v917_v12  ;;  %v1079_v45 = vmul.f32 %v917_v12, %v917_v12  ;;  %v1028_v46 = vadd.f32 %v1027_v43, %v917_v12  ;;  %v1068_v63 = vmul.f32 %v967_v15, %v967_v15  ;;  %v1023_v12 = vadd.f32 %v1022_v62, %v1021_v56 }
 0x103   : > { %1133 = vst [vmem:[%s2641_s5 + $0x18] sm:$0xff] %v967_v15  ;;  %v950_v22 = vadd.f32 %v949_v57, %v931_v16  ;;  %v1086_v20 = vrot.slane %v1085_v11, 2 }
 0x104   : > { %v1101_v50 = vadd.f32 %v1100_v42, %v1079_v45  ;;  %v1029_v55 = vrot.slane %v1028_v46, 4  ;;  %v1024_v21 = vrot.slane %v1023_v12, 1 }
 0x105   : > { %v1087_v32 = vadd.f32 %v1086_v20, %v1085_v11 }
 0x106   : > { %v1102_v58 = vrot.slane %v1101_v50, 4  ;;  %v1030_v23 = vadd.f32 %v1029_v55, %v1028_v46  ;;  %v1025_v35 = vadd.f32 %v1024_v21, %v1023_v12 }
 0x107   : > { %v933_v24 = vpop.f32.mrf.mxu2  ;;  %v968_v31 = vpop.f32.mrf.mxu3  ;;  %v1088_v34 = vrot.slane %v1087_v32, 1 }
 0x108   : > { %v934_v36 = vadd.f32 %v933_v24, %v346_v0  ;;  %v969_v37 = vadd.f32 %v968_v31, %v950_v22  ;;  %v952_v40 = vpop.f32.mrf.mxu1  ;;  %v1103_v1 = vadd.f32 %v1102_v58, %v1101_v50  ;;  %v1031_v7 = vrot.slane %v1030_v23, 2  ;;  %v1007_v58 = vld [vmem:[#allocation2] sm:$0xf] }
 0x109   : > { %v1048_v42 = vrot.slane %v1025_v35, 7  ;;  %v1089_v56 = vadd.f32 %v1088_v34, %v1087_v32 }
 0x10a   : > { %1137 = vst [vmem:[%s2641_s5 + $0x38] sm:$0xff] %v969_v37  ;;  %v953_v47 = vadd.f32 %v952_v40, %v934_v36  ;;  %v1072_v48 = vmul.f32 %v969_v37, %v969_v37  ;;  %v1035_v2 = vadd.f32 %v969_v37, %v967_v15  ;;  %v1104_v13 = vrot.slane %v1103_v1, 2 }
 0x10b   : > { %v1098_v40 = vadd.f32 %v1097_v26, %v1096_v17 }
 0x10c   : > { %v1108_v8 = vadd.f32 %v1072_v48, %v1068_v63  ;;  %v1105_v22 = vadd.f32 %v1104_v13, %v1103_v1  ;;  %v1064_v48 = vld [vmem:[#allocation3] sm:$0xf] }
 0x10d   : > { %v1121_v51 = vrot.slane %v1098_v40, 7 }
 0x10e   : > { %v1106_v36 = vrot.slane %v1105_v22, 1 }
 0x10f   : > { %v935_v53 = vpop.f32.mrf.mxu2  ;;  %v971_v54 = vpop.f32.mrf.mxu3  ;;  %v1124_v61 = vsel %vm1051_vm2, %v1089_v56, %v1121_v51 }
 0x110   : > { %v972_v52 = vadd.f32 %v971_v54, %v953_v47  ;;  %v936_v59 = vadd.f32 %v935_v53, %v346_v0  ;;  %v954_v44 = vpop.f32.mrf.mxu1  ;;  %v1012_v0 = vadd.f32 %v1011_v30, %v2435_v27  ;;  %v1032_v27 = vadd.f32 %v1031_v7, %v1030_v23 }
 0x111   : > { %v1107_v46 = vadd.f32 %v1106_v36, %v1105_v22  ;;  %v1059_v53 = vlaneseq }
 0x112   : > { %1141 = vst [vmem:[%s2641_s5 + $0x58] sm:$0xff] %v972_v52  ;;  %v1076_v3 = vmul.f32 %v972_v52, %v972_v52  ;;  %v955_v4 = vadd.f32 %v954_v44, %v936_v59  ;;  %v1036_v9 = vadd.f32 %v1035_v2, %v972_v52  ;;  %v1013_v15 = vrot.slane %v1012_v0, 2 }
 0x113   : > { %v1033_v28 = vrot.slane %v1032_v27, 1  ;;  %v1122_v30 = vrot.slane %v1107_v46, 6  ;;  %vm1061_vm5 = vcmp.lt.s32.totalorder %v1059_v53, 512 }
 0x114   : > { %v1109_v14 = vadd.f32 %v1108_v8, %v1076_v3  ;;  %v1014_v33 = vadd.f32 %v1013_v15, %v1012_v0 }
 0x115   : > { %v1034_v41 = vadd.f32 %v1033_v28, %v1032_v27 }
 0x116   : > { %v1015_v39 = vrot.slane %v1014_v33, 1 }
 0x117   : > { %v973_v6 = vpop.f32.mrf.mxu3  ;;  %v1049_v54 = vrot.slane %v1034_v41, 6 }
 0x118   : > { %v974_v10 = vadd.f32 %v973_v6, %v955_v4  ;;  %v1016_v50 = vadd.f32 %v1015_v39, %v1014_v33 }
 0x11a   : > { %v1037_v57 = vadd.f32 %v1036_v9, %v974_v10  ;;  %v1080_v16 = vmul.f32 %v974_v10, %v974_v10  ;;  %1145 = vst [vmem:[%s2641_s5 + $0x78] sm:$0xff] %v974_v10  ;;  %v1052_v59 = vsel %vm1051_vm2, %v1016_v50, %v1048_v42 }
 0x11c   : > { %v1038_v18 = vrot.slane %v1037_v57, 4  ;;  %v1110_v19 = vadd.f32 %v1109_v14, %v1080_v16 }
 0x11e   : > { %v1039_v24 = vadd.f32 %v1038_v18, %v1037_v57  ;;  %v1111_v25 = vrot.slane %v1110_v19, 4 }
 0x120   : > { %v1040_v29 = vrot.slane %v1039_v24, 2  ;;  %v1112_v31 = vadd.f32 %v1111_v25, %v1110_v19 }
 0x122   : > { %v1041_v37 = vadd.f32 %v1040_v29, %v1039_v24  ;;  %v1113_v38 = vrot.slane %v1112_v31, 2 }
 0x124   : > { %v1042_v43 = vrot.slane %v1041_v37, 1  ;;  %v1114_v45 = vadd.f32 %v1113_v38, %v1112_v31 }
 0x126   : > { %v1043_v47 = vadd.f32 %v1042_v43, %v1041_v37  ;;  %v1115_v49 = vrot.slane %v1114_v45, 1 }
 0x128   : > { %v1050_v55 = vrot.slane %v1043_v47, 5  ;;  %v1116_v52 = vadd.f32 %v1115_v49, %v1114_v45 }
 0x12a   : > { %v1054_v60 = vsel %vm1053_vm3, %v1049_v54, %v1050_v55  ;;  %v1123_v44 = vrot.slane %v1116_v52, 5 }
 0x12b   : > { %v1056_v23 = vsel %vm1055_vm4, %v1052_v59, %v1054_v60 }
 0x12c   : > { %v1058_v62 = vadd.f32 %v1056_v23, %v1007_v58  ;;  %v1125_v63 = vsel %vm1053_vm3, %v1122_v30, %v1123_v44 }
 0x12d   : > { %v1126_v1 = vsel %vm1055_vm4, %v1124_v61, %v1125_v63 }
 0x12e   : > { %1063 = vst.msk [vmem:[#allocation2] sm:$0xf] %vm1061_vm5, %v1058_v62  ;;  %v1128_v2 = vadd.f32 %v1126_v1, %v1064_v48 }
 0x130   : > { %1129 = vst.msk [vmem:[#allocation3] sm:$0xf] %vm1061_vm5, %v1128_v2 }
 0x131 PF: > { %p1707_p6 = scmp.ne.s32.totalorder %s1844_s18, 1 }
 0x133   : > { %1149 = sbr.rel (%p1707_p6) target bundleno = 371 (0x173), region = 52 }
 0x138   : > { %v1166_v3 = vld [vmem:[#allocation2] sm:$0x1]  ;;  %v1167_v4 = vld [vmem:[#allocation3] sm:$0x1]  ;;  %v1168_v0 = vld [vmem:[#allocation2 + $0x1] sm:$0x1] }
 0x139   : > { %v1170_v5 = vld [vmem:[#allocation3 + $0x1] sm:$0x1]  ;;  %v1172_v6 = vld [vmem:[#allocation2 + $0x2] sm:$0x1]  ;;  %v1169_v7 = vadd.f32 %v1168_v0, %v1166_v3  ;;  %v1174_v9 = vld [vmem:[#allocation3 + $0x2] sm:$0x1] }
 0x13a   : > { %v1171_v8 = vadd.f32 %v1170_v5, %v1167_v4  ;;  %v1176_v10 = vld [vmem:[#allocation2 + $0x3] sm:$0x1]  ;;  %v1178_v11 = vld [vmem:[#allocation3 + $0x3] sm:$0x1]  ;;  %v1202_v26 = vld [vmem:[%s2639_s3] sm:$0x1] }
 0x13b   : > { %v1173_v12 = vadd.f32 %v1172_v6, %v1169_v7  ;;  %v1150_v24 = vld [vmem:[%s2641_s5] sm:$0xff]  ;;  %v1151_v35 = vld [vmem:[%s2641_s5 + $0x8] sm:$0xff]  ;;  %v1152_v45 = vld [vmem:[%s2641_s5 + $0x10] sm:$0xff] }
 0x13c   : > { %v1175_v13 = vadd.f32 %v1174_v9, %v1171_v8  ;;  %v1154_v28 = vld [vmem:[%s2641_s5 + $0x20] sm:$0xff]  ;;  %v1155_v37 = vld [vmem:[%s2641_s5 + $0x28] sm:$0xff]  ;;  %v1156_v34 = vld [vmem:[%s2641_s5 + $0x30] sm:$0xff] }
 0x13d   : > { %v1177_v14 = vadd.f32 %v1176_v10, %v1173_v12  ;;  %v1158_v29 = vld [vmem:[%s2641_s5 + $0x40] sm:$0xff]  ;;  %v1159_v38 = vld [vmem:[%s2641_s5 + $0x48] sm:$0xff]  ;;  %v1160_v50 = vld [vmem:[%s2641_s5 + $0x50] sm:$0xff] }
 0x13e   : > { %v1179_v57 = vadd.f32 %v1178_v11, %v1175_v13  ;;  %v1231_v31 = vld [vmem:[%s2639_s3 + $0x1] sm:$0x1]  ;;  %v1260_v39 = vld [vmem:[%s2639_s3 + $0x2] sm:$0x1]  ;;  %v1163_v43 = vld [vmem:[%s2641_s5 + $0x68] sm:$0xff] }
 0x13f   : > { %v1180_v16 = vmul.f32 0.0078125, %v1177_v14  ;;  %v1162_v32 = vld [vmem:[%s2641_s5 + $0x60] sm:$0xff]  ;;  %v1164_v51 = vld [vmem:[%s2641_s5 + $0x70] sm:$0xff]  ;;  %v1153_v56 = vld [vmem:[%s2641_s5 + $0x18] sm:$0xff] }
 0x140   : > { %v1181_v15 = vmul.f32 0.0078125, %v1179_v57  ;;  %v1289_v58 = vld [vmem:[%s2639_s3 + $0x3] sm:$0x1]  ;;  %v1157_v59 = vld [vmem:[%s2641_s5 + $0x38] sm:$0xff]  ;;  %v1824_v61 = vld [vmem:[%s2640_s4] ss:$0 sm:$0xff] }
 0x141   : > { %v1182_v17 = vmul.f32 %v1180_v16, %v1180_v16  ;;  %v2492_v25 = vperm.slane %v1180_v16, 0  ;;  %v1825_v2 = vld [vmem:[%s2640_s4 + $0x1] ss:$0 sm:$0xff]  ;;  %v1161_v14 = vld [vmem:[%s2641_s5 + $0x58] sm:$0xff] }
 0x143   : > { %v1183_v27 = vsub.f32 %v1181_v15, %v1182_v17  ;;  %v1198_v40 = vsub.f32 %v1150_v24, %v2492_v25  ;;  %v1199_v41 = vsub.f32 %v1154_v28, %v2492_v25  ;;  %v1200_v46 = vsub.f32 %v1158_v29, %v2492_v25 }
 0x144   : > { %v1201_v47 = vsub.f32 %v1162_v32, %v2492_v25  ;;  %v1227_v49 = vsub.f32 %v1151_v35, %v2492_v25  ;;  %v1228_v55 = vsub.f32 %v1155_v37, %v2492_v25  ;;  %v1229_v30 = vsub.f32 %v1159_v38, %v2492_v25 }
 0x145   : > { %v1184_v18 = vadd.f32 1e-05, %v1183_v27  ;;  %v1230_v60 = vsub.f32 %v1163_v43, %v2492_v25  ;;  %v1256_v44 = vsub.f32 %v1152_v45, %v2492_v25  ;;  %v1257_v23 = vsub.f32 %v1156_v34, %v2492_v25  ;;  %v1165_v27 = vld [vmem:[%s2641_s5 + $0x78] sm:$0xff] }
 0x146   : > { %v1258_v63 = vsub.f32 %v1160_v50, %v2492_v25  ;;  %v1259_v1 = vsub.f32 %v1164_v51, %v2492_v25  ;;  %v1285_v4 = vsub.f32 %v1153_v56, %v2492_v25  ;;  %v1286_v5 = vsub.f32 %v1157_v59, %v2492_v25 }
 0x147   : > { %1828 = vrsqrt.f32 %v1184_v18  ;;  %vm1191_vm6 = vweird.f32 %v1184_v18  ;;  %v1287_v28 = vsub.f32 %v1161_v14, %v2492_v25  ;;  %v1288_v35 = vsub.f32 %v1165_v27, %v2492_v25 }
 0x14d   : > { %v1829_v19 = vpop.eup %1828 }
 0x14e   : > { %v1186_v20 = vmul.f32 %v1829_v19, %v1184_v18  ;;  %vm1192_vm7 = vweird.f32 %v1829_v19 }
 0x14f   : > { %vm1193_vm8 = vmor %vm1191_vm6, %vm1192_vm7 }
 0x150   : > { %v1187_v21 = vmul.f32 %v1829_v19, %v1186_v20 }
 0x152   : > { %v1188_v22 = vmul.f32 0.5, %v1187_v21 }
 0x154   : > { %v1189_v33 = vsub.f32 1.5, %v1188_v22 }
 0x156   : > { %v1190_v36 = vmul.f32 %v1829_v19, %v1189_v33 }
 0x158   : > { %v1194_v42 = vsel %vm1193_vm8, %v1829_v19, %v1190_v36 }
 0x159   : > { %v1203_v53 = vmul.f32 %v1202_v26, %v1194_v42  ;;  %v1232_v54 = vmul.f32 %v1231_v31, %v1194_v42  ;;  %v1261_v52 = vmul.f32 %v1260_v39, %v1194_v42  ;;  %v1290_v0 = vmul.f32 %v1289_v58, %v1194_v42  ;;  %v1826_v26 = vld [vmem:[%s2640_s4 + $0x2] ss:$0 sm:$0xff] }
 0x15b   : > { %v1205_v48 = vperm.slane %v1203_v53, 0  ;;  %v1234_v62 = vperm.slane %v1232_v54, 0  ;;  %v1263_v3 = vperm.slane %v1261_v52, 0  ;;  %v1292_v21 = vperm.slane %v1290_v0, 0 }
 0x15d   : > { %v1207_v6 = vmul.f32 %v1205_v48, %v1198_v40  ;;  %v1208_v7 = vmul.f32 %v1205_v48, %v1199_v41  ;;  %v1209_v8 = vmul.f32 %v1205_v48, %v1200_v46  ;;  %v1210_v9 = vmul.f32 %v1205_v48, %v1201_v47  ;;  %v1827_v40 = vld [vmem:[%s2640_s4 + $0x3] ss:$0 sm:$0xff] }
 0x15e   : > { %v1236_v10 = vmul.f32 %v1234_v62, %v1227_v49  ;;  %v1237_v11 = vmul.f32 %v1234_v62, %v1228_v55  ;;  %v1238_v12 = vmul.f32 %v1234_v62, %v1229_v30  ;;  %v1239_v13 = vmul.f32 %v1234_v62, %v1230_v60 }
 0x15f   : > { %v1215_v57 = vadd.f32 %v1824_v61, %v1207_v6  ;;  %v1216_v16 = vadd.f32 %v1824_v61, %v1208_v7  ;;  %v1217_v15 = vadd.f32 %v1824_v61, %v1209_v8  ;;  %v1218_v17 = vadd.f32 %v1824_v61, %v1210_v9 }
 0x160   : > { %v1244_v18 = vadd.f32 %v1825_v2, %v1236_v10  ;;  %v1245_v19 = vadd.f32 %v1825_v2, %v1237_v11  ;;  %v1246_v20 = vadd.f32 %v1825_v2, %v1238_v12  ;;  %v1247_v32 = vadd.f32 %v1825_v2, %v1239_v13 }
 0x161   : > { %v1219_v22 = vmax.f32 %v1215_v57, 0.0  ;;  %v1220_v24 = vmax.f32 %v1216_v16, 0.0  ;;  %v1221_v33 = vmax.f32 %v1217_v15, 0.0  ;;  %v1222_v29 = vmax.f32 %v1218_v17, 0.0 }
 0x162   : > { %v1248_v31 = vmax.f32 %v1244_v18, 0.0  ;;  %v1265_v36 = vmul.f32 %v1263_v3, %v1256_v44  ;;  %v1266_v37 = vmul.f32 %v1263_v3, %v1257_v23  ;;  %v1267_v38 = vmul.f32 %v1263_v3, %v1258_v63 }
 0x163   : > { %1223 = vst [vmem:[%s2641_s5] sm:$0xff] %v1219_v22  ;;  %v1268_v39 = vmul.f32 %v1263_v3, %v1259_v1  ;;  %v1249_v41 = vmax.f32 %v1245_v19, 0.0  ;;  %v1250_v43 = vmax.f32 %v1246_v20, 0.0  ;;  %v1294_v45 = vmul.f32 %v1292_v21, %v1285_v4 }
 0x164   : > { %1224 = vst [vmem:[%s2641_s5 + $0x20] sm:$0xff] %v1220_v24  ;;  %v1295_v25 = vmul.f32 %v1292_v21, %v1286_v5  ;;  %v1273_v34 = vadd.f32 %v1826_v26, %v1265_v36  ;;  %v1274_v42 = vadd.f32 %v1826_v26, %v1266_v37  ;;  %v1275_v46 = vadd.f32 %v1826_v26, %v1267_v38 }
 0x165   : > { %1225 = vst [vmem:[%s2641_s5 + $0x40] sm:$0xff] %v1221_v33  ;;  %v1296_v47 = vmul.f32 %v1292_v21, %v1287_v28  ;;  %v1251_v49 = vmax.f32 %v1247_v32, 0.0  ;;  %v1276_v50 = vadd.f32 %v1826_v26, %v1268_v39  ;;  %v1297_v51 = vmul.f32 %v1292_v21, %v1288_v35 }
 0x166   : > { %1226 = vst [vmem:[%s2641_s5 + $0x60] sm:$0xff] %v1222_v29  ;;  %v1277_v53 = vmax.f32 %v1273_v34, 0.0  ;;  %v1302_v54 = vadd.f32 %v1827_v40, %v1294_v45  ;;  %v1278_v55 = vmax.f32 %v1274_v42, 0.0  ;;  %v1303_v52 = vadd.f32 %v1827_v40, %v1295_v25 }
 0x167   : > { %1252 = vst [vmem:[%s2641_s5 + $0x8] sm:$0xff] %v1248_v31  ;;  %v1279_v56 = vmax.f32 %v1275_v46, 0.0  ;;  %v1304_v58 = vadd.f32 %v1827_v40, %v1296_v47  ;;  %v1280_v59 = vmax.f32 %v1276_v50, 0.0  ;;  %v1305_v30 = vadd.f32 %v1827_v40, %v1297_v51 }
 0x168   : > { %1253 = vst [vmem:[%s2641_s5 + $0x28] sm:$0xff] %v1249_v41  ;;  %v1306_v60 = vmax.f32 %v1302_v54, 0.0  ;;  %v1307_v44 = vmax.f32 %v1303_v52, 0.0 }
 0x169   : > { %1254 = vst [vmem:[%s2641_s5 + $0x48] sm:$0xff] %v1250_v43  ;;  %v1308_v23 = vmax.f32 %v1304_v58, 0.0  ;;  %v1309_v48 = vmax.f32 %v1305_v30, 0.0 }
 0x16a   : > { %1255 = vst [vmem:[%s2641_s5 + $0x68] sm:$0xff] %v1251_v49 }
 0x16b   : > { %1281 = vst [vmem:[%s2641_s5 + $0x10] sm:$0xff] %v1277_v53 }
 0x16c   : > { %1282 = vst [vmem:[%s2641_s5 + $0x30] sm:$0xff] %v1278_v55 }
 0x16d   : > { %1283 = vst [vmem:[%s2641_s5 + $0x50] sm:$0xff] %v1279_v56 }
 0x16e   : > { %1284 = vst [vmem:[%s2641_s5 + $0x70] sm:$0xff] %v1280_v59 }
 0x16f   : > { %1310 = vst [vmem:[%s2641_s5 + $0x18] sm:$0xff] %v1306_v60 }
 0x170   : > { %1311 = vst [vmem:[%s2641_s5 + $0x38] sm:$0xff] %v1307_v44 }
 0x171   : > { %1312 = vst [vmem:[%s2641_s5 + $0x58] sm:$0xff] %v1308_v23 }
 0x172   : > { %1313 = vst [vmem:[%s2641_s5 + $0x78] sm:$0xff] %v1309_v48 }
 0x173 PF: > { %s15_s20 = sadd.s32 1, %s1852_s20   ;;  %s2642_s18 = smov %s1848_s19 }
 0x174   : > { %p12_p7 = scmp.ge.s32.totalorder %s15_s20, 4   ;;  %s2643_s19 = smov %s2645_s21 }
 0x176   :  { %14 = sbr.rel (!%p12_p7) target bundleno = 2 (0x2), region = 82 }

// kernel: autoencoder_forward.17
= control target key start
LH: loop header
LB: loop body
LE: loop exit
PB: predicated region body
PF: predicated region fallthrough
CT: control target
= control target key end

     0   :  { %vm329_vm0 = vcmask 130048   ;;  %s1839_s1 = inlined_call_operand.vmem [shape: bf16[144,512], index: 1, kind: input, shape index: {}]   ;;  %s1840_s0 = inlined_call_operand.vmem [shape: bf16[128,144], index: 0, kind: input, shape index: {}]   ;;  %s1841_s2 = inlined_call_operand.vmem [shape: f32[1,512], index: 2, kind: input, shape index: {}]   ;;  %s1842_s3 = inlined_call_operand.vmem [shape: f32[128,512], index: 3, kind: output, shape index: {}]  }
   0x1   :  { %v992_v0 = vld [vmem:[%s1839_s1 + $0xe0] sm:$0xf]  ;;  %v1100_v1 = vld [vmem:[%s1839_s1 + $0xec] sm:$0xf0]  ;;  %v1098_v2 = vld [vmem:[%s1839_s1 + $0xe4] sm:$0xf] }
   0x2   :  { %v993_v3 = vor.u32 %v1100_v1, %v992_v0  ;;  %v994_v4 = vld [vmem:[%s1839_s1 + $0xf0] sm:$0xf0]  ;;  %v976_v5 = vld [vmem:[%s1839_s1 + $0xc0] sm:$0xf]  ;;  %v1096_v6 = vld [vmem:[%s1839_s1 + $0xcc] sm:$0xf0] }
   0x3   :  { %v997_v7 = vor.u32 %v1098_v2, %v994_v4  ;;  %v1094_v8 = vld [vmem:[%s1839_s1 + $0xc4] sm:$0xf]  ;;  %v978_v9 = vld [vmem:[%s1839_s1 + $0xd0] sm:$0xf0]  ;;  %v977_v10 = vor.u32 %v1096_v6, %v976_v5  ;;  %v960_v12 = vld [vmem:[%s1839_s1 + $0xa0] sm:$0xf] }
   0x4   :  { %354 = vmatpush.bf16.msra.mxu0 %v993_v3  ;;  %v981_v11 = vor.u32 %v1094_v8, %v978_v9  ;;  %v1092_v13 = vld [vmem:[%s1839_s1 + $0xac] sm:$0xf0]  ;;  %v1090_v14 = vld [vmem:[%s1839_s1 + $0xa4] sm:$0xf]  ;;  %v962_v15 = vld [vmem:[%s1839_s1 + $0xb0] sm:$0xf0] }
   0x5   :  { %452 = vmatpush.bf16.msra.mxu2 %v997_v7  ;;  %v961_v16 = vor.u32 %v1092_v13, %v960_v12  ;;  %v944_v17 = vld [vmem:[%s1839_s1 + $0x80] sm:$0xf]  ;;  %v1088_v18 = vld [vmem:[%s1839_s1 + $0x8c] sm:$0xf0]  ;;  %v965_v19 = vor.u32 %v1090_v14, %v962_v15  ;;  %v1102_v20 = vld [vmem:[%s1839_s1 + $0x104] sm:$0xf] }
   0x6   :  { %v1010_v21 = vld [vmem:[%s1839_s1 + $0x110] sm:$0xf0]  ;;  %v1054_v22 = vld [vmem:[%s1840_s0 + $0x4] sm:$0xf]  ;;  %v818_v26 = vld [vmem:[%s1840_s0 + $0x8] sm:$0xf0]  ;;  %v945_v30 = vor.u32 %v1088_v18, %v944_v17 }
   0x7   :  { %v1086_v23 = vld [vmem:[%s1839_s1 + $0x84] sm:$0xf]  ;;  %v946_v24 = vld [vmem:[%s1839_s1 + $0x90] sm:$0xf0]  ;;  %v1013_v25 = vor.u32 %v1102_v20, %v1010_v21  ;;  %v1186_v27 = vor.u32 %v1054_v22, %v818_v26  ;;  %v1008_v28 = vld [vmem:[%s1839_s1 + $0x100] sm:$0xf] }
   0x8   :  { %355 = vmatpush.bf16.msra.mxu0 %v977_v10  ;;  %v1104_v29 = vld [vmem:[%s1839_s1 + $0x10c] sm:$0xf0]  ;;  %v949_v32 = vor.u32 %v1086_v23, %v946_v24  ;;  %v928_v33 = vld [vmem:[%s1839_s1 + $0x60] sm:$0xf]  ;;  %v1082_v35 = vld [vmem:[%s1839_s1 + $0x64] sm:$0xf] }
   0x9   :  { %453 = vmatpush.bf16.msra.mxu2 %v981_v11  ;;  %508 = vmatpush.bf16.msra.mxu3 %v1013_v25  ;;  %v1009_v31 = vor.u32 %v1104_v29, %v1008_v28  ;;  %v1084_v34 = vld [vmem:[%s1839_s1 + $0x6c] sm:$0xf0]  ;;  %v930_v36 = vld [vmem:[%s1839_s1 + $0x70] sm:$0xf0]  ;;  %v1016_v37 = vld [vmem:[%s1839_s1 + $0x108] sm:$0xf] }
   0xa   :  { %v1105_v38 = vld [vmem:[%s1839_s1 + $0x114] sm:$0xf0]  ;;  %v1000_v40 = vld [vmem:[%s1839_s1 + $0xe8] sm:$0xf]  ;;  %v929_v41 = vor.u32 %v1084_v34, %v928_v33  ;;  %v933_v43 = vor.u32 %v1082_v35, %v930_v36  ;;  %v912_v44 = vld [vmem:[%s1839_s1 + $0x40] sm:$0xf] }
   0xb   :  { %410 = vmatpush.bf16.msra.mxu1 %v1009_v31  ;;  %v1017_v39 = vor.u32 %v1105_v38, %v1016_v37  ;;  %v1101_v42 = vld [vmem:[%s1839_s1 + $0xf4] sm:$0xf0]  ;;  %v1080_v45 = vld [vmem:[%s1839_s1 + $0x4c] sm:$0xf0]  ;;  %v1078_v47 = vld [vmem:[%s1839_s1 + $0x44] sm:$0xf] }
   0xc   :  { %356 = vmatpush.bf16.msra.mxu0 %v961_v16  ;;  %1030 = vmatmul.msk.bf16.vlgmr.msra.gmra.mxu3 %vm329_vm0, %v1186_v27  ;;  %v1001_v46 = vor.u32 %v1101_v42, %v1000_v40  ;;  %v914_v48 = vld [vmem:[%s1839_s1 + $0x50] sm:$0xf0]  ;;  %v913_v49 = vor.u32 %v1080_v45, %v912_v44  ;;  %v984_v50 = vld [vmem:[%s1839_s1 + $0xc8] sm:$0xf]  ;;  %v1097_v51 = vld [vmem:[%s1839_s1 + $0xd4] sm:$0xf0] }
   0xd   :  { %454 = vmatpush.bf16.msra.mxu2 %v965_v19  ;;  %606 = vmatpush.bf16.msrb.mxu3 %v1017_v39  ;;  %v917_v52 = vor.u32 %v1078_v47, %v914_v48  ;;  %v896_v53 = vld [vmem:[%s1839_s1 + $0x20] sm:$0xf]  ;;  %v1076_v54 = vld [vmem:[%s1839_s1 + $0x2c] sm:$0xf0]  ;;  %v985_v55 = vor.u32 %v1097_v51, %v984_v50  ;;  %v1074_v56 = vld [vmem:[%s1839_s1 + $0x24] sm:$0xf] }
   0xe   :  { %1022 = vmatmul.msk.bf16.vlgmr.msra.gmra.mxu1 %vm329_vm0, %v1186_v27  ;;  %v898_v57 = vld [vmem:[%s1839_s1 + $0x30] sm:$0xf0]  ;;  %v897_v58 = vor.u32 %v1076_v54, %v896_v53  ;;  %v826_v60 = vld [vmem:[%s1840_s0 + $0x18] sm:$0xf0]  ;;  %v880_v62 = vld [vmem:[%s1839_s1] sm:$0xf] }
   0xf   :  { %550 = vmatpush.bf16.msrb.mxu1 %v1001_v46  ;;  %v1056_v59 = vld [vmem:[%s1840_s0 + $0x14] sm:$0xf]  ;;  %v901_v61 = vor.u32 %v1074_v56, %v898_v57  ;;  %v1072_v63 = vld [vmem:[%s1839_s1 + $0xc] sm:$0xf0]  ;;  %v1070_v0 = vld [vmem:[%s1839_s1 + $0x4] sm:$0xf] }
  0x10   :  { %357 = vmatpush.bf16.msra.mxu0 %v945_v30  ;;  %v882_v1 = vld [vmem:[%s1839_s1 + $0x10] sm:$0xf0]  ;;  %v1099_v2 = vld [vmem:[%s1839_s1 + $0xec] sm:$0xf]  ;;  %v1002_v3 = vld [vmem:[%s1839_s1 + $0xf8] sm:$0xf0]  ;;  %v1282_v6 = vor.u32 %v1056_v59, %v826_v60  ;;  %v881_v7 = vor.u32 %v1072_v63, %v880_v62 }
  0x11   :  { %455 = vmatpush.bf16.msra.mxu2 %v949_v32  ;;  %v1103_v4 = vld [vmem:[%s1839_s1 + $0x10c] sm:$0xf]  ;;  %v1018_v5 = vld [vmem:[%s1839_s1 + $0x118] sm:$0xf0]  ;;  %v816_v8 = vld [vmem:[%s1840_s0] sm:$0xf]  ;;  %v885_v10 = vor.u32 %v1070_v0, %v882_v1  ;;  %v1005_v11 = vor.u32 %v1099_v2, %v1002_v3 }
  0x12   :  { %v1055_v9 = vld [vmem:[%s1840_s0 + $0x4] sm:$0xf0]  ;;  %v1021_v12 = vor.u32 %v1103_v4, %v1018_v5  ;;  %v1095_v13 = vld [vmem:[%s1839_s1 + $0xcc] sm:$0xf]  ;;  %v986_v14 = vld [vmem:[%s1839_s1 + $0xd8] sm:$0xf0] }
  0x13   :  { %551 = vmatpush.bf16.msrb.mxu1 %v985_v55  ;;  %v1296_v15 = vor.u32 %v1055_v9, %v816_v8  ;;  %v989_v16 = vor.u32 %v1095_v13, %v986_v14  ;;  %v968_v17 = vld [vmem:[%s1839_s1 + $0xa8] sm:$0xf]  ;;  %v1093_v18 = vld [vmem:[%s1839_s1 + $0xb4] sm:$0xf0]  ;;  %v1091_v19 = vld [vmem:[%s1839_s1 + $0xac] sm:$0xf] }
  0x14   :  { %358 = vmatpush.bf16.msra.mxu0 %v929_v41  ;;  %v969_v20 = vor.u32 %v1093_v18, %v968_v17  ;;  %v970_v21 = vld [vmem:[%s1839_s1 + $0xb8] sm:$0xf0]  ;;  %v1058_v23 = vld [vmem:[%s1840_s0 + $0x24] sm:$0xf]  ;;  %v834_v24 = vld [vmem:[%s1840_s0 + $0x28] sm:$0xf0] }
  0x15   :  { %456 = vmatpush.bf16.msra.mxu2 %v933_v43  ;;  %v973_v22 = vor.u32 %v1091_v19, %v970_v21  ;;  %v1322_v25 = vor.u32 %v1058_v23, %v834_v24  ;;  %v824_v26 = vld [vmem:[%s1840_s0 + $0x10] sm:$0xf]  ;;  %v1057_v28 = vld [vmem:[%s1840_s0 + $0x14] sm:$0xf0]  ;;  %v952_v30 = vld [vmem:[%s1839_s1 + $0x88] sm:$0xf] }
  0x16   :  { %v1330_v29 = vor.u32 %v1057_v28, %v824_v26  ;;  %v1089_v31 = vld [vmem:[%s1839_s1 + $0x94] sm:$0xf0]  ;;  %v1087_v32 = vld [vmem:[%s1839_s1 + $0x8c] sm:$0xf]  ;;  %v954_v34 = vld [vmem:[%s1839_s1 + $0x98] sm:$0xf0] }
  0x17   :  { %552 = vmatpush.bf16.msrb.mxu1 %v969_v20  ;;  %v953_v33 = vor.u32 %v1089_v31, %v952_v30  ;;  %v957_v35 = vor.u32 %v1087_v32, %v954_v34  ;;  %v1060_v36 = vld [vmem:[%s1840_s0 + $0x34] sm:$0xf]  ;;  %v842_v37 = vld [vmem:[%s1840_s0 + $0x38] sm:$0xf0]  ;;  %v832_v39 = vld [vmem:[%s1840_s0 + $0x20] sm:$0xf] }
  0x18   :  { %359 = vmatpush.bf16.msra.mxu0 %v913_v49  ;;  %v1356_v38 = vor.u32 %v1060_v36, %v842_v37  ;;  %v1059_v40 = vld [vmem:[%s1840_s0 + $0x24] sm:$0xf0]  ;;  %v1085_v43 = vld [vmem:[%s1839_s1 + $0x74] sm:$0xf0]  ;;  %v1083_v44 = vld [vmem:[%s1839_s1 + $0x6c] sm:$0xf] }
  0x19   :  { %457 = vmatpush.bf16.msra.mxu2 %v917_v52  ;;  %v1364_v41 = vor.u32 %v1059_v40, %v832_v39  ;;  %v936_v42 = vld [vmem:[%s1839_s1 + $0x68] sm:$0xf]  ;;  %v938_v46 = vld [vmem:[%s1839_s1 + $0x78] sm:$0xf0]  ;;  %v1062_v48 = vld [vmem:[%s1840_s0 + $0x44] sm:$0xf] }
  0x1a   :  { %v937_v45 = vor.u32 %v1085_v43, %v936_v42  ;;  %v941_v47 = vor.u32 %v1083_v44, %v938_v46  ;;  %v850_v49 = vld [vmem:[%s1840_s0 + $0x48] sm:$0xf0]  ;;  %v840_v51 = vld [vmem:[%s1840_s0 + $0x30] sm:$0xf]  ;;  %v1061_v52 = vld [vmem:[%s1840_s0 + $0x34] sm:$0xf0] }
  0x1b   :  { %553 = vmatpush.bf16.msrb.mxu1 %v953_v33  ;;  %v1390_v50 = vor.u32 %v1062_v48, %v850_v49  ;;  %v1398_v53 = vor.u32 %v1061_v52, %v840_v51  ;;  %v920_v54 = vld [vmem:[%s1839_s1 + $0x48] sm:$0xf]  ;;  %v1081_v55 = vld [vmem:[%s1839_s1 + $0x54] sm:$0xf0]  ;;  %v1079_v56 = vld [vmem:[%s1839_s1 + $0x4c] sm:$0xf] }
  0x1c   :  { %360 = vmatpush.bf16.msra.mxu0 %v897_v58  ;;  %1031 = vmatmul.msk.bf16.gmra.mxu3 %vm329_vm0, %v1282_v6  ;;  %v921_v57 = vor.u32 %v1081_v55, %v920_v54  ;;  %v922_v58 = vld [vmem:[%s1839_s1 + $0x58] sm:$0xf0]  ;;  %v1064_v60 = vld [vmem:[%s1840_s0 + $0x54] sm:$0xf]  ;;  %v848_v63 = vld [vmem:[%s1840_s0 + $0x40] sm:$0xf] }
  0x1d   :  { %458 = vmatpush.bf16.msra.mxu2 %v901_v61  ;;  %v925_v59 = vor.u32 %v1079_v56, %v922_v58  ;;  %v858_v61 = vld [vmem:[%s1840_s0 + $0x58] sm:$0xf0]  ;;  %v1063_v0 = vld [vmem:[%s1840_s0 + $0x44] sm:$0xf0]  ;;  %v1077_v3 = vld [vmem:[%s1839_s1 + $0x34] sm:$0xf0] }
  0x1e   :  { %1023 = vmatmul.msk.bf16.gmra.mxu1 %vm329_vm0, %v1282_v6  ;;  %v1424_v62 = vor.u32 %v1064_v60, %v858_v61  ;;  %v1432_v1 = vor.u32 %v1063_v0, %v848_v63  ;;  %v904_v2 = vld [vmem:[%s1839_s1 + $0x28] sm:$0xf]  ;;  %v1075_v4 = vld [vmem:[%s1839_s1 + $0x2c] sm:$0xf]  ;;  %v1066_v9 = vld [vmem:[%s1840_s0 + $0x64] sm:$0xf] }
  0x1f   :  { %554 = vmatpush.bf16.msrb.mxu1 %v937_v45  ;;  %v905_v5 = vor.u32 %v1077_v3, %v904_v2  ;;  %v1065_v13 = vld [vmem:[%s1840_s0 + $0x54] sm:$0xf0]  ;;  %v1071_v18 = vld [vmem:[%s1839_s1 + $0xc] sm:$0xf]  ;;  %v890_v20 = vld [vmem:[%s1839_s1 + $0x18] sm:$0xf0] }
  0x20   :  { %361 = vmatpush.bf16.msra.mxu0 %v881_v7  ;;  %v906_v7 = vld [vmem:[%s1839_s1 + $0x38] sm:$0xf0]  ;;  %v1073_v17 = vld [vmem:[%s1839_s1 + $0x14] sm:$0xf0]  ;;  %v893_v21 = vor.u32 %v1071_v18, %v890_v20  ;;  %v864_v26 = vld [vmem:[%s1840_s0 + $0x60] sm:$0xf] }
  0x21   :  { %459 = vmatpush.bf16.msra.mxu2 %v885_v10  ;;  %v909_v8 = vor.u32 %v1075_v4, %v906_v7  ;;  %v866_v10 = vld [vmem:[%s1840_s0 + $0x68] sm:$0xf0]  ;;  %v874_v23 = vld [vmem:[%s1840_s0 + $0x78] sm:$0xf0]  ;;  %v1067_v28 = vld [vmem:[%s1840_s0 + $0x64] sm:$0xf0] }
  0x22   :  { %v1500_v30 = vor.u32 %v1067_v28, %v864_v26  ;;  %v872_v31 = vld [vmem:[%s1840_s0 + $0x70] sm:$0xf]  ;;  %v1069_v32 = vld [vmem:[%s1840_s0 + $0x74] sm:$0xf0]  ;;  %v1524_v37 = vld [vmem:[%s1841_s2] sm:$0xf] }
  0x23   :  { %362 = vmatmul.bf16.vlgmr.msra.gmra.mxu0 %v1296_v15  ;;  %555 = vmatpush.bf16.msrb.mxu1 %v921_v57  ;;  %v1514_v34 = vor.u32 %v1069_v32, %v872_v31  ;;  %v1527_v40 = vperm.slane %v1524_v37, 0 }
  0x24   :  { %648 = vmatpush.bf16.msrb.mxu0 %v1005_v11  ;;  %460 = vmatmul.bf16.vlgmr.msra.gmra.mxu2 %v1296_v15  ;;  %v1458_v11 = vor.u32 %v1066_v9, %v866_v10 }
  0x25   :  { %704 = vmatpush.bf16.msrb.mxu2 %v1021_v12  ;;  %v856_v12 = vld [vmem:[%s1840_s0 + $0x50] sm:$0xf] }
  0x26   :  { %v1466_v14 = vor.u32 %v1065_v13, %v856_v12 }
  0x27   :  { %556 = vmatpush.bf16.msrb.mxu1 %v905_v5 }
  0x28   :  { %649 = vmatpush.bf16.msrb.mxu0 %v989_v16  ;;  %v888_v16 = vld [vmem:[%s1839_s1 + $0x8] sm:$0xf] }
  0x29   :  { %v889_v19 = vor.u32 %v1073_v17, %v888_v16 }
  0x2b   :  { %557 = vmatpush.bf16.msrb.mxu1 %v889_v19 }
  0x2c   :  { %650 = vmatpush.bf16.msrb.mxu0 %v973_v22  ;;  %1032 = vmatmul.msk.bf16.gmra.mxu3 %vm329_vm0, %v1322_v25  ;;  %v1068_v22 = vld [vmem:[%s1840_s0 + $0x74] sm:$0xf] }
  0x2d   :  { %v1492_v24 = vor.u32 %v1068_v22, %v874_v23 }
  0x2e   :  { %1024 = vmatmul.msk.bf16.gmra.mxu1 %vm329_vm0, %v1322_v25 }
  0x30   :  { %651 = vmatpush.bf16.msrb.mxu0 %v957_v35 }
  0x33   :  { %367 = vmatmul.bf16.gmra.mxu0 %v1330_v29 }
  0x34   :  { %465 = vmatmul.bf16.gmra.mxu2 %v1330_v29  ;;  %652 = vmatpush.bf16.msrb.mxu0 %v941_v47  ;;  %v1537_v47 = vperm.slane %v1524_v37, 1 }
  0x38   :  { %653 = vmatpush.bf16.msrb.mxu0 %v925_v59 }
  0x3c   :  { %1033 = vmatmul.msk.bf16.gmra.mxu3 %vm329_vm0, %v1356_v38  ;;  %654 = vmatpush.bf16.msrb.mxu0 %v909_v8 }
  0x3e   :  { %1025 = vmatmul.msk.bf16.gmra.mxu1 %vm329_vm0, %v1356_v38 }
  0x40   :  { %655 = vmatpush.bf16.msrb.mxu0 %v893_v21 }
  0x43   :  { %372 = vmatmul.bf16.gmra.mxu0 %v1364_v41 }
  0x44   :  { %470 = vmatmul.bf16.gmra.mxu2 %v1364_v41 }
  0x4c   :  { %1034 = vmatmul.msk.bf16.gmra.mxu3 %vm329_vm0, %v1390_v50 }
  0x4e   :  { %1026 = vmatmul.msk.bf16.gmra.mxu1 %vm329_vm0, %v1390_v50 }
  0x53   :  { %377 = vmatmul.bf16.gmra.mxu0 %v1398_v53 }
  0x54   :  { %475 = vmatmul.bf16.gmra.mxu2 %v1398_v53 }
  0x5c   :  { %1035 = vmatmul.msk.bf16.gmra.mxu3 %vm329_vm0, %v1424_v62 }
  0x5e   :  { %1027 = vmatmul.msk.bf16.gmra.mxu1 %vm329_vm0, %v1424_v62 }
  0x63   :  { %382 = vmatmul.bf16.gmra.mxu0 %v1432_v1 }
  0x64   :  { %480 = vmatmul.bf16.gmra.mxu2 %v1432_v1 }
  0x6c   :  { %1036 = vmatmul.msk.bf16.gmra.mxu3 %vm329_vm0, %v1458_v11 }
  0x6e   :  { %1028 = vmatmul.msk.bf16.gmra.mxu1 %vm329_vm0, %v1458_v11 }
  0x73   :  { %387 = vmatmul.bf16.gmra.mxu0 %v1466_v14 }
  0x74   :  { %485 = vmatmul.bf16.gmra.mxu2 %v1466_v14 }
  0x7c   :  { %1037 = vmatmul.msk.bf16.gmra.mxu3 %vm329_vm0, %v1492_v24 }
  0x7e   :  { %1029 = vmatmul.msk.bf16.gmra.mxu1 %vm329_vm0, %v1492_v24 }
  0x83   :  { %392 = vmatmul.bf16.gmra.mxu0 %v1500_v30 }
  0x84   :  { %490 = vmatmul.bf16.gmra.mxu2 %v1500_v30 }
  0x8b   :  { %v412_v33 = vpop.f32.mrf.mxu1 }
  0x8c   :  { %1038 = vmatmul.msk.bf16.vlgmr.msrb.gmra.mxu3 %vm329_vm0, %v1186_v27 }
  0x8e   :  { %558 = vmatmul.bf16.vlgmr.msrb.gmra.mxu1 %v1296_v15 }
  0x8f   :  { %v510_v35 = vpop.f32.mrf.mxu3 }
  0x93   :  { %397 = vmatmul.bf16.gmra.mxu0 %v1514_v34  ;;  %v414_v36 = vpop.f32.mrf.mxu1 }
  0x94   :  { %495 = vmatmul.bf16.gmra.mxu2 %v1514_v34 }
  0x97   :  { %v512_v39 = vpop.f32.mrf.mxu3 }
  0x9b   :  { %v417_v42 = vpop.f32.mrf.mxu1 }
  0x9c   :  { %1039 = vmatmul.msk.bf16.gmra.mxu3 %vm329_vm0, %v1282_v6 }
  0x9e   :  { %563 = vmatmul.bf16.gmra.mxu1 %v1330_v29 }
  0x9f   :  { %v515_v45 = vpop.f32.mrf.mxu3 }
  0xa0   :  { %v363_v43 = vpop.f32.mrf.mxu0 }
  0xa1   :  { %v364_v44 = vadd.f32 %v363_v43, %v1527_v40 }
  0xa3   :  { %v413_v46 = vadd.f32 %v412_v33, %v364_v44  ;;  %656 = vmatmul.bf16.vlgmr.msrb.gmra.mxu0 %v1296_v15  ;;  %v419_v49 = vpop.f32.mrf.mxu1 }
  0xa4   :  { %1046 = vmatmul.msk.bf16.vlgmr.msrb.gmra.mxu2 %vm329_vm0, %v1186_v27 }
  0xa5   :  { %746 = vst [vmem:[%s1842_s3] sm:$0xff] %v413_v46 }
  0xa7   :  { %v461_v48 = vpop.f32.mrf.mxu2  ;;  %v517_v56 = vpop.f32.mrf.mxu3 }
  0xa8   :  { %v462_v51 = vadd.f32 %v461_v48, %v1537_v47  ;;  %v365_v52 = vpop.f32.mrf.mxu0 }
  0xa9   :  { %v366_v54 = vadd.f32 %v365_v52, %v1527_v40 }
  0xaa   :  { %v511_v55 = vadd.f32 %v510_v35, %v462_v51 }
  0xab   :  { %v415_v15 = vadd.f32 %v414_v36, %v366_v54  ;;  %v422_v57 = vpop.f32.mrf.mxu1 }
  0xac   :  { %747 = vst [vmem:[%s1842_s3 + $0x8] sm:$0xff] %v511_v55  ;;  %1040 = vmatmul.msk.bf16.gmra.mxu3 %vm329_vm0, %v1322_v25 }
  0xad   :  { %750 = vst [vmem:[%s1842_s3 + $0x20] sm:$0xff] %v415_v15 }
  0xae   :  { %568 = vmatmul.bf16.gmra.mxu1 %v1364_v41 }
  0xaf   :  { %v463_v27 = vpop.f32.mrf.mxu2  ;;  %v520_v63 = vpop.f32.mrf.mxu3 }
  0xb0   :  { %v464_v58 = vadd.f32 %v463_v27, %v1537_v47  ;;  %v368_v59 = vpop.f32.mrf.mxu0 }
  0xb1   :  { %v369_v60 = vadd.f32 %v368_v59, %v1527_v40 }
  0xb2   :  { %v513_v61 = vadd.f32 %v512_v39, %v464_v58 }
  0xb3   :  { %v418_v0 = vadd.f32 %v417_v42, %v369_v60  ;;  %661 = vmatmul.bf16.gmra.mxu0 %v1330_v29  ;;  %v424_v3 = vpop.f32.mrf.mxu1 }
  0xb4   :  { %751 = vst [vmem:[%s1842_s3 + $0x28] sm:$0xff] %v513_v61  ;;  %1047 = vmatmul.msk.bf16.gmra.mxu2 %vm329_vm0, %v1282_v6 }
  0xb5   :  { %754 = vst [vmem:[%s1842_s3 + $0x40] sm:$0xff] %v418_v0 }
  0xb7   :  { %v466_v2 = vpop.f32.mrf.mxu2  ;;  %v522_v29 = vpop.f32.mrf.mxu3 }
  0xb8   :  { %v467_v4 = vadd.f32 %v466_v2, %v1537_v47  ;;  %v370_v5 = vpop.f32.mrf.mxu0 }
  0xb9   :  { %v371_v7 = vadd.f32 %v370_v5, %v1527_v40 }
  0xba   :  { %v516_v8 = vadd.f32 %v515_v45, %v467_v4 }
  0xbb   :  { %v420_v9 = vadd.f32 %v419_v49, %v371_v7  ;;  %v427_v10 = vpop.f32.mrf.mxu1 }
  0xbc   :  { %755 = vst [vmem:[%s1842_s3 + $0x48] sm:$0xff] %v516_v8  ;;  %1041 = vmatmul.msk.bf16.gmra.mxu3 %vm329_vm0, %v1356_v38 }
  0xbd   :  { %758 = vst [vmem:[%s1842_s3 + $0x60] sm:$0xff] %v420_v9 }
  0xbe   :  { %573 = vmatmul.bf16.gmra.mxu1 %v1398_v53 }
  0xbf   :  { %v468_v6 = vpop.f32.mrf.mxu2  ;;  %v525_v18 = vpop.f32.mrf.mxu3 }
  0xc0   :  { %v469_v12 = vadd.f32 %v468_v6, %v1537_v47  ;;  %v373_v13 = vpop.f32.mrf.mxu0 }
  0xc1   :  { %v374_v16 = vadd.f32 %v373_v13, %v1527_v40 }
  0xc2   :  { %v518_v17 = vadd.f32 %v517_v56, %v469_v12 }
  0xc3   :  { %v423_v19 = vadd.f32 %v422_v57, %v374_v16  ;;  %666 = vmatmul.bf16.gmra.mxu0 %v1364_v41  ;;  %v429_v21 = vpop.f32.mrf.mxu1 }
  0xc4   :  { %759 = vst [vmem:[%s1842_s3 + $0x68] sm:$0xff] %v518_v17  ;;  %1048 = vmatmul.msk.bf16.gmra.mxu2 %vm329_vm0, %v1322_v25 }
  0xc5   :  { %762 = vst [vmem:[%s1842_s3 + $0x80] sm:$0xff] %v423_v19 }
  0xc7   :  { %v471_v20 = vpop.f32.mrf.mxu2  ;;  %v527_v41 = vpop.f32.mrf.mxu3 }
  0xc8   :  { %v472_v22 = vadd.f32 %v471_v20, %v1537_v47  ;;  %v375_v23 = vpop.f32.mrf.mxu0 }
  0xc9   :  { %v376_v26 = vadd.f32 %v375_v23, %v1527_v40 }
  0xca   :  { %v521_v28 = vadd.f32 %v520_v63, %v472_v22 }
  0xcb   :  { %v425_v31 = vadd.f32 %v424_v3, %v376_v26  ;;  %v432_v32 = vpop.f32.mrf.mxu1 }
  0xcc   :  { %763 = vst [vmem:[%s1842_s3 + $0x88] sm:$0xff] %v521_v28  ;;  %1042 = vmatmul.msk.bf16.gmra.mxu3 %vm329_vm0, %v1390_v50 }
  0xcd   :  { %766 = vst [vmem:[%s1842_s3 + $0xa0] sm:$0xff] %v425_v31 }
  0xce   :  { %578 = vmatmul.bf16.gmra.mxu1 %v1432_v1 }
  0xcf   :  { %v473_v25 = vpop.f32.mrf.mxu2  ;;  %v530_v42 = vpop.f32.mrf.mxu3 }
  0xd0   :  { %v474_v33 = vadd.f32 %v473_v25, %v1537_v47  ;;  %v378_v35 = vpop.f32.mrf.mxu0 }
  0xd1   :  { %v379_v36 = vadd.f32 %v378_v35, %v1527_v40 }
  0xd2   :  { %v523_v39 = vadd.f32 %v522_v29, %v474_v33 }
  0xd3   :  { %v428_v43 = vadd.f32 %v427_v10, %v379_v36  ;;  %671 = vmatmul.bf16.gmra.mxu0 %v1398_v53  ;;  %v434_v45 = vpop.f32.mrf.mxu1 }
  0xd4   :  { %767 = vst [vmem:[%s1842_s3 + $0xa8] sm:$0xff] %v523_v39  ;;  %1049 = vmatmul.msk.bf16.gmra.mxu2 %vm329_vm0, %v1356_v38 }
  0xd5   :  { %770 = vst [vmem:[%s1842_s3 + $0xc0] sm:$0xff] %v428_v43 }
  0xd7   :  { %v476_v44 = vpop.f32.mrf.mxu2  ;;  %v532_v53 = vpop.f32.mrf.mxu3 }
  0xd8   :  { %v477_v46 = vadd.f32 %v476_v44, %v1537_v47  ;;  %v380_v48 = vpop.f32.mrf.mxu0 }
  0xd9   :  { %v381_v49 = vadd.f32 %v380_v48, %v1527_v40 }
  0xda   :  { %v526_v51 = vadd.f32 %v525_v18, %v477_v46 }
  0xdb   :  { %v430_v52 = vadd.f32 %v429_v21, %v381_v49  ;;  %v437_v54 = vpop.f32.mrf.mxu1 }
  0xdc   :  { %771 = vst [vmem:[%s1842_s3 + $0xc8] sm:$0xff] %v526_v51  ;;  %1043 = vmatmul.msk.bf16.gmra.mxu3 %vm329_vm0, %v1424_v62 }
  0xdd   :  { %774 = vst [vmem:[%s1842_s3 + $0xe0] sm:$0xff] %v430_v52 }
  0xde   :  { %583 = vmatmul.bf16.gmra.mxu1 %v1466_v14 }
  0xdf   :  { %v478_v38 = vpop.f32.mrf.mxu2  ;;  %v535_v57 = vpop.f32.mrf.mxu3 }
  0xe0   :  { %v479_v55 = vadd.f32 %v478_v38, %v1537_v47  ;;  %v383_v56 = vpop.f32.mrf.mxu0 }
  0xe1   :  { %v384_v15 = vadd.f32 %v383_v56, %v1527_v40 }
  0xe2   :  { %v528_v27 = vadd.f32 %v527_v41, %v479_v55 }
  0xe3   :  { %v433_v58 = vadd.f32 %v432_v32, %v384_v15  ;;  %676 = vmatmul.bf16.gmra.mxu0 %v1432_v1  ;;  %v439_v60 = vpop.f32.mrf.mxu1 }
  0xe4   :  { %775 = vst [vmem:[%s1842_s3 + $0xe8] sm:$0xff] %v528_v27  ;;  %1050 = vmatmul.msk.bf16.gmra.mxu2 %vm329_vm0, %v1390_v50 }
  0xe5   :  { %778 = vst [vmem:[%s1842_s3 + $0x100] sm:$0xff] %v433_v58 }
  0xe7   :  { %v481_v59 = vpop.f32.mrf.mxu2  ;;  %v537_v1 = vpop.f32.mrf.mxu3 }
  0xe8   :  { %v482_v61 = vadd.f32 %v481_v59, %v1537_v47  ;;  %v385_v63 = vpop.f32.mrf.mxu0 }
  0xe9   :  { %v386_v0 = vadd.f32 %v385_v63, %v1527_v40 }
  0xea   :  { %v531_v2 = vadd.f32 %v530_v42, %v482_v61  ;;  %v1714_v61 = vperm.slane %v1524_v37, 3 }
  0xeb   :  { %v435_v3 = vadd.f32 %v434_v45, %v386_v0  ;;  %v442_v4 = vpop.f32.mrf.mxu1 }
  0xec   :  { %779 = vst [vmem:[%s1842_s3 + $0x108] sm:$0xff] %v531_v2  ;;  %1044 = vmatmul.msk.bf16.gmra.mxu3 %vm329_vm0, %v1458_v11 }
  0xed   :  { %782 = vst [vmem:[%s1842_s3 + $0x120] sm:$0xff] %v435_v3 }
  0xee   :  { %588 = vmatmul.bf16.gmra.mxu1 %v1500_v30 }
  0xef   :  { %v483_v50 = vpop.f32.mrf.mxu2  ;;  %v540_v9 = vpop.f32.mrf.mxu3 }
  0xf0   :  { %v484_v5 = vadd.f32 %v483_v50, %v1537_v47  ;;  %v388_v7 = vpop.f32.mrf.mxu0 }
  0xf1   :  { %v389_v8 = vadd.f32 %v388_v7, %v1527_v40 }
  0xf2   :  { %v533_v29 = vadd.f32 %v532_v53, %v484_v5 }
  0xf3   :  { %v438_v6 = vadd.f32 %v437_v54, %v389_v8  ;;  %681 = vmatmul.bf16.gmra.mxu0 %v1466_v14  ;;  %v444_v12 = vpop.f32.mrf.mxu1 }
  0xf4   :  { %783 = vst [vmem:[%s1842_s3 + $0x128] sm:$0xff] %v533_v29  ;;  %1051 = vmatmul.msk.bf16.gmra.mxu2 %vm329_vm0, %v1424_v62 }
  0xf5   :  { %786 = vst [vmem:[%s1842_s3 + $0x140] sm:$0xff] %v438_v6 }
  0xf7   :  { %v486_v10 = vpop.f32.mrf.mxu2  ;;  %v542_v14 = vpop.f32.mrf.mxu3 }
  0xf8   :  { %v487_v13 = vadd.f32 %v486_v10, %v1537_v47  ;;  %v390_v16 = vpop.f32.mrf.mxu0 }
  0xf9   :  { %v391_v17 = vadd.f32 %v390_v16, %v1527_v40 }
  0xfa   :  { %v536_v18 = vadd.f32 %v535_v57, %v487_v13 }
  0xfb   :  { %v440_v19 = vadd.f32 %v439_v60, %v391_v17  ;;  %v447_v20 = vpop.f32.mrf.mxu1 }
  0xfc   :  { %787 = vst [vmem:[%s1842_s3 + $0x148] sm:$0xff] %v536_v18  ;;  %1045 = vmatmul.msk.bf16.gmra.mxu3 %vm329_vm0, %v1492_v24 }
  0xfd   :  { %790 = vst [vmem:[%s1842_s3 + $0x160] sm:$0xff] %v440_v19 }
  0xfe   :  { %593 = vmatmul.bf16.gmra.mxu1 %v1514_v34 }
  0xff   :  { %v488_v62 = vpop.f32.mrf.mxu2  ;;  %v545_v28 = vpop.f32.mrf.mxu3 }
 0x100   :  { %v489_v21 = vadd.f32 %v488_v62, %v1537_v47  ;;  %v393_v22 = vpop.f32.mrf.mxu0 }
 0x101   :  { %v394_v23 = vadd.f32 %v393_v22, %v1527_v40 }
 0x102   :  { %v538_v26 = vadd.f32 %v537_v1, %v489_v21 }
 0x103   :  { %v443_v41 = vadd.f32 %v442_v4, %v394_v23  ;;  %686 = vmatmul.bf16.gmra.mxu0 %v1500_v30  ;;  %v449_v25 = vpop.f32.mrf.mxu1 }
 0x104   :  { %791 = vst [vmem:[%s1842_s3 + $0x168] sm:$0xff] %v538_v26  ;;  %1052 = vmatmul.msk.bf16.gmra.mxu2 %vm329_vm0, %v1458_v11  ;;  %v1680_v11 = vperm.slane %v1524_v37, 2 }
 0x105   :  { %794 = vst [vmem:[%s1842_s3 + $0x180] sm:$0xff] %v443_v41 }
 0x107   :  { %v491_v31 = vpop.f32.mrf.mxu2  ;;  %v547_v30 = vpop.f32.mrf.mxu3 }
 0x108   :  { %v492_v32 = vadd.f32 %v491_v31, %v1537_v47  ;;  %v395_v33 = vpop.f32.mrf.mxu0 }
 0x109   :  { %v396_v35 = vadd.f32 %v395_v33, %v1527_v40 }
 0x10a   :  { %v541_v36 = vadd.f32 %v540_v9, %v492_v32 }
 0x10b   :  { %v445_v39 = vadd.f32 %v444_v12, %v396_v35  ;;  %v559_v43 = vpop.f32.mrf.mxu1 }
 0x10c   :  { %795 = vst [vmem:[%s1842_s3 + $0x188] sm:$0xff] %v541_v36  ;;  %v560_v46 = vadd.f32 %v559_v43, %v1680_v11 }
 0x10d   :  { %798 = vst [vmem:[%s1842_s3 + $0x1a0] sm:$0xff] %v445_v39 }
 0x10f   :  { %v493_v42 = vpop.f32.mrf.mxu2  ;;  %v608_v51 = vpop.f32.mrf.mxu3 }
 0x110   :  { %v494_v44 = vadd.f32 %v493_v42, %v1537_v47  ;;  %v398_v45 = vpop.f32.mrf.mxu0  ;;  %v609_v52 = vadd.f32 %v608_v51, %v560_v46 }
 0x111   :  { %v399_v48 = vadd.f32 %v398_v45, %v1527_v40 }
 0x112   :  { %v543_v49 = vadd.f32 %v542_v14, %v494_v44  ;;  %748 = vst [vmem:[%s1842_s3 + $0x10] sm:$0xff] %v609_v52 }
 0x113   :  { %v448_v53 = vadd.f32 %v447_v20, %v399_v48  ;;  %691 = vmatmul.bf16.gmra.mxu0 %v1514_v34  ;;  %v561_v54 = vpop.f32.mrf.mxu1 }
 0x114   :  { %799 = vst [vmem:[%s1842_s3 + $0x1a8] sm:$0xff] %v543_v49  ;;  %1053 = vmatmul.msk.bf16.gmra.mxu2 %vm329_vm0, %v1492_v24  ;;  %v562_v56 = vadd.f32 %v561_v54, %v1680_v11 }
 0x115   :  { %802 = vst [vmem:[%s1842_s3 + $0x1c0] sm:$0xff] %v448_v53 }
 0x117   :  { %v496_v38 = vpop.f32.mrf.mxu2  ;;  %v610_v57 = vpop.f32.mrf.mxu3 }
 0x118   :  { %v497_v34 = vadd.f32 %v496_v38, %v1537_v47  ;;  %v400_v55 = vpop.f32.mrf.mxu0  ;;  %v611_v58 = vadd.f32 %v610_v57, %v562_v56 }
 0x119   :  { %v401_v15 = vadd.f32 %v400_v55, %v1527_v40 }
 0x11a   :  { %v546_v27 = vadd.f32 %v545_v28, %v497_v34  ;;  %752 = vst [vmem:[%s1842_s3 + $0x30] sm:$0xff] %v611_v58 }
 0x11b   :  { %v450_v24 = vadd.f32 %v449_v25, %v401_v15  ;;  %v564_v60 = vpop.f32.mrf.mxu1 }
 0x11c   :  { %803 = vst [vmem:[%s1842_s3 + $0x1c8] sm:$0xff] %v546_v27  ;;  %v565_v0 = vadd.f32 %v564_v60, %v1680_v11 }
 0x11d   :  { %806 = vst [vmem:[%s1842_s3 + $0x1e0] sm:$0xff] %v450_v24 }
 0x11f   :  { %v498_v59 = vpop.f32.mrf.mxu2  ;;  %v613_v1 = vpop.f32.mrf.mxu3 }
 0x120   :  { %v499_v40 = vadd.f32 %v498_v59, %v1537_v47  ;;  %v657_v63 = vpop.f32.mrf.mxu0  ;;  %v614_v3 = vadd.f32 %v613_v1, %v565_v0 }
 0x121   :  { %v658_v50 = vadd.f32 %v657_v63, %v1714_v61 }
 0x122   :  { %v548_v2 = vadd.f32 %v547_v30, %v499_v40  ;;  %756 = vst [vmem:[%s1842_s3 + $0x50] sm:$0xff] %v614_v3 }
 0x123   :  { %v566_v4 = vpop.f32.mrf.mxu1 }
 0x124   :  { %807 = vst [vmem:[%s1842_s3 + $0x1e8] sm:$0xff] %v548_v2  ;;  %v567_v7 = vadd.f32 %v566_v4, %v1680_v11 }
 0x127   :  { %v706_v47 = vpop.f32.mrf.mxu2  ;;  %v615_v8 = vpop.f32.mrf.mxu3 }
 0x128   :  { %v707_v37 = vadd.f32 %v706_v47, %v658_v50  ;;  %v659_v5 = vpop.f32.mrf.mxu0  ;;  %v616_v29 = vadd.f32 %v615_v8, %v567_v7 }
 0x129   :  { %v660_v9 = vadd.f32 %v659_v5, %v1714_v61 }
 0x12a   :  { %749 = vst [vmem:[%s1842_s3 + $0x18] sm:$0xff] %v707_v37 }
 0x12b   :  { %760 = vst [vmem:[%s1842_s3 + $0x70] sm:$0xff] %v616_v29  ;;  %v569_v10 = vpop.f32.mrf.mxu1 }
 0x12c   :  { %v570_v16 = vadd.f32 %v569_v10, %v1680_v11 }
 0x12f   :  { %v708_v6 = vpop.f32.mrf.mxu2  ;;  %v618_v17 = vpop.f32.mrf.mxu3 }
 0x130   :  { %v709_v12 = vadd.f32 %v708_v6, %v660_v9  ;;  %v662_v13 = vpop.f32.mrf.mxu0  ;;  %v619_v18 = vadd.f32 %v618_v17, %v570_v16 }
 0x131   :  { %v663_v14 = vadd.f32 %v662_v13, %v1714_v61 }
 0x132   :  { %753 = vst [vmem:[%s1842_s3 + $0x38] sm:$0xff] %v709_v12 }
 0x133   :  { %764 = vst [vmem:[%s1842_s3 + $0x90] sm:$0xff] %v619_v18  ;;  %v571_v62 = vpop.f32.mrf.mxu1 }
 0x134   :  { %v572_v22 = vadd.f32 %v571_v62, %v1680_v11 }
 0x137   :  { %v711_v19 = vpop.f32.mrf.mxu2  ;;  %v620_v23 = vpop.f32.mrf.mxu3 }
 0x138   :  { %v712_v20 = vadd.f32 %v711_v19, %v663_v14  ;;  %v664_v21 = vpop.f32.mrf.mxu0  ;;  %v621_v26 = vadd.f32 %v620_v23, %v572_v22 }
 0x139   :  { %v665_v28 = vadd.f32 %v664_v21, %v1714_v61 }
 0x13a   :  { %757 = vst [vmem:[%s1842_s3 + $0x58] sm:$0xff] %v712_v20 }
 0x13b   :  { %768 = vst [vmem:[%s1842_s3 + $0xb0] sm:$0xff] %v621_v26  ;;  %v574_v31 = vpop.f32.mrf.mxu1 }
 0x13c   :  { %v575_v33 = vadd.f32 %v574_v31, %v1680_v11 }
 0x13f   :  { %v713_v41 = vpop.f32.mrf.mxu2  ;;  %v623_v35 = vpop.f32.mrf.mxu3 }
 0x140   :  { %v714_v25 = vadd.f32 %v713_v41, %v665_v28  ;;  %v667_v32 = vpop.f32.mrf.mxu0  ;;  %v624_v36 = vadd.f32 %v623_v35, %v575_v33 }
 0x141   :  { %v668_v30 = vadd.f32 %v667_v32, %v1714_v61 }
 0x142   :  { %761 = vst [vmem:[%s1842_s3 + $0x78] sm:$0xff] %v714_v25 }
 0x143   :  { %772 = vst [vmem:[%s1842_s3 + $0xd0] sm:$0xff] %v624_v36  ;;  %v576_v42 = vpop.f32.mrf.mxu1 }
 0x144   :  { %v577_v45 = vadd.f32 %v576_v42, %v1680_v11 }
 0x147   :  { %v716_v39 = vpop.f32.mrf.mxu2  ;;  %v625_v46 = vpop.f32.mrf.mxu3 }
 0x148   :  { %v717_v43 = vadd.f32 %v716_v39, %v668_v30  ;;  %v669_v44 = vpop.f32.mrf.mxu0  ;;  %v626_v48 = vadd.f32 %v625_v46, %v577_v45 }
 0x149   :  { %v670_v49 = vadd.f32 %v669_v44, %v1714_v61 }
 0x14a   :  { %765 = vst [vmem:[%s1842_s3 + $0x98] sm:$0xff] %v717_v43 }
 0x14b   :  { %776 = vst [vmem:[%s1842_s3 + $0xf0] sm:$0xff] %v626_v48  ;;  %v579_v53 = vpop.f32.mrf.mxu1 }
 0x14c   :  { %v580_v54 = vadd.f32 %v579_v53, %v1680_v11 }
 0x14f   :  { %v718_v51 = vpop.f32.mrf.mxu2  ;;  %v628_v34 = vpop.f32.mrf.mxu3 }
 0x150   :  { %v719_v52 = vadd.f32 %v718_v51, %v670_v49  ;;  %v672_v38 = vpop.f32.mrf.mxu0  ;;  %v629_v55 = vadd.f32 %v628_v34, %v580_v54 }
 0x151   :  { %v673_v56 = vadd.f32 %v672_v38, %v1714_v61 }
 0x152   :  { %769 = vst [vmem:[%s1842_s3 + $0xb8] sm:$0xff] %v719_v52 }
 0x153   :  { %780 = vst [vmem:[%s1842_s3 + $0x110] sm:$0xff] %v629_v55  ;;  %v581_v27 = vpop.f32.mrf.mxu1 }
 0x154   :  { %v582_v58 = vadd.f32 %v581_v27, %v1680_v11 }
 0x157   :  { %v721_v15 = vpop.f32.mrf.mxu2  ;;  %v630_v59 = vpop.f32.mrf.mxu3 }
 0x158   :  { %v722_v57 = vadd.f32 %v721_v15, %v673_v56  ;;  %v674_v24 = vpop.f32.mrf.mxu0  ;;  %v631_v60 = vadd.f32 %v630_v59, %v582_v58 }
 0x159   :  { %v675_v40 = vadd.f32 %v674_v24, %v1714_v61 }
 0x15a   :  { %773 = vst [vmem:[%s1842_s3 + $0xd8] sm:$0xff] %v722_v57 }
 0x15b   :  { %784 = vst [vmem:[%s1842_s3 + $0x130] sm:$0xff] %v631_v60  ;;  %v584_v0 = vpop.f32.mrf.mxu1 }
 0x15c   :  { %v585_v3 = vadd.f32 %v584_v0, %v1680_v11 }
 0x15f   :  { %v723_v63 = vpop.f32.mrf.mxu2  ;;  %v633_v50 = vpop.f32.mrf.mxu3 }
 0x160   :  { %v724_v2 = vadd.f32 %v723_v63, %v675_v40  ;;  %v677_v1 = vpop.f32.mrf.mxu0  ;;  %v634_v47 = vadd.f32 %v633_v50, %v585_v3 }
 0x161   :  { %v678_v4 = vadd.f32 %v677_v1, %v1714_v61 }
 0x162   :  { %777 = vst [vmem:[%s1842_s3 + $0xf8] sm:$0xff] %v724_v2 }
 0x163   :  { %788 = vst [vmem:[%s1842_s3 + $0x150] sm:$0xff] %v634_v47  ;;  %v586_v5 = vpop.f32.mrf.mxu1 }
 0x164   :  { %v587_v29 = vadd.f32 %v586_v5, %v1680_v11 }
 0x167   :  { %v726_v37 = vpop.f32.mrf.mxu2  ;;  %v635_v9 = vpop.f32.mrf.mxu3 }
 0x168   :  { %v727_v7 = vadd.f32 %v726_v37, %v678_v4  ;;  %v679_v8 = vpop.f32.mrf.mxu0  ;;  %v636_v6 = vadd.f32 %v635_v9, %v587_v29 }
 0x169   :  { %v680_v10 = vadd.f32 %v679_v8, %v1714_v61 }
 0x16a   :  { %781 = vst [vmem:[%s1842_s3 + $0x118] sm:$0xff] %v727_v7 }
 0x16b   :  { %792 = vst [vmem:[%s1842_s3 + $0x170] sm:$0xff] %v636_v6  ;;  %v589_v13 = vpop.f32.mrf.mxu1 }
 0x16c   :  { %v590_v18 = vadd.f32 %v589_v13, %v1680_v11 }
 0x16f   :  { %v728_v12 = vpop.f32.mrf.mxu2  ;;  %v638_v14 = vpop.f32.mrf.mxu3 }
 0x170   :  { %v729_v16 = vadd.f32 %v728_v12, %v680_v10  ;;  %v682_v17 = vpop.f32.mrf.mxu0  ;;  %v639_v19 = vadd.f32 %v638_v14, %v590_v18 }
 0x171   :  { %v683_v62 = vadd.f32 %v682_v17, %v1714_v61 }
 0x172   :  { %785 = vst [vmem:[%s1842_s3 + $0x138] sm:$0xff] %v729_v16 }
 0x173   :  { %796 = vst [vmem:[%s1842_s3 + $0x190] sm:$0xff] %v639_v19  ;;  %v591_v21 = vpop.f32.mrf.mxu1 }
 0x174   :  { %v592_v26 = vadd.f32 %v591_v21, %v1680_v11 }
 0x177   :  { %v731_v20 = vpop.f32.mrf.mxu2  ;;  %v640_v28 = vpop.f32.mrf.mxu3 }
 0x178   :  { %v732_v22 = vadd.f32 %v731_v20, %v683_v62  ;;  %v684_v23 = vpop.f32.mrf.mxu0  ;;  %v641_v41 = vadd.f32 %v640_v28, %v592_v26 }
 0x179   :  { %v685_v31 = vadd.f32 %v684_v23, %v1714_v61 }
 0x17a   :  { %789 = vst [vmem:[%s1842_s3 + $0x158] sm:$0xff] %v732_v22 }
 0x17b   :  { %800 = vst [vmem:[%s1842_s3 + $0x1b0] sm:$0xff] %v641_v41  ;;  %v594_v32 = vpop.f32.mrf.mxu1 }
 0x17c   :  { %v595_v36 = vadd.f32 %v594_v32, %v1680_v11 }
 0x17f   :  { %v733_v25 = vpop.f32.mrf.mxu2  ;;  %v643_v30 = vpop.f32.mrf.mxu3 }
 0x180   :  { %v734_v33 = vadd.f32 %v733_v25, %v685_v31  ;;  %v687_v35 = vpop.f32.mrf.mxu0  ;;  %v644_v39 = vadd.f32 %v643_v30, %v595_v36 }
 0x181   :  { %v688_v42 = vadd.f32 %v687_v35, %v1714_v61 }
 0x182   :  { %793 = vst [vmem:[%s1842_s3 + $0x178] sm:$0xff] %v734_v33 }
 0x183   :  { %804 = vst [vmem:[%s1842_s3 + $0x1d0] sm:$0xff] %v644_v39  ;;  %v596_v44 = vpop.f32.mrf.mxu1 }
 0x184   :  { %v597_v48 = vadd.f32 %v596_v44, %v1680_v11 }
 0x187   :  { %v736_v43 = vpop.f32.mrf.mxu2  ;;  %v645_v49 = vpop.f32.mrf.mxu3 }
 0x188   :  { %v737_v45 = vadd.f32 %v736_v43, %v688_v42  ;;  %v689_v46 = vpop.f32.mrf.mxu0  ;;  %v646_v51 = vadd.f32 %v645_v49, %v597_v48 }
 0x189   :  { %v690_v53 = vadd.f32 %v689_v46, %v1714_v61 }
 0x18a   :  { %797 = vst [vmem:[%s1842_s3 + $0x198] sm:$0xff] %v737_v45 }
 0x18b   :  { %808 = vst [vmem:[%s1842_s3 + $0x1f0] sm:$0xff] %v646_v51 }
 0x18f   :  { %v738_v52 = vpop.f32.mrf.mxu2 }
 0x190   :  { %v739_v38 = vadd.f32 %v738_v52, %v690_v53  ;;  %v692_v54 = vpop.f32.mrf.mxu0 }
 0x191   :  { %v693_v11 = vadd.f32 %v692_v54, %v1714_v61 }
 0x192   :  { %801 = vst [vmem:[%s1842_s3 + $0x1b8] sm:$0xff] %v739_v38 }
 0x197   :  { %v741_v34 = vpop.f32.mrf.mxu2 }
 0x198   :  { %v742_v55 = vadd.f32 %v741_v34, %v693_v11  ;;  %v694_v56 = vpop.f32.mrf.mxu0 }
 0x199   :  { %v695_v15 = vadd.f32 %v694_v56, %v1714_v61 }
 0x19a   :  { %805 = vst [vmem:[%s1842_s3 + $0x1d8] sm:$0xff] %v742_v55 }
 0x19f   :  { %v743_v27 = vpop.f32.mrf.mxu2 }
 0x1a0   :  { %v744_v57 = vadd.f32 %v743_v27, %v695_v15 }
 0x1a2   :  { %809 = vst [vmem:[%s1842_s3 + $0x1f8] sm:$0xff] %v744_v57 }

</bundles_post_ra>
